<compile_context>
chip_gen: v5e
topology: v5e:2x2
jax: 0.10.0
libtpu: 0.0.40
codegen_flags: <defaults>
</compile_context>

<pallas_src>
import numpy as np
import jax
import jax.numpy as jnp
from jax.experimental import pallas as pl
from jax.experimental.pallas import tpu as pltpu

PARAM_ORDER = ("wsq", "sqb", "maskl", "maskr",
               "w2", "b2", "w4", "b4",
               "w1a", "b1a", "w1b", "b1b",
               "w3a", "b3a", "w3b", "b3b",
               "mf", "fshift")


def _make_kernel(H, W, L, C, P, alpha):
    HW = H * W

    def kernel(x_ref, wsq_ref, sqb_ref, maskl_ref, maskr_ref,
               w2_ref, b2_ref, w4_ref, b4_ref,
               w1a_ref, b1a_ref, w1b_ref, b1b_ref,
               w3a_ref, b3a_ref, w3b_ref, b3b_ref,
               mf_ref, fshift_ref,
               o_ref, zpad_ref, tpad_ref, slab_ref):
        xin = x_ref[0, :, :]                                   # (HW, C)

        # LAP_squeeze_1x1 + folded BN: one MXU matmul over channels.
        z = jnp.dot(xin, wsq_ref[...], preferred_element_type=jnp.float32)
        z = z + sqb_ref[...]

        # Zero only the halo rows; the interior is fully overwritten below.
        halo = jnp.zeros((P, L), jnp.float32)
        zpad_ref[0:P, :] = halo
        zpad_ref[P + HW:P + HW + P, :] = halo
        tpad_ref[0:P, :] = halo
        tpad_ref[P + HW:P + HW + P, :] = halo
        zpad_ref[P:P + HW, :] = z

        mL = maskl_ref[...]   # (HW,1): 1.0 iff left  neighbour exists (w > 0)
        mR = maskr_ref[...]   # (HW,1): 1.0 iff right neighbour exists (w < W-1)

        def conv3x3(pad_ref, w_ref):
            # Factored by dw: dh shifts read zeros from the halo; only the
            # dw=+-1 column groups need one wrap-mask multiply each.
            out = None
            for dw, mask in ((0, None), (-1, mL), (1, mR)):
                grp = None
                for dh in (-1, 0, 1):
                    t = (dh + 1) * 3 + (dw + 1)
                    src = pad_ref[P + dh * W + dw:P + dh * W + dw + HW, :]
                    term = src * w_ref[t:t + 1, :]
                    grp = term if grp is None else grp + term
                if mask is not None:
                    grp = grp * mask
                out = grp if out is None else out + grp
            return out

        def conv3x1(pad_ref, w_ref):
            # Taps (dh, 0): never wrap across image rows -> no masks at all.
            out = None
            for dh in (-1, 0, 1):
                src = pad_ref[P + dh * W:P + dh * W + HW, :]
                term = src * w_ref[dh + 1:dh + 2, :]
                out = term if out is None else out + term
            return out

        def conv1x3(pad_ref, w_ref):
            mid = pad_ref[P:P + HW, :] * w_ref[1:2, :]
            lft = pad_ref[P - 1:P - 1 + HW, :] * w_ref[0:1, :]
            rgt = pad_ref[P + 1:P + 1 + HW, :] * w_ref[2:3, :]
            return mid + lft * mL + rgt * mR

        def prelu(t):
            return jnp.where(t >= 0.0, t, alpha * t)

        # branch_2 / branch_4: depthwise 3x3 (+BN)
        a = conv3x3(zpad_ref, w2_ref) + b2_ref[...]
        b = conv3x3(zpad_ref, w4_ref) + b4_ref[...]

        # branch_1: depthwise (3,1)+BN then (1,3)+BN
        u = conv3x1(zpad_ref, w1a_ref) + b1a_ref[...]
        tpad_ref[P:P + HW, :] = u
        c = conv1x3(tpad_ref, w1b_ref) + b1b_ref[...]

        # branch_3: depthwise (1,3)+BN then (3,1)+BN
        v = conv1x3(zpad_ref, w3a_ref) + b3a_ref[...]
        tpad_ref[P:P + HW, :] = v
        d = conv3x1(tpad_ref, w3b_ref) + b3b_ref[...]

        # PReLU each branch directly into the (HW, C) fusion slab; the channel
        # shuffle, grouped 1x1 fusion (weights+bias) and final BN are baked
        # into the single (C, C) matrix mf and the shift fshift.
        slab_ref[:, 0 * L:1 * L] = prelu(a)
        slab_ref[:, 1 * L:2 * L] = prelu(b)
        slab_ref[:, 2 * L:3 * L] = prelu(c)
        slab_ref[:, 3 * L:4 * L] = prelu(d)

        fused = jnp.dot(slab_ref[...], mf_ref[...],
                        preferred_element_type=jnp.float32)
        fused = fused + fshift_ref[...]

        o_ref[0, :, :] = xin + fused                           # residual add

    return kernel


def regular_lap_pallas(x_nchw, kparams):
    N, C, H, W = x_nchw.shape
    L = C // 4
    HW = H * W
    P = ((W + 1 + 7) // 8) * 8          # halo rows (>= W+1, sublane aligned)

    x_flat = jnp.transpose(x_nchw, (0, 2, 3, 1)).reshape(N, HW, C)
    param_list = [kparams[k] for k in PARAM_ORDER]
    kernel = _make_kernel(H, W, L, C, P, alpha=0.25)

    def pspec(a):
        nd = a.ndim
        return pl.BlockSpec(a.shape, lambda n, _nd=nd: (0,) * _nd)

    out_flat = pl.pallas_call(
        kernel,
        out_shape=jax.ShapeDtypeStruct((N, HW, C), jnp.float32),
        grid=(N,),
        in_specs=[pl.BlockSpec((1, HW, C), lambda n: (n, 0, 0))]
                 + [pspec(a) for a in param_list],
        out_specs=pl.BlockSpec((1, HW, C), lambda n: (n, 0, 0)),
        scratch_shapes=[pltpu.VMEM((HW + 2 * P, L), jnp.float32),   # zpad
                        pltpu.VMEM((HW + 2 * P, L), jnp.float32),   # tpad
                        pltpu.VMEM((HW, C), jnp.float32)],          # fusion slab
        compiler_params=pltpu.CompilerParams(
            dimension_semantics=("parallel",),
            vmem_limit_bytes=32 * 1024 * 1024),
    )(x_flat, *param_list)

    return jnp.transpose(out_flat.reshape(N, H, W, C), (0, 3, 1, 2))


# ----------------------- deterministic parameter setup -----------------------

def init_raw_params(key, input_ch):
    L = input_ch // 4
    keys = jax.random.split(key, 48)
    it = iter(keys)

    def nrm(shape, scale=0.3):
        return scale * jax.random.normal(next(it), shape, jnp.float32)

    def bn(ch):
        g = 0.5 + 0.5 * jax.random.uniform(next(it), (ch,), jnp.float32)
        b = 0.1 * jax.random.normal(next(it), (ch,), jnp.float32)
        m = 0.1 * jax.random.normal(next(it), (ch,), jnp.float32)
        v = 0.5 + 0.5 * jax.random.uniform(next(it), (ch,), jnp.float32)
        return (g, b, m, v)

    p = {}
    p['wsq'] = nrm((L, input_ch, 1, 1)); p['bn_sq'] = bn(L)
    p['w2'] = nrm((L, 1, 3, 3));         p['bn2'] = bn(L)
    p['w4'] = nrm((L, 1, 3, 3));         p['bn4'] = bn(L)
    p['w1a'] = nrm((L, 1, 3, 1));        p['bn1a'] = bn(L)
    p['w1b'] = nrm((L, 1, 1, 3));        p['bn1b'] = bn(L)
    p['w3a'] = nrm((L, 1, 1, 3));        p['bn3a'] = bn(L)
    p['w3b'] = nrm((L, 1, 3, 1));        p['bn3b'] = bn(L)
    p['wf'] = nrm((input_ch, 4, 1, 1));  p['bias_f'] = nrm((input_ch,), 0.1)
    p['bn_fin'] = bn(input_ch)
    return p


def fold_bn(stats, eps=1e-5):
    g, b, m, v = stats
    s = g / jnp.sqrt(v + eps)
    return s, b - m * s


def build_kernel_params(p, input_ch, H, W):
    L = input_ch // 4
    HW = H * W
    kp = {}

    s, sh = fold_bn(p['bn_sq'])
    kp['wsq'] = (p['wsq'].reshape(L, input_ch).T * s[None, :]).astype(jnp.float32)
    kp['sqb'] = sh[None, :].astype(jnp.float32)

    # Column-wrap masks for dw=+-1 taps only (dh handled by the zero halo).
    w_idx = np.arange(HW, dtype=np.int64) % W
    kp['maskl'] = jnp.asarray((w_idx > 0).astype(np.float32)[:, None])
    kp['maskr'] = jnp.asarray((w_idx < W - 1).astype(np.float32)[:, None])

    def dwfold(w_raw, ntaps, stats):
        sc, shf = fold_bn(stats)
        wt = w_raw.reshape(L, ntaps).T * sc[None, :]
        return wt.astype(jnp.float32), shf[None, :].astype(jnp.float32)

    kp['w2'], kp['b2'] = dwfold(p['w2'], 9, p['bn2'])
    kp['w4'], kp['b4'] = dwfold(p['w4'], 9, p['bn4'])
    kp['w1a'], kp['b1a'] = dwfold(p['w1a'], 3, p['bn1a'])
    kp['w1b'], kp['b1b'] = dwfold(p['w1b'], 3, p['bn1b'])
    kp['w3a'], kp['b3a'] = dwfold(p['w3a'], 3, p['bn3a'])
    kp['w3b'], kp['b3b'] = dwfold(p['w3b'], 3, p['bn3b'])

    s_fin, sh_fin = fold_bn(p['bn_fin'])
    wf2 = np.asarray(p['wf']).reshape(input_ch, 4)
    s_fin_np = np.asarray(s_fin)
    # mf[k, g, o] mixes branch-k / lap-channel-g into final output channel o
    # (channel shuffle: shuffled channel 4g+k == branch k, lap channel g).
    mf = np.zeros((4, L, input_ch), np.float32)
    for o in range(input_ch):
        g = o // 4
        for k in range(4):
            mf[k, g, o] = wf2[o, k] * s_fin_np[o]
    # Flatten to a single (C, C) matrix: slab column j = k*L + g.
    kp['mf'] = jnp.asarray(mf.reshape(4 * L, input_ch))
    kp['fshift'] = (sh_fin + p['bias_f'] * s_fin)[None, :].astype(jnp.float32)
    return kp


# ------------------------- plain-JAX reference check -------------------------

def ref_forward(x, p, eps=1e-5, alpha=0.25):
    L = x.shape[1] // 4

    def conv(inp, w, pad, groups=1):
        return jax.lax.conv_general_dilated(
            inp, w, (1, 1), pad, feature_group_count=groups,
            dimension_numbers=('NCHW', 'OIHW', 'NCHW'),
            precision=jax.lax.Precision.HIGHEST)

    def bn(inp, stats):
        g, b, m, v = (t[None, :, None, None] for t in stats)
        return (inp - m) / jnp.sqrt(v + eps) * g + b

    main = x
    z = bn(conv(x, p['wsq'], [(0, 0), (0, 0)]), p['bn_sq'])
    a = bn(conv(z, p['w2'], [(1, 1), (1, 1)], L), p['bn2'])
    b_ = bn(conv(z, p['w4'], [(1, 1), (1, 1)], L), p['bn4'])
    c = bn(conv(z, p['w1a'], [(1, 1), (0, 0)], L), p['bn1a'])
    c = bn(conv(c, p['w1b'], [(0, 0), (1, 1)], L), p['bn1b'])
    d = bn(conv(z, p['w3a'], [(0, 0), (1, 1)], L), p['bn3a'])
    d = bn(conv(d, p['w3b'], [(1, 1), (0, 0)], L), p['bn3b'])
    xx = jnp.concatenate([a, b_, c, d], axis=1)
    N, C, H, W = xx.shape
    xx = xx.reshape(N, 4, C // 4, H, W).transpose(0, 2, 1, 3, 4).reshape(N, C, H, W)
    xx = jnp.where(xx >= 0.0, xx, alpha * xx)
    xx = conv(xx, p['wf'], [(0, 0), (0, 0)], L) + p['bias_f'][None, :, None, None]
    xx = bn(xx, p['bn_fin'])
    return main + xx


if __name__ == "__main__":
    N, input_ch, H, W = 2, 16, 16, 16
    key = jax.random.PRNGKey(0)
    kx, kw = jax.random.split(key)
    x = jax.random.normal(kx, (N, input_ch, H, W), jnp.float32)

    raw = init_raw_params(kw, input_ch)
    kparams = build_kernel_params(raw, input_ch, H, W)

    out = jax.block_until_ready(regular_lap_pallas(x, kparams))
    assert out.shape == (N, input_ch, H, W)

    ref = jax.block_until_ready(ref_forward(x, raw))
    diff = np.abs(np.asarray(out) - np.asarray(ref))
    # Kernel matmuls use the MXU's native single-pass (bf16) path per perf
    # guidance; the reference uses HIGHEST f32.  Allow bf16-level noise while
    # still catching structural bugs (wrong tap/mask/shuffle => O(1) errors).
    assert float(diff.max()) < 1e-1, f"max abs diff too large: {diff.max()}"
    assert float(diff.mean()) < 2.5e-2, f"mean abs diff too large: {diff.mean()}"
    print("KERNEL_OK")
</pallas_src>

<mosaic_0001>
module attributes {stable_mosaic.version = 11 : i64} {
  func.func @kernel(%arg0: i32, %arg1: memref<1x256x16xf32, #tpu.memory_space<vmem>>, %arg2: memref<16x4xf32, #tpu.memory_space<vmem>>, %arg3: memref<1x4xf32, #tpu.memory_space<vmem>>, %arg4: memref<256x1xf32, #tpu.memory_space<vmem>>, %arg5: memref<256x1xf32, #tpu.memory_space<vmem>>, %arg6: memref<9x4xf32, #tpu.memory_space<vmem>>, %arg7: memref<1x4xf32, #tpu.memory_space<vmem>>, %arg8: memref<9x4xf32, #tpu.memory_space<vmem>>, %arg9: memref<1x4xf32, #tpu.memory_space<vmem>>, %arg10: memref<3x4xf32, #tpu.memory_space<vmem>>, %arg11: memref<1x4xf32, #tpu.memory_space<vmem>>, %arg12: memref<3x4xf32, #tpu.memory_space<vmem>>, %arg13: memref<1x4xf32, #tpu.memory_space<vmem>>, %arg14: memref<3x4xf32, #tpu.memory_space<vmem>>, %arg15: memref<1x4xf32, #tpu.memory_space<vmem>>, %arg16: memref<3x4xf32, #tpu.memory_space<vmem>>, %arg17: memref<1x4xf32, #tpu.memory_space<vmem>>, %arg18: memref<16x16xf32, #tpu.memory_space<vmem>>, %arg19: memref<1x16xf32, #tpu.memory_space<vmem>>, %arg20: memref<1x256x16xf32, #tpu.memory_space<vmem>>, %arg21: memref<304x4xf32, #tpu.memory_space<vmem>>, %arg22: memref<304x4xf32, #tpu.memory_space<vmem>>, %arg23: memref<256x16xf32, #tpu.memory_space<vmem>>) attributes {dimension_semantics = [#tpu.dimension_semantics<parallel>], iteration_bounds = array<i64: 2>, scalar_prefetch = 0 : i64, scratch_operands = 3 : i64, tpu.core_type = #tpu.core_type<tc>, window_params = [{transform_indices = @transform_0, window_bounds = array<i64: 1, 256, 16>}, {pipeline_mode = #tpu.pipeline_mode<synchronous>, transform_indices = @transform_1, window_bounds = array<i64: 16, 4>}, {pipeline_mode = #tpu.pipeline_mode<synchronous>, transform_indices = @transform_2, window_bounds = array<i64: 1, 4>}, {pipeline_mode = #tpu.pipeline_mode<synchronous>, transform_indices = @transform_3, window_bounds = array<i64: 256, 1>}, {pipeline_mode = #tpu.pipeline_mode<synchronous>, transform_indices = @transform_4, window_bounds = array<i64: 256, 1>}, {pipeline_mode = #tpu.pipeline_mode<synchronous>, transform_indices = @transform_5, window_bounds = array<i64: 9, 4>}, {pipeline_mode = #tpu.pipeline_mode<synchronous>, transform_indices = @transform_6, window_bounds = array<i64: 1, 4>}, {pipeline_mode = #tpu.pipeline_mode<synchronous>, transform_indices = @transform_7, window_bounds = array<i64: 9, 4>}, {pipeline_mode = #tpu.pipeline_mode<synchronous>, transform_indices = @transform_8, window_bounds = array<i64: 1, 4>}, {pipeline_mode = #tpu.pipeline_mode<synchronous>, transform_indices = @transform_9, window_bounds = array<i64: 3, 4>}, {pipeline_mode = #tpu.pipeline_mode<synchronous>, transform_indices = @transform_10, window_bounds = array<i64: 1, 4>}, {pipeline_mode = #tpu.pipeline_mode<synchronous>, transform_indices = @transform_11, window_bounds = array<i64: 3, 4>}, {pipeline_mode = #tpu.pipeline_mode<synchronous>, transform_indices = @transform_12, window_bounds = array<i64: 1, 4>}, {pipeline_mode = #tpu.pipeline_mode<synchronous>, transform_indices = @transform_13, window_bounds = array<i64: 3, 4>}, {pipeline_mode = #tpu.pipeline_mode<synchronous>, transform_indices = @transform_14, window_bounds = array<i64: 1, 4>}, {pipeline_mode = #tpu.pipeline_mode<synchronous>, transform_indices = @transform_15, window_bounds = array<i64: 3, 4>}, {pipeline_mode = #tpu.pipeline_mode<synchronous>, transform_indices = @transform_16, window_bounds = array<i64: 1, 4>}, {pipeline_mode = #tpu.pipeline_mode<synchronous>, transform_indices = @transform_17, window_bounds = array<i64: 16, 16>}, {pipeline_mode = #tpu.pipeline_mode<synchronous>, transform_indices = @transform_18, window_bounds = array<i64: 1, 16>}, {transform_indices = @transform_19, window_bounds = array<i64: 1, 256, 16>}]} {
    %c0 = arith.constant 0 : index
    %c0_0 = arith.constant 0 : index
    %c0_1 = arith.constant 0 : index
    %0 = vector.load %arg1[%c0, %c0_0, %c0_1] : memref<1x256x16xf32, #tpu.memory_space<vmem>>, vector<1x256x16xf32>
    %1 = vector.shape_cast %0 : vector<1x256x16xf32> to vector<256x16xf32>
    %c0_2 = arith.constant 0 : index
    %c0_3 = arith.constant 0 : index
    %2 = vector.load %arg2[%c0_2, %c0_3] : memref<16x4xf32, #tpu.memory_space<vmem>>, vector<16x4xf32>
    %cst = arith.constant dense<0.000000e+00> : vector<256x4xf32>
    %3 = tpu.matmul %1, %2, %cst {dimension_numbers = #tpu.dot_dimension_numbers<[1], [0], [0], [1], [0, 0, 1, 1], [], []>} : vector<256x16xf32>, vector<16x4xf32>, vector<256x4xf32> -> vector<256x4xf32>
    %c0_4 = arith.constant 0 : index
    %c0_5 = arith.constant 0 : index
    %4 = vector.load %arg3[%c0_4, %c0_5] : memref<1x4xf32, #tpu.memory_space<vmem>>, vector<1x4xf32>
    %5 = vector.broadcast %4 : vector<1x4xf32> to vector<256x4xf32>
    %6 = arith.addf %3, %5 : vector<256x4xf32>
    %cst_6 = arith.constant 0.000000e+00 : f32
    %7 = vector.broadcast %cst_6 : f32 to vector<24x4xf32>
    %c0_7 = arith.constant 0 : index
    %c0_8 = arith.constant 0 : index
    %8 = vector.load %arg21[%c0_7, %c0_8] : memref<304x4xf32, #tpu.memory_space<vmem>>, vector<24x4xf32>
    tpu.vector_store %arg21[%c0_7, %c0_8], %7 {strides = array<i32>} : memref<304x4xf32, #tpu.memory_space<vmem>>, vector<24x4xf32>,
    %c280 = arith.constant 280 : index
    %c0_9 = arith.constant 0 : index
    %9 = vector.load %arg21[%c280, %c0_9] : memref<304x4xf32, #tpu.memory_space<vmem>>, vector<24x4xf32>
    tpu.vector_store %arg21[%c280, %c0_9], %7 {strides = array<i32>} : memref<304x4xf32, #tpu.memory_space<vmem>>, vector<24x4xf32>,
    %c0_10 = arith.constant 0 : index
    %c0_11 = arith.constant 0 : index
    %10 = vector.load %arg22[%c0_10, %c0_11] : memref<304x4xf32, #tpu.memory_space<vmem>>, vector<24x4xf32>
    tpu.vector_store %arg22[%c0_10, %c0_11], %7 {strides = array<i32>} : memref<304x4xf32, #tpu.memory_space<vmem>>, vector<24x4xf32>,
    %c280_12 = arith.constant 280 : index
    %c0_13 = arith.constant 0 : index
    %11 = vector.load %arg22[%c280_12, %c0_13] : memref<304x4xf32, #tpu.memory_space<vmem>>, vector<24x4xf32>
    tpu.vector_store %arg22[%c280_12, %c0_13], %7 {strides = array<i32>} : memref<304x4xf32, #tpu.memory_space<vmem>>, vector<24x4xf32>,
    %c24 = arith.constant 24 : index
    %c0_14 = arith.constant 0 : index
    %12 = vector.load %arg21[%c24, %c0_14] : memref<304x4xf32, #tpu.memory_space<vmem>>, vector<256x4xf32>
    tpu.vector_store %arg21[%c24, %c0_14], %6 {strides = array<i32>} : memref<304x4xf32, #tpu.memory_space<vmem>>, vector<256x4xf32>,
    %c0_15 = arith.constant 0 : index
    %c0_16 = arith.constant 0 : index
    %13 = vector.load %arg4[%c0_15, %c0_16] : memref<256x1xf32, #tpu.memory_space<vmem>>, vector<256x1xf32>
    %c0_17 = arith.constant 0 : index
    %c0_18 = arith.constant 0 : index
    %14 = vector.load %arg5[%c0_17, %c0_18] : memref<256x1xf32, #tpu.memory_space<vmem>>, vector<256x1xf32>
    %c8 = arith.constant 8 : index
    %c0_19 = arith.constant 0 : index
    %15 = vector.load %arg21[%c8, %c0_19] : memref<304x4xf32, #tpu.memory_space<vmem>>, vector<256x4xf32>
    %c1 = arith.constant 1 : index
    %c0_20 = arith.constant 0 : index
    %16 = vector.load %arg6[%c1, %c0_20] : memref<9x4xf32, #tpu.memory_space<vmem>>, vector<1x4xf32>
    %17 = vector.broadcast %16 : vector<1x4xf32> to vector<256x4xf32>
    %18 = arith.mulf %15, %17 : vector<256x4xf32>
    %c24_21 = arith.constant 24 : index
    %c0_22 = arith.constant 0 : index
    %19 = vector.load %arg21[%c24_21, %c0_22] : memref<304x4xf32, #tpu.memory_space<vmem>>, vector<256x4xf32>
    %c4 = arith.constant 4 : index
    %c0_23 = arith.constant 0 : index
    %20 = vector.load %arg6[%c4, %c0_23] : memref<9x4xf32, #tpu.memory_space<vmem>>, vector<1x4xf32>
    %21 = vector.broadcast %20 : vector<1x4xf32> to vector<256x4xf32>
    %22 = arith.mulf %19, %21 : vector<256x4xf32>
    %23 = arith.addf %18, %22 : vector<256x4xf32>
    %c40 = arith.constant 40 : index
    %c0_24 = arith.constant 0 : index
    %24 = vector.load %arg21[%c40, %c0_24] : memref<304x4xf32, #tpu.memory_space<vmem>>, vector<256x4xf32>
    %c7 = arith.constant 7 : index
    %c0_25 = arith.constant 0 : index
    %25 = vector.load %arg6[%c7, %c0_25] : memref<9x4xf32, #tpu.memory_space<vmem>>, vector<1x4xf32>
    %26 = vector.broadcast %25 : vector<1x4xf32> to vector<256x4xf32>
    %27 = arith.mulf %24, %26 : vector<256x4xf32>
    %28 = arith.addf %23, %27 : vector<256x4xf32>
    %c7_26 = arith.constant 7 : index
    %c0_27 = arith.constant 0 : index
    %29 = vector.load %arg21[%c7_26, %c0_27] : memref<304x4xf32, #tpu.memory_space<vmem>>, vector<256x4xf32>
    %c0_28 = arith.constant 0 : index
    %c0_29 = arith.constant 0 : index
    %30 = vector.load %arg6[%c0_28, %c0_29] : memref<9x4xf32, #tpu.memory_space<vmem>>, vector<1x4xf32>
    %31 = vector.broadcast %30 : vector<1x4xf32> to vector<256x4xf32>
    %32 = arith.mulf %29, %31 : vector<256x4xf32>
    %c23 = arith.constant 23 : index
    %c0_30 = arith.constant 0 : index
    %33 = vector.load %arg21[%c23, %c0_30] : memref<304x4xf32, #tpu.memory_space<vmem>>, vector<256x4xf32>
    %c3 = arith.constant 3 : index
    %c0_31 = arith.constant 0 : index
    %34 = vector.load %arg6[%c3, %c0_31] : memref<9x4xf32, #tpu.memory_space<vmem>>, vector<1x4xf32>
    %35 = vector.broadcast %34 : vector<1x4xf32> to vector<256x4xf32>
    %36 = arith.mulf %33, %35 : vector<256x4xf32>
    %37 = arith.addf %32, %36 : vector<256x4xf32>
    %c39 = arith.constant 39 : index
    %c0_32 = arith.constant 0 : index
    %38 = vector.load %arg21[%c39, %c0_32] : memref<304x4xf32, #tpu.memory_space<vmem>>, vector<256x4xf32>
    %c6 = arith.constant 6 : index
    %c0_33 = arith.constant 0 : index
    %39 = vector.load %arg6[%c6, %c0_33] : memref<9x4xf32, #tpu.memory_space<vmem>>, vector<1x4xf32>
    %40 = vector.broadcast %39 : vector<1x4xf32> to vector<256x4xf32>
    %41 = arith.mulf %38, %40 : vector<256x4xf32>
    %42 = arith.addf %37, %41 : vector<256x4xf32>
    %43 = vector.broadcast %13 : vector<256x1xf32> to vector<256x4xf32>
    %44 = arith.mulf %42, %43 : vector<256x4xf32>
    %45 = arith.addf %28, %44 : vector<256x4xf32>
    %c9 = arith.constant 9 : index
    %c0_34 = arith.constant 0 : index
    %46 = vector.load %arg21[%c9, %c0_34] : memref<304x4xf32, #tpu.memory_space<vmem>>, vector<256x4xf32>
    %c2 = arith.constant 2 : index
    %c0_35 = arith.constant 0 : index
    %47 = vector.load %arg6[%c2, %c0_35] : memref<9x4xf32, #tpu.memory_space<vmem>>, vector<1x4xf32>
    %48 = vector.broadcast %47 : vector<1x4xf32> to vector<256x4xf32>
    %49 = arith.mulf %46, %48 : vector<256x4xf32>
    %c25 = arith.constant 25 : index
    %c0_36 = arith.constant 0 : index
    %50 = vector.load %arg21[%c25, %c0_36] : memref<304x4xf32, #tpu.memory_space<vmem>>, vector<256x4xf32>
    %c5 = arith.constant 5 : index
    %c0_37 = arith.constant 0 : index
    %51 = vector.load %arg6[%c5, %c0_37] : memref<9x4xf32, #tpu.memory_space<vmem>>, vector<1x4xf32>
    %52 = vector.broadcast %51 : vector<1x4xf32> to vector<256x4xf32>
    %53 = arith.mulf %50, %52 : vector<256x4xf32>
    %54 = arith.addf %49, %53 : vector<256x4xf32>
    %c41 = arith.constant 41 : index
    %c0_38 = arith.constant 0 : index
    %55 = vector.load %arg21[%c41, %c0_38] : memref<304x4xf32, #tpu.memory_space<vmem>>, vector<256x4xf32>
    %c8_39 = arith.constant 8 : index
    %c0_40 = arith.constant 0 : index
    %56 = vector.load %arg6[%c8_39, %c0_40] : memref<9x4xf32, #tpu.memory_space<vmem>>, vector<1x4xf32>
    %57 = vector.broadcast %56 : vector<1x4xf32> to vector<256x4xf32>
    %58 = arith.mulf %55, %57 : vector<256x4xf32>
    %59 = arith.addf %54, %58 : vector<256x4xf32>
    %60 = vector.broadcast %14 : vector<256x1xf32> to vector<256x4xf32>
    %61 = arith.mulf %59, %60 : vector<256x4xf32>
    %62 = arith.addf %45, %61 : vector<256x4xf32>
    %c0_41 = arith.constant 0 : index
    %c0_42 = arith.constant 0 : index
    %63 = vector.load %arg7[%c0_41, %c0_42] : memref<1x4xf32, #tpu.memory_space<vmem>>, vector<1x4xf32>
    %64 = vector.broadcast %63 : vector<1x4xf32> to vector<256x4xf32>
    %65 = arith.addf %62, %64 : vector<256x4xf32>
    %c8_43 = arith.constant 8 : index
    %c0_44 = arith.constant 0 : index
    %66 = vector.load %arg21[%c8_43, %c0_44] : memref<304x4xf32, #tpu.memory_space<vmem>>, vector<256x4xf32>
    %c1_45 = arith.constant 1 : index
    %c0_46 = arith.constant 0 : index
    %67 = vector.load %arg8[%c1_45, %c0_46] : memref<9x4xf32, #tpu.memory_space<vmem>>, vector<1x4xf32>
    %68 = vector.broadcast %67 : vector<1x4xf32> to vector<256x4xf32>
    %69 = arith.mulf %66, %68 : vector<256x4xf32>
    %c24_47 = arith.constant 24 : index
    %c0_48 = arith.constant 0 : index
    %70 = vector.load %arg21[%c24_47, %c0_48] : memref<304x4xf32, #tpu.memory_space<vmem>>, vector<256x4xf32>
    %c4_49 = arith.constant 4 : index
    %c0_50 = arith.constant 0 : index
    %71 = vector.load %arg8[%c4_49, %c0_50] : memref<9x4xf32, #tpu.memory_space<vmem>>, vector<1x4xf32>
    %72 = vector.broadcast %71 : vector<1x4xf32> to vector<256x4xf32>
    %73 = arith.mulf %70, %72 : vector<256x4xf32>
    %74 = arith.addf %69, %73 : vector<256x4xf32>
    %c40_51 = arith.constant 40 : index
    %c0_52 = arith.constant 0 : index
    %75 = vector.load %arg21[%c40_51, %c0_52] : memref<304x4xf32, #tpu.memory_space<vmem>>, vector<256x4xf32>
    %c7_53 = arith.constant 7 : index
    %c0_54 = arith.constant 0 : index
    %76 = vector.load %arg8[%c7_53, %c0_54] : memref<9x4xf32, #tpu.memory_space<vmem>>, vector<1x4xf32>
    %77 = vector.broadcast %76 : vector<1x4xf32> to vector<256x4xf32>
    %78 = arith.mulf %75, %77 : vector<256x4xf32>
    %79 = arith.addf %74, %78 : vector<256x4xf32>
    %c7_55 = arith.constant 7 : index
    %c0_56 = arith.constant 0 : index
    %80 = vector.load %arg21[%c7_55, %c0_56] : memref<304x4xf32, #tpu.memory_space<vmem>>, vector<256x4xf32>
    %c0_57 = arith.constant 0 : index
    %c0_58 = arith.constant 0 : index
    %81 = vector.load %arg8[%c0_57, %c0_58] : memref<9x4xf32, #tpu.memory_space<vmem>>, vector<1x4xf32>
    %82 = vector.broadcast %81 : vector<1x4xf32> to vector<256x4xf32>
    %83 = arith.mulf %80, %82 : vector<256x4xf32>
    %c23_59 = arith.constant 23 : index
    %c0_60 = arith.constant 0 : index
    %84 = vector.load %arg21[%c23_59, %c0_60] : memref<304x4xf32, #tpu.memory_space<vmem>>, vector<256x4xf32>
    %c3_61 = arith.constant 3 : index
    %c0_62 = arith.constant 0 : index
    %85 = vector.load %arg8[%c3_61, %c0_62] : memref<9x4xf32, #tpu.memory_space<vmem>>, vector<1x4xf32>
    %86 = vector.broadcast %85 : vector<1x4xf32> to vector<256x4xf32>
    %87 = arith.mulf %84, %86 : vector<256x4xf32>
    %88 = arith.addf %83, %87 : vector<256x4xf32>
    %c39_63 = arith.constant 39 : index
    %c0_64 = arith.constant 0 : index
    %89 = vector.load %arg21[%c39_63, %c0_64] : memref<304x4xf32, #tpu.memory_space<vmem>>, vector<256x4xf32>
    %c6_65 = arith.constant 6 : index
    %c0_66 = arith.constant 0 : index
    %90 = vector.load %arg8[%c6_65, %c0_66] : memref<9x4xf32, #tpu.memory_space<vmem>>, vector<1x4xf32>
    %91 = vector.broadcast %90 : vector<1x4xf32> to vector<256x4xf32>
    %92 = arith.mulf %89, %91 : vector<256x4xf32>
    %93 = arith.addf %88, %92 : vector<256x4xf32>
    %94 = vector.broadcast %13 : vector<256x1xf32> to vector<256x4xf32>
    %95 = arith.mulf %93, %94 : vector<256x4xf32>
    %96 = arith.addf %79, %95 : vector<256x4xf32>
    %c9_67 = arith.constant 9 : index
    %c0_68 = arith.constant 0 : index
    %97 = vector.load %arg21[%c9_67, %c0_68] : memref<304x4xf32, #tpu.memory_space<vmem>>, vector<256x4xf32>
    %c2_69 = arith.constant 2 : index
    %c0_70 = arith.constant 0 : index
    %98 = vector.load %arg8[%c2_69, %c0_70] : memref<9x4xf32, #tpu.memory_space<vmem>>, vector<1x4xf32>
    %99 = vector.broadcast %98 : vector<1x4xf32> to vector<256x4xf32>
    %100 = arith.mulf %97, %99 : vector<256x4xf32>
    %c25_71 = arith.constant 25 : index
    %c0_72 = arith.constant 0 : index
    %101 = vector.load %arg21[%c25_71, %c0_72] : memref<304x4xf32, #tpu.memory_space<vmem>>, vector<256x4xf32>
    %c5_73 = arith.constant 5 : index
    %c0_74 = arith.constant 0 : index
    %102 = vector.load %arg8[%c5_73, %c0_74] : memref<9x4xf32, #tpu.memory_space<vmem>>, vector<1x4xf32>
    %103 = vector.broadcast %102 : vector<1x4xf32> to vector<256x4xf32>
    %104 = arith.mulf %101, %103 : vector<256x4xf32>
    %105 = arith.addf %100, %104 : vector<256x4xf32>
    %c41_75 = arith.constant 41 : index
    %c0_76 = arith.constant 0 : index
    %106 = vector.load %arg21[%c41_75, %c0_76] : memref<304x4xf32, #tpu.memory_space<vmem>>, vector<256x4xf32>
    %c8_77 = arith.constant 8 : index
    %c0_78 = arith.constant 0 : index
    %107 = vector.load %arg8[%c8_77, %c0_78] : memref<9x4xf32, #tpu.memory_space<vmem>>, vector<1x4xf32>
    %108 = vector.broadcast %107 : vector<1x4xf32> to vector<256x4xf32>
    %109 = arith.mulf %106, %108 : vector<256x4xf32>
    %110 = arith.addf %105, %109 : vector<256x4xf32>
    %111 = vector.broadcast %14 : vector<256x1xf32> to vector<256x4xf32>
    %112 = arith.mulf %110, %111 : vector<256x4xf32>
    %113 = arith.addf %96, %112 : vector<256x4xf32>
    %c0_79 = arith.constant 0 : index
    %c0_80 = arith.constant 0 : index
    %114 = vector.load %arg9[%c0_79, %c0_80] : memref<1x4xf32, #tpu.memory_space<vmem>>, vector<1x4xf32>
    %115 = vector.broadcast %114 : vector<1x4xf32> to vector<256x4xf32>
    %116 = arith.addf %113, %115 : vector<256x4xf32>
    %c8_81 = arith.constant 8 : index
    %c0_82 = arith.constant 0 : index
    %117 = vector.load %arg21[%c8_81, %c0_82] : memref<304x4xf32, #tpu.memory_space<vmem>>, vector<256x4xf32>
    %c0_83 = arith.constant 0 : index
    %c0_84 = arith.constant 0 : index
    %118 = vector.load %arg10[%c0_83, %c0_84] : memref<3x4xf32, #tpu.memory_space<vmem>>, vector<1x4xf32>
    %119 = vector.broadcast %118 : vector<1x4xf32> to vector<256x4xf32>
    %120 = arith.mulf %117, %119 : vector<256x4xf32>
    %c24_85 = arith.constant 24 : index
    %c0_86 = arith.constant 0 : index
    %121 = vector.load %arg21[%c24_85, %c0_86] : memref<304x4xf32, #tpu.memory_space<vmem>>, vector<256x4xf32>
    %c1_87 = arith.constant 1 : index
    %c0_88 = arith.constant 0 : index
    %122 = vector.load %arg10[%c1_87, %c0_88] : memref<3x4xf32, #tpu.memory_space<vmem>>, vector<1x4xf32>
    %123 = vector.broadcast %122 : vector<1x4xf32> to vector<256x4xf32>
    %124 = arith.mulf %121, %123 : vector<256x4xf32>
    %125 = arith.addf %120, %124 : vector<256x4xf32>
    %c40_89 = arith.constant 40 : index
    %c0_90 = arith.constant 0 : index
    %126 = vector.load %arg21[%c40_89, %c0_90] : memref<304x4xf32, #tpu.memory_space<vmem>>, vector<256x4xf32>
    %c2_91 = arith.constant 2 : index
    %c0_92 = arith.constant 0 : index
    %127 = vector.load %arg10[%c2_91, %c0_92] : memref<3x4xf32, #tpu.memory_space<vmem>>, vector<1x4xf32>
    %128 = vector.broadcast %127 : vector<1x4xf32> to vector<256x4xf32>
    %129 = arith.mulf %126, %128 : vector<256x4xf32>
    %130 = arith.addf %125, %129 : vector<256x4xf32>
    %c0_93 = arith.constant 0 : index
    %c0_94 = arith.constant 0 : index
    %131 = vector.load %arg11[%c0_93, %c0_94] : memref<1x4xf32, #tpu.memory_space<vmem>>, vector<1x4xf32>
    %132 = vector.broadcast %131 : vector<1x4xf32> to vector<256x4xf32>
    %133 = arith.addf %130, %132 : vector<256x4xf32>
    %c24_95 = arith.constant 24 : index
    %c0_96 = arith.constant 0 : index
    %134 = vector.load %arg22[%c24_95, %c0_96] : memref<304x4xf32, #tpu.memory_space<vmem>>, vector<256x4xf32>
    tpu.vector_store %arg22[%c24_95, %c0_96], %133 {strides = array<i32>} : memref<304x4xf32, #tpu.memory_space<vmem>>, vector<256x4xf32>,
    %c24_97 = arith.constant 24 : index
    %c0_98 = arith.constant 0 : index
    %135 = vector.load %arg22[%c24_97, %c0_98] : memref<304x4xf32, #tpu.memory_space<vmem>>, vector<256x4xf32>
    %c1_99 = arith.constant 1 : index
    %c0_100 = arith.constant 0 : index
    %136 = vector.load %arg12[%c1_99, %c0_100] : memref<3x4xf32, #tpu.memory_space<vmem>>, vector<1x4xf32>
    %137 = vector.broadcast %136 : vector<1x4xf32> to vector<256x4xf32>
    %138 = arith.mulf %135, %137 : vector<256x4xf32>
    %c23_101 = arith.constant 23 : index
    %c0_102 = arith.constant 0 : index
    %139 = vector.load %arg22[%c23_101, %c0_102] : memref<304x4xf32, #tpu.memory_space<vmem>>, vector<256x4xf32>
    %c0_103 = arith.constant 0 : index
    %c0_104 = arith.constant 0 : index
    %140 = vector.load %arg12[%c0_103, %c0_104] : memref<3x4xf32, #tpu.memory_space<vmem>>, vector<1x4xf32>
    %141 = vector.broadcast %140 : vector<1x4xf32> to vector<256x4xf32>
    %142 = arith.mulf %139, %141 : vector<256x4xf32>
    %c25_105 = arith.constant 25 : index
    %c0_106 = arith.constant 0 : index
    %143 = vector.load %arg22[%c25_105, %c0_106] : memref<304x4xf32, #tpu.memory_space<vmem>>, vector<256x4xf32>
    %c2_107 = arith.constant 2 : index
    %c0_108 = arith.constant 0 : index
    %144 = vector.load %arg12[%c2_107, %c0_108] : memref<3x4xf32, #tpu.memory_space<vmem>>, vector<1x4xf32>
    %145 = vector.broadcast %144 : vector<1x4xf32> to vector<256x4xf32>
    %146 = arith.mulf %143, %145 : vector<256x4xf32>
    %147 = vector.broadcast %13 : vector<256x1xf32> to vector<256x4xf32>
    %148 = arith.mulf %142, %147 : vector<256x4xf32>
    %149 = arith.addf %138, %148 : vector<256x4xf32>
    %150 = vector.broadcast %14 : vector<256x1xf32> to vector<256x4xf32>
    %151 = arith.mulf %146, %150 : vector<256x4xf32>
    %152 = arith.addf %149, %151 : vector<256x4xf32>
    %c0_109 = arith.constant 0 : index
    %c0_110 = arith.constant 0 : index
    %153 = vector.load %arg13[%c0_109, %c0_110] : memref<1x4xf32, #tpu.memory_space<vmem>>, vector<1x4xf32>
    %154 = vector.broadcast %153 : vector<1x4xf32> to vector<256x4xf32>
    %155 = arith.addf %152, %154 : vector<256x4xf32>
    %c24_111 = arith.constant 24 : index
    %c0_112 = arith.constant 0 : index
    %156 = vector.load %arg21[%c24_111, %c0_112] : memref<304x4xf32, #tpu.memory_space<vmem>>, vector<256x4xf32>
    %c1_113 = arith.constant 1 : index
    %c0_114 = arith.constant 0 : index
    %157 = vector.load %arg14[%c1_113, %c0_114] : memref<3x4xf32, #tpu.memory_space<vmem>>, vector<1x4xf32>
    %158 = vector.broadcast %157 : vector<1x4xf32> to vector<256x4xf32>
    %159 = arith.mulf %156, %158 : vector<256x4xf32>
    %c23_115 = arith.constant 23 : index
    %c0_116 = arith.constant 0 : index
    %160 = vector.load %arg21[%c23_115, %c0_116] : memref<304x4xf32, #tpu.memory_space<vmem>>, vector<256x4xf32>
    %c0_117 = arith.constant 0 : index
    %c0_118 = arith.constant 0 : index
    %161 = vector.load %arg14[%c0_117, %c0_118] : memref<3x4xf32, #tpu.memory_space<vmem>>, vector<1x4xf32>
    %162 = vector.broadcast %161 : vector<1x4xf32> to vector<256x4xf32>
    %163 = arith.mulf %160, %162 : vector<256x4xf32>
    %c25_119 = arith.constant 25 : index
    %c0_120 = arith.constant 0 : index
    %164 = vector.load %arg21[%c25_119, %c0_120] : memref<304x4xf32, #tpu.memory_space<vmem>>, vector<256x4xf32>
    %c2_121 = arith.constant 2 : index
    %c0_122 = arith.constant 0 : index
    %165 = vector.load %arg14[%c2_121, %c0_122] : memref<3x4xf32, #tpu.memory_space<vmem>>, vector<1x4xf32>
    %166 = vector.broadcast %165 : vector<1x4xf32> to vector<256x4xf32>
    %167 = arith.mulf %164, %166 : vector<256x4xf32>
    %168 = vector.broadcast %13 : vector<256x1xf32> to vector<256x4xf32>
    %169 = arith.mulf %163, %168 : vector<256x4xf32>
    %170 = arith.addf %159, %169 : vector<256x4xf32>
    %171 = vector.broadcast %14 : vector<256x1xf32> to vector<256x4xf32>
    %172 = arith.mulf %167, %171 : vector<256x4xf32>
    %173 = arith.addf %170, %172 : vector<256x4xf32>
    %c0_123 = arith.constant 0 : index
    %c0_124 = arith.constant 0 : index
    %174 = vector.load %arg15[%c0_123, %c0_124] : memref<1x4xf32, #tpu.memory_space<vmem>>, vector<1x4xf32>
    %175 = vector.broadcast %174 : vector<1x4xf32> to vector<256x4xf32>
    %176 = arith.addf %173, %175 : vector<256x4xf32>
    %c24_125 = arith.constant 24 : index
    %c0_126 = arith.constant 0 : index
    %177 = vector.load %arg22[%c24_125, %c0_126] : memref<304x4xf32, #tpu.memory_space<vmem>>, vector<256x4xf32>
    tpu.vector_store %arg22[%c24_125, %c0_126], %176 {strides = array<i32>} : memref<304x4xf32, #tpu.memory_space<vmem>>, vector<256x4xf32>,
    %c8_127 = arith.constant 8 : index
    %c0_128 = arith.constant 0 : index
    %178 = vector.load %arg22[%c8_127, %c0_128] : memref<304x4xf32, #tpu.memory_space<vmem>>, vector<256x4xf32>
    %c0_129 = arith.constant 0 : index
    %c0_130 = arith.constant 0 : index
    %179 = vector.load %arg16[%c0_129, %c0_130] : memref<3x4xf32, #tpu.memory_space<vmem>>, vector<1x4xf32>
    %180 = vector.broadcast %179 : vector<1x4xf32> to vector<256x4xf32>
    %181 = arith.mulf %178, %180 : vector<256x4xf32>
    %c24_131 = arith.constant 24 : index
    %c0_132 = arith.constant 0 : index
    %182 = vector.load %arg22[%c24_131, %c0_132] : memref<304x4xf32, #tpu.memory_space<vmem>>, vector<256x4xf32>
    %c1_133 = arith.constant 1 : index
    %c0_134 = arith.constant 0 : index
    %183 = vector.load %arg16[%c1_133, %c0_134] : memref<3x4xf32, #tpu.memory_space<vmem>>, vector<1x4xf32>
    %184 = vector.broadcast %183 : vector<1x4xf32> to vector<256x4xf32>
    %185 = arith.mulf %182, %184 : vector<256x4xf32>
    %186 = arith.addf %181, %185 : vector<256x4xf32>
    %c40_135 = arith.constant 40 : index
    %c0_136 = arith.constant 0 : index
    %187 = vector.load %arg22[%c40_135, %c0_136] : memref<304x4xf32, #tpu.memory_space<vmem>>, vector<256x4xf32>
    %c2_137 = arith.constant 2 : index
    %c0_138 = arith.constant 0 : index
    %188 = vector.load %arg16[%c2_137, %c0_138] : memref<3x4xf32, #tpu.memory_space<vmem>>, vector<1x4xf32>
    %189 = vector.broadcast %188 : vector<1x4xf32> to vector<256x4xf32>
    %190 = arith.mulf %187, %189 : vector<256x4xf32>
    %191 = arith.addf %186, %190 : vector<256x4xf32>
    %c0_139 = arith.constant 0 : index
    %c0_140 = arith.constant 0 : index
    %192 = vector.load %arg17[%c0_139, %c0_140] : memref<1x4xf32, #tpu.memory_space<vmem>>, vector<1x4xf32>
    %193 = vector.broadcast %192 : vector<1x4xf32> to vector<256x4xf32>
    %194 = arith.addf %191, %193 : vector<256x4xf32>
    %cst_141 = arith.constant 0.000000e+00 : f32
    %195 = vector.broadcast %cst_141 : f32 to vector<256x4xf32>
    %196 = arith.cmpf oge, %65, %195 : vector<256x4xf32>
    %cst_142 = arith.constant 2.500000e-01 : f32
    %197 = vector.broadcast %cst_142 : f32 to vector<256x4xf32>
    %198 = arith.mulf %197, %65 : vector<256x4xf32>
    %199 = arith.select %196, %65, %198 : vector<256x4xi1>, vector<256x4xf32>
    %c0_143 = arith.constant 0 : index
    %c0_144 = arith.constant 0 : index
    %200 = vector.load %arg23[%c0_143, %c0_144] : memref<256x16xf32, #tpu.memory_space<vmem>>, vector<256x4xf32>
    tpu.vector_store %arg23[%c0_143, %c0_144], %199 {strides = array<i32>} : memref<256x16xf32, #tpu.memory_space<vmem>>, vector<256x4xf32>,
    %cst_145 = arith.constant 0.000000e+00 : f32
    %201 = vector.broadcast %cst_145 : f32 to vector<256x4xf32>
    %202 = arith.cmpf oge, %116, %201 : vector<256x4xf32>
    %cst_146 = arith.constant 2.500000e-01 : f32
    %203 = vector.broadcast %cst_146 : f32 to vector<256x4xf32>
    %204 = arith.mulf %203, %116 : vector<256x4xf32>
    %205 = arith.select %202, %116, %204 : vector<256x4xi1>, vector<256x4xf32>
    %c0_147 = arith.constant 0 : index
    %c4_148 = arith.constant 4 : index
    %206 = vector.load %arg23[%c0_147, %c4_148] : memref<256x16xf32, #tpu.memory_space<vmem>>, vector<256x4xf32>
    tpu.vector_store %arg23[%c0_147, %c4_148], %205 {strides = array<i32>} : memref<256x16xf32, #tpu.memory_space<vmem>>, vector<256x4xf32>,
    %cst_149 = arith.constant 0.000000e+00 : f32
    %207 = vector.broadcast %cst_149 : f32 to vector<256x4xf32>
    %208 = arith.cmpf oge, %155, %207 : vector<256x4xf32>
    %cst_150 = arith.constant 2.500000e-01 : f32
    %209 = vector.broadcast %cst_150 : f32 to vector<256x4xf32>
    %210 = arith.mulf %209, %155 : vector<256x4xf32>
    %211 = arith.select %208, %155, %210 : vector<256x4xi1>, vector<256x4xf32>
    %c0_151 = arith.constant 0 : index
    %c8_152 = arith.constant 8 : index
    %212 = vector.load %arg23[%c0_151, %c8_152] : memref<256x16xf32, #tpu.memory_space<vmem>>, vector<256x4xf32>
    tpu.vector_store %arg23[%c0_151, %c8_152], %211 {strides = array<i32>} : memref<256x16xf32, #tpu.memory_space<vmem>>, vector<256x4xf32>,
    %cst_153 = arith.constant 0.000000e+00 : f32
    %213 = vector.broadcast %cst_153 : f32 to vector<256x4xf32>
    %214 = arith.cmpf oge, %194, %213 : vector<256x4xf32>
    %cst_154 = arith.constant 2.500000e-01 : f32
    %215 = vector.broadcast %cst_154 : f32 to vector<256x4xf32>
    %216 = arith.mulf %215, %194 : vector<256x4xf32>
    %217 = arith.select %214, %194, %216 : vector<256x4xi1>, vector<256x4xf32>
    %c0_155 = arith.constant 0 : index
    %c12 = arith.constant 12 : index
    %218 = vector.load %arg23[%c0_155, %c12] : memref<256x16xf32, #tpu.memory_space<vmem>>, vector<256x4xf32>
    tpu.vector_store %arg23[%c0_155, %c12], %217 {strides = array<i32>} : memref<256x16xf32, #tpu.memory_space<vmem>>, vector<256x4xf32>,
    %c0_156 = arith.constant 0 : index
    %c0_157 = arith.constant 0 : index
    %219 = vector.load %arg23[%c0_156, %c0_157] : memref<256x16xf32, #tpu.memory_space<vmem>>, vector<256x16xf32>
    %c0_158 = arith.constant 0 : index
    %c0_159 = arith.constant 0 : index
    %220 = vector.load %arg18[%c0_158, %c0_159] : memref<16x16xf32, #tpu.memory_space<vmem>>, vector<16x16xf32>
    %cst_160 = arith.constant dense<0.000000e+00> : vector<256x16xf32>
    %221 = tpu.matmul %219, %220, %cst_160 {dimension_numbers = #tpu.dot_dimension_numbers<[1], [0], [0], [1], [0, 0, 1, 1], [], []>} : vector<256x16xf32>, vector<16x16xf32>, vector<256x16xf32> -> vector<256x16xf32>
    %c0_161 = arith.constant 0 : index
    %c0_162 = arith.constant 0 : index
    %222 = vector.load %arg19[%c0_161, %c0_162] : memref<1x16xf32, #tpu.memory_space<vmem>>, vector<1x16xf32>
    %223 = vector.broadcast %222 : vector<1x16xf32> to vector<256x16xf32>
    %224 = arith.addf %221, %223 : vector<256x16xf32>
    %225 = arith.addf %1, %224 : vector<256x16xf32>
    %c0_163 = arith.constant 0 : index
    %c0_164 = arith.constant 0 : index
    %c0_165 = arith.constant 0 : index
    %226 = vector.load %arg20[%c0_163, %c0_164, %c0_165] : memref<1x256x16xf32, #tpu.memory_space<vmem>>, vector<1x256x16xf32>
    %227 = vector.shape_cast %226 : vector<1x256x16xf32> to vector<256x16xf32>
    %228 = vector.shape_cast %225 : vector<256x16xf32> to vector<1x256x16xf32>
    tpu.vector_store %arg20[%c0_163, %c0_164, %c0_165], %228 {strides = array<i32>} : memref<1x256x16xf32, #tpu.memory_space<vmem>>, vector<1x256x16xf32>,
    return
  }
  func.func @transform_0(%arg0: i32) -> (i32, i32, i32) {
    %c0_i32 = arith.constant 0 : i32
    %c0_i32_0 = arith.constant 0 : i32
    %c0_i32_1 = arith.constant 0 : i32
    return %arg0, %c0_i32, %c0_i32_0 : i32, i32, i32
  }
  func.func @transform_1(%arg0: i32) -> (i32, i32) {
    %c0_i32 = arith.constant 0 : i32
    %c0_i32_0 = arith.constant 0 : i32
    %c0_i32_1 = arith.constant 0 : i32
    return %c0_i32, %c0_i32_0 : i32, i32
  }
  func.func @transform_2(%arg0: i32) -> (i32, i32) {
    %c0_i32 = arith.constant 0 : i32
    %c0_i32_0 = arith.constant 0 : i32
    %c0_i32_1 = arith.constant 0 : i32
    return %c0_i32, %c0_i32_0 : i32, i32
  }
  func.func @transform_3(%arg0: i32) -> (i32, i32) {
    %c0_i32 = arith.constant 0 : i32
    %c0_i32_0 = arith.constant 0 : i32
    %c0_i32_1 = arith.constant 0 : i32
    return %c0_i32, %c0_i32_0 : i32, i32
  }
  func.func @transform_4(%arg0: i32) -> (i32, i32) {
    %c0_i32 = arith.constant 0 : i32
    %c0_i32_0 = arith.constant 0 : i32
    %c0_i32_1 = arith.constant 0 : i32
    return %c0_i32, %c0_i32_0 : i32, i32
  }
  func.func @transform_5(%arg0: i32) -> (i32, i32) {
    %c0_i32 = arith.constant 0 : i32
    %c0_i32_0 = arith.constant 0 : i32
    %c0_i32_1 = arith.constant 0 : i32
    return %c0_i32, %c0_i32_0 : i32, i32
  }
  func.func @transform_6(%arg0: i32) -> (i32, i32) {
    %c0_i32 = arith.constant 0 : i32
    %c0_i32_0 = arith.constant 0 : i32
    %c0_i32_1 = arith.constant 0 : i32
    return %c0_i32, %c0_i32_0 : i32, i32
  }
  func.func @transform_7(%arg0: i32) -> (i32, i32) {
    %c0_i32 = arith.constant 0 : i32
    %c0_i32_0 = arith.constant 0 : i32
    %c0_i32_1 = arith.constant 0 : i32
    return %c0_i32, %c0_i32_0 : i32, i32
  }
  func.func @transform_8(%arg0: i32) -> (i32, i32) {
    %c0_i32 = arith.constant 0 : i32
    %c0_i32_0 = arith.constant 0 : i32
    %c0_i32_1 = arith.constant 0 : i32
    return %c0_i32, %c0_i32_0 : i32, i32
  }
  func.func @transform_9(%arg0: i32) -> (i32, i32) {
    %c0_i32 = arith.constant 0 : i32
    %c0_i32_0 = arith.constant 0 : i32
    %c0_i32_1 = arith.constant 0 : i32
    return %c0_i32, %c0_i32_0 : i32, i32
  }
  func.func @transform_10(%arg0: i32) -> (i32, i32) {
    %c0_i32 = arith.constant 0 : i32
    %c0_i32_0 = arith.constant 0 : i32
    %c0_i32_1 = arith.constant 0 : i32
    return %c0_i32, %c0_i32_0 : i32, i32
  }
  func.func @transform_11(%arg0: i32) -> (i32, i32) {
    %c0_i32 = arith.constant 0 : i32
    %c0_i32_0 = arith.constant 0 : i32
    %c0_i32_1 = arith.constant 0 : i32
    return %c0_i32, %c0_i32_0 : i32, i32
  }
  func.func @transform_12(%arg0: i32) -> (i32, i32) {
    %c0_i32 = arith.constant 0 : i32
    %c0_i32_0 = arith.constant 0 : i32
    %c0_i32_1 = arith.constant 0 : i32
    return %c0_i32, %c0_i32_0 : i32, i32
  }
  func.func @transform_13(%arg0: i32) -> (i32, i32) {
    %c0_i32 = arith.constant 0 : i32
    %c0_i32_0 = arith.constant 0 : i32
    %c0_i32_1 = arith.constant 0 : i32
    return %c0_i32, %c0_i32_0 : i32, i32
  }
  func.func @transform_14(%arg0: i32) -> (i32, i32) {
    %c0_i32 = arith.constant 0 : i32
    %c0_i32_0 = arith.constant 0 : i32
    %c0_i32_1 = arith.constant 0 : i32
    return %c0_i32, %c0_i32_0 : i32, i32
  }
  func.func @transform_15(%arg0: i32) -> (i32, i32) {
    %c0_i32 = arith.constant 0 : i32
    %c0_i32_0 = arith.constant 0 : i32
    %c0_i32_1 = arith.constant 0 : i32
    return %c0_i32, %c0_i32_0 : i32, i32
  }
  func.func @transform_16(%arg0: i32) -> (i32, i32) {
    %c0_i32 = arith.constant 0 : i32
    %c0_i32_0 = arith.constant 0 : i32
    %c0_i32_1 = arith.constant 0 : i32
    return %c0_i32, %c0_i32_0 : i32, i32
  }
  func.func @transform_17(%arg0: i32) -> (i32, i32) {
    %c0_i32 = arith.constant 0 : i32
    %c0_i32_0 = arith.constant 0 : i32
    %c0_i32_1 = arith.constant 0 : i32
    return %c0_i32, %c0_i32_0 : i32, i32
  }
  func.func @transform_18(%arg0: i32) -> (i32, i32) {
    %c0_i32 = arith.constant 0 : i32
    %c0_i32_0 = arith.constant 0 : i32
    %c0_i32_1 = arith.constant 0 : i32
    return %c0_i32, %c0_i32_0 : i32, i32
  }
  func.func @transform_19(%arg0: i32) -> (i32, i32, i32) {
    %c0_i32 = arith.constant 0 : i32
    %c0_i32_0 = arith.constant 0 : i32
    %c0_i32_1 = arith.constant 0 : i32
    return %arg0, %c0_i32, %c0_i32_0 : i32, i32, i32
  }
}

</mosaic_0001>

<bundles_post_ra>
// kernel: tpu_custom_call.1
= control target key start
LH: loop header
LB: loop body
LE: loop exit
PB: predicated region body
PF: predicated region fallthrough
CT: control target
= control target key end

     0   :  { %s10799_s0 = inlined_call_operand.vmem [shape: f32[2,256,16], index: 0, kind: input, shape index: {}]   ;;  %s10800_s1 = inlined_call_operand.vmem [shape: f32[16,4], index: 1, kind: input, shape index: {}]   ;;  %s10801_s2 = inlined_call_operand.vmem [shape: f32[1,4], index: 2, kind: input, shape index: {}]   ;;  %s10802_s3 = inlined_call_operand.vmem [shape: f32[256,1], index: 3, kind: input, shape index: {}]   ;;  %s10803_s4 = inlined_call_operand.vmem [shape: f32[256,1], index: 4, kind: input, shape index: {}]   ;;  %s10804_s5 = inlined_call_operand.vmem [shape: f32[9,4], index: 5, kind: input, shape index: {}]   ;;  %s10805_s6 = inlined_call_operand.vmem [shape: f32[1,4], index: 6, kind: input, shape index: {}]   ;;  %s10806_s7 = inlined_call_operand.vmem [shape: f32[9,4], index: 7, kind: input, shape index: {}]   ;;  %s10807_s8 = inlined_call_operand.vmem [shape: f32[1,4], index: 8, kind: input, shape index: {}]   ;;  %s10808_s9 = inlined_call_operand.vmem [shape: f32[3,4], index: 9, kind: input, shape index: {}]   ;;  %s10809_s10 = inlined_call_operand.vmem [shape: f32[1,4], index: 10, kind: input, shape index: {}]   ;;  %s10810_s11 = inlined_call_operand.vmem [shape: f32[3,4], index: 11, kind: input, shape index: {}]   ;;  %s10811_s12 = inlined_call_operand.vmem [shape: f32[1,4], index: 12, kind: input, shape index: {}]   ;;  %s10812_s13 = inlined_call_operand.vmem [shape: f32[3,4], index: 13, kind: input, shape index: {}]   ;;  %s10813_s14 = inlined_call_operand.vmem [shape: f32[1,4], index: 14, kind: input, shape index: {}]   ;;  %s10814_s15 = inlined_call_operand.vmem [shape: f32[3,4], index: 15, kind: input, shape index: {}]   ;;  %s10815_s16 = inlined_call_operand.vmem [shape: f32[1,4], index: 16, kind: input, shape index: {}]   ;;  %s10816_s17 = inlined_call_operand.vmem [shape: f32[16,16], index: 17, kind: input, shape index: {}]   ;;  %s10817_s18 = inlined_call_operand.vmem [shape: f32[1,16], index: 18, kind: input, shape index: {}]   ;;  %s10818_s19 = inlined_call_operand.vmem [shape: f32[2,256,16], index: 19, kind: output, shape index: {}]  }
   0x1   :  { %11077 = sst [smem:[#allocation111_spill]] %s10799_s0  ;;  %s5822_s0 = smov 0  }
   0x2   :  { %11078 = sst [smem:[#allocation112_spill]] %s10800_s1 }
   0x3   :  { %11079 = sst [smem:[#allocation113_spill]] %s10801_s2 }
   0x4   :  { %11080 = sst [smem:[#allocation114_spill]] %s10802_s3 }
   0x5 LB: > { %s5205_s30 = sadd.s32 4294967295, %s5715_s0   ;;  %p5209_p0 = scmp.ge.s32.totalorder %s5715_s0, 1  ;;  %s5715_s0 = sphi %s5822_s0, %s29_s0  }
   0x6   : > { %p537_p1 = scmp.lt.s32.totalorder %s5715_s0, 3 }
   0x8   : > { %p538_p2 = pnand %p5209_p0, %p537_p1 }
   0xa   : > { %541 = sbr.rel (%p538_p2) target bundleno = 1087 (0x43f), region = 96 }
   0xf   : > { %s11081_s1 = sld [smem:[#allocation114_spill]]  ;;  %p593_p3 = scmp.lt.s32.totalorder %s5205_s30, 1  ;;  %v5717_v3 = vmov 0   ;;  %vm641_vm0 = vcmask 130048   ;;  %v928_v53 = vld [vmem:[%s10803_s4] sm:$0xff]  ;;  %v931_v58 = vld [vmem:[%s10803_s4 + $0x18] sm:$0xff] }
  0x10   : > { %5301 = vset.pattern.permute.xlu2 %v5717_v3  ;;  %5300 = vset.pattern.permute.xlu1 %v5717_v3  ;;  %s11082_s26 = sld [smem:[#allocation112_spill]]  ;;  %v930_v59 = vld [vmem:[%s10803_s4 + $0x10] sm:$0xff]  ;;  %v929_v60 = vld [vmem:[%s10803_s4 + $0x8] sm:$0xff]  ;;  %vm851_vm1 = vcmask 31744   ;;  %s5719_s27 = smov 4  }
  0x11   : > { %5299 = vset.pattern.permute.xlu0 %v5717_v3  ;;  %s11702_s30 = smov (!%p593_p3, %s5205_s30), 1  ;;  %s11083_s22 = sld [smem:[#allocation111_spill]] }
  0x12   : > { %s10822_s29 = sshll.u32 %s11702_s30, 8  ;;  %s5720_s21 = smov 8  }
  0x13   : > { %s5721_s23 = smov 12  }
  0x15   : > { %v900_v0 = vld [vmem:[%s11081_s1 + $0x20] sm:$0xff]  ;;  %v898_v1 = vld [vmem:[%s11081_s1 + $0x10] sm:$0xff]  ;;  %v901_v8 = vld [vmem:[%s11081_s1 + $0x28] sm:$0xff] }
  0x16   : > { %v896_v2 = vld [vmem:[%s11081_s1] sm:$0xff]  ;;  %v636_v4 = vld [vmem:[%s11082_s26 + $0x8] sm:$0xff]  ;;  %1386 = vperm.xlu2 %5301, %v900_v0   ;;  %1376 = vperm.xlu1 %5300, %v898_v1   ;;  %v899_v9 = vld [vmem:[%s11081_s1 + $0x18] sm:$0xff] }
  0x17   : > { %1366 = vperm.xlu0 %5299, %v896_v2   ;;  %v635_v5 = vld [vmem:[%s11082_s26] sm:$0xff]  ;;  %752 = vmatpush.msra.mxu0 %v636_v4  ;;  %s5853_s2 = scalar_lea.vmem %s11083_s22, %s10822_s29  ;;  %v897_v10 = vld [vmem:[%s11081_s1 + $0x8] sm:$0xff]  ;;  %v903_v14 = vld [vmem:[%s11081_s1 + $0x38] sm:$0xff]  ;;  %s11091_s22 = sld [smem:[#allocation113_spill]] }
  0x18   : > { %5282 = vmatpush.msra.mxu2 %v636_v4  ;;  %v603_v6 = vld [vmem:[%s5853_s2] sm:$0xff]  ;;  %v604_v11 = vld [vmem:[%s5853_s2 + $0x8] sm:$0xff]  ;;  %v902_v15 = vld [vmem:[%s11081_s1 + $0x30] sm:$0xff] }
  0x19   : > { %753 = vmatpush.msra.mxu0 %v635_v5  ;;  %v619_v7 = vld [vmem:[%s5853_s2 + $0x80] sm:$0xff]  ;;  %v620_v12 = vld [vmem:[%s5853_s2 + $0x88] sm:$0xff]  ;;  %v605_v16 = vld [vmem:[%s5853_s2 + $0x10] sm:$0xff] }
  0x1a   : > { %5283 = vmatpush.msra.mxu2 %v635_v5  ;;  %5214 = vmatmul.msk.f32.vlgmr.msra.gmra.mxu0 %vm641_vm0, %v603_v6  ;;  %v904_v13 = vld [vmem:[%s11081_s1 + $0x40] sm:$0xff]  ;;  %v621_v17 = vld [vmem:[%s5853_s2 + $0x90] sm:$0xff]  ;;  %v907_v18 = vld [vmem:[%s11081_s1 + $0x58] sm:$0xff] }
  0x1b   : > { %5230 = vmatmul.msk.f32.vlgmr.msra.gmra.mxu2 %vm641_vm0, %v619_v7  ;;  %v906_v19 = vld [vmem:[%s11081_s1 + $0x50] sm:$0xff]  ;;  %v905_v20 = vld [vmem:[%s11081_s1 + $0x48] sm:$0xff]  ;;  %v606_v21 = vld [vmem:[%s5853_s2 + $0x18] sm:$0xff] }
  0x1c   : > { %v622_v22 = vld [vmem:[%s5853_s2 + $0x98] sm:$0xff]  ;;  %v910_v23 = vld [vmem:[%s11081_s1 + $0x70] sm:$0xff]  ;;  %v909_v24 = vld [vmem:[%s11081_s1 + $0x68] sm:$0xff] }
  0x1d   : > { %v908_v25 = vld [vmem:[%s11081_s1 + $0x60] sm:$0xff]  ;;  %v913_v28 = vld [vmem:[%s11081_s1 + $0x88] sm:$0xff]  ;;  %v911_v30 = vld [vmem:[%s11081_s1 + $0x78] sm:$0xff] }
  0x1e   : > { %1391 = vperm.xlu2 %5301, %v901_v8   ;;  %1381 = vperm.xlu1 %5300, %v899_v9   ;;  %v607_v26 = vld [vmem:[%s5853_s2 + $0x20] sm:$0xff]  ;;  %v608_v31 = vld [vmem:[%s5853_s2 + $0x28] sm:$0xff]  ;;  %v915_v34 = vld [vmem:[%s11081_s1 + $0x98] sm:$0xff]  ;;  %v5718_v9 = vmov 0.0  }
  0x1f   : > { %1371 = vperm.xlu0 %5299, %v897_v10   ;;  %v623_v27 = vld [vmem:[%s5853_s2 + $0xa0] sm:$0xff]  ;;  %v624_v32 = vld [vmem:[%s5853_s2 + $0xa8] sm:$0xff]  ;;  %v914_v35 = vld [vmem:[%s11081_s1 + $0x90] sm:$0xff]  ;;  %852 = vst.msk [vmem:[#allocation2] sm:$0xff] %vm851_vm1, %v5718_v9 }
  0x20   : > { %v912_v29 = vld [vmem:[%s11081_s1 + $0x80] sm:$0xff]  ;;  %v609_v36 = vld [vmem:[%s5853_s2 + $0x30] sm:$0xff]  ;;  %v919_v38 = vld [vmem:[%s11081_s1 + $0xb8] sm:$0xff]  ;;  %853 = vst.msk [vmem:[#allocation2 + $0x8] sm:$0xff] %vm851_vm1, %v5718_v9 }
  0x21   : > { %v916_v33 = vld [vmem:[%s11081_s1 + $0xa0] sm:$0xff]  ;;  %v625_v37 = vld [vmem:[%s5853_s2 + $0xb0] sm:$0xff]  ;;  %v917_v40 = vld [vmem:[%s11081_s1 + $0xa8] sm:$0xff]  ;;  %854 = vst.msk [vmem:[#allocation2 + $0x10] sm:$0xff] %vm851_vm1, %v5718_v9 }
  0x22   : > { %5215 = vmatmul.msk.f32.gmra.mxu0 %vm641_vm0, %v604_v11  ;;  %v918_v39 = vld [vmem:[%s11081_s1 + $0xb0] sm:$0xff]  ;;  %v610_v41 = vld [vmem:[%s5853_s2 + $0x38] sm:$0xff]  ;;  %v921_v44 = vld [vmem:[%s11081_s1 + $0xc8] sm:$0xff]  ;;  %860 = vst.msk [vmem:[#allocation3 + $0x10] sm:$0xff] %vm851_vm1, %v5718_v9 }
  0x23   : > { %5231 = vmatmul.msk.f32.gmra.mxu2 %vm641_vm0, %v620_v12  ;;  %v626_v42 = vld [vmem:[%s5853_s2 + $0xb8] sm:$0xff]  ;;  %v922_v43 = vld [vmem:[%s11081_s1 + $0xd0] sm:$0xff]  ;;  %v920_v45 = vld [vmem:[%s11081_s1 + $0xc0] sm:$0xff]  ;;  %855 = vst.msk [vmem:[#allocation2 + $0x118] sm:$0xff] %vm851_vm1, %v5718_v9 }
  0x24   : > { %v611_v46 = vld [vmem:[%s5853_s2 + $0x40] sm:$0xff]  ;;  %v925_v48 = vld [vmem:[%s11081_s1 + $0xe8] sm:$0xff]  ;;  %v923_v50 = vld [vmem:[%s11081_s1 + $0xd8] sm:$0xff]  ;;  %856 = vst.msk [vmem:[#allocation2 + $0x120] sm:$0xff] %vm851_vm1, %v5718_v9 }
  0x25   : > { %v627_v47 = vld [vmem:[%s5853_s2 + $0xc0] sm:$0xff]  ;;  %v612_v51 = vld [vmem:[%s5853_s2 + $0x48] sm:$0xff]  ;;  %v927_v54 = vld [vmem:[%s11081_s1 + $0xf8] sm:$0xff]  ;;  %857 = vst.msk [vmem:[#allocation2 + $0x128] sm:$0xff] %vm851_vm1, %v5718_v9 }
  0x26   : > { %1406 = vperm.xlu2 %5301, %v904_v13   ;;  %1401 = vperm.xlu1 %5300, %v903_v14   ;;  %v924_v49 = vld [vmem:[%s11081_s1 + $0xe0] sm:$0xff]  ;;  %v628_v52 = vld [vmem:[%s5853_s2 + $0xc8] sm:$0xff]  ;;  %v926_v55 = vld [vmem:[%s11081_s1 + $0xf0] sm:$0xff]  ;;  %859 = vst.msk [vmem:[#allocation3 + $0x8] sm:$0xff] %vm851_vm1, %v5718_v9 }
  0x27   : > { %1396 = vperm.xlu0 %5299, %v902_v15   ;;  %v613_v56 = vld [vmem:[%s5853_s2 + $0x50] sm:$0xff]  ;;  %v614_v62 = vld [vmem:[%s5853_s2 + $0x58] sm:$0xff]  ;;  %v933_v1 = vld [vmem:[%s10803_s4 + $0x28] sm:$0xff]  ;;  %861 = vst.msk [vmem:[#allocation3 + $0x118] sm:$0xff] %vm851_vm1, %v5718_v9 }
  0x28   : > { %v629_v57 = vld [vmem:[%s5853_s2 + $0xd0] sm:$0xff]  ;;  %v630_v63 = vld [vmem:[%s5853_s2 + $0xd8] sm:$0xff]  ;;  %v932_v2 = vld [vmem:[%s10803_s4 + $0x20] sm:$0xff]  ;;  %862 = vst.msk [vmem:[#allocation3 + $0x120] sm:$0xff] %vm851_vm1, %v5718_v9 }
  0x29   : > { %v934_v0 = vld [vmem:[%s10803_s4 + $0x30] sm:$0xff]  ;;  %v615_v4 = vld [vmem:[%s5853_s2 + $0x60] sm:$0xff]  ;;  %v937_v6 = vld [vmem:[%s10803_s4 + $0x48] sm:$0xff] }
  0x2a   : > { %5216 = vmatmul.msk.f32.gmra.mxu0 %vm641_vm0, %v605_v16  ;;  %v631_v5 = vld [vmem:[%s5853_s2 + $0xe0] sm:$0xff]  ;;  %v935_v8 = vld [vmem:[%s10803_s4 + $0x38] sm:$0xff]  ;;  %v616_v11 = vld [vmem:[%s5853_s2 + $0x68] sm:$0xff] }
  0x2b   : > { %5232 = vmatmul.msk.f32.gmra.mxu2 %vm641_vm0, %v621_v17  ;;  %v936_v7 = vld [vmem:[%s10803_s4 + $0x40] sm:$0xff]  ;;  %v632_v12 = vld [vmem:[%s5853_s2 + $0xe8] sm:$0xff]  ;;  %v939_v14 = vld [vmem:[%s10803_s4 + $0x58] sm:$0xff] }
  0x2c   : > { %v940_v13 = vld [vmem:[%s10803_s4 + $0x60] sm:$0xff]  ;;  %v938_v15 = vld [vmem:[%s10803_s4 + $0x50] sm:$0xff] }
  0x2d   : > { %v617_v17 = vld [vmem:[%s5853_s2 + $0x70] sm:$0xff]  ;;  %v6199_v9 = vld [vmem:[%s10804_s5 + $0x2] ss:$0 sm:$0xff] }
  0x2e   : > { %1421 = vperm.xlu2 %5301, %v907_v18   ;;  %1416 = vperm.xlu1 %5300, %v906_v19   ;;  %v633_v18 = vld [vmem:[%s5853_s2 + $0xf0] sm:$0xff]  ;;  %11106 = vst [vmem:[#allocation26_spill] sm:$0xff] %v6199_v9 }
  0x2f   : > { %1411 = vperm.xlu0 %5299, %v905_v20  }
  0x32   : > { %5217 = vmatmul.msk.f32.gmra.mxu0 %vm641_vm0, %v606_v21  ;;  %v943_v21 = vld [vmem:[%s10803_s4 + $0x78] sm:$0xff] }
  0x33   : > { %5233 = vmatmul.msk.f32.gmra.mxu2 %vm641_vm0, %v622_v22  ;;  %v942_v22 = vld [vmem:[%s10803_s4 + $0x70] sm:$0xff] }
  0x36   : > { %1436 = vperm.xlu2 %5301, %v910_v23   ;;  %1431 = vperm.xlu1 %5300, %v909_v24   ;;  %v941_v23 = vld [vmem:[%s10803_s4 + $0x68] sm:$0xff] }
  0x37   : > { %1426 = vperm.xlu0 %5299, %v908_v25   ;;  %v618_v25 = vld [vmem:[%s5853_s2 + $0x78] sm:$0xff] }
  0x3a   : > { %5218 = vmatmul.msk.f32.gmra.mxu0 %vm641_vm0, %v607_v26  ;;  %v634_v26 = vld [vmem:[%s5853_s2 + $0xf8] sm:$0xff] }
  0x3b   : > { %5234 = vmatmul.msk.f32.gmra.mxu2 %vm641_vm0, %v623_v27 }
  0x3e   : > { %1451 = vperm.xlu2 %5301, %v913_v28   ;;  %1446 = vperm.xlu1 %5300, %v912_v29   ;;  %v946_v29 = vld [vmem:[%s10803_s4 + $0x90] sm:$0xff] }
  0x3f   : > { %1441 = vperm.xlu0 %5299, %v911_v30   ;;  %v945_v30 = vld [vmem:[%s10803_s4 + $0x88] sm:$0xff] }
  0x42   : > { %5219 = vmatmul.msk.f32.gmra.mxu0 %vm641_vm0, %v608_v31  ;;  %v944_v31 = vld [vmem:[%s10803_s4 + $0x80] sm:$0xff] }
  0x43   : > { %5235 = vmatmul.msk.f32.gmra.mxu2 %vm641_vm0, %v624_v32  ;;  %v6094_v32 = vld [vmem:[%s11091_s22] ss:$0 sm:$0xff] }
  0x46   : > { %1466 = vperm.xlu2 %5301, %v916_v33   ;;  %1461 = vperm.xlu1 %5300, %v915_v34  }
  0x47   : > { %1456 = vperm.xlu0 %5299, %v914_v35  }
  0x4a   : > { %5220 = vmatmul.msk.f32.gmra.mxu0 %vm641_vm0, %v609_v36 }
  0x4b   : > { %5236 = vmatmul.msk.f32.gmra.mxu2 %vm641_vm0, %v625_v37 }
  0x4e   : > { %1481 = vperm.xlu2 %5301, %v919_v38   ;;  %1476 = vperm.xlu1 %5300, %v918_v39   ;;  %v949_v38 = vld [vmem:[%s10803_s4 + $0xa8] sm:$0xff]  ;;  %v948_v39 = vld [vmem:[%s10803_s4 + $0xa0] sm:$0xff] }
  0x4f   : > { %1471 = vperm.xlu0 %5299, %v917_v40   ;;  %v947_v40 = vld [vmem:[%s10803_s4 + $0x98] sm:$0xff] }
  0x52   : > { %5221 = vmatmul.msk.f32.gmra.mxu0 %vm641_vm0, %v610_v41  ;;  %v6116_v41 = vld [vmem:[%s10804_s5 + $0x1] ss:$0 sm:$0xff] }
  0x53   : > { %5237 = vmatmul.msk.f32.gmra.mxu2 %vm641_vm0, %v626_v42  ;;  %11095 = vst [vmem:[#allocation15_spill] sm:$0xff] %v6116_v41  ;;  %v6121_v42 = vld [vmem:[%s10804_s5] ss:$0 sm:$0xff] }
  0x54   : > { %11096 = vst [vmem:[#allocation16_spill] sm:$0xff] %v6121_v42 }
  0x56   : > { %1496 = vperm.xlu2 %5301, %v922_v43   ;;  %1491 = vperm.xlu1 %5300, %v921_v44   ;;  %v1162_v44 = vld [vmem:[#allocation2 + $0x7] sm:$0xff] }
  0x57   : > { %1486 = vperm.xlu0 %5299, %v920_v45  }
  0x5a   : > { %5222 = vmatmul.msk.f32.gmra.mxu0 %vm641_vm0, %v611_v46  ;;  %v6127_v46 = vld [vmem:[%s10808_s9] ss:$0 sm:$0xff] }
  0x5b   : > { %5238 = vmatmul.msk.f32.gmra.mxu2 %vm641_vm0, %v627_v47  ;;  %v6132_v47 = vld [vmem:[%s10812_s13] ss:$0 sm:$0xff] }
  0x5e   : > { %1511 = vperm.xlu2 %5301, %v925_v48   ;;  %1506 = vperm.xlu1 %5300, %v924_v49   ;;  %v6137_v48 = vld [vmem:[%s10804_s5 + $0x4] ss:$0 sm:$0xff]  ;;  %v6142_v49 = vld [vmem:[%s10804_s5 + $0x3] ss:$0 sm:$0xff] }
  0x5f   : > { %1501 = vperm.xlu0 %5299, %v923_v50   ;;  %11097 = vst [vmem:[#allocation17_spill] sm:$0xff] %v6137_v48 }
  0x60   : > { %11098 = vst [vmem:[#allocation18_spill] sm:$0xff] %v6142_v49 }
  0x62   : > { %5223 = vmatmul.msk.f32.gmra.mxu0 %vm641_vm0, %v612_v51 }
  0x63   : > { %5239 = vmatmul.msk.f32.gmra.mxu2 %vm641_vm0, %v628_v52  ;;  %v6149_v52 = vld [vmem:[%s10808_s9 + $0x1] ss:$0 sm:$0xff] }
  0x66   : > { %1792 = vperm.xlu2 %5301, %v928_v53   ;;  %1521 = vperm.xlu1 %5300, %v927_v54   ;;  %v6154_v53 = vld [vmem:[%s10806_s7] ss:$0 sm:$0xff]  ;;  %v960_v54 = vld [vmem:[#allocation2 + $0x8] sm:$0xff] }
  0x67   : > { %1516 = vperm.xlu0 %5299, %v926_v55   ;;  %11100 = vst [vmem:[#allocation20_spill] sm:$0xff] %v6154_v53 }
  0x6a   : > { %5224 = vmatmul.msk.f32.gmra.mxu0 %vm641_vm0, %v613_v56 }
  0x6b   : > { %5240 = vmatmul.msk.f32.gmra.mxu2 %vm641_vm0, %v629_v57 }
  0x6e   : > { %1807 = vperm.xlu2 %5301, %v931_v58   ;;  %1802 = vperm.xlu1 %5300, %v930_v59   ;;  %v6165_v58 = vld [vmem:[%s10806_s7 + $0x1] ss:$0 sm:$0xff]  ;;  %v6170_v59 = vld [vmem:[%s10806_s7 + $0x3] ss:$0 sm:$0xff] }
  0x6f   : > { %1797 = vperm.xlu0 %5299, %v929_v60   ;;  %11103 = vst [vmem:[#allocation23_spill] sm:$0xff] %v6165_v58  ;;  %v994_v60 = vmul.f32 %v6116_v41, %v960_v54 }
  0x70   : > { %v5998_v61 = vpop.permute.xlu2 %1386  ;;  %11104 = vst [vmem:[#allocation24_spill] sm:$0xff] %v6170_v59 }
  0x71   : > { %11084 = vst [vmem:[#allocation5_spill] sm:$0xff] %v5998_v61 }
  0x72   : > { %5225 = vmatmul.msk.f32.gmra.mxu0 %vm641_vm0, %v614_v62  ;;  %v1196_v62 = vmul.f32 %v6121_v42, %v1162_v44 }
  0x73   : > { %5241 = vmatmul.msk.f32.gmra.mxu2 %vm641_vm0, %v630_v63  ;;  %v6177_v63 = vld [vmem:[%s10806_s7 + $0x4] ss:$0 sm:$0xff] }
  0x74   : > { %11105 = vst [vmem:[#allocation25_spill] sm:$0xff] %v6177_v63 }
  0x76   : > { %1822 = vperm.xlu2 %5301, %v934_v0   ;;  %1817 = vperm.xlu1 %5300, %v933_v1  }
  0x77   : > { %1812 = vperm.xlu0 %5299, %v932_v2   ;;  %v6182_v2 = vld [vmem:[%s10812_s13 + $0x1] ss:$0 sm:$0xff] }
  0x78   : > { %v6013_v3 = vpop.permute.xlu2 %1391 }
  0x79   : > { %11085 = vst [vmem:[#allocation6_spill] sm:$0xff] %v6013_v3 }
  0x7a   : > { %5226 = vmatmul.msk.f32.gmra.mxu0 %vm641_vm0, %v615_v4  ;;  %v952_v4 = vld [vmem:[%s10803_s4 + $0xc0] sm:$0xff] }
  0x7b   : > { %5242 = vmatmul.msk.f32.gmra.mxu2 %vm641_vm0, %v631_v5 }
  0x7e   : > { %1837 = vperm.xlu2 %5301, %v937_v6   ;;  %1832 = vperm.xlu1 %5300, %v936_v7   ;;  %v951_v7 = vld [vmem:[%s10803_s4 + $0xb8] sm:$0xff] }
  0x7f   : > { %1827 = vperm.xlu0 %5299, %v935_v8   ;;  %v950_v8 = vld [vmem:[%s10803_s4 + $0xb0] sm:$0xff] }
  0x80   : > { %v6031_v10 = vpop.permute.xlu2 %1406 }
  0x81   : > { %11086 = vst [vmem:[#allocation7_spill] sm:$0xff] %v6031_v10 }
  0x82   : > { %5227 = vmatmul.msk.f32.gmra.mxu0 %vm641_vm0, %v616_v11  ;;  %v2218_v11 = vmul.f32 %v6154_v53, %v1162_v44 }
  0x83   : > { %5243 = vmatmul.msk.f32.gmra.mxu2 %vm641_vm0, %v632_v12  ;;  %v6205_v12 = vld [vmem:[%s10806_s7 + $0x2] ss:$0 sm:$0xff] }
  0x84   : > { %11107 = vst [vmem:[#allocation27_spill] sm:$0xff] %v6205_v12 }
  0x86   : > { %1852 = vperm.xlu2 %5301, %v940_v13   ;;  %1847 = vperm.xlu1 %5300, %v939_v14   ;;  %v6207_v13 = vld [vmem:[#allocation2 + $0x10] sm:$0xff] }
  0x87   : > { %1842 = vperm.xlu0 %5299, %v938_v15  }
  0x88   : > { %v6053_v16 = vpop.permute.xlu2 %1421  ;;  %v6057_v19 = vpop.permute.xlu1 %1376 }
  0x89   : > { %11087 = vst [vmem:[#allocation8_spill] sm:$0xff] %v6053_v16  ;;  %v6059_v20 = vpop.permute.xlu0 %1366  ;;  %v6314_v16 = vld [vmem:[%s10804_s5 + $0x6] ss:$0 sm:$0xff] }
  0x8a   : > { %5228 = vmatmul.msk.f32.gmra.mxu0 %vm641_vm0, %v617_v17  ;;  %v1588_v17 = vld [vmem:[#allocation2 + $0x9] sm:$0xff]  ;;  %11116 = vst [vmem:[#allocation36_spill] sm:$0xff] %v6314_v16 }
  0x8b   : > { %5244 = vmatmul.msk.f32.gmra.mxu2 %vm641_vm0, %v633_v18  ;;  %v2714_v18 = vmul.f32 %v6127_v46, %v960_v54 }
  0x8e   : > { %1867 = vperm.xlu2 %5301, %v943_v21   ;;  %1862 = vperm.xlu1 %5300, %v942_v22  }
  0x8f   : > { %1857 = vperm.xlu0 %5299, %v941_v23   ;;  %v2052_v23 = vmul.f32 %v6165_v58, %v960_v54  ;;  %v2448_v54 = vmul.f32 %v6205_v12, %v1588_v17 }
  0x90   : > { %v6072_v24 = vpop.permute.xlu2 %1436  ;;  %v6076_v27 = vpop.permute.xlu1 %1381 }
  0x91   : > { %11088 = vst [vmem:[#allocation9_spill] sm:$0xff] %v6072_v24  ;;  %v6078_v28 = vpop.permute.xlu0 %1371 }
  0x92   : > { %11089 = vst [vmem:[#allocation10_spill] sm:$0xff] %v6076_v27  ;;  %5229 = vmatmul.msk.f32.gmra.mxu0 %vm641_vm0, %v618_v25 }
  0x93   : > { %11090 = vst [vmem:[#allocation11_spill] sm:$0xff] %v6078_v28  ;;  %5245 = vmatmul.msk.f32.gmra.mxu2 %vm641_vm0, %v634_v26 }
  0x96   : > { %1882 = vperm.xlu2 %5301, %v946_v29   ;;  %1877 = vperm.xlu1 %5300, %v945_v30  }
  0x97   : > { %1872 = vperm.xlu0 %5299, %v944_v31   ;;  %v755_v34 = vpop.f32.mrf.mxu0  ;;  %v6223_v31 = vld [vmem:[%s10804_s5 + $0x5] ss:$0 sm:$0xff] }
  0x98   : > { %v6096_v33 = vpop.permute.xlu2 %1451  ;;  %v6098_v35 = vpop.permute.xlu1 %1401  ;;  %v756_v37 = vadd.f32 %v6094_v32, %v755_v34  ;;  %11108 = vst [vmem:[#allocation28_spill] sm:$0xff] %v6223_v31 }
  0x99   : > { %11092 = vst [vmem:[#allocation12_spill] sm:$0xff] %v6096_v33  ;;  %v6100_v36 = vpop.permute.xlu0 %1396 }
  0x9a   : > { %11093 = vst [vmem:[#allocation13_spill] sm:$0xff] %v6098_v35 }
  0x9b   : > { %11094 = vst [vmem:[#allocation14_spill] sm:$0xff] %v6100_v36 }
  0x9c   : > { %864 = vst.msk [vmem:[#allocation2 + $0x18] sm:$0xff] %vm851_vm1, %v756_v37 }
  0x9e   : > { %1897 = vperm.xlu2 %5301, %v949_v38   ;;  %v803_v43 = vpop.f32.mrf.mxu2  ;;  %1892 = vperm.xlu1 %5300, %v948_v39   ;;  %v6230_v38 = vld [vmem:[%s10806_s7 + $0x5] ss:$0 sm:$0xff]  ;;  %v1622_v39 = vmul.f32 %v6199_v9, %v1588_v17  ;;  %v6263_v17 = vld [vmem:[%s10808_s9 + $0x2] ss:$0 sm:$0xff] }
  0x9f   : > { %1887 = vperm.xlu0 %5299, %v947_v40   ;;  %v804_v45 = vadd.f32 %v6094_v32, %v803_v43  ;;  %v758_v51 = vpop.f32.mrf.mxu0  ;;  %11110 = vst [vmem:[#allocation30_spill] sm:$0xff] %v6230_v38  ;;  %v2715_v40 = vmul.f32 %v6127_v46, %v6207_v13 }
  0xa0   : > { %v6144_v50 = vpop.permute.xlu2 %1466  ;;  %v6157_v55 = vpop.permute.xlu1 %1416  ;;  %v759_v57 = vadd.f32 %v6094_v32, %v758_v51  ;;  %v6244_v51 = vld [vmem:[%s10812_s13 + $0x2] ss:$0 sm:$0xff] }
  0xa1   : > { %11099 = vst [vmem:[#allocation19_spill] sm:$0xff] %v6144_v50  ;;  %v6159_v56 = vpop.permute.xlu0 %1411 }
  0xa2   : > { %880 = vst.msk [vmem:[#allocation2 + $0x98] sm:$0xff] %vm851_vm1, %v804_v45 }
  0xa3   : > { %11101 = vst [vmem:[#allocation21_spill] sm:$0xff] %v6157_v55  ;;  %v962_v0 = vld [vmem:[#allocation2 + $0x18] sm:$0xff] }
  0xa4   : > { %11102 = vst [vmem:[#allocation22_spill] sm:$0xff] %v6159_v56  ;;  %v1164_v1 = vld [vmem:[#allocation2 + $0x17] sm:$0xff]  ;;  %v1030_v5 = vmul.f32 %v6137_v48, %v962_v0  ;;  %v2086_v25 = vmul.f32 %v6177_v63, %v962_v0  ;;  %v2748_v29 = vmul.f32 %v6149_v52, %v962_v0 }
  0xa5   : > { %865 = vst.msk [vmem:[#allocation2 + $0x20] sm:$0xff] %vm851_vm1, %v759_v57  ;;  %v1232_v6 = vmul.f32 %v6142_v49, %v1164_v1  ;;  %v3408_v21 = vmul.f32 %v6132_v47, %v1164_v1  ;;  %v2252_v26 = vmul.f32 %v6170_v59, %v1164_v1  ;;  %v3342_v57 = vmul.f32 %v6182_v2, %v962_v0 }
  0xa6   : > { %v6209_v14 = vadd.f32 %v1030_v5, %v994_v60  ;;  %1912 = vperm.xlu2 %5301, %v952_v4   ;;  %v806_v22 = vpop.f32.mrf.mxu2  ;;  %1907 = vperm.xlu1 %5300, %v951_v7   ;;  %v6251_v5 = vadd.f32 %v2086_v25, %v2052_v23  ;;  %v6256_v7 = vmul.f32 %v6127_v46, %v962_v0 }
  0xa7   : > { %v6211_v15 = vadd.f32 %v1232_v6, %v1196_v62  ;;  %1902 = vperm.xlu0 %5299, %v950_v8   ;;  %v807_v30 = vadd.f32 %v6094_v32, %v806_v22  ;;  %v761_v37 = vpop.f32.mrf.mxu0  ;;  %v3506_v60 = vmul.f32 %v3408_v21, %v6059_v20  ;;  %v6253_v6 = vadd.f32 %v2252_v26, %v2218_v11  ;;  %v955_v21 = vld [vmem:[%s10803_s4 + $0xd8] sm:$0xff] }
  0xa8   : > { %v6225_v34 = vpop.permute.xlu2 %1481  ;;  %v6236_v43 = vpop.permute.xlu1 %1431  ;;  %v762_v45 = vadd.f32 %v6094_v32, %v761_v37  ;;  %v6258_v8 = vadd.f32 %v2748_v29, %v2714_v18  ;;  %v6272_v23 = vmul.f32 %v6116_v41, %v962_v0  ;;  %v6275_v18 = vmul.f32 %v6121_v42, %v1164_v1  ;;  %v953_v37 = vld [vmem:[%s10803_s4 + $0xc8] sm:$0xff] }
  0xa9   : > { %11109 = vst [vmem:[#allocation29_spill] sm:$0xff] %v6225_v34  ;;  %v6238_v44 = vpop.permute.xlu0 %1426  ;;  %v6278_v25 = vmul.f32 %v6165_v58, %v962_v0  ;;  %v6280_v26 = vld [vmem:[#allocation2 + $0x98] sm:$0xff]  ;;  %v6292_v34 = vmul.f32 %v6154_v53, %v1164_v1 }
  0xaa   : > { %881 = vst.msk [vmem:[#allocation2 + $0xa0] sm:$0xff] %vm851_vm1, %v807_v30  ;;  %v954_v30 = vld [vmem:[%s10803_s4 + $0xd0] sm:$0xff]  ;;  %v6297_v50 = vmul.f32 %v6263_v17, %v6280_v26 }
  0xab   : > { %11111 = vst [vmem:[#allocation31_spill] sm:$0xff] %v6236_v43  ;;  %v6301_v43 = vadd.f32 %v3506_v60, %v3342_v57  ;;  %v1163_v57 = vld [vmem:[#allocation2 + $0xf] sm:$0xff] }
  0xac   : > { %11112 = vst [vmem:[#allocation32_spill] sm:$0xff] %v6238_v44  ;;  %v963_v62 = vld [vmem:[#allocation2 + $0x20] sm:$0xff]  ;;  %v6306_v44 = vmul.f32 %v6182_v2, %v6280_v26 }
  0xad   : > { %v6249_v4 = vld [vmem:[#allocation2 + $0x19] sm:$0xff]  ;;  %866 = vst.msk [vmem:[#allocation2 + $0x28] sm:$0xff] %vm851_vm1, %v762_v45  ;;  %v2749_v29 = vmul.f32 %v6149_v52, %v963_v62  ;;  %v3343_v33 = vmul.f32 %v6182_v2, %v963_v62  ;;  %v6309_v55 = vmul.f32 %v6127_v46, %v963_v62 }
  0xae   : > { %v1165_v22 = vld [vmem:[#allocation2 + $0x1f] sm:$0xff]  ;;  %v1658_v11 = vmul.f32 %v6223_v31, %v6249_v4  ;;  %11113 = vst [vmem:[#allocation33_spill] sm:$0xff] %v6280_v26  ;;  %v2482_v45 = vmul.f32 %v6230_v38, %v6249_v4  ;;  %1927 = vperm.xlu2 %5301, %v955_v21   ;;  %v809_v1 = vpop.f32.mrf.mxu2  ;;  %1922 = vperm.xlu1 %5300, %v954_v30   ;;  %v6325_v21 = vld [vmem:[%s10804_s5 + $0x7] ss:$0 sm:$0xff] }
  0xaf   : > { %v3409_v0 = vmul.f32 %v6132_v47, %v1165_v22  ;;  %11114 = vst [vmem:[#allocation34_spill] sm:$0xff] %v6297_v50  ;;  %1917 = vperm.xlu0 %5299, %v953_v37   ;;  %v6335_v50 = vld [vmem:[%s10806_s7 + $0x6] ss:$0 sm:$0xff]  ;;  %v1197_v30 = vmul.f32 %v6121_v42, %v1163_v57  ;;  %v1233_v37 = vmul.f32 %v6142_v49, %v1165_v22 }
  0xb0   : > { %v6299_v24 = vadd.f32 %v1658_v11, %v1622_v39  ;;  %11115 = vst [vmem:[#allocation35_spill] sm:$0xff] %v6306_v44  ;;  %v6318_v39 = vmul.f32 %v6244_v51, %v6249_v4  ;;  %v810_v11 = vadd.f32 %v6094_v32, %v809_v1  ;;  %v6330_v44 = vld [vmem:[%s10806_s7 + $0x7] ss:$0 sm:$0xff]  ;;  %v764_v1 = vpop.f32.mrf.mxu0  ;;  %v6341_v35 = vadd.f32 %v2482_v45, %v2448_v54  ;;  %v6348_v56 = vpop.permute.xlu1 %1446 }
  0xb1   : > { %v3507_v60 = vmul.f32 %v3409_v0, %v6078_v28  ;;  %v6339_v0 = vpop.permute.xlu2 %1496  ;;  %v6343_v10 = vadd.f32 %v2749_v29, %v2715_v40  ;;  %v2219_v26 = vmul.f32 %v6154_v53, %v1163_v57  ;;  %v2253_v61 = vmul.f32 %v6170_v59, %v1165_v22  ;;  %11118 = vst [vmem:[#allocation38_spill] sm:$0xff] %v6348_v56  ;;  %v6350_v3 = vpop.permute.xlu0 %1441 }
  0xb2   : > { %11117 = vst [vmem:[#allocation37_spill] sm:$0xff] %v6339_v0  ;;  %v765_v42 = vadd.f32 %v6094_v32, %v764_v1  ;;  %v6355_v0 = vmul.f32 %v6116_v41, %v6207_v13  ;;  %v6358_v54 = vmul.f32 %v6137_v48, %v963_v62  ;;  %v6366_v45 = vadd.f32 %v1233_v37, %v1197_v30 }
  0xb3   : > { %882 = vst.msk [vmem:[#allocation2 + $0xa8] sm:$0xff] %vm851_vm1, %v810_v11  ;;  %v6360_v40 = vadd.f32 %v3507_v60, %v3343_v33  ;;  %v6370_v57 = vmul.f32 %v6165_v58, %v6207_v13  ;;  %v6373_v11 = vmul.f32 %v6177_v63, %v963_v62  ;;  %v6375_v1 = vadd.f32 %v2253_v61, %v2219_v26  ;;  %v958_v33 = vld [vmem:[%s10803_s4 + $0xf0] sm:$0xff]  ;;  %v957_v61 = vld [vmem:[%s10803_s4 + $0xe8] sm:$0xff]  ;;  %v6398_v26 = vld [vmem:[%s10809_s10] ss:$0 sm:$0xff] }
  0xb4   : > { %11119 = vst [vmem:[#allocation39_spill] sm:$0xff] %v6350_v3  ;;  %v6362_v29 = vld [vmem:[#allocation2 + $0x28] sm:$0xff] }
  0xb5   : > { %11120 = vst [vmem:[#allocation40_spill] sm:$0xff] %v6360_v40  ;;  %v6364_v22 = vld [vmem:[#allocation2 + $0x27] sm:$0xff]  ;;  %v1098_v60 = vmul.f32 %v6325_v21, %v6362_v29  ;;  %v2152_v13 = vmul.f32 %v6330_v44, %v6362_v29  ;;  %v6402_v37 = vmul.f32 %v6127_v46, %v6362_v29  ;;  %v2750_v56 = vmul.f32 %v6149_v52, %v6362_v29 }
  0xb6   : > { %11121 = vst [vmem:[#allocation41_spill] sm:$0xff] %v6362_v29  ;;  %v1300_v30 = vmul.f32 %v6314_v16, %v6364_v22  ;;  %v2318_v62 = vmul.f32 %v6335_v50, %v6364_v22  ;;  %v2814_v3 = vmul.f32 %v6263_v17, %v6362_v29  ;;  %v1032_v40 = vmul.f32 %v6137_v48, %v6362_v29  ;;  %v812_v36 = vpop.f32.mrf.mxu2 }
  0xb7   : > { %11122 = vst [vmem:[#allocation42_spill] sm:$0xff] %v6364_v22  ;;  %v1130_v53 = vadd.f32 %v1098_v60, %v6209_v14  ;;  %v2184_v41 = vadd.f32 %v2152_v13, %v6251_v5  ;;  %1942 = vperm.xlu2 %5301, %v958_v33   ;;  %v1234_v48 = vmul.f32 %v6142_v49, %v6364_v22  ;;  %v6506_v49 = vld [vmem:[%s10810_s11] ss:$0 sm:$0xff] }
  0xb8   : > { %11123 = vst [vmem:[#allocation43_spill] sm:$0xff] %v6373_v11  ;;  %v1332_v58 = vadd.f32 %v1300_v30, %v6211_v15  ;;  %v2846_v28 = vadd.f32 %v2814_v3, %v6258_v8  ;;  %v6419_v11 = vadd.f32 %v1032_v40, %v6272_v23  ;;  %1937 = vperm.xlu1 %5300, %v957_v61   ;;  %v6427_v15 = vld [vmem:[%s10804_s5 + $0x8] ss:$0 sm:$0xff] }
  0xb9   : > { %11124 = vst [vmem:[#allocation44_spill] sm:$0xff] %v6375_v1  ;;  %v2350_v1 = vadd.f32 %v2318_v62, %v6253_v6  ;;  %v813_v14 = vadd.f32 %v6094_v32, %v812_v36  ;;  %v767_v36 = vpop.f32.mrf.mxu0  ;;  %v6442_v40 = vadd.f32 %v1234_v48, %v6275_v18  ;;  %v2088_v33 = vmul.f32 %v6177_v63, %v6362_v29  ;;  %v6455_v30 = vpop.permute.xlu0 %1456  ;;  %v6501_v63 = vld [vmem:[%s10810_s11 + $0x1] ss:$0 sm:$0xff] }
  0xba   : > { %867 = vst.msk [vmem:[#allocation2 + $0x30] sm:$0xff] %vm851_vm1, %v765_v42  ;;  %v956_v42 = vld [vmem:[%s10803_s4 + $0xe0] sm:$0xff]  ;;  %v1524_v3 = vmul.f32 %v6059_v20, %v1332_v58  ;;  %v6436_v6 = vld [vmem:[#allocation2 + $0xa8] sm:$0xff]  ;;  %v2882_v23 = vadd.f32 %v6398_v26, %v2846_v28  ;;  %v2254_v60 = vmul.f32 %v6170_v59, %v6364_v22  ;;  %v768_v18 = vadd.f32 %v6094_v32, %v767_v36 }
  0xbb   : > { %11125 = vst [vmem:[#allocation45_spill] sm:$0xff] %v6398_v26  ;;  %1932 = vperm.xlu0 %5299, %v956_v42   ;;  %v2382_v5 = vmul.f32 %v2350_v1, %v6059_v20  ;;  %v3392_v8 = vld [vmem:[#allocation2 + $0xa7] sm:$0xff]  ;;  %v6450_v58 = vmul.f32 %v6127_v46, %v6436_v6  ;;  %v6453_v1 = vpop.permute.xlu1 %1461  ;;  %v3360_v28 = vmul.f32 %v6182_v2, %v6436_v6 }
  0xbc   : > { %11126 = vst [vmem:[#allocation46_spill] sm:$0xff] %v6402_v37  ;;  %v6415_v37 = vadd.f32 %v2750_v56, %v6256_v7  ;;  %v6432_v56 = vld [vmem:[%s10806_s7 + $0x8] ss:$0 sm:$0xff]  ;;  %v6438_v7 = vpop.permute.xlu2 %1511  ;;  %v3426_v48 = vmul.f32 %v6132_v47, %v3392_v8  ;;  %v1556_v62 = vadd.f32 %v1524_v3, %v1130_v53 }
  0xbd   : > { %11127 = vst [vmem:[#allocation47_spill] sm:$0xff] %v6436_v6  ;;  %v2414_v42 = vadd.f32 %v2382_v5, %v2184_v41  ;;  %v959_v5 = vld [vmem:[%s10803_s4 + $0xf8] sm:$0xff] }
  0xbe   : > { %11128 = vst [vmem:[#allocation48_spill] sm:$0xff] %v6438_v7  ;;  %v1624_v7 = vmul.f32 %v6199_v9, %v6249_v4  ;;  %v3524_v8 = vmul.f32 %v3426_v48, %v6455_v30  ;;  %v815_v59 = vpop.f32.mrf.mxu2 }
  0xbf   : > { %11129 = vst [vmem:[#allocation49_spill] sm:$0xff] %v6450_v58  ;;  %v6471_v58 = vadd.f32 %v2088_v33, %v6278_v25  ;;  %v6491_v33 = vadd.f32 %v2254_v60, %v6292_v34 }
  0xc0   : > { %883 = vst.msk [vmem:[#allocation2 + $0xb0] sm:$0xff] %vm851_vm1, %v813_v14  ;;  %v6493_v48 = vadd.f32 %v3524_v8, %v3360_v28 }
  0xc1   : > { %11130 = vst [vmem:[#allocation50_spill] sm:$0xff] %v6453_v1  ;;  %v6461_v13 = vld [vmem:[#allocation2 + $0x30] sm:$0xff] }
  0xc2   : > { %11131 = vst [vmem:[#allocation51_spill] sm:$0xff] %v6455_v30  ;;  %v6463_v61 = vld [vmem:[#allocation2 + $0x29] sm:$0xff]  ;;  %v2815_v3 = vmul.f32 %v6263_v17, %v6461_v13  ;;  %v3345_v25 = vmul.f32 %v6182_v2, %v6461_v13  ;;  %v2751_v8 = vmul.f32 %v6149_v52, %v6461_v13 }
  0xc3   : > { %11132 = vst [vmem:[#allocation52_spill] sm:$0xff] %v6463_v61  ;;  %v6466_v14 = vld [vmem:[#allocation2 + $0x2f] sm:$0xff]  ;;  %v1726_v53 = vmul.f32 %v6427_v15, %v6463_v61  ;;  %v2548_v41 = vmul.f32 %v6432_v56, %v6463_v61  ;;  %1947 = vperm.xlu0 %5299, %v959_v5  }
  0xc4   : > { %2914 = vst.msk [vmem:[#allocation3 + $0x18] sm:$0xff] %vm851_vm1, %v2882_v23  ;;  %v3411_v36 = vmul.f32 %v6132_v47, %v6466_v14  ;;  %v1660_v23 = vmul.f32 %v6223_v31, %v6463_v61  ;;  %v2847_v6 = vadd.f32 %v2815_v3, %v6343_v10  ;;  %v2484_v10 = vmul.f32 %v6230_v38, %v6463_v61  ;;  %v6525_v3 = vpop.permute.xlu2 %1792 }
  0xc5   : > { %868 = vst.msk [vmem:[#allocation2 + $0x38] sm:$0xff] %vm851_vm1, %v768_v18  ;;  %v1758_v18 = vadd.f32 %v1726_v53, %v6299_v24  ;;  %v2580_v30 = vadd.f32 %v2548_v41, %v6341_v35  ;;  %v2450_v24 = vmul.f32 %v6205_v12, %v6249_v4  ;;  %v816_v35 = vadd.f32 %v6094_v32, %v815_v59  ;;  %v770_v4 = vpop.f32.mrf.mxu0 }
  0xc6   : > { %11133 = vst [vmem:[#allocation53_spill] sm:$0xff] %v6493_v48  ;;  %v3509_v34 = vmul.f32 %v3411_v36, %v6076_v27  ;;  %v6509_v60 = vadd.f32 %v1660_v23, %v1624_v7  ;;  %v2883_v28 = vadd.f32 %v6398_v26, %v2847_v6  ;;  %v6521_v53 = vmul.f32 %v6182_v2, %v6362_v29  ;;  %v6545_v48 = vpop.permute.xlu1 %1476 }
  0xc7   : > { %11134 = vst [vmem:[#allocation54_spill] sm:$0xff] %v6501_v63  ;;  %v6523_v7 = vld [vmem:[#allocation2 + $0xb0] sm:$0xff]  ;;  %v6529_v5 = vadd.f32 %v2484_v10, %v2450_v24  ;;  %v6533_v59 = vmul.f32 %v6132_v47, %v6364_v22  ;;  %v6537_v6 = vadd.f32 %v6358_v54, %v6355_v0  ;;  %v6547_v22 = vpop.permute.xlu0 %1471  ;;  %v6552_v0 = vld [vmem:[%s10807_s8] ss:$0 sm:$0xff] }
  0xc8   : > { %11135 = vst [vmem:[#allocation55_spill] sm:$0xff] %v6506_v49  ;;  %v3393_v41 = vld [vmem:[#allocation2 + $0xaf] sm:$0xff]  ;;  %v6527_v36 = vadd.f32 %v3509_v34, %v3345_v25  ;;  %v3361_v23 = vmul.f32 %v6182_v2, %v6523_v7  ;;  %v1950_v25 = vmul.f32 %v6525_v3, %v1758_v18  ;;  %v2612_v34 = vmul.f32 %v2580_v30, %v6525_v3  ;;  %v6557_v54 = vld [vmem:[%s10813_s14] ss:$0 sm:$0xff] }
  0xc9   : > { %11136 = vst [vmem:[#allocation56_spill] sm:$0xff] %v6523_v7  ;;  %v3427_v27 = vmul.f32 %v6132_v47, %v3393_v41  ;;  %v771_v41 = vadd.f32 %v6094_v32, %v770_v4 }
  0xca   : > { %884 = vst.msk [vmem:[#allocation2 + $0xb8] sm:$0xff] %vm851_vm1, %v816_v35  ;;  %v3570_v35 = vmul.f32 %v6318_v39, %v6525_v3  ;;  %v6570_v29 = vadd.f32 %v1950_v25, %v1556_v62  ;;  %v2644_v38 = vadd.f32 %v2612_v34, %v2414_v42 }
  0xcb   : > { %v2946_v24 = vld [vmem:[#allocation3 + $0x18] sm:$0xff]  ;;  %11137 = vst [vmem:[#allocation57_spill] sm:$0xff] %v6545_v48  ;;  %v3525_v7 = vmul.f32 %v3427_v27, %v6453_v1 }
  0xcc   : > { %v3012_v10 = vld [vmem:[#allocation3 + $0x17] sm:$0xff]  ;;  %11138 = vst [vmem:[#allocation58_spill] sm:$0xff] %v6547_v22  ;;  %v2980_v30 = vmul.f32 %v6501_v63, %v2946_v24  ;;  %v6565_v48 = vld [vmem:[#allocation2 + $0x31] sm:$0xff]  ;;  %v3602_v39 = vadd.f32 %v3570_v35, %v6301_v43  ;;  %v2680_v42 = vadd.f32 %v6552_v0, %v2644_v38  ;;  %v6593_v43 = vld [vmem:[%s10810_s11 + $0x2] ss:$0 sm:$0xff]  ;;  %v818_v35 = vpop.f32.mrf.mxu2  ;;  %v6602_v1 = vpop.permute.xlu2 %1807 }
  0xcd   : > { %11139 = vst [vmem:[#allocation59_spill] sm:$0xff] %v6552_v0  ;;  %v3046_v18 = vmul.f32 %v6506_v49, %v3012_v10  ;;  %v6567_v22 = vld [vmem:[#allocation2 + $0x37] sm:$0xff]  ;;  %v6583_v62 = vadd.f32 %v3525_v7, %v3361_v23  ;;  %v819_v38 = vadd.f32 %v6094_v32, %v818_v35  ;;  %v773_v0 = vpop.f32.mrf.mxu0 }
  0xce   : > { %2915 = vst.msk [vmem:[#allocation3 + $0x20] sm:$0xff] %vm851_vm1, %v2883_v28  ;;  %v3477_v28 = vmul.f32 %v6244_v51, %v6565_v48  ;;  %v6574_v24 = vld [vmem:[#allocation2 + $0x38] sm:$0xff]  ;;  %v1302_v27 = vmul.f32 %v6314_v16, %v6567_v22  ;;  %vm4068_vm2 = vcmp.ge.f32.partialorder %v2680_v42, 0.0 }
  0xcf   : > { %11140 = vst [vmem:[#allocation60_spill] sm:$0xff] %v6567_v22  ;;  %v3144_v10 = vmul.f32 %v3046_v18, %v6059_v20  ;;  %v1100_v4 = vmul.f32 %v6325_v21, %v6574_v24  ;;  %v2154_v25 = vmul.f32 %v6330_v44, %v6574_v24  ;;  %v2320_v20 = vmul.f32 %v6335_v50, %v6567_v22 }
  0xd0   : > { %11141 = vst [vmem:[#allocation61_spill] sm:$0xff] %v6570_v29  ;;  %v3638_v18 = vadd.f32 %v6557_v54, %v3602_v39  ;;  %v1334_v23 = vadd.f32 %v1302_v27, %v6442_v40  ;;  %v2783_v40 = vadd.f32 %v2751_v8, %v6309_v55  ;;  %v6617_v27 = vpop.permute.xlu1 %1491 }
  0xd1   : > { %869 = vst.msk [vmem:[#allocation2 + $0x40] sm:$0xff] %vm851_vm1, %v771_v41  ;;  %v3176_v34 = vadd.f32 %v3144_v10, %v2980_v30  ;;  %v1132_v7 = vadd.f32 %v1100_v4, %v6419_v11  ;;  %v4100_v41 = vmul.f32 0.25, %v2680_v42  ;;  %v2186_v29 = vadd.f32 %v2154_v25, %v6471_v58  ;;  %v6619_v25 = vpop.permute.xlu0 %1486 }
  0xd2   : > { %11142 = vst [vmem:[#allocation62_spill] sm:$0xff] %v6583_v62  ;;  %v6600_v62 = vld [vmem:[#allocation2 + $0xb8] sm:$0xff]  ;;  %v1526_v30 = vmul.f32 %v6057_v19, %v1334_v23  ;;  %v2352_v10 = vadd.f32 %v2320_v20, %v6491_v33  ;;  %v6608_v11 = vmul.f32 %v6149_v52, %v6574_v24  ;;  %v3573_v4 = vmul.f32 %v3477_v28, %v6602_v1 }
  0xd3   : > { %11143 = vst [vmem:[#allocation63_spill] sm:$0xff] %v6593_v43  ;;  %v6613_v39 = vmul.f32 %v6149_v52, %v6600_v62  ;;  %v774_v33 = vadd.f32 %v6094_v32, %v773_v0  ;;  %v4132_v20 = vsel %vm4068_vm2, %v2680_v42, %v4100_v41  ;;  %v2816_v28 = vmul.f32 %v6263_v17, %v6574_v24 }
  0xd4   : > { %11144 = vst [vmem:[#allocation64_spill] sm:$0xff] %v6600_v62  ;;  %4196 = vrot.lane.b32.xlu2 %v4132_v20, %s5719_s27  ;;  %v6627_v8 = vadd.f32 %v1526_v30, %v1132_v7  ;;  %v2384_v23 = vmul.f32 %v2352_v10, %v6057_v19  ;;  %v3605_v0 = vadd.f32 %v3573_v4, %v6527_v36  ;;  %v6650_v36 = vld [vmem:[%s10811_s12] ss:$0 sm:$0xff] }
  0xd5   : > { %11145 = vst [vmem:[#allocation65_spill] sm:$0xff] %v6602_v1  ;;  %v3078_v58 = vld [vmem:[#allocation3 + $0x19] sm:$0xff]  ;;  %v6640_v41 = vmul.f32 %v6244_v51, %v6463_v61  ;;  %v3508_v7 = vmul.f32 %v6533_v59, %v6057_v19  ;;  %v1099_v30 = vmul.f32 %v6325_v21, %v6461_v13  ;;  %v2848_v20 = vadd.f32 %v2816_v28, %v6415_v37 }
  0xd6   : > { %11146 = vst [vmem:[#allocation66_spill] sm:$0xff] %v6613_v39  ;;  %v6623_v35 = vld [vmem:[#allocation3 + $0x1f] sm:$0xff]  ;;  %v3112_v55 = vmul.f32 %v6593_v43, %v3078_v58  ;;  %v6654_v4 = vadd.f32 %v2384_v23, %v2186_v29  ;;  %v6660_v59 = vadd.f32 %v6557_v54, %v3605_v0  ;;  %v821_v29 = vpop.f32.mrf.mxu2  ;;  %v1301_v37 = vmul.f32 %v6314_v16, %v6466_v14 }
  0xd7   : > { %885 = vst.msk [vmem:[#allocation2 + $0xc0] sm:$0xff] %vm851_vm1, %v819_v38  ;;  %v822_v0 = vadd.f32 %v6094_v32, %v821_v29  ;;  %v2884_v39 = vadd.f32 %v6398_v26, %v2848_v20 }
  0xd8   : > { %11147 = vst [vmem:[#allocation67_spill] sm:$0xff] %v6617_v27  ;;  %v6632_v38 = vld [vmem:[#allocation2 + $0x40] sm:$0xff]  ;;  %v3208_v10 = vmul.f32 %v3112_v55, %v6525_v3  ;;  %v6666_v55 = vadd.f32 %v3508_v7, %v6521_v53  ;;  %v1589_v27 = vld [vmem:[#allocation2 + $0x11] sm:$0xff] }
  0xd9   : > { %11148 = vst [vmem:[#allocation68_spill] sm:$0xff] %v6619_v25  ;;  %v6636_v42 = vld [vmem:[#allocation2 + $0x39] sm:$0xff]  ;;  %v2817_v3 = vmul.f32 %v6263_v17, %v6632_v38  ;;  %v1591_v53 = vld [vmem:[#allocation2 + $0x21] sm:$0xff]  ;;  %v1623_v7 = vmul.f32 %v6199_v9, %v1589_v27 }
  0xda   : > { %870 = vst.msk [vmem:[#allocation2 + $0x48] sm:$0xff] %vm851_vm1, %v774_v33  ;;  %v1728_v58 = vmul.f32 %v6427_v15, %v6636_v42  ;;  %v2550_v33 = vmul.f32 %v6432_v56, %v6636_v42  ;;  %v3240_v25 = vadd.f32 %v3208_v10, %v3176_v34  ;;  %v776_v34 = vpop.f32.mrf.mxu0  ;;  %v6693_v10 = vpop.permute.xlu0 %1501 }
  0xdb   : > { %11149 = vst [vmem:[#allocation69_spill] sm:$0xff] %v6636_v42 }
  0xdc   : > { %11150 = vst [vmem:[#allocation70_spill] sm:$0xff] %v6650_v36  ;;  %v6669_v23 = vadd.f32 %v1728_v58, %v6509_v60  ;;  %v6672_v1 = vadd.f32 %v2550_v33, %v6529_v5  ;;  %v3276_v60 = vadd.f32 %v6650_v36, %v3240_v25  ;;  %v1659_v5 = vmul.f32 %v6223_v31, %v1591_v53  ;;  %v11160_v36 = vld [vmem:[#allocation30_spill] sm:$0xff] }
  0xdd   : > { %3670 = vst.msk [vmem:[#allocation3 + $0x18] sm:$0xff] %vm851_vm1, %v3638_v18  ;;  %v1131_v18 = vadd.f32 %v1099_v30, %v6537_v6  ;;  %v1727_v6 = vmul.f32 %v6427_v15, %v6565_v48  ;;  %v6691_v30 = vpop.permute.xlu1 %1506  ;;  %v777_v58 = vadd.f32 %v6094_v32, %v776_v34  ;;  %v1333_v33 = vadd.f32 %v1301_v37, %v6366_v45  ;;  %v11158_v45 = vld [vmem:[#allocation11_spill] sm:$0xff] }
  0xde   : > { %11151 = vst [vmem:[#allocation71_spill] sm:$0xff] %v6660_v59  ;;  %v2849_v59 = vadd.f32 %v2817_v3, %v2783_v40  ;;  %v6679_v28 = vld [vmem:[#allocation2 + $0xc0] sm:$0xff]  ;;  %vm4325_vm3 = vcmp.ge.f32.partialorder %v3276_v60, 0.0  ;;  %v4357_v29 = vmul.f32 0.25, %v3276_v60  ;;  %v2153_v34 = vmul.f32 %v6330_v44, %v6461_v13 }
  0xdf   : > { %11152 = vst [vmem:[#allocation72_spill] sm:$0xff] %v6679_v28  ;;  %v6688_v40 = vmul.f32 %v6127_v46, %v6679_v28  ;;  %v1525_v37 = vmul.f32 %v11158_v45, %v1333_v33  ;;  %v2947_v28 = vld [vmem:[#allocation3 + $0x20] sm:$0xff]  ;;  %v2483_v42 = vmul.f32 %v11160_v36, %v1591_v53 }
  0xe0   : > { %886 = vst.msk [vmem:[#allocation2 + $0xc8] sm:$0xff] %vm851_vm1, %v822_v0  ;;  %v2885_v25 = vadd.f32 %v6398_v26, %v2849_v59  ;;  %v11157_v0 = vld [vmem:[#allocation43_spill] sm:$0xff]  ;;  %v4389_v62 = vsel %vm4325_vm3, %v3276_v60, %v4357_v29  ;;  %v824_v60 = vpop.f32.mrf.mxu2  ;;  %v11161_v29 = vld [vmem:[#allocation44_spill] sm:$0xff] }
  0xe1   : > { %11153 = vst [vmem:[#allocation73_spill] sm:$0xff] %v6688_v40  ;;  %v6698_v3 = vld [vmem:[#allocation2 + $0x48] sm:$0xff]  ;;  %v1691_v40 = vadd.f32 %v1659_v5, %v1623_v7  ;;  %v2449_v7 = vmul.f32 %v6205_v12, %v1589_v27  ;;  %4453 = vrot.lane.b32.xlu0 %v4389_v62, %s5720_s21  ;;  %v3047_v27 = vmul.f32 %v6506_v49, %v6623_v35 }
  0xe2   : > { %11154 = vst [vmem:[#allocation74_spill] sm:$0xff] %v6691_v30  ;;  %v6700_v20 = vld [vmem:[#allocation2 + $0x47] sm:$0xff]  ;;  %v2119_v30 = vadd.f32 %v11157_v0, %v6370_v57  ;;  %v2319_v57 = vmul.f32 %v6335_v50, %v6466_v14 }
  0xe3   : > { %11155 = vst [vmem:[#allocation75_spill] sm:$0xff] %v6693_v10  ;;  %v3348_v10 = vmul.f32 %v6182_v2, %v6698_v3  ;;  %v3414_v59 = vmul.f32 %v6132_v47, %v6700_v20  ;;  %v11159_v5 = vld [vmem:[#allocation14_spill] sm:$0xff]  ;;  %v2515_v62 = vadd.f32 %v2483_v42, %v2449_v7  ;;  %v6745_v42 = vpop.permute.xlu0 %1516 }
  0xe4   : > { %11156 = vst [vmem:[#allocation76_spill] sm:$0xff] %v6700_v20  ;;  %v2185_v33 = vadd.f32 %v2153_v34, %v2119_v30  ;;  %v779_v30 = vpop.f32.mrf.mxu0  ;;  %v3145_v34 = vmul.f32 %v3047_v27, %v11158_v45  ;;  %v6740_v20 = vld [vmem:[#allocation2 + $0x3f] sm:$0xff]  ;;  %v11168_v27 = vld [vmem:[#allocation18_spill] sm:$0xff] }
  0xe5   : > { %2916 = vst.msk [vmem:[#allocation3 + $0x28] sm:$0xff] %vm851_vm1, %v2884_v39  ;;  %v6714_v39 = vadd.f32 %v1727_v6, %v1691_v40  ;;  %v3512_v0 = vmul.f32 %v3414_v59, %v11159_v5  ;;  %v2549_v6 = vmul.f32 %v6432_v56, %v6565_v48  ;;  %v2981_v40 = vmul.f32 %v6501_v63, %v2947_v28  ;;  %v11163_v28 = vld [vmem:[#allocation17_spill] sm:$0xff]  ;;  %v6743_v35 = vpop.permute.xlu1 %1521 }
  0xe6   : > { %871 = vst.msk [vmem:[#allocation2 + $0x50] sm:$0xff] %vm851_vm1, %v777_v58  ;;  %v6721_v58 = vadd.f32 %v1525_v37, %v1131_v18  ;;  %v825_v5 = vadd.f32 %v6094_v32, %v824_v60  ;;  %v6732_v18 = vmul.f32 %v6244_v51, %v1591_v53  ;;  %v1035_v61 = vmul.f32 %v11163_v28, %v6632_v38  ;;  %v11167_v60 = vld [vmem:[#allocation16_spill] sm:$0xff] }
  0xe7   : > { %2917 = vst.msk [vmem:[#allocation3 + $0x30] sm:$0xff] %vm851_vm1, %v2885_v25  ;;  %v2351_v25 = vadd.f32 %v2319_v57, %v11161_v29  ;;  %v3544_v59 = vadd.f32 %v3512_v0, %v3348_v10  ;;  %v11162_v57 = vld [vmem:[#allocation15_spill] sm:$0xff]  ;;  %v780_v53 = vadd.f32 %v6094_v32, %v779_v30  ;;  %v2581_v0 = vadd.f32 %v2549_v6, %v2515_v62 }
  0xe8   : > { %v999_v29 = vmul.f32 %v11162_v57, %v6461_v13  ;;  %11164 = vst [vmem:[#allocation43_spill] sm:$0xff] %v6740_v20  ;;  %v1237_v22 = vmul.f32 %v11168_v27, %v6740_v20  ;;  %v3177_v27 = vadd.f32 %v3145_v34, %v2981_v40  ;;  %v827_v34 = vpop.f32.mrf.mxu2 }
  0xe9   : > { %v2383_v37 = vmul.f32 %v2351_v25, %v11158_v45  ;;  %887 = vst.msk [vmem:[#allocation2 + $0xd0] sm:$0xff] %vm851_vm1, %v825_v5  ;;  %v1201_v25 = vmul.f32 %v11167_v60, %v6466_v14 }
  0xea   : > { %11165 = vst [vmem:[#allocation11_spill] sm:$0xff] %v6743_v35  ;;  %v1067_v60 = vadd.f32 %v1035_v61, %v999_v29  ;;  %v1627_v61 = vmul.f32 %v6199_v9, %v6565_v48 }
  0xeb   : > { %11166 = vst [vmem:[#allocation30_spill] sm:$0xff] %v6745_v42  ;;  %v2415_v57 = vadd.f32 %v2383_v37, %v2185_v33 }
  0xec   : > { %v2948_v10 = vld [vmem:[#allocation3 + $0x28] sm:$0xff]  ;;  %872 = vst.msk [vmem:[#allocation2 + $0x58] sm:$0xff] %vm851_vm1, %v780_v53 }
  0xed   : > { %v3014_v7 = vld [vmem:[#allocation3 + $0x27] sm:$0xff]  ;;  %v6752_v28 = vld [vmem:[#allocation2 + $0x49] sm:$0xff]  ;;  %v2982_v5 = vmul.f32 %v6501_v63, %v2948_v10  ;;  %v6766_v63 = vpop.permute.xlu2 %1822 }
  0xee   : > { %v3079_v45 = vld [vmem:[#allocation3 + $0x21] sm:$0xff]  ;;  %11169 = vst [vmem:[#allocation44_spill] sm:$0xff] %v6752_v28  ;;  %v3048_v35 = vmul.f32 %v6506_v49, %v3014_v7  ;;  %v3480_v6 = vmul.f32 %v6244_v51, %v6752_v28  ;;  %v3080_v62 = vld [vmem:[#allocation3 + $0x29] sm:$0xff]  ;;  %v1269_v7 = vadd.f32 %v1237_v22, %v1201_v25  ;;  %v6772_v49 = vld [vmem:[#allocation2 + $0x41] sm:$0xff] }
  0xef   : > { %v3113_v42 = vmul.f32 %v6593_v43, %v3079_v45  ;;  %v6757_v30 = vld [vmem:[#allocation2 + $0x50] sm:$0xff]  ;;  %11171 = vst [vmem:[#allocation78_spill] sm:$0xff] %v6766_v63  ;;  %v3114_v33 = vmul.f32 %v6593_v43, %v3080_v62  ;;  %v1663_v40 = vmul.f32 %v6223_v31, %v6772_v49 }
  0xf0   : > { %v6759_v26 = vld [vmem:[#allocation2 + $0x4f] sm:$0xff]  ;;  %v1103_v10 = vmul.f32 %v6325_v21, %v6757_v30  ;;  %v3146_v37 = vmul.f32 %v3048_v35, %v6057_v19  ;;  %11172 = vst [vmem:[#allocation79_spill] sm:$0xff] %v6772_v49  ;;  %v3576_v53 = vmul.f32 %v3480_v6, %v6766_v63  ;;  %v11174_v35 = vld [vmem:[#allocation25_spill] sm:$0xff] }
  0xf1   : > { %11170 = vst [vmem:[#allocation77_spill] sm:$0xff] %v6759_v26  ;;  %v1305_v45 = vmul.f32 %v6314_v16, %v6759_v26  ;;  %v11173_v19 = vld [vmem:[#allocation23_spill] sm:$0xff]  ;;  %v2091_v25 = vmul.f32 %v11174_v35, %v6632_v38  ;;  %v828_v16 = vadd.f32 %v6094_v32, %v827_v34  ;;  %v1695_v6 = vadd.f32 %v1663_v40, %v1627_v61  ;;  %v11175_v63 = vld [vmem:[#allocation6_spill] sm:$0xff] }
  0xf2   : > { %v1135_v28 = vadd.f32 %v1103_v10, %v1067_v60  ;;  %v3178_v29 = vadd.f32 %v3146_v37, %v2982_v5  ;;  %v2057_v22 = vmul.f32 %v11173_v19, %v6461_v13  ;;  %v3608_v43 = vadd.f32 %v3576_v53, %v3544_v59  ;;  %v782_v10 = vpop.f32.mrf.mxu0  ;;  %v11176_v5 = vld [vmem:[#allocation20_spill] sm:$0xff]  ;;  %v1803_v59 = vpop.permute.xlu1 %1802 }
  0xf3   : > { %v1337_v62 = vadd.f32 %v1305_v45, %v1269_v7  ;;  %v2157_v60 = vmul.f32 %v6330_v44, %v6757_v30  ;;  %v2223_v37 = vmul.f32 %v11176_v5, %v6466_v14  ;;  %v11177_v7 = vld [vmem:[#allocation24_spill] sm:$0xff]  ;;  %888 = vst.msk [vmem:[#allocation2 + $0xd8] sm:$0xff] %vm851_vm1, %v828_v16  ;;  %v1798_v53 = vpop.permute.xlu0 %1797  ;;  %v783_v61 = vadd.f32 %v6094_v32, %v782_v10 }
  0xf4   : > { %v2123_v31 = vadd.f32 %v2091_v25, %v2057_v22  ;;  %v2257_v45 = vmul.f32 %v11177_v7, %v6740_v20  ;;  %v6792_v19 = vadd.f32 %v6557_v54, %v3608_v43  ;;  %v2323_v40 = vmul.f32 %v6335_v50, %v6759_v26 }
  0xf5   : > { %v1529_v9 = vmul.f32 %v11175_v63, %v1337_v62  ;;  %v2453_v34 = vmul.f32 %v6205_v12, %v6565_v48  ;;  %v6800_v62 = vld [vmem:[#allocation2 + $0x58] sm:$0xff]  ;;  %v1952_v14 = vmul.f32 %v1803_v59, %v6669_v23  ;;  %v2614_v22 = vmul.f32 %v6672_v1, %v1803_v59  ;;  %873 = vst.msk [vmem:[#allocation2 + $0x60] sm:$0xff] %vm851_vm1, %v783_v61 }
  0xf6   : > { %11178 = vst [vmem:[#allocation25_spill] sm:$0xff] %v6792_v19  ;;  %v3210_v43 = vmul.f32 %v3114_v33, %v1803_v59  ;;  %v3572_v25 = vmul.f32 %v6640_v41, %v1803_v59  ;;  %v6807_v16 = vmul.f32 %v6127_v46, %v6800_v62  ;;  %v1951_v10 = vmul.f32 %v1798_v53, %v6714_v39  ;;  %v6811_v48 = vld [vmem:[#allocation2 + $0x51] sm:$0xff] }
  0xf7   : > { %v2613_v19 = vmul.f32 %v2581_v0, %v1798_v53  ;;  %v3209_v26 = vmul.f32 %v3113_v42, %v1798_v53  ;;  %v6814_v12 = vadd.f32 %v1952_v14, %v6627_v8  ;;  %v6817_v1 = vadd.f32 %v2614_v22, %v6654_v4  ;;  %v830_v8 = vpop.f32.mrf.mxu2  ;;  %v11182_v14 = vld [vmem:[#allocation40_spill] sm:$0xff] }
  0xf8   : > { %v6819_v23 = vadd.f32 %v3210_v43, %v3178_v29  ;;  %v3604_v41 = vadd.f32 %v3572_v25, %v6666_v55  ;;  %v6823_v33 = vadd.f32 %v1951_v10, %v6721_v58  ;;  %v3571_v0 = vmul.f32 %v6732_v18, %v1798_v53  ;;  %v11184_v25 = vld [vmem:[#allocation46_spill] sm:$0xff] }
  0xf9   : > { %11179 = vst [vmem:[#allocation6_spill] sm:$0xff] %v6814_v12  ;;  %v6825_v39 = vadd.f32 %v2613_v19, %v2415_v57  ;;  %v6827_v42 = vadd.f32 %v3209_v26, %v3177_v27  ;;  %v1561_v61 = vadd.f32 %v1529_v9, %v1135_v28  ;;  %v1731_v4 = vmul.f32 %v6427_v15, %v6811_v48  ;;  %v6839_v57 = vpop.permute.xlu2 %1837 }
  0xfa   : > { %11180 = vst [vmem:[#allocation20_spill] sm:$0xff] %v6823_v33  ;;  %v6831_v59 = vadd.f32 %v6557_v54, %v3604_v41  ;;  %v2189_v29 = vadd.f32 %v2157_v60, %v2123_v31  ;;  %v3603_v55 = vadd.f32 %v3571_v0, %v11182_v14  ;;  %v831_v58 = vadd.f32 %v6094_v32, %v830_v8  ;;  %v6849_v32 = vpop.permute.xlu1 %1817  ;;  %v11186_v14 = vld [vmem:[#allocation22_spill] sm:$0xff] }
  0xfb   : > { %v2289_v22 = vadd.f32 %v2257_v45, %v2223_v37  ;;  %v2487_v26 = vmul.f32 %v11160_v36, %v6772_v49  ;;  %11183 = vst [vmem:[#allocation40_spill] sm:$0xff] %v6839_v57  ;;  %v1763_v18 = vadd.f32 %v1731_v4, %v1695_v6  ;;  %v2553_v27 = vmul.f32 %v6432_v56, %v6811_v48  ;;  %v1813_v12 = vpop.permute.xlu0 %1812 }
  0xfc   : > { %11181 = vst [vmem:[#allocation24_spill] sm:$0xff] %v6831_v59  ;;  %v2719_v9 = vmul.f32 %v6127_v46, %v6461_v13  ;;  %v2720_v31 = vmul.f32 %v6127_v46, %v6574_v24  ;;  %v3639_v28 = vadd.f32 %v6557_v54, %v3603_v55  ;;  %v6853_v6 = vmul.f32 %v6127_v46, %v6757_v30  ;;  %v6855_v37 = vld [vmem:[#allocation2 + $0x60] sm:$0xff] }
  0xfd   : > { %889 = vst.msk [vmem:[#allocation2 + $0xe0] sm:$0xff] %vm851_vm1, %v831_v58  ;;  %v2355_v19 = vadd.f32 %v2323_v40, %v2289_v22  ;;  %v2519_v60 = vadd.f32 %v2487_v26, %v2453_v34  ;;  %v6857_v45 = vld [vmem:[#allocation2 + $0x5f] sm:$0xff]  ;;  %v1955_v13 = vmul.f32 %v6849_v32, %v1763_v18  ;;  %v2753_v53 = vmul.f32 %v6149_v52, %v6632_v38 }
  0xfe   : > { %v2754_v43 = vmul.f32 %v6149_v52, %v6698_v3  ;;  %v2784_v40 = vadd.f32 %v6608_v11, %v11184_v25  ;;  %3671 = vst.msk [vmem:[#allocation3 + $0x20] sm:$0xff] %vm851_vm1, %v3639_v28  ;;  %v3351_v46 = vmul.f32 %v6182_v2, %v6855_v37  ;;  %v3417_v34 = vmul.f32 %v6132_v47, %v6857_v45 }
  0xff   : > { %v2387_v10 = vmul.f32 %v2355_v19, %v11175_v63  ;;  %v2585_v41 = vadd.f32 %v2553_v27, %v2519_v60  ;;  %v6872_v0 = vadd.f32 %v1955_v13, %v1561_v61  ;;  %v2785_v8 = vadd.f32 %v2753_v53, %v2719_v9  ;;  %v11188_v60 = vld [vmem:[#allocation45_spill] sm:$0xff] }
 0x100   : > { %v2786_v4 = vadd.f32 %v2754_v43, %v2720_v31  ;;  %v2818_v52 = vmul.f32 %v6263_v17, %v6698_v3  ;;  %v3515_v11 = vmul.f32 %v3417_v34, %v11186_v14  ;;  %v2819_v22 = vmul.f32 %v6263_v17, %v6757_v30  ;;  %v11189_v53 = vld [vmem:[#allocation41_spill] sm:$0xff]  ;;  %v11190_v43 = vld [vmem:[#allocation15_spill] sm:$0xff] }
 0x101   : > { %11185 = vst [vmem:[#allocation46_spill] sm:$0xff] %v6872_v0  ;;  %v2419_v55 = vadd.f32 %v2387_v10, %v2189_v29  ;;  %v2617_v58 = vmul.f32 %v2585_v41, %v6849_v32  ;;  %v2820_v26 = vmul.f32 %v6263_v17, %v6800_v62  ;;  %v3347_v61 = vmul.f32 %v6182_v2, %v6632_v38  ;;  %v6902_v41 = vpop.permute.xlu2 %1852  ;;  %v11201_v0 = vld [vmem:[#allocation69_spill] sm:$0xff] }
 0x102   : > { %v2850_v18 = vadd.f32 %v2818_v52, %v2784_v40  ;;  %v3413_v27 = vmul.f32 %v6132_v47, %v6740_v20  ;;  %v6886_v9 = vadd.f32 %v3515_v11, %v3351_v46  ;;  %v2851_v29 = vadd.f32 %v2819_v22, %v2785_v8  ;;  %v11191_v46 = vld [vmem:[#allocation17_spill] sm:$0xff]  ;;  %11192 = vst [vmem:[#allocation45_spill] sm:$0xff] %v6902_v41  ;;  %v11193_v52 = vld [vmem:[#allocation42_spill] sm:$0xff]  ;;  %v11194_v11 = vld [vmem:[#allocation16_spill] sm:$0xff]  ;;  %v7077_v41 = vpop.permute.xlu1 %1832 }
 0x103   : > { %v6888_v31 = vadd.f32 %v2617_v58, %v2419_v55  ;;  %v3479_v28 = vmul.f32 %v6244_v51, %v6772_v49  ;;  %v2852_v19 = vadd.f32 %v2820_v26, %v2786_v4  ;;  %v998_v25 = vmul.f32 %v11190_v43, %v11189_v53  ;;  %v11195_v58 = vld [vmem:[#allocation60_spill] sm:$0xff]  ;;  %v11196_v22 = vld [vmem:[#allocation18_spill] sm:$0xff]  ;;  %11228 = vst [vmem:[#allocation69_spill] sm:$0xff] %v7077_v41 }
 0x104   : > { %v2886_v13 = vadd.f32 %v11188_v60, %v2850_v18  ;;  %v3511_v17 = vmul.f32 %v3413_v27, %v11175_v63  ;;  %v2887_v40 = vadd.f32 %v11188_v60, %v2851_v29  ;;  %v1034_v34 = vmul.f32 %v11191_v46, %v6574_v24  ;;  %v11197_v27 = vld [vmem:[#allocation76_spill] sm:$0xff]  ;;  %v11200_v43 = vld [vmem:[#allocation26_spill] sm:$0xff] }
 0x105   : > { %11187 = vst [vmem:[#allocation80_spill] sm:$0xff] %v6888_v31  ;;  %v3575_v47 = vmul.f32 %v3479_v28, %v6849_v32  ;;  %v1102_v10 = vmul.f32 %v6325_v21, %v6698_v3  ;;  %v2888_v8 = vadd.f32 %v11188_v60, %v2852_v19  ;;  %v1200_v55 = vmul.f32 %v11194_v11, %v11193_v52  ;;  %v11198_v29 = vld [vmem:[#allocation36_spill] sm:$0xff] }
 0x106   : > { %2918 = vst.msk [vmem:[#allocation3 + $0x38] sm:$0xff] %vm851_vm1, %v2886_v13  ;;  %v3543_v4 = vadd.f32 %v3511_v17, %v3347_v61  ;;  %v1236_v26 = vmul.f32 %v11196_v22, %v11195_v58  ;;  %v1066_v18 = vadd.f32 %v1034_v34, %v998_v25  ;;  %v1304_v28 = vmul.f32 %v11198_v29, %v11197_v27  ;;  %v11199_v21 = vld [vmem:[#allocation52_spill] sm:$0xff]  ;;  %v11204_v22 = vld [vmem:[#allocation23_spill] sm:$0xff] }
 0x107   : > { %2919 = vst.msk [vmem:[#allocation3 + $0x40] sm:$0xff] %vm851_vm1, %v2887_v40  ;;  %v1626_v46 = vmul.f32 %v11200_v43, %v11199_v21  ;;  %v11202_v19 = vld [vmem:[#allocation28_spill] sm:$0xff]  ;;  %v2056_v40 = vmul.f32 %v11204_v22, %v11189_v53  ;;  %v2090_v29 = vmul.f32 %v11174_v35, %v6574_v24  ;;  %v2156_v43 = vmul.f32 %v6330_v44, %v6698_v3  ;;  %v11205_v35 = vld [vmem:[#allocation27_spill] sm:$0xff] }
 0x108   : > { %v1662_v14 = vmul.f32 %v11202_v19, %v11201_v0  ;;  %2920 = vst.msk [vmem:[#allocation3 + $0x48] sm:$0xff] %vm851_vm1, %v2888_v8  ;;  %v3607_v61 = vadd.f32 %v3575_v47, %v3543_v4  ;;  %v1268_v13 = vadd.f32 %v1236_v26, %v1200_v55  ;;  %v11203_v17 = vld [vmem:[#allocation44_spill] sm:$0xff]  ;;  %v1134_v25 = vadd.f32 %v1102_v10, %v1066_v18  ;;  %v11206_v26 = vld [vmem:[#allocation5_spill] sm:$0xff] }
 0x109   : > { %v1730_v11 = vmul.f32 %v6427_v15, %v11203_v17  ;;  %v2222_v47 = vmul.f32 %v11176_v5, %v11193_v52  ;;  %v2256_v4 = vmul.f32 %v11177_v7, %v11195_v58  ;;  %v2122_v53 = vadd.f32 %v2090_v29, %v2056_v40  ;;  %v11207_v40 = vld [vmem:[#allocation54_spill] sm:$0xff] }
 0x10a   : > { %v1694_v34 = vadd.f32 %v1662_v14, %v1626_v46  ;;  %v3643_v19 = vadd.f32 %v6557_v54, %v3607_v61  ;;  %v1336_v8 = vadd.f32 %v1304_v28, %v1268_v13  ;;  %v2322_v14 = vmul.f32 %v6335_v50, %v11197_v27  ;;  %v6945_v50 = vld [vmem:[%s10812_s13] ss:$0 sm:$0xff] }
 0x10b   : > { %v2452_v10 = vmul.f32 %v11205_v35, %v11199_v21  ;;  %v2288_v18 = vadd.f32 %v2256_v4, %v2222_v47  ;;  %v2486_v28 = vmul.f32 %v11160_v36, %v11201_v0  ;;  %v2552_v5 = vmul.f32 %v6432_v56, %v11203_v17 }
 0x10c   : > { %v1762_v55 = vadd.f32 %v1730_v11, %v1694_v34  ;;  %v1528_v44 = vmul.f32 %v11206_v26, %v1336_v8  ;;  %v2188_v46 = vadd.f32 %v2156_v43, %v2122_v53  ;;  %v3346_v13 = vmul.f32 %v6182_v2, %v6574_v24  ;;  %v11208_v8 = vld [vmem:[#allocation55_spill] sm:$0xff] }
 0x10d   : > { %v2950_v7 = vld [vmem:[#allocation3 + $0x38] sm:$0xff]  ;;  %v3412_v27 = vmul.f32 %v6945_v50, %v11195_v58  ;;  %v2354_v22 = vadd.f32 %v2322_v14, %v2288_v18  ;;  %v2518_v17 = vadd.f32 %v2486_v28, %v2452_v10  ;;  %v6956_v58 = vpop.permute.xlu2 %1867 }
 0x10e   : > { %v1954_v52 = vmul.f32 %v1813_v12, %v1762_v55  ;;  %v3016_v61 = vld [vmem:[#allocation3 + $0x37] sm:$0xff]  ;;  %v2951_v21 = vld [vmem:[#allocation3 + $0x40] sm:$0xff]  ;;  %v1560_v11 = vadd.f32 %v1528_v44, %v1134_v25  ;;  %v2984_v34 = vmul.f32 %v11207_v40, %v2950_v7  ;;  %11211 = vst [vmem:[#allocation15_spill] sm:$0xff] %v6956_v58  ;;  %v785_v44 = vpop.f32.mrf.mxu0 }
 0x10f   : > { %v3017_v36 = vld [vmem:[#allocation3 + $0x3f] sm:$0xff]  ;;  %v2985_v43 = vmul.f32 %v11207_v40, %v2951_v21  ;;  %v6952_v47 = vld [vmem:[#allocation3 + $0x47] sm:$0xff]  ;;  %v3050_v4 = vmul.f32 %v11208_v8, %v3016_v61  ;;  %v2386_v35 = vmul.f32 %v2354_v22, %v11206_v26  ;;  %v2584_v10 = vadd.f32 %v2552_v5, %v2518_v17 }
 0x110   : > { %v3082_v29 = vld [vmem:[#allocation3 + $0x39] sm:$0xff]  ;;  %v3051_v2 = vmul.f32 %v11208_v8, %v3017_v36  ;;  %v3083_v24 = vld [vmem:[#allocation3 + $0x41] sm:$0xff]  ;;  %11209 = vst [vmem:[#allocation41_spill] sm:$0xff] %v6952_v47  ;;  %v6959_v14 = vadd.f32 %v1954_v52, %v1560_v11  ;;  %v3478_v61 = vmul.f32 %v6244_v51, %v11201_v0  ;;  %v3510_v52 = vmul.f32 %v3412_v27, %v11206_v26  ;;  %v833_v11 = vpop.f32.mrf.mxu2  ;;  %v6969_v22 = vld [vmem:[#allocation2 + $0x99] sm:$0xff] }
 0x111   : > { %v11210_v55 = vld [vmem:[#allocation63_spill] sm:$0xff]  ;;  %3675 = vst.msk [vmem:[#allocation3 + $0x40] sm:$0xff] %vm851_vm1, %v3643_v19  ;;  %v3148_v28 = vmul.f32 %v3050_v4, %v11206_v26  ;;  %v2418_v36 = vadd.f32 %v2386_v35, %v2188_v46  ;;  %v2616_v40 = vmul.f32 %v2584_v10, %v1813_v12  ;;  %v11215_v0 = vld [vmem:[#allocation70_spill] sm:$0xff] }
 0x112   : > { %v3116_v53 = vmul.f32 %v11210_v55, %v3082_v29  ;;  %v3117_v25 = vmul.f32 %v11210_v55, %v3083_v24  ;;  %11212 = vst [vmem:[#allocation17_spill] sm:$0xff] %v6959_v14  ;;  %v3149_v18 = vmul.f32 %v3051_v2, %v11175_v63  ;;  %v3574_v17 = vmul.f32 %v3478_v61, %v1813_v12  ;;  %v6974_v63 = vld [vmem:[%s11091_s22] ss:$0 sm:$0xff]  ;;  %v11216_v26 = vld [vmem:[#allocation59_spill] sm:$0xff]  ;;  %v7017_v61 = vld [vmem:[%s10806_s7 + $0x5] ss:$0 sm:$0xff] }
 0x113   : > { %11213 = vst [vmem:[#allocation42_spill] sm:$0xff] %v6969_v22  ;;  %v3180_v19 = vadd.f32 %v3148_v28, %v2984_v34  ;;  %v786_v29 = vadd.f32 %v6974_v63, %v785_v44  ;;  %v6977_v51 = vadd.f32 %v2616_v40, %v2418_v36  ;;  %v3277_v46 = vadd.f32 %v11215_v0, %v6827_v42  ;;  %v1608_v8 = vld [vmem:[#allocation2 + $0xa9] sm:$0xff]  ;;  %v979_v24 = vld [vmem:[#allocation2 + $0xa0] sm:$0xff] }
 0x114   : > { %v3212_v7 = vmul.f32 %v3116_v53, %v1813_v12  ;;  %v3213_v21 = vmul.f32 %v3117_v25, %v6849_v32  ;;  %v3181_v5 = vadd.f32 %v3149_v18, %v2985_v43  ;;  %v3542_v32 = vadd.f32 %v3510_v52, %v3346_v13  ;;  %v1610_v43 = vld [vmem:[#allocation2 + $0xb9] sm:$0xff]  ;;  %v6992_v13 = vld [vmem:[%s10804_s5 + $0x2] ss:$0 sm:$0xff]  ;;  %v7000_v25 = vld [vmem:[%s10804_s5 + $0x5] ss:$0 sm:$0xff]  ;;  %11221 = vst [vmem:[#allocation52_spill] sm:$0xff] %v7017_v61 }
 0x115   : > { %11214 = vst [vmem:[#allocation16_spill] sm:$0xff] %v6977_v51  ;;  %v2681_v27 = vadd.f32 %v11216_v26, %v6825_v39  ;;  %v834_v2 = vadd.f32 %v6974_v63, %v833_v11  ;;  %v1640_v42 = vmul.f32 %v6992_v13, %v6969_v22  ;;  %vm4326_vm4 = vcmp.ge.f32.partialorder %v3277_v46, 0.0  ;;  %v7007_v44 = vld [vmem:[%s10806_s7 + $0x2] ss:$0 sm:$0xff]  ;;  %v7025_v11 = vld [vmem:[%s10808_s9] ss:$0 sm:$0xff] }
 0x116   : > { %v6983_v34 = vadd.f32 %v3213_v21, %v3181_v5  ;;  %v6985_v12 = vadd.f32 %v3212_v7, %v3180_v19  ;;  %874 = vst.msk [vmem:[#allocation2 + $0x68] sm:$0xff] %vm851_vm1, %v786_v29  ;;  %v3606_v39 = vadd.f32 %v3574_v17, %v3542_v32  ;;  %v4358_v4 = vmul.f32 0.25, %v3277_v46  ;;  %v11222_v5 = vld [vmem:[#allocation33_spill] sm:$0xff]  ;;  %v3382_v29 = vld [vmem:[#allocation2 + $0x57] sm:$0xff]  ;;  %v7031_v32 = vpop.permute.xlu2 %1882 }
 0x117   : > { %vm4069_vm5 = vcmp.ge.f32.partialorder %v2681_v27, 0.0  ;;  %v4101_v53 = vmul.f32 0.25, %v2681_v27  ;;  %890 = vst.msk [vmem:[#allocation2 + $0xe8] sm:$0xff] %vm851_vm1, %v834_v2  ;;  %v1676_v35 = vmul.f32 %v7000_v25, %v1608_v8  ;;  %v1744_v10 = vmul.f32 %v6427_v15, %v1610_v43 }
 0x118   : > { %11217 = vst [vmem:[#allocation60_spill] sm:$0xff] %v6983_v34  ;;  %v2466_v18 = vmul.f32 %v7007_v44, %v6969_v22  ;;  %v7012_v28 = vadd.f32 %v6557_v54, %v3606_v39  ;;  %v4390_v7 = vsel %vm4326_vm4, %v3277_v46, %v4358_v4  ;;  %v2500_v21 = vmul.f32 %v7017_v61, %v1608_v8  ;;  %v11225_v4 = vld [vmem:[#allocation64_spill] sm:$0xff] }
 0x119   : > { %11218 = vst [vmem:[#allocation18_spill] sm:$0xff] %v6985_v12  ;;  %v2566_v36 = vmul.f32 %v6432_v56, %v1610_v43  ;;  %4455 = vrot.lane.b32.xlu0 %v4390_v7, %s5720_s21  ;;  %v4133_v40 = vsel %vm4069_vm5, %v2681_v27, %v4101_v53  ;;  %v1708_v52 = vadd.f32 %v1676_v35, %v1640_v42  ;;  %v7036_v27 = vld [vmem:[%s10808_s9 + $0x1] ss:$0 sm:$0xff]  ;;  %v11223_v43 = vld [vmem:[#allocation47_spill] sm:$0xff]  ;;  %v11224_v42 = vld [vmem:[#allocation56_spill] sm:$0xff]  ;;  %vm4292_vm5 = vcmask 64544  }
 0x11a   : > { %11219 = vst [vmem:[#allocation76_spill] sm:$0xff] %v7007_v44  ;;  %v2732_v19 = vmul.f32 %v7025_v11, %v11222_v5  ;;  %v2733_v17 = vmul.f32 %v7025_v11, %v979_v24  ;;  %4198 = vrot.lane.b32.xlu2 %v4133_v40, %s5719_s27  ;;  %v2532_v46 = vadd.f32 %v2500_v21, %v2466_v18  ;;  %v7045_v24 = vld [vmem:[%s10808_s9 + $0x2] ss:$0 sm:$0xff]  ;;  %v11226_v18 = vld [vmem:[#allocation72_spill] sm:$0xff]  ;;  %v7060_v5 = vld [vmem:[%s10812_s13 + $0x1] ss:$0 sm:$0xff] }
 0x11b   : > { %11220 = vst [vmem:[#allocation36_spill] sm:$0xff] %v7012_v28  ;;  %v2766_v2 = vmul.f32 %v7036_v27, %v11223_v43  ;;  %v2767_v39 = vmul.f32 %v7036_v27, %v11224_v42  ;;  %v2832_v53 = vmul.f32 %v7045_v24, %v11225_v4  ;;  %v1776_v35 = vadd.f32 %v1744_v10, %v1708_v52  ;;  %v7054_v21 = vld [vmem:[%s10812_s13 + $0x2] ss:$0 sm:$0xff]  ;;  %v3448_v4 = vld [vmem:[#allocation2 + $0x59] sm:$0xff] }
 0x11c   : > { %v2833_v7 = vmul.f32 %v7045_v24, %v11226_v18  ;;  %v3492_v40 = vmul.f32 %v7054_v21, %v1608_v8  ;;  %v3350_v43 = vmul.f32 %v7060_v5, %v6800_v62  ;;  %v2598_v14 = vadd.f32 %v2566_v36, %v2532_v46 }
 0x11d   : > { %v7064_v10 = vld [vmem:[#allocation2 + $0x68] sm:$0xff]  ;;  %v2798_v33 = vadd.f32 %v2766_v2, %v2732_v19  ;;  %v2799_v47 = vadd.f32 %v2767_v39, %v2733_v17  ;;  %v3416_v12 = vmul.f32 %v6945_v50, %v3382_v29  ;;  %v7074_v31 = vmul.f32 %v7031_v32, %v1776_v35  ;;  %v11231_v2 = vld [vmem:[#allocation53_spill] sm:$0xff]  ;;  %v11232_v35 = vld [vmem:[#allocation7_spill] sm:$0xff] }
 0x11e   : > { %v7066_v52 = vld [vmem:[#allocation2 + $0x61] sm:$0xff]  ;;  %v2758_v8 = vmul.f32 %v7036_v27, %v7064_v10  ;;  %v3588_v58 = vmul.f32 %v3492_v40, %v7031_v32  ;;  %v7080_v22 = vmul.f32 %v2598_v14, %v7031_v32  ;;  %v3482_v17 = vmul.f32 %v7054_v21, %v3448_v4 }
 0x11f   : > { %v3483_v34 = vmul.f32 %v7054_v21, %v7066_v52  ;;  %11227 = vst [vmem:[#allocation26_spill] sm:$0xff] %v7074_v31  ;;  %v2864_v36 = vadd.f32 %v2832_v53, %v2798_v33  ;;  %v2865_v19 = vadd.f32 %v2833_v7, %v2799_v47  ;;  %v3514_v31 = vmul.f32 %v3416_v12, %v11232_v35  ;;  %v7095_v33 = vld [vmem:[%s10804_s5 + $0x1] ss:$0 sm:$0xff]  ;;  %v7114_v53 = vld [vmem:[%s10804_s5 + $0x7] ss:$0 sm:$0xff] }
 0x120   : > { %11229 = vst [vmem:[#allocation28_spill] sm:$0xff] %v7080_v22  ;;  %v7084_v29 = vadd.f32 %v2758_v8, %v6807_v16  ;;  %v3620_v39 = vadd.f32 %v3588_v58, %v11231_v2  ;;  %v3578_v14 = vmul.f32 %v3482_v17, %v7077_v41  ;;  %v1001_v16 = vmul.f32 %v7095_v33, %v6632_v38  ;;  %v11239_v4 = vld [vmem:[#allocation77_spill] sm:$0xff] }
 0x121   : > { %v3579_v46 = vmul.f32 %v3483_v34, %v6839_v57  ;;  %v2900_v40 = vadd.f32 %v11188_v60, %v2864_v36  ;;  %v2901_v28 = vadd.f32 %v11188_v60, %v2865_v19  ;;  %11233 = vst [vmem:[#allocation23_spill] sm:$0xff] %v7095_v33  ;;  %v3546_v34 = vadd.f32 %v3514_v31, %v3350_v43  ;;  %v7106_v60 = vld [vmem:[%s10804_s5 + $0x4] ss:$0 sm:$0xff]  ;;  %v7121_v31 = vld [vmem:[%s10804_s5] ss:$0 sm:$0xff] }
 0x122   : > { %11230 = vst [vmem:[#allocation44_spill] sm:$0xff] %v7084_v29  ;;  %v7101_v58 = vadd.f32 %v6557_v54, %v3620_v39  ;;  %v1037_v12 = vmul.f32 %v7106_v60, %v6757_v30  ;;  %v1203_v7 = vmul.f32 %v7121_v31, %v6740_v20  ;;  %v7128_v43 = vld [vmem:[%s10804_s5 + $0x3] ss:$0 sm:$0xff]  ;;  %v7135_v36 = vld [vmem:[%s10804_s5 + $0x6] ss:$0 sm:$0xff]  ;;  %v1629_v39 = vmul.f32 %v6992_v13, %v6772_v49 }
 0x123   : > { %v3611_v47 = vadd.f32 %v3579_v46, %v6886_v9  ;;  %11235 = vst [vmem:[#allocation5_spill] sm:$0xff] %v7106_v60  ;;  %v1105_v9 = vmul.f32 %v7114_v53, %v6855_v37  ;;  %v1239_v8 = vmul.f32 %v7128_v43, %v11239_v4  ;;  %v1307_v19 = vmul.f32 %v7135_v36, %v6857_v45  ;;  %v7152_v41 = vld [vmem:[%s10806_s7 + $0x1] ss:$0 sm:$0xff] }
 0x124   : > { %11234 = vst [vmem:[#allocation27_spill] sm:$0xff] %v7101_v58  ;;  %v3610_v46 = vadd.f32 %v3578_v14, %v3546_v34  ;;  %v1069_v2 = vadd.f32 %v1037_v12, %v1001_v16  ;;  %v1665_v57 = vmul.f32 %v7000_v25, %v6811_v48  ;;  %v1733_v22 = vmul.f32 %v6427_v15, %v7066_v52  ;;  %v7169_v34 = vld [vmem:[%s10806_s7 + $0x7] ss:$0 sm:$0xff] }
 0x125   : > { %2932 = vst.msk [vmem:[#allocation3 + $0xa8] sm:$0xff] %vm851_vm1, %v2900_v40  ;;  %v7140_v17 = vadd.f32 %v6557_v54, %v3611_v47  ;;  %v1271_v40 = vadd.f32 %v1239_v8, %v1203_v7  ;;  %v7162_v47 = vld [vmem:[%s10806_s7 + $0x4] ss:$0 sm:$0xff]  ;;  %v2159_v12 = vmul.f32 %v7169_v34, %v6855_v37 }
 0x126   : > { %11236 = vst [vmem:[#allocation54_spill] sm:$0xff] %v7114_v53  ;;  %v7157_v14 = vadd.f32 %v6557_v54, %v3610_v46  ;;  %v1137_v16 = vadd.f32 %v1105_v9, %v1069_v2  ;;  %v2093_v15 = vmul.f32 %v7162_v47, %v6757_v30  ;;  %v1697_v8 = vadd.f32 %v1665_v57, %v1629_v39  ;;  %v7176_v9 = vld [vmem:[%s10806_s7] ss:$0 sm:$0xff]  ;;  %v7183_v2 = vld [vmem:[%s10806_s7 + $0x3] ss:$0 sm:$0xff] }
 0x127   : > { %11237 = vst [vmem:[#allocation55_spill] sm:$0xff] %v7121_v31  ;;  %v1339_v7 = vadd.f32 %v1307_v19, %v1271_v40  ;;  %v2225_v46 = vmul.f32 %v7176_v9, %v6740_v20  ;;  %v2259_v35 = vmul.f32 %v7183_v2, %v11239_v4  ;;  %v7190_v57 = vld [vmem:[%s10806_s7 + $0x6] ss:$0 sm:$0xff]  ;;  %v2455_v39 = vmul.f32 %v7007_v44, %v6772_v49 }
 0x128   : > { %11238 = vst [vmem:[#allocation63_spill] sm:$0xff] %v7128_v43  ;;  %v2325_v19 = vmul.f32 %v7190_v57, %v6857_v45  ;;  %v2489_v40 = vmul.f32 %v7017_v61, %v6811_v48  ;;  %v11244_v58 = vld [vmem:[#allocation13_spill] sm:$0xff]  ;;  %v1765_v29 = vadd.f32 %v1733_v22, %v1697_v8  ;;  %v2721_v45 = vmul.f32 %v7025_v11, %v6632_v38 }
 0x129   : > { %11240 = vst [vmem:[#allocation70_spill] sm:$0xff] %v7135_v36  ;;  %v2291_v20 = vadd.f32 %v2259_v35, %v2225_v46  ;;  %v2722_v49 = vmul.f32 %v7025_v11, %v6698_v3  ;;  %v7210_v22 = vmul.f32 %v7025_v11, %v6855_v37  ;;  %v2755_v35 = vmul.f32 %v7036_v27, %v6757_v30  ;;  %v836_v46 = vpop.f32.mrf.mxu2 }
 0x12a   : > { %11241 = vst [vmem:[#allocation59_spill] sm:$0xff] %v7140_v17  ;;  %v2521_v59 = vadd.f32 %v2489_v40, %v2455_v39  ;;  %v3349_v8 = vmul.f32 %v7060_v5, %v6757_v30  ;;  %v2682_v39 = vadd.f32 %v11216_v26, %v6817_v1  ;;  %v7249_v30 = vld [vmem:[%s10809_s10] ss:$0 sm:$0xff]  ;;  %v7257_v1 = vld [vmem:[#allocation2 + $0xaf] sm:$0xff] }
 0x12b   : > { %2933 = vst.msk [vmem:[#allocation3 + $0xb0] sm:$0xff] %vm851_vm1, %v2901_v28  ;;  %v2059_v28 = vmul.f32 %v7152_v41, %v6632_v38  ;;  %v2756_v38 = vmul.f32 %v7036_v27, %v6800_v62 }
 0x12c   : > { %11242 = vst [vmem:[#allocation33_spill] sm:$0xff] %v7157_v14  ;;  %v1531_v14 = vmul.f32 %v11244_v58, %v1339_v7  ;;  %v2357_v7 = vadd.f32 %v2325_v19, %v2291_v20  ;;  %v2757_v20 = vmul.f32 %v7036_v27, %v6855_v37  ;;  %v3278_v19 = vadd.f32 %v11215_v0, %v6819_v23 }
 0x12d   : > { %v2125_v17 = vadd.f32 %v2093_v15, %v2059_v28  ;;  %11243 = vst [vmem:[#allocation47_spill] sm:$0xff] %v7190_v57  ;;  %v2555_v28 = vmul.f32 %v6432_v56, %v7066_v52  ;;  %v7201_v15 = vpop.permute.xlu0 %1827  ;;  %vm4070_vm7 = vcmp.ge.f32.partialorder %v2682_v39, 0.0 }
 0x12e   : > { %v1563_v57 = vadd.f32 %v1531_v14, %v1137_v16  ;;  %v1957_v61 = vmul.f32 %v7201_v15, %v1765_v29  ;;  %11245 = vst [vmem:[#allocation56_spill] sm:$0xff] %v7210_v22  ;;  %v2389_v3 = vmul.f32 %v2357_v7, %v11244_v58  ;;  %v2821_v29 = vmul.f32 %v7045_v24, %v6855_v37  ;;  %v788_v14 = vpop.f32.mrf.mxu0  ;;  %v7260_v7 = vld [vmem:[#allocation2 + $0xd0] sm:$0xff] }
 0x12f   : > { %v2191_v51 = vadd.f32 %v2159_v12, %v2125_v17  ;;  %v2587_v52 = vadd.f32 %v2555_v28, %v2521_v59  ;;  %v2788_v16 = vadd.f32 %v2756_v38, %v2722_v49  ;;  %v7229_v62 = vadd.f32 %v2757_v20, %v6853_v6  ;;  %11249 = vst [vmem:[#allocation77_spill] sm:$0xff] %v7257_v1  ;;  %v7268_v38 = vld [vmem:[#allocation2 + $0xcf] sm:$0xff] }
 0x130   : > { %v7217_v17 = vadd.f32 %v1957_v61, %v1563_v57  ;;  %v2822_v61 = vmul.f32 %v7045_v24, %v7064_v10  ;;  %v3481_v57 = vmul.f32 %v7054_v21, %v6811_v48  ;;  %v789_v49 = vadd.f32 %v6974_v63, %v788_v14 }
 0x131   : > { %v2619_v59 = vmul.f32 %v2587_v52, %v7201_v15  ;;  %v2421_v12 = vadd.f32 %v2389_v3, %v2191_v51  ;;  %v837_v28 = vadd.f32 %v6974_v63, %v836_v46  ;;  %vm4327_vm6 = vcmp.ge.f32.partialorder %v3278_v19, 0.0 }
 0x132   : > { %v3096_v44 = vld [vmem:[#allocation3 + $0xa9] sm:$0xff]  ;;  %11246 = vst [vmem:[#allocation64_spill] sm:$0xff] %v7217_v17  ;;  %v2854_v6 = vadd.f32 %v2822_v61, %v2788_v16  ;;  %v3577_v40 = vmul.f32 %v3481_v57, %v7201_v15  ;;  %v4359_v0 = vmul.f32 0.25, %v3278_v19  ;;  %v1051_v52 = vmul.f32 %v7106_v60, %v11226_v18  ;;  %v7284_v61 = vld [vmem:[#allocation2 + $0xc1] sm:$0xff] }
 0x133   : > { %v3130_v56 = vmul.f32 %v11210_v55, %v3096_v44  ;;  %v2787_v44 = vadd.f32 %v2755_v35, %v2721_v45  ;;  %v7240_v51 = vadd.f32 %v2619_v59, %v2421_v12  ;;  %875 = vst.msk [vmem:[#allocation2 + $0x70] sm:$0xff] %vm851_vm1, %v789_v49  ;;  %v4102_v45 = vmul.f32 0.25, %v2682_v39  ;;  %v7266_v35 = vld [vmem:[#allocation2 + $0xbf] sm:$0xff]  ;;  %v7282_v12 = vld [vmem:[#allocation2 + $0xb1] sm:$0xff] }
 0x134   : > { %v2890_v23 = vadd.f32 %v7249_v30, %v2854_v6  ;;  %11250 = vst [vmem:[#allocation13_spill] sm:$0xff] %v7266_v35  ;;  %v4391_v3 = vsel %vm4327_vm6, %v3278_v19, %v4359_v0  ;;  %v1119_v20 = vmul.f32 %v7114_v53, %v7260_v7  ;;  %v1253_v14 = vmul.f32 %v7128_v43, %v7266_v35  ;;  %v7297_v6 = vld [vmem:[%s10804_s5 + $0x8] ss:$0 sm:$0xff]  ;;  %v7335_v17 = vld [vmem:[%s10810_s11] ss:$0 sm:$0xff] }
 0x135   : > { %v7225_v55 = vmul.f32 %v3130_v56, %v7031_v32  ;;  %v2853_v37 = vadd.f32 %v2821_v29, %v2787_v44  ;;  %v3415_v32 = vmul.f32 %v6945_v50, %v11239_v4  ;;  %11248 = vst [vmem:[#allocation53_spill] sm:$0xff] %v7240_v51  ;;  %v1015_v56 = vmul.f32 %v7095_v33, %v11224_v42  ;;  %v7277_v42 = vld [vmem:[#allocation2 + $0xd1] sm:$0xff] }
 0x136   : > { %2922 = vst.msk [vmem:[#allocation3 + $0x58] sm:$0xff] %vm851_vm1, %v2890_v23  ;;  %v1217_v29 = vmul.f32 %v7121_v31, %v7257_v1  ;;  %4457 = vrot.lane.b32.xlu0 %v4391_v3, %s5720_s21  ;;  %v4134_v44 = vsel %vm4070_vm7, %v2682_v39, %v4102_v45  ;;  %v1321_v46 = vmul.f32 %v7135_v36, %v7268_v38  ;;  %v7301_v39 = vld [vmem:[#allocation2 + $0xb0] sm:$0xff] }
 0x137   : > { %11247 = vst [vmem:[#allocation72_spill] sm:$0xff] %v7225_v55  ;;  %v2889_v4 = vadd.f32 %v7249_v30, %v2853_v37  ;;  %v3513_v48 = vmul.f32 %v3415_v32, %v11244_v58  ;;  %v1083_v16 = vadd.f32 %v1051_v52, %v1015_v56  ;;  %4200 = vrot.lane.b32.xlu2 %v4134_v44, %s5719_s27  ;;  %v11257_v44 = vld [vmem:[#allocation58_spill] sm:$0xff] }
 0x138   : > { %891 = vst.msk [vmem:[#allocation2 + $0xf0] sm:$0xff] %vm851_vm1, %v837_v28  ;;  %v1643_v37 = vmul.f32 %v6992_v13, %v7282_v12  ;;  %v1679_v32 = vmul.f32 %v7000_v25, %v7284_v61  ;;  %v1747_v19 = vmul.f32 %v7297_v6, %v7277_v42  ;;  %v2173_v0 = vmul.f32 %v7169_v34, %v7260_v7 }
 0x139   : > { %2921 = vst.msk [vmem:[#allocation3 + $0x50] sm:$0xff] %vm851_vm1, %v2889_v4  ;;  %v3545_v26 = vadd.f32 %v3513_v48, %v3349_v8  ;;  %v1285_v8 = vadd.f32 %v1253_v14, %v1217_v29  ;;  %v1151_v49 = vadd.f32 %v1119_v20, %v1083_v16  ;;  %v2073_v4 = vmul.f32 %v7301_v39, %v7152_v41  ;;  %v7317_v20 = vpop.permute.xlu2 %1897 }
 0x13a   : > { %11251 = vst [vmem:[#allocation81_spill] sm:$0xff] %v7282_v12  ;;  %v973_v48 = vld [vmem:[#allocation2 + $0x70] sm:$0xff]  ;;  %v1711_v23 = vadd.f32 %v1679_v32, %v1643_v37  ;;  %v2239_v37 = vmul.f32 %v7176_v9, %v7257_v1  ;;  %v7327_v32 = vld [vmem:[%s10810_s11 + $0x1] ss:$0 sm:$0xff] }
 0x13b   : > { %v3609_v59 = vadd.f32 %v3577_v40, %v3545_v26  ;;  %11252 = vst [vmem:[#allocation82_spill] sm:$0xff] %v7284_v61  ;;  %v3385_v40 = vld [vmem:[#allocation2 + $0x6f] sm:$0xff]  ;;  %v1353_v28 = vadd.f32 %v1321_v46, %v1285_v8  ;;  %v7309_v26 = vld [vmem:[#allocation3 + $0x48] sm:$0xff]  ;;  %v7312_v45 = vmul.f32 %v7025_v11, %v973_v48  ;;  %v2823_v56 = vmul.f32 %v7045_v24, %v973_v48 }
 0x13c   : > { %11253 = vst [vmem:[#allocation83_spill] sm:$0xff] %v7301_v39  ;;  %v3353_v52 = vmul.f32 %v7060_v5, %v973_v48  ;;  %v3419_v3 = vmul.f32 %v6945_v50, %v3385_v40  ;;  %v1779_v8 = vadd.f32 %v1747_v19, %v1711_v23 }
 0x13d   : > { %v3645_v57 = vadd.f32 %v6557_v54, %v3609_v59  ;;  %v2107_v54 = vmul.f32 %v7162_v47, %v11226_v18  ;;  %11254 = vst [vmem:[#allocation84_spill] sm:$0xff] %v7309_v26  ;;  %v1545_v16 = vmul.f32 %v11257_v44, %v1353_v28  ;;  %v11260_v28 = vld [vmem:[#allocation25_spill] sm:$0xff]  ;;  %v2855_v23 = vadd.f32 %v2823_v56, %v7229_v62  ;;  %v11271_v26 = vld [vmem:[#allocation66_spill] sm:$0xff] }
 0x13e   : > { %11255 = vst [vmem:[#allocation85_spill] sm:$0xff] %v7312_v45  ;;  %v2273_v56 = vmul.f32 %v7183_v2, %v7266_v35 }
 0x13f   : > { %v2139_v46 = vadd.f32 %v2107_v54, %v2073_v4  ;;  %11259 = vst [vmem:[#allocation87_spill] sm:$0xff] %v7335_v17  ;;  %v11261_v54 = vld [vmem:[#allocation8_spill] sm:$0xff]  ;;  %v1577_v55 = vadd.f32 %v1545_v16, %v1151_v49 }
 0x140   : > { %v2953_v29 = vld [vmem:[#allocation3 + $0x50] sm:$0xff]  ;;  %v3517_v22 = vmul.f32 %v3419_v3, %v11261_v54  ;;  %v11265_v49 = vld [vmem:[#allocation76_spill] sm:$0xff] }
 0x141   : > { %v3019_v14 = vld [vmem:[#allocation3 + $0x4f] sm:$0xff]  ;;  %v2987_v48 = vmul.f32 %v7327_v32, %v2953_v29  ;;  %v7330_v40 = vld [vmem:[#allocation3 + $0x57] sm:$0xff]  ;;  %v2205_v51 = vadd.f32 %v2173_v0, %v2139_v46  ;;  %v2469_v16 = vmul.f32 %v11265_v49, %v7282_v12  ;;  %v2735_v46 = vmul.f32 %v7301_v39, %v7025_v11 }
 0x142   : > { %v7319_v59 = vld [vmem:[#allocation3 + $0x49] sm:$0xff]  ;;  %11258 = vst [vmem:[#allocation58_spill] sm:$0xff] %v7330_v40  ;;  %v3053_v19 = vmul.f32 %v7335_v17, %v3019_v14  ;;  %v3085_v4 = vld [vmem:[#allocation3 + $0x51] sm:$0xff]  ;;  %v1971_v14 = vmul.f32 %v7317_v20, %v1779_v8  ;;  %v7352_v62 = vadd.f32 %v3517_v22, %v3353_v52  ;;  %v2305_v22 = vadd.f32 %v2273_v56, %v2239_v37 }
 0x143   : > { %11256 = vst [vmem:[#allocation86_spill] sm:$0xff] %v7319_v59  ;;  %v7345_v29 = vld [vmem:[%s10810_s11 + $0x2] ss:$0 sm:$0xff]  ;;  %v7363_v0 = vld [vmem:[#allocation2 + $0xc8] sm:$0xff]  ;;  %v11266_v52 = vld [vmem:[#allocation52_spill] sm:$0xff] }
 0x144   : > { %3676 = vst.msk [vmem:[#allocation3 + $0x48] sm:$0xff] %vm851_vm1, %v11260_v28  ;;  %v3119_v40 = vmul.f32 %v7345_v29, %v3085_v4  ;;  %v3151_v59 = vmul.f32 %v3053_v19, %v11244_v58  ;;  %v2891_v28 = vadd.f32 %v7249_v30, %v2855_v23  ;;  %v7357_v54 = vadd.f32 %v1971_v14, %v1577_v55  ;;  %v11264_v4 = vld [vmem:[#allocation47_spill] sm:$0xff]  ;;  %v7393_v56 = vld [vmem:[#allocation3 + $0x2f] sm:$0xff] }
 0x145   : > { %11262 = vst [vmem:[#allocation25_spill] sm:$0xff] %v7345_v29  ;;  %v2503_v8 = vmul.f32 %v11266_v52, %v7284_v61  ;;  %v7391_v14 = vmul.f32 %v7036_v27, %v7260_v7 }
 0x146   : > { %3677 = vst.msk [vmem:[#allocation3 + $0x50] sm:$0xff] %vm851_vm1, %v3645_v57  ;;  %v3215_v3 = vmul.f32 %v3119_v40, %v7201_v15  ;;  %v2339_v57 = vmul.f32 %v11264_v4, %v7268_v38  ;;  %v3183_v58 = vadd.f32 %v3151_v59, %v2987_v48  ;;  %v7371_v15 = vld [vmem:[%s10806_s7 + $0x8] ss:$0 sm:$0xff]  ;;  %v7375_v38 = vld [vmem:[#allocation2 + $0xd8] sm:$0xff]  ;;  %v2769_v48 = vmul.f32 %v7036_v27, %v11226_v18 }
 0x147   : > { %11263 = vst [vmem:[#allocation88_spill] sm:$0xff] %v7357_v54  ;;  %v2569_v55 = vmul.f32 %v7371_v15, %v7277_v42  ;;  %v7379_v59 = vld [vmem:[#allocation2 + $0xb8] sm:$0xff]  ;;  %v2770_v40 = vmul.f32 %v7036_v27, %v7363_v0  ;;  %v2535_v42 = vadd.f32 %v2503_v8, %v2469_v16  ;;  %v11270_v54 = vld [vmem:[#allocation49_spill] sm:$0xff]  ;;  %v2834_v18 = vmul.f32 %v7045_v24, %v7363_v0 }
 0x148   : > { %2923 = vst.msk [vmem:[#allocation3 + $0x60] sm:$0xff] %vm851_vm1, %v2891_v28  ;;  %v2736_v37 = vmul.f32 %v7379_v59, %v7025_v11  ;;  %v7387_v19 = vadd.f32 %v3215_v3, %v3183_v58  ;;  %v2371_v23 = vadd.f32 %v2339_v57, %v2305_v22  ;;  %v3329_v28 = vld [vmem:[#allocation2 + $0xc0] sm:$0xff]  ;;  %v2800_v12 = vadd.f32 %v11271_v26, %v11270_v54 }
 0x149   : > { %11267 = vst [vmem:[#allocation47_spill] sm:$0xff] %v7379_v59  ;;  %v2801_v1 = vadd.f32 %v2769_v48, %v2735_v46  ;;  %v11272_v59 = vld [vmem:[#allocation24_spill] sm:$0xff]  ;;  %v2601_v57 = vadd.f32 %v2569_v55, %v2535_v42  ;;  %v2835_v16 = vmul.f32 %v7045_v24, %v7260_v7  ;;  %v2836_v58 = vmul.f32 %v7045_v24, %v7375_v38  ;;  %v3384_v46 = vld [vmem:[#allocation2 + $0x67] sm:$0xff] }
 0x14a   : > { %11268 = vst [vmem:[#allocation76_spill] sm:$0xff] %v7387_v19  ;;  %v2802_v39 = vadd.f32 %v2770_v40, %v2736_v37  ;;  %v2403_v3 = vmul.f32 %v2371_v23, %v11257_v44  ;;  %v2866_v22 = vadd.f32 %v2834_v18, %v2800_v12  ;;  %v3363_v26 = vmul.f32 %v7060_v5, %v3329_v28  ;;  %v3450_v40 = vld [vmem:[#allocation2 + $0x69] sm:$0xff]  ;;  %v791_v23 = vpop.f32.mrf.mxu0 }
 0x14b   : > { %11269 = vst [vmem:[#allocation52_spill] sm:$0xff] %v7393_v56  ;;  %v3429_v54 = vmul.f32 %v6945_v50, %v7266_v35  ;;  %v3495_v8 = vmul.f32 %v7054_v21, %v7284_v61  ;;  %v2633_v37 = vmul.f32 %v2601_v57, %v7317_v20  ;;  %v2867_v55 = vadd.f32 %v2835_v16, %v2801_v1  ;;  %v7428_v16 = vld [vmem:[%s10807_s8] ss:$0 sm:$0xff] }
 0x14c   : > { %3672 = vst.msk [vmem:[#allocation3 + $0x28] sm:$0xff] %vm851_vm1, %v11272_v59  ;;  %v2435_v59 = vadd.f32 %v2403_v3, %v2205_v51  ;;  %v2868_v48 = vadd.f32 %v2836_v58, %v2802_v39  ;;  %v2902_v42 = vadd.f32 %v7249_v30, %v2866_v22  ;;  %v3352_v18 = vmul.f32 %v7060_v5, %v7064_v10  ;;  %v11274_v10 = vld [vmem:[#allocation16_spill] sm:$0xff]  ;;  %v7433_v22 = vpop.permute.xlu0 %1842 }
 0x14d   : > { %v3527_v12 = vmul.f32 %v3429_v54, %v11257_v44  ;;  %v3591_v28 = vmul.f32 %v3495_v8, %v7317_v20  ;;  %v2903_v61 = vadd.f32 %v7249_v30, %v2867_v55  ;;  %v3418_v1 = vmul.f32 %v6945_v50, %v3384_v46  ;;  %11275 = vst [vmem:[#allocation66_spill] sm:$0xff] %v7433_v22  ;;  %v11276_v54 = vld [vmem:[#allocation21_spill] sm:$0xff] }
 0x14e   : > { %v7417_v19 = vadd.f32 %v2633_v37, %v2435_v59  ;;  %v2904_v51 = vadd.f32 %v7249_v30, %v2868_v48  ;;  %2934 = vst.msk [vmem:[#allocation3 + $0xb8] sm:$0xff] %vm851_vm1, %v2902_v42  ;;  %v3484_v3 = vmul.f32 %v7054_v21, %v3450_v40  ;;  %v792_v57 = vadd.f32 %v6974_v63, %v791_v23  ;;  %v5372_v46 = vld [vmem:[#allocation2 + $0x20] sm:$0xff]  ;;  %v5373_v59 = vld [vmem:[#allocation2 + $0x30] sm:$0xff] }
 0x14f   : > { %v3559_v39 = vadd.f32 %v3527_v12, %v3363_v26  ;;  %v2684_v58 = vadd.f32 %v7428_v16, %v11274_v10  ;;  %2935 = vst.msk [vmem:[#allocation3 + $0xc0] sm:$0xff] %vm851_vm1, %v2903_v61  ;;  %v3516_v8 = vmul.f32 %v3418_v1, %v11276_v54  ;;  %v2055_v26 = vmul.f32 %v5372_v46, %v7152_v41  ;;  %v5374_v55 = vld [vmem:[#allocation2 + $0x40] sm:$0xff]  ;;  %v5376_v46 = vld [vmem:[#allocation2 + $0x2f] sm:$0xff]  ;;  %v839_v54 = vpop.f32.mrf.mxu2 }
 0x150   : > { %11273 = vst [vmem:[#allocation49_spill] sm:$0xff] %v7417_v19  ;;  %v2089_v37 = vmul.f32 %v5373_v59, %v7162_v47  ;;  %v2155_v48 = vmul.f32 %v5374_v55, %v7169_v34  ;;  %v3580_v23 = vmul.f32 %v3484_v3, %v7433_v22  ;;  %v5375_v1 = vld [vmem:[#allocation2 + $0x1f] sm:$0xff]  ;;  %v2255_v59 = vmul.f32 %v5376_v46, %v7183_v2  ;;  %v5379_v46 = vld [vmem:[#allocation2 + $0x31] sm:$0xff]  ;;  %v7459_v19 = vld [vmem:[#allocation2 + $0xe7] sm:$0xff] }
 0x151   : > { %2936 = vst.msk [vmem:[#allocation3 + $0xc8] sm:$0xff] %vm851_vm1, %v2904_v51  ;;  %v3623_v40 = vadd.f32 %v3591_v28, %v3559_v39  ;;  %vm4072_vm8 = vcmp.ge.f32.partialorder %v2684_v58, 0.0  ;;  %v4104_v61 = vmul.f32 0.25, %v2684_v58  ;;  %v3548_v42 = vadd.f32 %v3516_v8, %v3352_v18  ;;  %v7447_v51 = vld [vmem:[%s10813_s14] ss:$0 sm:$0xff]  ;;  %v11278_v18 = vld [vmem:[#allocation43_spill] sm:$0xff] }
 0x152   : > { %876 = vst.msk [vmem:[#allocation2 + $0x78] sm:$0xff] %vm851_vm1, %v792_v57  ;;  %v2121_v12 = vadd.f32 %v2089_v37, %v2055_v26  ;;  %v2221_v10 = vmul.f32 %v5375_v1, %v7176_v9  ;;  %v2321_v3 = vmul.f32 %v11264_v4, %v11278_v18  ;;  %v5378_v57 = vld [vmem:[#allocation2 + $0x21] sm:$0xff]  ;;  %v2485_v22 = vmul.f32 %v5379_v46, %v11266_v52  ;;  %v7481_v46 = vld [vmem:[#allocation2 + $0xd7] sm:$0xff] }
 0x153   : > { %v7450_v28 = vadd.f32 %v7447_v51, %v3623_v40  ;;  %v4136_v39 = vsel %vm4072_vm8, %v2684_v58, %v4104_v61  ;;  %v2451_v8 = vmul.f32 %v5378_v57, %v11265_v49  ;;  %v7455_v26 = vld [vmem:[#allocation3 + $0x31] sm:$0xff]  ;;  %v3612_v37 = vadd.f32 %v3580_v23, %v3548_v42  ;;  %v11280_v58 = vld [vmem:[#allocation79_spill] sm:$0xff] }
 0x154   : > { %11279 = vst [vmem:[#allocation16_spill] sm:$0xff] %v7455_v26  ;;  %4204 = vrot.lane.b32.xlu0 %v4136_v39, %s5719_s27  ;;  %v2187_v55 = vadd.f32 %v2155_v48, %v2121_v12  ;;  %v2287_v1 = vadd.f32 %v2255_v59, %v2221_v10  ;;  %v7461_v40 = vld [vmem:[#allocation3 + $0x30] sm:$0xff]  ;;  %v2551_v61 = vmul.f32 %v7371_v15, %v11280_v58  ;;  %v7466_v57 = vld [vmem:[#allocation2 + $0xe8] sm:$0xff]  ;;  %v11281_v42 = vld [vmem:[#allocation71_spill] sm:$0xff] }
 0x155   : > { %11277 = vst [vmem:[#allocation24_spill] sm:$0xff] %v7450_v28  ;;  %v840_v18 = vadd.f32 %v6974_v63, %v839_v54  ;;  %v1018_v23 = vmul.f32 %v7095_v33, %v7363_v0  ;;  %v1054_v48 = vmul.f32 %v7106_v60, %v7375_v38  ;;  %v7475_v12 = vadd.f32 %v7447_v51, %v3612_v37  ;;  %v7479_v54 = vld [vmem:[#allocation2 + $0xc7] sm:$0xff]  ;;  %v11285_v58 = vld [vmem:[#allocation36_spill] sm:$0xff] }
 0x156   : > { %3673 = vst.msk [vmem:[#allocation3 + $0x30] sm:$0xff] %vm851_vm1, %v11281_v42  ;;  %v2353_v10 = vadd.f32 %v2321_v3, %v2287_v1  ;;  %v2517_v59 = vadd.f32 %v2485_v22, %v2451_v8  ;;  %v1122_v39 = vmul.f32 %v7114_v53, %v7466_v57  ;;  %v2967_v28 = vld [vmem:[#allocation3 + $0xc0] sm:$0xff]  ;;  %v1220_v37 = vmul.f32 %v7121_v31, %v7479_v54 }
 0x157   : > { %11282 = vst [vmem:[#allocation43_spill] sm:$0xff] %v7475_v12  ;;  %v3033_v35 = vld [vmem:[#allocation3 + $0xbf] sm:$0xff]  ;;  %v1086_v42 = vadd.f32 %v1054_v48, %v1018_v23  ;;  %v1256_v22 = vmul.f32 %v7128_v43, %v7481_v46  ;;  %v1324_v3 = vmul.f32 %v7135_v36, %v7459_v19  ;;  %v3001_v8 = vmul.f32 %v7327_v32, %v2967_v28 }
 0x158   : > { %11283 = vst [vmem:[#allocation79_spill] sm:$0xff] %v7479_v54  ;;  %v3067_v1 = vmul.f32 %v7335_v17, %v3033_v35  ;;  %v3099_v12 = vld [vmem:[#allocation3 + $0xc1] sm:$0xff]  ;;  %v2583_v60 = vadd.f32 %v2551_v61, %v2517_v59  ;;  %v7495_v33 = vld [vmem:[#allocation2 + $0xc9] sm:$0xff]  ;;  %v7506_v59 = vld [vmem:[#allocation2 + $0xd9] sm:$0xff] }
 0x159   : > { %11284 = vst [vmem:[#allocation71_spill] sm:$0xff] %v7481_v46  ;;  %v974_v23 = vld [vmem:[#allocation2 + $0x78] sm:$0xff]  ;;  %v1154_v45 = vadd.f32 %v1122_v39, %v1086_v42  ;;  %v1288_v43 = vadd.f32 %v1256_v22, %v1220_v37  ;;  %v1646_v36 = vmul.f32 %v6992_v13, %v7495_v33  ;;  %v7511_v22 = vpop.permute.xlu1 %1847 }
 0x15a   : > { %3674 = vst.msk [vmem:[#allocation3 + $0x38] sm:$0xff] %vm851_vm1, %v11285_v58  ;;  %v11286_v58 = vld [vmem:[#allocation10_spill] sm:$0xff]  ;;  %v3386_v48 = vld [vmem:[#allocation2 + $0x77] sm:$0xff]  ;;  %v3165_v28 = vmul.f32 %v3067_v1, %v11257_v44  ;;  %v7502_v35 = vmul.f32 %v7025_v11, %v974_v23  ;;  %v3354_v61 = vmul.f32 %v7060_v5, %v974_v23 }
 0x15b   : > { %892 = vst.msk [vmem:[#allocation2 + $0xf8] sm:$0xff] %vm851_vm1, %v840_v18  ;;  %v2385_v53 = vmul.f32 %v2353_v10, %v11286_v58  ;;  %v3133_v18 = vmul.f32 %v7345_v29, %v3099_v12  ;;  %v3451_v31 = vld [vmem:[#allocation2 + $0x71] sm:$0xff]  ;;  %v2824_v10 = vmul.f32 %v7045_v24, %v974_v23  ;;  %v1616_v12 = vld [vmem:[#allocation2 + $0xe9] sm:$0xff]  ;;  %v3420_v39 = vmul.f32 %v6945_v50, %v3386_v48 }
 0x15c   : > { %11287 = vst [vmem:[#allocation36_spill] sm:$0xff] %v7495_v33  ;;  %v3485_v42 = vmul.f32 %v7054_v21, %v3451_v31  ;;  %v3197_v13 = vadd.f32 %v3165_v28, %v3001_v8  ;;  %v11291_v44 = vld [vmem:[#allocation44_spill] sm:$0xff]  ;;  %v1356_v26 = vadd.f32 %v1324_v3, %v1288_v43  ;;  %v2076_v3 = vmul.f32 %v7152_v41, %v7363_v0 }
 0x15d   : > { %11288 = vst [vmem:[#allocation89_spill] sm:$0xff] %v7502_v35  ;;  %v3229_v58 = vmul.f32 %v3133_v18, %v7317_v20  ;;  %v2417_v37 = vadd.f32 %v2385_v53, %v2187_v55  ;;  %v2856_v1 = vadd.f32 %v2824_v10, %v11291_v44  ;;  %v11292_v35 = vld [vmem:[#allocation65_spill] sm:$0xff]  ;;  %v11293_v17 = vld [vmem:[#allocation32_spill] sm:$0xff]  ;;  %v1682_v20 = vmul.f32 %v7000_v25, %v7506_v59 }
 0x15e   : > { %11289 = vst [vmem:[#allocation90_spill] sm:$0xff] %v7506_v59  ;;  %v2615_v29 = vmul.f32 %v2583_v60, %v11292_v35  ;;  %v3518_v23 = vmul.f32 %v3420_v39, %v11293_v17  ;;  %v3581_v56 = vmul.f32 %v3485_v42, %v7511_v22  ;;  %v1750_v18 = vmul.f32 %v7297_v6, %v1616_v12  ;;  %v11295_v55 = vld [vmem:[#allocation68_spill] sm:$0xff]  ;;  %v7542_v39 = vpop.permute.xlu2 %1912 }
 0x15f   : > { %11290 = vst [vmem:[#allocation91_spill] sm:$0xff] %v7511_v22  ;;  %v7520_v48 = vadd.f32 %v3229_v58, %v3197_v13  ;;  %v2892_v53 = vadd.f32 %v7249_v30, %v2856_v1  ;;  %v1548_v8 = vmul.f32 %v11295_v55, %v1356_v26  ;;  %v1714_v43 = vadd.f32 %v1682_v20, %v1646_v36 }
 0x160   : > { %v2647_v31 = vadd.f32 %v2615_v29, %v2417_v37  ;;  %v7524_v28 = vadd.f32 %v3518_v23, %v3354_v61  ;;  %v3613_v60 = vadd.f32 %v3581_v56, %v7352_v62  ;;  %v2110_v58 = vmul.f32 %v7162_v47, %v7375_v38  ;;  %v7551_v23 = vld [vmem:[#allocation2 + $0xe0] sm:$0xff] }
 0x161   : > { %11294 = vst [vmem:[#allocation44_spill] sm:$0xff] %v7520_v48  ;;  %v1580_v10 = vadd.f32 %v1548_v8, %v1154_v45  ;;  %v2176_v29 = vmul.f32 %v7169_v34, %v7466_v57  ;;  %v1782_v61 = vadd.f32 %v1750_v18, %v1714_v43  ;;  %v2242_v36 = vmul.f32 %v7176_v9, %v7479_v54  ;;  %v989_v8 = vld [vmem:[#allocation2 + $0xf0] sm:$0xff]  ;;  %v11320_v48 = vld [vmem:[#allocation12_spill] sm:$0xff] }
 0x162   : > { %2924 = vst.msk [vmem:[#allocation3 + $0x68] sm:$0xff] %vm851_vm1, %v2892_v53  ;;  %v2683_v25 = vadd.f32 %v7428_v16, %v2647_v31  ;;  %v7536_v26 = vadd.f32 %v7447_v51, %v3613_v60  ;;  %v2276_v62 = vmul.f32 %v7183_v2, %v7481_v46  ;;  %v2142_v45 = vadd.f32 %v2110_v58, %v2076_v3  ;;  %v11299_v58 = vld [vmem:[#allocation73_spill] sm:$0xff] }
 0x163   : > { %v2342_v42 = vmul.f32 %v11264_v4, %v7459_v19  ;;  %v1974_v37 = vmul.f32 %v7542_v39, %v1782_v61  ;;  %v2472_v44 = vmul.f32 %v11265_v49, %v7495_v33  ;;  %v2506_v1 = vmul.f32 %v11266_v52, %v7506_v59  ;;  %v3332_v52 = vld [vmem:[#allocation2 + $0xd8] sm:$0xff]  ;;  %v794_v61 = vpop.f32.mrf.mxu0 }
 0x164   : > { %11296 = vst [vmem:[#allocation68_spill] sm:$0xff] %v7536_v26  ;;  %vm4071_vm9 = vcmp.ge.f32.partialorder %v2683_v25, 0.0  ;;  %v4103_v56 = vmul.f32 0.25, %v2683_v25  ;;  %v2308_v13 = vadd.f32 %v2276_v62, %v2242_v36  ;;  %v2208_v18 = vadd.f32 %v2176_v29, %v2142_v45  ;;  %v7571_v29 = vpop.permute.xlu1 %1862 }
 0x165   : > { %v2572_v53 = vmul.f32 %v7371_v15, %v1616_v12  ;;  %v2738_v31 = vmul.f32 %v7025_v11, %v7363_v0  ;;  %v7557_v19 = vadd.f32 %v1974_v37, %v1580_v10  ;;  %v2538_v43 = vadd.f32 %v2506_v1, %v2472_v44  ;;  %11300 = vst [vmem:[#allocation73_spill] sm:$0xff] %v7571_v29 }
 0x166   : > { %v4135_v20 = vsel %vm4071_vm9, %v2683_v25, %v4103_v56  ;;  %v2374_v60 = vadd.f32 %v2342_v42, %v2308_v13  ;;  %v2739_v49 = vmul.f32 %v7025_v11, %v7260_v7  ;;  %v7563_v3 = vmul.f32 %v7025_v11, %v7466_v57 }
 0x167   : > { %4202 = vrot.lane.b32.xlu2 %v4135_v20, %s5719_s27  ;;  %11297 = vst [vmem:[#allocation92_spill] sm:$0xff] %v7557_v19  ;;  %v2772_v12 = vmul.f32 %v7036_v27, %v7375_v38  ;;  %v2773_v25 = vmul.f32 %v7036_v27, %v7551_v23  ;;  %v2803_v10 = vadd.f32 %v7391_v14, %v11299_v58  ;;  %v7586_v20 = vld [vmem:[%s10814_s15] ss:$0 sm:$0xff]  ;;  %v7604_v58 = vld [vmem:[#allocation3 + $0x28] sm:$0xff]  ;;  %v11314_v19 = vld [vmem:[#allocation10_spill] sm:$0xff] }
 0x168   : > { %11298 = vst [vmem:[#allocation93_spill] sm:$0xff] %v7563_v3  ;;  %v2406_v36 = vmul.f32 %v2374_v60, %v11295_v55  ;;  %v2604_v7 = vadd.f32 %v2572_v53, %v2538_v43  ;;  %v2837_v62 = vmul.f32 %v7045_v24, %v7551_v23  ;;  %v2838_v56 = vmul.f32 %v7045_v24, %v7466_v57  ;;  %v7591_v57 = vld [vmem:[%s10814_s15 + $0x1] ss:$0 sm:$0xff]  ;;  %v3702_v60 = vld [vmem:[#allocation3 + $0x8] sm:$0xff]  ;;  %v7596_v43 = vld [vmem:[#allocation3 + $0x18] sm:$0xff] }
 0x169   : > { %v2804_v45 = vadd.f32 %v2772_v12, %v2738_v31  ;;  %v2805_v38 = vadd.f32 %v2773_v25, %v2739_v49  ;;  %v2839_v42 = vmul.f32 %v7045_v24, %v989_v8  ;;  %v3366_v37 = vmul.f32 %v7060_v5, %v3332_v52  ;;  %11301 = vst [vmem:[#allocation94_spill] sm:$0xff] %v7586_v20  ;;  %v11321_v3 = vld [vmem:[#allocation42_spill] sm:$0xff] }
 0x16a   : > { %v2438_v13 = vadd.f32 %v2406_v36, %v2208_v18  ;;  %v2636_v14 = vmul.f32 %v2604_v7, %v7542_v39  ;;  %v2869_v44 = vadd.f32 %v2837_v62, %v2803_v10  ;;  %v3432_v1 = vmul.f32 %v6945_v50, %v7481_v46  ;;  %11302 = vst [vmem:[#allocation95_spill] sm:$0xff] %v7591_v57  ;;  %v842_v10 = vpop.f32.mrf.mxu2  ;;  %v11306_v62 = vld [vmem:[#allocation52_spill] sm:$0xff] }
 0x16b   : > { %v2870_v24 = vadd.f32 %v2838_v56, %v2804_v45  ;;  %v2871_v53 = vadd.f32 %v2839_v42, %v2805_v38  ;;  %v3498_v18 = vmul.f32 %v7054_v21, %v7506_v59  ;;  %v795_v31 = vadd.f32 %v6974_v63, %v794_v61  ;;  %11303 = vst [vmem:[#allocation96_spill] sm:$0xff] %v7596_v43  ;;  %v11307_v56 = vld [vmem:[#allocation87_spill] sm:$0xff]  ;;  %v7615_v38 = vld [vmem:[%s10814_s15 + $0x2] ss:$0 sm:$0xff] }
 0x16c   : > { %v7598_v49 = vadd.f32 %v2636_v14, %v2438_v13  ;;  %v2905_v52 = vadd.f32 %v7249_v30, %v2869_v44  ;;  %v3530_v12 = vmul.f32 %v3432_v1, %v11295_v55  ;;  %v2983_v25 = vmul.f32 %v7327_v32, %v7461_v40  ;;  %11305 = vst [vmem:[#allocation98_spill] sm:$0xff] %v7604_v58  ;;  %v7617_v40 = vld [vmem:[#allocation2 + $0xef] sm:$0xff]  ;;  %v7620_v13 = vpop.permute.xlu0 %1857  ;;  %v11311_v14 = vld [vmem:[#allocation16_spill] sm:$0xff]  ;;  %v11312_v44 = vld [vmem:[#allocation25_spill] sm:$0xff] }
 0x16d   : > { %v2906_v36 = vadd.f32 %v7249_v30, %v2870_v24  ;;  %v2907_v7 = vadd.f32 %v7249_v30, %v2871_v53  ;;  %v3594_v61 = vmul.f32 %v3498_v18, %v7542_v39  ;;  %877 = vst.msk [vmem:[#allocation2 + $0x80] sm:$0xff] %vm851_vm1, %v795_v31  ;;  %v3049_v45 = vmul.f32 %v11307_v56, %v11306_v62  ;;  %v7627_v18 = vld [vmem:[#allocation2 + $0xf1] sm:$0xff]  ;;  %v3325_v31 = vld [vmem:[#allocation2 + $0xa0] sm:$0xff] }
 0x16e   : > { %11304 = vst [vmem:[#allocation97_spill] sm:$0xff] %v7598_v49  ;;  %v3562_v42 = vadd.f32 %v3530_v12, %v3366_v37  ;;  %v3115_v1 = vmul.f32 %v11312_v44, %v11311_v14  ;;  %v3736_v24 = vmul.f32 %v7586_v20, %v3702_v60  ;;  %v3772_v53 = vmul.f32 %v7591_v57, %v7596_v43  ;;  %v7629_v62 = vld [vmem:[#allocation2 + $0x9f] sm:$0xff]  ;;  %v7697_v59 = vld [vmem:[#allocation3 + $0x20] sm:$0xff] }
 0x16f   : > { %11308 = vst [vmem:[#allocation52_spill] sm:$0xff] %v7615_v38  ;;  %v3840_v37 = vmul.f32 %v7615_v38, %v7604_v58  ;;  %v843_v12 = vadd.f32 %v6974_v63, %v842_v10  ;;  %v3369_v14 = vmul.f32 %v7060_v5, %v989_v8  ;;  %v7637_v60 = vld [vmem:[#allocation2 + $0xa1] sm:$0xff]  ;;  %v3501_v8 = vmul.f32 %v7054_v21, %v7627_v18  ;;  %v7651_v10 = vpop.permute.xlu1 %1877 }
 0x170   : > { %11309 = vst [vmem:[#allocation87_spill] sm:$0xff] %v7617_v40  ;;  %v3626_v17 = vadd.f32 %v3594_v61, %v3562_v42  ;;  %v3211_v22 = vmul.f32 %v3115_v1, %v11292_v35  ;;  %v3804_v26 = vadd.f32 %v3772_v53, %v3736_v24  ;;  %v3425_v61 = vmul.f32 %v6945_v50, %v7629_v62  ;;  %v797_v42 = vpop.f32.mrf.mxu0  ;;  %v7659_v53 = vpop.permute.xlu2 %1927  ;;  %v3703_v43 = vld [vmem:[#allocation3 + $0x10] sm:$0xff] }
 0x171   : > { %2937 = vst.msk [vmem:[#allocation3 + $0xd0] sm:$0xff] %vm851_vm1, %v2905_v52  ;;  %v3147_v52 = vmul.f32 %v3049_v45, %v11314_v19  ;;  %v3435_v45 = vmul.f32 %v6945_v50, %v7617_v40  ;;  %v3597_v19 = vmul.f32 %v3501_v8, %v7659_v53 }
 0x172   : > { %11310 = vst [vmem:[#allocation99_spill] sm:$0xff] %v7620_v13  ;;  %v7657_v1 = vadd.f32 %v7447_v51, %v3626_v17  ;;  %v3872_v24 = vadd.f32 %v3840_v37, %v3804_v26 }
 0x173   : > { %11313 = vst [vmem:[#allocation16_spill] sm:$0xff] %v7627_v18  ;;  %v3179_v49 = vadd.f32 %v3147_v52, %v2983_v25  ;;  %v11319_v25 = vld [vmem:[#allocation75_spill] sm:$0xff]  ;;  %v3490_v18 = vmul.f32 %v7054_v21, %v11321_v3 }
 0x174   : > { %2938 = vst.msk [vmem:[#allocation3 + $0xd8] sm:$0xff] %vm851_vm1, %v2906_v36  ;;  %v7644_v36 = vld [vmem:[%s10815_s16] ss:$0 sm:$0xff]  ;;  %v3533_v52 = vmul.f32 %v3435_v45, %v11319_v25  ;;  %v798_v45 = vadd.f32 %v6974_v63, %v797_v42 }
 0x175   : > { %2939 = vst.msk [vmem:[#allocation3 + $0xe0] sm:$0xff] %vm851_vm1, %v2907_v7  ;;  %v3359_v7 = vmul.f32 %v7060_v5, %v3325_v31  ;;  %v3243_v35 = vadd.f32 %v3211_v22, %v3179_v49  ;;  %v3523_v31 = vmul.f32 %v3425_v61, %v11320_v48  ;;  %v975_v40 = vld [vmem:[#allocation2 + $0x80] sm:$0xff]  ;;  %v3908_v26 = vadd.f32 %v7644_v36, %v3872_v24 }
 0x176   : > { %11315 = vst [vmem:[#allocation25_spill] sm:$0xff] %v7644_v36  ;;  %v3387_v58 = vld [vmem:[#allocation2 + $0x7f] sm:$0xff]  ;;  %v3565_v37 = vadd.f32 %v3533_v52, %v3369_v14  ;;  %v7672_v25 = vmul.f32 %v7025_v11, %v975_v40  ;;  %v2761_v22 = vmul.f32 %v7036_v27, %v975_v40  ;;  %v3355_v49 = vmul.f32 %v7060_v5, %v975_v40  ;;  %v11325_v52 = vld [vmem:[#allocation31_spill] sm:$0xff] }
 0x177   : > { %893 = vst.msk [vmem:[#allocation2 + $0x100] sm:$0xff] %vm851_vm1, %v843_v12  ;;  %v3491_v12 = vmul.f32 %v7054_v21, %v7637_v60  ;;  %v3452_v17 = vld [vmem:[#allocation2 + $0x79] sm:$0xff]  ;;  %v3421_v8 = vmul.f32 %v6945_v50, %v3387_v58  ;;  %vm4582_vm10 = vcmp.ge.f32.partialorder %v3908_v26, 0.0  ;;  %v4614_v11 = vmul.f32 0.25, %v3908_v26 }
 0x178   : > { %11316 = vst [vmem:[#allocation100_spill] sm:$0xff] %v7651_v10  ;;  %v7681_v14 = vld [vmem:[%s10811_s12] ss:$0 sm:$0xff] }
 0x179   : > { %11317 = vst [vmem:[#allocation101_spill] sm:$0xff] %v7657_v1  ;;  %v3587_v1 = vmul.f32 %v3491_v12, %v7651_v10  ;;  %v3279_v63 = vadd.f32 %v7681_v14, %v3243_v35  ;;  %v11324_v58 = vld [vmem:[#allocation85_spill] sm:$0xff]  ;;  %v3519_v12 = vmul.f32 %v3421_v8, %v11325_v52  ;;  %v845_v52 = vpop.f32.mrf.mxu2 }
 0x17a   : > { %11318 = vst [vmem:[#allocation102_spill] sm:$0xff] %v7659_v53  ;;  %v3486_v53 = vmul.f32 %v7054_v21, %v3452_v17  ;;  %v7688_v24 = vadd.f32 %v2761_v22, %v11324_v58  ;;  %v11326_v10 = vld [vmem:[#allocation45_spill] sm:$0xff]  ;;  %v3555_v58 = vadd.f32 %v3523_v31, %v3359_v7 }
 0x17b   : > { %11322 = vst [vmem:[#allocation42_spill] sm:$0xff] %v7672_v25  ;;  %v2970_v3 = vld [vmem:[#allocation3 + $0xd8] sm:$0xff]  ;;  %vm4328_vm11 = vcmp.ge.f32.partialorder %v3279_v63, 0.0  ;;  %v4360_v35 = vmul.f32 0.25, %v3279_v63  ;;  %v7693_v25 = vpop.permute.xlu0 %1872  ;;  %v7699_v22 = vld [vmem:[#allocation3 + $0x30] sm:$0xff] }
 0x17c   : > { %v3036_v61 = vld [vmem:[#allocation3 + $0xd7] sm:$0xff]  ;;  %11323 = vst [vmem:[#allocation103_spill] sm:$0xff] %v7681_v14  ;;  %v3004_v42 = vmul.f32 %v7327_v32, %v2970_v3  ;;  %v3582_v48 = vmul.f32 %v3486_v53, %v11326_v10  ;;  %v3551_v3 = vadd.f32 %v3519_v12, %v3355_v49  ;;  %v3629_v14 = vadd.f32 %v3597_v19, %v3565_v37  ;;  %v11336_v12 = vld [vmem:[#allocation47_spill] sm:$0xff] }
 0x17d   : > { %878 = vst.msk [vmem:[#allocation2 + $0x88] sm:$0xff] %vm851_vm1, %v798_v45  ;;  %v3070_v40 = vmul.f32 %v11307_v56, %v3036_v61  ;;  %v3102_v50 = vld [vmem:[#allocation3 + $0xd9] sm:$0xff]  ;;  %v4646_v61 = vsel %vm4582_vm10, %v3908_v26, %v4614_v11  ;;  %v4392_v53 = vsel %vm4328_vm11, %v3279_v63, %v4360_v35  ;;  %v7709_v19 = vmul.f32 %v3490_v18, %v7693_v25 }
 0x17e   : > { %v3136_v17 = vmul.f32 %v11312_v44, %v3102_v50  ;;  %11327 = vst [vmem:[#allocation85_spill] sm:$0xff] %v7693_v25  ;;  %v3614_v50 = vadd.f32 %v3582_v48, %v7524_v28  ;;  %4710 = vrot.lane.b32.xlu2 %v4646_v61, %s5721_s23  ;;  %4459 = vrot.lane.b32.xlu0 %v4392_v53, %s5720_s21  ;;  %v1182_v31 = vld [vmem:[#allocation2 + $0xa7] sm:$0xff]  ;;  %v11334_v11 = vld [vmem:[#allocation23_spill] sm:$0xff]  ;;  %v7738_v61 = vld [vmem:[%s10812_s13] ss:$0 sm:$0xff] }
 0x17f   : > { %v3168_v45 = vmul.f32 %v3070_v40, %v11295_v55  ;;  %11328 = vst [vmem:[#allocation104_spill] sm:$0xff] %v7697_v59  ;;  %v7706_v55 = vadd.f32 %v7447_v51, %v3629_v14  ;;  %v3737_v26 = vmul.f32 %v7586_v20, %v3703_v43  ;;  %v3619_v48 = vadd.f32 %v3587_v1, %v3555_v58  ;;  %v7724_v43 = vld [vmem:[%s11091_s22] ss:$0 sm:$0xff]  ;;  %v5382_v1 = vld [vmem:[#allocation2 + $0xa8] sm:$0xff] }
 0x180   : > { %11329 = vst [vmem:[#allocation105_spill] sm:$0xff] %v7699_v22  ;;  %v3232_v8 = vmul.f32 %v3136_v17, %v7542_v39  ;;  %v7713_v39 = vadd.f32 %v7447_v51, %v3614_v50  ;;  %v3773_v28 = vmul.f32 %v7591_v57, %v7697_v59  ;;  %v3841_v7 = vmul.f32 %v7615_v38, %v7699_v22  ;;  %v11335_v40 = vld [vmem:[#allocation5_spill] sm:$0xff]  ;;  %v11338_v58 = vld [vmem:[#allocation54_spill] sm:$0xff] }
 0x181   : > { %v3200_v10 = vadd.f32 %v3168_v45, %v3004_v42  ;;  %11330 = vst [vmem:[#allocation106_spill] sm:$0xff] %v7706_v55  ;;  %v846_v18 = vadd.f32 %v7724_v43, %v845_v52  ;;  %v1014_v42 = vmul.f32 %v5382_v1, %v11334_v11  ;;  %v1050_v17 = vmul.f32 %v11336_v12, %v11335_v40  ;;  %v7745_v11 = vld [vmem:[#allocation2 + $0xb7] sm:$0xff]  ;;  %v11361_v22 = vld [vmem:[#allocation82_spill] sm:$0xff] }
 0x182   : > { %11331 = vst [vmem:[#allocation107_spill] sm:$0xff] %v7709_v19  ;;  %v7731_v35 = vadd.f32 %v7447_v51, %v3619_v48  ;;  %v3805_v50 = vadd.f32 %v3773_v28, %v3737_v26  ;;  %v1118_v48 = vmul.f32 %v11338_v58, %v7363_v0  ;;  %v1745_v59 = vmul.f32 %v7297_v6, %v11361_v22  ;;  %v3097_v38 = vld [vmem:[#allocation3 + $0xb1] sm:$0xff] }
 0x183   : > { %11332 = vst [vmem:[#allocation108_spill] sm:$0xff] %v7713_v39  ;;  %v7719_v37 = vadd.f32 %v3232_v8, %v3200_v10  ;;  %v1082_v53 = vadd.f32 %v1050_v17, %v1014_v42  ;;  %v11342_v39 = vld [vmem:[#allocation55_spill] sm:$0xff]  ;;  %v11345_v42 = vld [vmem:[#allocation34_spill] sm:$0xff]  ;;  %v3131_v19 = vmul.f32 %v11312_v44, %v3097_v38 }
 0x184   : > { %v976_v49 = vld [vmem:[#allocation2 + $0x88] sm:$0xff]  ;;  %11337 = vst [vmem:[#allocation23_spill] sm:$0xff] %v7731_v35  ;;  %v11343_v35 = vld [vmem:[#allocation63_spill] sm:$0xff]  ;;  %v3873_v26 = vadd.f32 %v3841_v7, %v3805_v50  ;;  %v7770_v50 = vld [vmem:[#allocation2 + $0xb9] sm:$0xff] }
 0x185   : > { %11333 = vst [vmem:[#allocation109_spill] sm:$0xff] %v7719_v37  ;;  %v3388_v14 = vld [vmem:[#allocation2 + $0x87] sm:$0xff]  ;;  %v2762_v10 = vmul.f32 %v7036_v27, %v976_v49  ;;  %v3356_v45 = vmul.f32 %v7060_v5, %v976_v49  ;;  %v1216_v37 = vmul.f32 %v11342_v39, %v1182_v31  ;;  %v1150_v28 = vadd.f32 %v1118_v48, %v1082_v53 }
 0x186   : > { %v3453_v63 = vld [vmem:[#allocation2 + $0x81] sm:$0xff]  ;;  %v3422_v52 = vmul.f32 %v7738_v61, %v3388_v14  ;;  %894 = vst.msk [vmem:[#allocation2 + $0x108] sm:$0xff] %vm851_vm1, %v846_v18  ;;  %v1252_v14 = vmul.f32 %v11343_v35, %v7745_v11  ;;  %v5385_v39 = vld [vmem:[#allocation2 + $0xa9] sm:$0xff]  ;;  %v3909_v7 = vadd.f32 %v7644_v36, %v3873_v26 }
 0x187   : > { %v3487_v8 = vmul.f32 %v7054_v21, %v3453_v63  ;;  %11339 = vst [vmem:[#allocation5_spill] sm:$0xff] %v7745_v11  ;;  %v11340_v27 = vld [vmem:[#allocation89_spill] sm:$0xff]  ;;  %v11344_v63 = vld [vmem:[#allocation70_spill] sm:$0xff] }
 0x188   : > { %v2794_v5 = vadd.f32 %v2762_v10, %v11340_v27  ;;  %v11341_v49 = vld [vmem:[#allocation9_spill] sm:$0xff]  ;;  %v1320_v18 = vmul.f32 %v11344_v63, %v7479_v54  ;;  %v1284_v25 = vadd.f32 %v1252_v14, %v1216_v37  ;;  %11346 = vst [vmem:[#allocation47_spill] sm:$0xff] %v7770_v50  ;;  %v2106_v27 = vmul.f32 %v11336_v12, %v7162_v47  ;;  %v11348_v63 = vld [vmem:[#allocation19_spill] sm:$0xff] }
 0x189   : > { %v3520_v40 = vmul.f32 %v3422_v52, %v11341_v49  ;;  %v3583_v21 = vmul.f32 %v3487_v8, %v7620_v13  ;;  %v7761_v10 = vld [vmem:[%s10804_s5 + $0x2] ss:$0 sm:$0xff]  ;;  %v7768_v8 = vld [vmem:[%s10804_s5 + $0x5] ss:$0 sm:$0xff]  ;;  %vm4583_vm12 = vcmp.ge.f32.partialorder %v3909_v7, 0.0  ;;  %v3460_v13 = vld [vmem:[#allocation2 + $0xb9] sm:$0xff] }
 0x18a   : > { %v2860_v17 = vadd.f32 %v11345_v42, %v2794_v5  ;;  %v1642_v35 = vmul.f32 %v5385_v39, %v7761_v10  ;;  %v1678_v37 = vmul.f32 %v7770_v50, %v7768_v8  ;;  %v1352_v48 = vadd.f32 %v1320_v18, %v1284_v25  ;;  %v7791_v47 = vld [vmem:[%s10808_s9 + $0x1] ss:$0 sm:$0xff]  ;;  %v7799_v12 = vld [vmem:[%s10808_s9 + $0x2] ss:$0 sm:$0xff] }
 0x18b   : > { %v7756_v58 = vadd.f32 %v3520_v40, %v3356_v45  ;;  %v3615_v52 = vadd.f32 %v3583_v21, %v3551_v3  ;;  %v1746_v45 = vmul.f32 %v7297_v6, %v7495_v33  ;;  %v2072_v3 = vmul.f32 %v5382_v1, %v7152_v41  ;;  %11350 = vst [vmem:[#allocation55_spill] sm:$0xff] %v7799_v12  ;;  %v3031_v36 = vld [vmem:[#allocation3 + $0xaf] sm:$0xff] }
 0x18c   : > { %v2896_v53 = vadd.f32 %v7249_v30, %v2860_v17  ;;  %v4615_v40 = vmul.f32 0.25, %v3909_v7  ;;  %v1710_v14 = vadd.f32 %v1678_v37, %v1642_v35  ;;  %v1544_v42 = vmul.f32 %v11348_v63, %v1352_v48  ;;  %v3032_v37 = vld [vmem:[#allocation3 + $0xb7] sm:$0xff] }
 0x18d   : > { %v7781_v5 = vadd.f32 %v7447_v51, %v3615_v52  ;;  %v1026_v21 = vld [vmem:[#allocation2 + $0x108] sm:$0xff]  ;;  %v2138_v49 = vadd.f32 %v2106_v27, %v2072_v3  ;;  %v2172_v30 = vmul.f32 %v7169_v34, %v7363_v0  ;;  %v2238_v41 = vmul.f32 %v7176_v9, %v1182_v31  ;;  %v7807_v34 = vld [vmem:[%s10812_s13 + $0x1] ss:$0 sm:$0xff]  ;;  %v1893_v0 = vpop.permute.xlu1 %1892  ;;  %v7819_v27 = vld [vmem:[%s10806_s7 + $0x2] ss:$0 sm:$0xff] }
 0x18e   : > { %2928 = vst.msk [vmem:[#allocation3 + $0x88] sm:$0xff] %vm851_vm1, %v2896_v53  ;;  %v3404_v26 = vld [vmem:[#allocation2 + $0x107] sm:$0xff]  ;;  %v4647_v25 = vsel %vm4583_vm12, %v3909_v7, %v4615_v40  ;;  %v7794_v1 = vmul.f32 %v7791_v47, %v1026_v21  ;;  %v7802_v18 = vmul.f32 %v7799_v12, %v1026_v21  ;;  %v3372_v9 = vmul.f32 %v7807_v34, %v1026_v21 }
 0x18f   : > { %11347 = vst [vmem:[#allocation54_spill] sm:$0xff] %v7781_v5  ;;  %v2966_v31 = vld [vmem:[#allocation3 + $0xb8] sm:$0xff]  ;;  %4712 = vrot.lane.b32.xlu2 %v4647_v25, %s5721_s23  ;;  %v3438_v17 = vmul.f32 %v7738_v61, %v3404_v26  ;;  %v1576_v35 = vadd.f32 %v1544_v42, %v1150_v28  ;;  %v1778_v52 = vadd.f32 %v1746_v45, %v1710_v14  ;;  %v7825_v28 = vld [vmem:[%s10806_s7 + $0x5] ss:$0 sm:$0xff]  ;;  %v3328_v45 = vld [vmem:[#allocation2 + $0xb8] sm:$0xff] }
 0x190   : > { %11349 = vst [vmem:[#allocation89_spill] sm:$0xff] %v7794_v1  ;;  %v2204_v7 = vadd.f32 %v2172_v30, %v2138_v49  ;;  %v3098_v53 = vld [vmem:[#allocation3 + $0xb9] sm:$0xff]  ;;  %v2272_v48 = vmul.f32 %v7183_v2, %v7745_v11  ;;  %v2338_v3 = vmul.f32 %v11264_v4, %v7479_v54  ;;  %v2468_v40 = vmul.f32 %v7819_v27, %v5385_v39 }
 0x191   : > { %11351 = vst [vmem:[#allocation63_spill] sm:$0xff] %v7802_v18  ;;  %v2502_v49 = vmul.f32 %v7825_v28, %v7770_v50  ;;  %v11352_v2 = vld [vmem:[#allocation30_spill] sm:$0xff]  ;;  %v1970_v21 = vmul.f32 %v1893_v0, %v1778_v52  ;;  %v2568_v4 = vmul.f32 %v7371_v15, %v7495_v33  ;;  %v3000_v26 = vmul.f32 %v7327_v32, %v2966_v31 }
 0x192   : > { %v3536_v14 = vmul.f32 %v3438_v17, %v11352_v2  ;;  %v2304_v42 = vadd.f32 %v2272_v48, %v2238_v41  ;;  %v3066_v39 = vmul.f32 %v11307_v56, %v3032_v37  ;;  %v3132_v25 = vmul.f32 %v11312_v44, %v3098_v53  ;;  %v7846_v37 = vld [vmem:[%s10812_s13 + $0x2] ss:$0 sm:$0xff]  ;;  %v7853_v53 = vld [vmem:[%s10804_s5 + $0x1] ss:$0 sm:$0xff] }
 0x193   : > { %v2534_v30 = vadd.f32 %v2502_v49, %v2468_v40  ;;  %v7837_v55 = vadd.f32 %v1970_v21, %v1576_v35  ;;  %v3362_v18 = vmul.f32 %v7807_v34, %v3328_v45  ;;  %v3428_v17 = vmul.f32 %v7738_v61, %v7745_v11  ;;  %v5395_v48 = vld [vmem:[#allocation2 + $0xa0] sm:$0xff]  ;;  %v11355_v49 = vld [vmem:[#allocation83_spill] sm:$0xff]  ;;  %v800_v11 = vpop.f32.mrf.mxu0 }
 0x194   : > { %v7835_v5 = vadd.f32 %v3536_v14, %v3372_v9  ;;  %v2370_v52 = vadd.f32 %v2338_v3, %v2304_v42  ;;  %v3164_v31 = vmul.f32 %v3066_v39, %v11348_v63  ;;  %v3228_v41 = vmul.f32 %v3132_v25, %v1893_v0  ;;  %v7859_v40 = vld [vmem:[%s10804_s5 + $0x4] ss:$0 sm:$0xff] }
 0x195   : > { %11354 = vst [vmem:[#allocation34_spill] sm:$0xff] %v7837_v55  ;;  %v2600_v2 = vadd.f32 %v2568_v4, %v2534_v30  ;;  %v3494_v9 = vmul.f32 %v7846_v37, %v3460_v13  ;;  %v3526_v35 = vmul.f32 %v3428_v17, %v11348_v63  ;;  %v1013_v3 = vmul.f32 %v5395_v48, %v7853_v53  ;;  %v7867_v4 = vld [vmem:[%s10804_s5 + $0x7] ss:$0 sm:$0xff]  ;;  %v7876_v55 = vld [vmem:[%s10804_s5] ss:$0 sm:$0xff] }
 0x196   : > { %11353 = vst [vmem:[#allocation70_spill] sm:$0xff] %v7835_v5  ;;  %v1049_v45 = vmul.f32 %v7859_v40, %v11355_v49  ;;  %v2402_v13 = vmul.f32 %v2370_v52, %v11348_v63  ;;  %v3196_v21 = vadd.f32 %v3164_v31, %v3000_v26  ;;  %v7869_v42 = vld [vmem:[#allocation2 + $0xc0] sm:$0xff]  ;;  %v1215_v63 = vmul.f32 %v7876_v55, %v7629_v62 }
 0x197   : > { %v2632_v14 = vmul.f32 %v2600_v2, %v1893_v0  ;;  %v1117_v30 = vmul.f32 %v7869_v42, %v7867_v4  ;;  %v3558_v39 = vadd.f32 %v3526_v35, %v3362_v18  ;;  %v3590_v25 = vmul.f32 %v3494_v9, %v1893_v0  ;;  %v7885_v52 = vld [vmem:[%s10804_s5 + $0x3] ss:$0 sm:$0xff]  ;;  %v7892_v0 = vld [vmem:[%s10804_s5 + $0x6] ss:$0 sm:$0xff] }
 0x198   : > { %v1081_v17 = vadd.f32 %v1049_v45, %v1013_v3  ;;  %v2434_v2 = vadd.f32 %v2402_v13, %v2204_v7  ;;  %v7880_v26 = vadd.f32 %v3228_v41, %v3196_v21  ;;  %v11357_v31 = vld [vmem:[#allocation77_spill] sm:$0xff]  ;;  %v1641_v41 = vmul.f32 %v7761_v10, %v7637_v60 }
 0x199   : > { %v1251_v18 = vmul.f32 %v7885_v52, %v11357_v31  ;;  %v11358_v9 = vld [vmem:[#allocation13_spill] sm:$0xff]  ;;  %v3622_v3 = vadd.f32 %v3590_v25, %v3558_v39  ;;  %v2467_v20 = vmul.f32 %v7819_v27, %v7637_v60  ;;  %v2567_v54 = vmul.f32 %v7371_v15, %v11361_v22 }
 0x19a   : > { %11356 = vst [vmem:[#allocation19_spill] sm:$0xff] %v7880_v26  ;;  %v1319_v35 = vmul.f32 %v7892_v0, %v11358_v9  ;;  %v1149_v7 = vadd.f32 %v1117_v30, %v1081_v17  ;;  %v11359_v45 = vld [vmem:[#allocation81_spill] sm:$0xff]  ;;  %v7900_v21 = vadd.f32 %v2632_v14, %v2434_v2  ;;  %v801_v15 = vadd.f32 %v7724_v43, %v800_v11 }
 0x19b   : > { %v1677_v13 = vmul.f32 %v7768_v8, %v11359_v45  ;;  %v1283_v1 = vadd.f32 %v1251_v18, %v1215_v63  ;;  %v7907_v26 = vld [vmem:[%s10806_s7 + $0x1] ss:$0 sm:$0xff]  ;;  %v3658_v30 = vadd.f32 %v7447_v51, %v3622_v3  ;;  %v7914_v17 = vld [vmem:[%s10806_s7 + $0x4] ss:$0 sm:$0xff]  ;;  %v7921_v63 = vld [vmem:[%s10806_s7 + $0x7] ss:$0 sm:$0xff]  ;;  %v1888_v18 = vpop.permute.xlu0 %1887  ;;  %v2501_v33 = vmul.f32 %v7825_v28, %v11359_v45 }
 0x19c   : > { %11360 = vst [vmem:[#allocation83_spill] sm:$0xff] %v7900_v21  ;;  %v2071_v39 = vmul.f32 %v7907_v26, %v5395_v48  ;;  %v2105_v14 = vmul.f32 %v7914_v17, %v11355_v49  ;;  %v2171_v2 = vmul.f32 %v7921_v63, %v7869_v42  ;;  %v2965_v48 = vld [vmem:[#allocation3 + $0xb0] sm:$0xff] }
 0x19d   : > { %v1709_v25 = vadd.f32 %v1677_v13, %v1641_v41  ;;  %v1351_v3 = vadd.f32 %v1319_v35, %v1283_v1  ;;  %v7928_v41 = vld [vmem:[%s10806_s7] ss:$0 sm:$0xff]  ;;  %v7935_v49 = vld [vmem:[%s10806_s7 + $0x3] ss:$0 sm:$0xff]  ;;  %v7942_v1 = vld [vmem:[%s10806_s7 + $0x6] ss:$0 sm:$0xff] }
 0x19e   : > { %v2237_v13 = vmul.f32 %v7928_v41, %v7629_v62  ;;  %v2271_v21 = vmul.f32 %v7935_v49, %v11357_v31  ;;  %v2337_v35 = vmul.f32 %v7942_v1, %v11358_v9  ;;  %v2137_v62 = vadd.f32 %v2105_v14, %v2071_v39  ;;  %3690 = vst.msk [vmem:[#allocation3 + $0xb8] sm:$0xff] %vm851_vm1, %v3658_v30  ;;  %v11362_v31 = vld [vmem:[#allocation50_spill] sm:$0xff]  ;;  %v11363_v22 = vld [vmem:[#allocation49_spill] sm:$0xff] }
 0x19f   : > { %v1777_v57 = vadd.f32 %v1745_v59, %v1709_v25  ;;  %v1543_v50 = vmul.f32 %v11362_v31, %v1351_v3  ;;  %v2999_v9 = vmul.f32 %v7327_v32, %v2965_v48  ;;  %v2533_v39 = vadd.f32 %v2501_v33, %v2467_v20  ;;  %879 = vst.msk [vmem:[#allocation2 + $0x90] sm:$0xff] %vm851_vm1, %v801_v15 }
 0x1a0   : > { %v2303_v46 = vadd.f32 %v2271_v21, %v2237_v13  ;;  %v2203_v59 = vadd.f32 %v2171_v2, %v2137_v62  ;;  %v3065_v25 = vmul.f32 %v11307_v56, %v3031_v36  ;;  %v3493_v30 = vmul.f32 %v7846_v37, %v11359_v45  ;;  %v11365_v36 = vld [vmem:[#allocation62_spill] sm:$0xff]  ;;  %v7975_v45 = vld [vmem:[#allocation2 + $0xd0] sm:$0xff]  ;;  %v5409_v62 = vld [vmem:[#allocation2 + $0xbf] sm:$0xff] }
 0x1a1   : > { %v1969_v5 = vmul.f32 %v1888_v18, %v1777_v57  ;;  %v1575_v60 = vadd.f32 %v1543_v50, %v1149_v7  ;;  %v2599_v3 = vadd.f32 %v2567_v54, %v2533_v39  ;;  %v2701_v32 = vadd.f32 %v7428_v16, %v11363_v22  ;;  %v848_v57 = vpop.f32.mrf.mxu2  ;;  %v7981_v13 = vld [vmem:[#allocation2 + $0xe1] sm:$0xff] }
 0x1a2   : > { %v2369_v14 = vadd.f32 %v2337_v35, %v2303_v46  ;;  %v3163_v21 = vmul.f32 %v3065_v25, %v11362_v31  ;;  %v3227_v20 = vmul.f32 %v3131_v19, %v1888_v18  ;;  %v3589_v46 = vmul.f32 %v3493_v30, %v1888_v18  ;;  %11367 = vst [vmem:[#allocation81_spill] sm:$0xff] %v7981_v13  ;;  %v7997_v30 = vld [vmem:[#allocation2 + $0xd1] sm:$0xff] }
 0x1a3   : > { %v7963_v2 = vadd.f32 %v1969_v5, %v1575_v60  ;;  %v2631_v56 = vmul.f32 %v2599_v3, %v1888_v18  ;;  %vm4089_vm13 = vcmp.ge.f32.partialorder %v2701_v32, 0.0  ;;  %v4121_v54 = vmul.f32 0.25, %v2701_v32  ;;  %v7971_v5 = vld [vmem:[#allocation2 + $0xdf] sm:$0xff]  ;;  %11368 = vst [vmem:[#allocation82_spill] sm:$0xff] %v7997_v30 }
 0x1a4   : > { %v2401_v33 = vmul.f32 %v2369_v14, %v11362_v31  ;;  %v3195_v38 = vadd.f32 %v3163_v21, %v2999_v9  ;;  %v3621_v50 = vadd.f32 %v3589_v46, %v11365_v36  ;;  %v849_v11 = vadd.f32 %v7724_v43, %v848_v57  ;;  %11366 = vst [vmem:[#allocation13_spill] sm:$0xff] %v7971_v5  ;;  %v5411_v60 = vld [vmem:[#allocation2 + $0xc1] sm:$0xff] }
 0x1a5   : > { %11364 = vst [vmem:[#allocation77_spill] sm:$0xff] %v7963_v2  ;;  %v1017_v16 = vmul.f32 %v7869_v42, %v7853_v53  ;;  %v4153_v19 = vsel %vm4089_vm13, %v2701_v32, %v4121_v54  ;;  %v1053_v48 = vmul.f32 %v7975_v45, %v7859_v40  ;;  %v1121_v18 = vmul.f32 %v7867_v4, %v7551_v23  ;;  %v8007_v32 = vld [vmem:[#allocation3 + $0xc7] sm:$0xff] }
 0x1a6   : > { %v2433_v44 = vadd.f32 %v2401_v33, %v2203_v59  ;;  %v7973_v7 = vadd.f32 %v3227_v20, %v3195_v38  ;;  %v3657_v43 = vadd.f32 %v7447_v51, %v3621_v50  ;;  %4238 = vrot.lane.b32.xlu2 %v4153_v19, %s5719_s27  ;;  %895 = vst.msk [vmem:[#allocation2 + $0x110] sm:$0xff] %vm851_vm1, %v849_v11  ;;  %v7989_v59 = vld [vmem:[#allocation2 + $0xcf] sm:$0xff]  ;;  %v3390_v54 = vld [vmem:[#allocation2 + $0x97] sm:$0xff] }
 0x1a7   : > { %v1219_v31 = vmul.f32 %v5409_v62, %v7876_v55  ;;  %v1085_v9 = vadd.f32 %v1053_v48, %v1017_v16  ;;  %v1255_v39 = vmul.f32 %v7989_v59, %v7885_v52  ;;  %v1323_v25 = vmul.f32 %v7892_v0, %v7971_v5  ;;  %v977_v38 = vld [vmem:[#allocation2 + $0x90] sm:$0xff] }
 0x1a8   : > { %v7983_v35 = vadd.f32 %v2631_v56, %v2433_v44  ;;  %v1645_v14 = vmul.f32 %v5411_v60, %v7761_v10  ;;  %3689 = vst.msk [vmem:[#allocation3 + $0xb0] sm:$0xff] %vm851_vm1, %v3657_v43  ;;  %v1681_v3 = vmul.f32 %v7997_v30, %v7768_v8  ;;  %v1749_v21 = vmul.f32 %v7297_v6, %v7981_v13  ;;  %v11369_v56 = vld [vmem:[#allocation24_spill] sm:$0xff]  ;;  %v3389_v6 = vld [vmem:[#allocation2 + $0x8f] sm:$0xff] }
 0x1a9   : > { %v2075_v15 = vmul.f32 %v7907_v26, %v7869_v42  ;;  %v2109_v22 = vmul.f32 %v7975_v45, %v7914_v17  ;;  %v1153_v57 = vadd.f32 %v1121_v18, %v1085_v9  ;;  %v1287_v33 = vadd.f32 %v1255_v39, %v1219_v31  ;;  %3691 = vst.msk [vmem:[#allocation3 + $0xc0] sm:$0xff] %vm851_vm1, %v11369_v56  ;;  %v3454_v48 = vld [vmem:[#allocation2 + $0x89] sm:$0xff]  ;;  %v3455_v18 = vld [vmem:[#allocation2 + $0x91] sm:$0xff]  ;;  %v8027_v9 = vpop.permute.xlu1 %1907 }
 0x1aa   : > { %v2175_v20 = vmul.f32 %v7921_v63, %v7551_v23  ;;  %v2241_v46 = vmul.f32 %v5409_v62, %v7928_v41  ;;  %v1713_v44 = vadd.f32 %v1681_v3, %v1645_v14  ;;  %v2275_v36 = vmul.f32 %v7989_v59, %v7935_v49  ;;  %v11371_v3 = vld [vmem:[#allocation39_spill] sm:$0xff] }
 0x1ab   : > { %v2141_v42 = vadd.f32 %v2109_v22, %v2075_v15  ;;  %v2341_v50 = vmul.f32 %v7942_v1, %v7971_v5  ;;  %v8019_v11 = vmul.f32 %v7791_v47, %v977_v38  ;;  %v2827_v23 = vmul.f32 %v7799_v12, %v977_v38 }
 0x1ac   : > { %v3357_v16 = vmul.f32 %v7807_v34, %v977_v38  ;;  %v3423_v19 = vmul.f32 %v7738_v61, %v3389_v6  ;;  %v3424_v43 = vmul.f32 %v7738_v61, %v3390_v54  ;;  %v3488_v62 = vmul.f32 %v7846_v37, %v3454_v48  ;;  %v11373_v6 = vld [vmem:[#allocation38_spill] sm:$0xff]  ;;  %v11374_v54 = vld [vmem:[#allocation15_spill] sm:$0xff] }
 0x1ad   : > { %11370 = vst [vmem:[#allocation50_spill] sm:$0xff] %v8019_v11  ;;  %v3489_v31 = vmul.f32 %v7846_v37, %v3455_v18  ;;  %v1355_v39 = vadd.f32 %v1323_v25, %v1287_v33  ;;  %v2859_v14 = vadd.f32 %v2827_v23, %v7688_v24  ;;  %v8031_v22 = vld [vmem:[#allocation2 + $0x109] sm:$0xff]  ;;  %v1781_v56 = vadd.f32 %v1749_v21, %v1713_v44  ;;  %v8038_v18 = vpop.permute.xlu2 %1942  ;;  %v8043_v24 = vld [vmem:[%s10809_s10] ss:$0 sm:$0xff] }
 0x1ae   : > { %v3521_v15 = vmul.f32 %v3423_v19, %v11371_v3  ;;  %11372 = vst [vmem:[#allocation49_spill] sm:$0xff] %v8031_v22  ;;  %v2207_v38 = vadd.f32 %v2175_v20, %v2141_v42  ;;  %v3522_v2 = vmul.f32 %v3424_v43, %v11373_v6  ;;  %v3584_v11 = vmul.f32 %v3488_v62, %v7571_v29  ;;  %v11377_v33 = vld [vmem:[#allocation29_spill] sm:$0xff]  ;;  %v11378_v42 = vld [vmem:[#allocation35_spill] sm:$0xff]  ;;  %v5419_v29 = vld [vmem:[#allocation2 + $0xc8] sm:$0xff] }
 0x1af   : > { %v3585_v5 = vmul.f32 %v3489_v31, %v11374_v54  ;;  %v3504_v48 = vmul.f32 %v7846_v37, %v8031_v22  ;;  %11375 = vst [vmem:[#allocation62_spill] sm:$0xff] %v8038_v18  ;;  %v2895_v25 = vadd.f32 %v8043_v24, %v2859_v14  ;;  %v1547_v20 = vmul.f32 %v11377_v33, %v1355_v39  ;;  %v2969_v14 = vld [vmem:[#allocation3 + $0xd0] sm:$0xff]  ;;  %v11379_v39 = vld [vmem:[#allocation107_spill] sm:$0xff] }
 0x1b0   : > { %11376 = vst [vmem:[#allocation24_spill] sm:$0xff] %v8043_v24  ;;  %v3553_v21 = vadd.f32 %v3521_v15, %v3357_v16  ;;  %v1973_v44 = vmul.f32 %v8027_v9, %v1781_v56  ;;  %v3554_v23 = vadd.f32 %v3522_v2, %v11378_v42  ;;  %v3616_v19 = vadd.f32 %v3584_v11, %v7756_v58  ;;  %v11381_v2 = vld [vmem:[#allocation70_spill] sm:$0xff] }
 0x1b1   : > { %v3600_v43 = vmul.f32 %v3504_v48, %v8038_v18  ;;  %v2307_v62 = vadd.f32 %v2275_v36, %v2241_v46  ;;  %2927 = vst.msk [vmem:[#allocation3 + $0x80] sm:$0xff] %vm851_vm1, %v2895_v25  ;;  %v1579_v54 = vadd.f32 %v1547_v20, %v1153_v57  ;;  %v2471_v3 = vmul.f32 %v5411_v60, %v7819_v27  ;;  %v3035_v48 = vld [vmem:[#allocation3 + $0xcf] sm:$0xff]  ;;  %v3331_v46 = vld [vmem:[#allocation2 + $0xd0] sm:$0xff]  ;;  %v8068_v57 = vld [vmem:[%s10806_s7 + $0x8] ss:$0 sm:$0xff] }
 0x1b2   : > { %v3617_v31 = vadd.f32 %v3585_v5, %v3553_v21  ;;  %v2505_v16 = vmul.f32 %v7997_v30, %v7825_v28  ;;  %v3618_v15 = vadd.f32 %v11379_v39, %v3554_v23  ;;  %v8057_v56 = vadd.f32 %v7447_v51, %v3616_v19  ;;  %v3397_v21 = vld [vmem:[#allocation2 + $0xcf] sm:$0xff]  ;;  %v3101_v23 = vld [vmem:[#allocation3 + $0xd1] sm:$0xff] }
 0x1b3   : > { %v3632_v58 = vadd.f32 %v3600_v43, %v11381_v2  ;;  %v2373_v11 = vadd.f32 %v2341_v50, %v2307_v62  ;;  %v8063_v5 = vadd.f32 %v1973_v44, %v1579_v54  ;;  %v2571_v25 = vmul.f32 %v8068_v57, %v7981_v13  ;;  %v3463_v20 = vld [vmem:[#allocation2 + $0xd1] sm:$0xff]  ;;  %v8088_v43 = vld [vmem:[%s10810_s11] ss:$0 sm:$0xff] }
 0x1b4   : > { %11380 = vst [vmem:[#allocation29_spill] sm:$0xff] %v8057_v56  ;;  %v8061_v36 = vadd.f32 %v7447_v51, %v3617_v31  ;;  %v2537_v60 = vadd.f32 %v2505_v16, %v2471_v3  ;;  %v8073_v50 = vadd.f32 %v7447_v51, %v3618_v15  ;;  %v8082_v3 = vld [vmem:[%s10810_s11 + $0x1] ss:$0 sm:$0xff]  ;;  %v3069_v62 = vmul.f32 %v8088_v43, %v3035_v48  ;;  %v8094_v31 = vld [vmem:[%s10810_s11 + $0x2] ss:$0 sm:$0xff] }
 0x1b5   : > { %11383 = vst [vmem:[#allocation107_spill] sm:$0xff] %v8063_v5  ;;  %v8076_v42 = vadd.f32 %v7447_v51, %v3632_v58  ;;  %v2405_v54 = vmul.f32 %v2373_v11, %v11377_v33  ;;  %v3003_v44 = vmul.f32 %v8082_v3, %v2969_v14  ;;  %v3135_v16 = vmul.f32 %v8094_v31, %v3101_v23  ;;  %v5418_v58 = vld [vmem:[#allocation2 + $0xb8] sm:$0xff] }
 0x1b6   : > { %11382 = vst [vmem:[#allocation35_spill] sm:$0xff] %v8061_v36  ;;  %v2603_v19 = vadd.f32 %v2571_v25, %v2537_v60  ;;  %v3365_v39 = vmul.f32 %v7807_v34, %v3331_v46  ;;  %v3431_v14 = vmul.f32 %v7738_v61, %v3397_v21  ;;  %v3497_v2 = vmul.f32 %v7846_v37, %v3463_v20  ;;  %v8107_v46 = vld [vmem:[#allocation2 + $0xd8] sm:$0xff]  ;;  %v11386_v20 = vld [vmem:[#allocation5_spill] sm:$0xff]  ;;  %v11389_v36 = vld [vmem:[#allocation71_spill] sm:$0xff] }
 0x1b7   : > { %11384 = vst [vmem:[#allocation70_spill] sm:$0xff] %v8073_v50  ;;  %v2437_v15 = vadd.f32 %v2405_v54, %v2207_v38  ;;  %v1016_v11 = vmul.f32 %v5418_v58, %v7853_v53  ;;  %v3167_v48 = vmul.f32 %v3069_v62, %v11377_v33  ;;  %v3231_v25 = vmul.f32 %v3135_v16, %v8027_v9  ;;  %v11388_v16 = vld [vmem:[#allocation79_spill] sm:$0xff] }
 0x1b8   : > { %11385 = vst [vmem:[#allocation110_spill] sm:$0xff] %v8076_v42  ;;  %v2635_v60 = vmul.f32 %v2603_v19, %v8027_v9  ;;  %v1052_v18 = vmul.f32 %v5419_v29, %v7859_v40  ;;  %v3529_v23 = vmul.f32 %v3431_v14, %v11377_v33  ;;  %v3593_v38 = vmul.f32 %v3497_v2, %v8027_v9  ;;  %v11390_v9 = vld [vmem:[#allocation47_spill] sm:$0xff]  ;;  %v11391_v2 = vld [vmem:[#allocation36_spill] sm:$0xff] }
 0x1b9   : > { %v1120_v21 = vmul.f32 %v8107_v46, %v7867_v4  ;;  %v1218_v54 = vmul.f32 %v7876_v55, %v11386_v20  ;;  %v3199_v62 = vadd.f32 %v3167_v48, %v3003_v44  ;;  %v1254_v56 = vmul.f32 %v7885_v52, %v11388_v16  ;;  %v11393_v44 = vld [vmem:[#allocation90_spill] sm:$0xff] }
 0x1ba   : > { %v8113_v19 = vadd.f32 %v2635_v60, %v2437_v15  ;;  %v1084_v5 = vadd.f32 %v1052_v18, %v1016_v11  ;;  %v3561_v50 = vadd.f32 %v3529_v23, %v3365_v39  ;;  %v1322_v33 = vmul.f32 %v7892_v0, %v11389_v36  ;;  %v8128_v18 = vld [vmem:[%s10804_s5 + $0x8] ss:$0 sm:$0xff] }
 0x1bb   : > { %v1644_v14 = vmul.f32 %v11390_v9, %v7761_v10  ;;  %v1680_v6 = vmul.f32 %v7768_v8, %v11391_v2  ;;  %v8123_v42 = vadd.f32 %v3231_v25, %v3199_v62  ;;  %v1286_v15 = vadd.f32 %v1254_v56, %v1218_v54 }
 0x1bc   : > { %11387 = vst [vmem:[#allocation5_spill] sm:$0xff] %v8113_v19  ;;  %v1152_v22 = vadd.f32 %v1120_v21, %v1084_v5  ;;  %v1748_v39 = vmul.f32 %v8128_v18, %v11393_v44  ;;  %v3625_v11 = vadd.f32 %v3593_v38, %v3561_v50  ;;  %v2074_v48 = vmul.f32 %v5418_v58, %v7907_v26  ;;  %v1903_v19 = vpop.permute.xlu0 %1902  ;;  %v2968_v21 = vld [vmem:[#allocation3 + $0xc8] sm:$0xff] }
 0x1bd   : > { %11392 = vst [vmem:[#allocation79_spill] sm:$0xff] %v8123_v42  ;;  %v1712_v60 = vadd.f32 %v1680_v6, %v1644_v14  ;;  %v2108_v23 = vmul.f32 %v5419_v29, %v7914_v17  ;;  %v1354_v13 = vadd.f32 %v1322_v33, %v1286_v15  ;;  %v2174_v5 = vmul.f32 %v8107_v46, %v7921_v63  ;;  %v11394_v29 = vld [vmem:[#allocation57_spill] sm:$0xff]  ;;  %v3330_v15 = vld [vmem:[#allocation2 + $0xc8] sm:$0xff] }
 0x1be   : > { %v2240_v56 = vmul.f32 %v7928_v41, %v11386_v20  ;;  %v2274_v25 = vmul.f32 %v7935_v49, %v11388_v16  ;;  %v3661_v54 = vadd.f32 %v7447_v51, %v3625_v11  ;;  %v2340_v58 = vmul.f32 %v7942_v1, %v11389_v36  ;;  %v3100_v14 = vld [vmem:[#allocation3 + $0xc9] sm:$0xff] }
 0x1bf   : > { %v1780_v50 = vadd.f32 %v1748_v39, %v1712_v60  ;;  %v2140_v6 = vadd.f32 %v2108_v23, %v2074_v48  ;;  %v1546_v38 = vmul.f32 %v11394_v29, %v1354_v13  ;;  %v2470_v33 = vmul.f32 %v7819_v27, %v11390_v9 }
 0x1c0   : > { %v2306_v62 = vadd.f32 %v2274_v25, %v2240_v56  ;;  %v2504_v20 = vmul.f32 %v7825_v28, %v11391_v2  ;;  %v2570_v51 = vmul.f32 %v8068_v57, %v11393_v44  ;;  %v3002_v39 = vmul.f32 %v8082_v3, %v2968_v21  ;;  %3693 = vst.msk [vmem:[#allocation3 + $0xd0] sm:$0xff] %vm851_vm1, %v3661_v54 }
 0x1c1   : > { %v1972_v42 = vmul.f32 %v1903_v19, %v1780_v50  ;;  %v2206_v30 = vadd.f32 %v2174_v5, %v2140_v6  ;;  %v1578_v36 = vadd.f32 %v1546_v38, %v1152_v22  ;;  %v3068_v9 = vmul.f32 %v8088_v43, %v8007_v32  ;;  %v8168_v50 = vld [vmem:[%s10807_s8] ss:$0 sm:$0xff] }
 0x1c2   : > { %v2372_v13 = vadd.f32 %v2340_v58, %v2306_v62  ;;  %v2536_v11 = vadd.f32 %v2504_v20, %v2470_v33  ;;  %v3134_v60 = vmul.f32 %v8094_v31, %v3100_v14  ;;  %v3364_v48 = vmul.f32 %v7807_v34, %v3330_v15  ;;  %v11396_v58 = vld [vmem:[#allocation103_spill] sm:$0xff]  ;;  %v8174_v62 = vld [vmem:[#allocation3 + $0x38] sm:$0xff]  ;;  %v11398_v20 = vld [vmem:[#allocation96_spill] sm:$0xff] }
 0x1c3   : > { %v3430_v23 = vmul.f32 %v7738_v61, %v11388_v16  ;;  %v3496_v44 = vmul.f32 %v7846_v37, %v11391_v2  ;;  %v8160_v5 = vadd.f32 %v1972_v42, %v1578_v36  ;;  %v3166_v25 = vmul.f32 %v3068_v9, %v11394_v29  ;;  %11397 = vst [vmem:[#allocation47_spill] sm:$0xff] %v8174_v62  ;;  %v11399_v14 = vld [vmem:[#allocation94_spill] sm:$0xff] }
 0x1c4   : > { %v2404_v56 = vmul.f32 %v2372_v13, %v11394_v29  ;;  %v2602_v22 = vadd.f32 %v2570_v51, %v2536_v11  ;;  %v3230_v21 = vmul.f32 %v3134_v60, %v1903_v19  ;;  %v2699_v16 = vadd.f32 %v8168_v50, %v7983_v35  ;;  %v11403_v13 = vld [vmem:[#allocation95_spill] sm:$0xff]  ;;  %v8186_v60 = vld [vmem:[#allocation2 + $0xf8] sm:$0xff] }
 0x1c5   : > { %11395 = vst [vmem:[#allocation71_spill] sm:$0xff] %v8160_v5  ;;  %v3528_v32 = vmul.f32 %v3430_v23, %v11394_v29  ;;  %v3592_v54 = vmul.f32 %v3496_v44, %v1903_v19  ;;  %v3198_v6 = vadd.f32 %v3166_v25, %v3002_v39  ;;  %v3295_v38 = vadd.f32 %v11396_v58, %v7973_v7  ;;  %v11402_v39 = vld [vmem:[#allocation98_spill] sm:$0xff]  ;;  %v11404_v7 = vld [vmem:[#allocation52_spill] sm:$0xff]  ;;  %v11411_v5 = vld [vmem:[#allocation25_spill] sm:$0xff] }
 0x1c6   : > { %v2436_v2 = vadd.f32 %v2404_v56, %v2206_v30  ;;  %v2634_v42 = vmul.f32 %v2602_v22, %v1903_v19  ;;  %vm4087_vm14 = vcmp.ge.f32.partialorder %v2699_v16, 0.0  ;;  %v4119_v29 = vmul.f32 0.25, %v2699_v16  ;;  %v8193_v56 = vld [vmem:[#allocation2 + $0xe8] sm:$0xff] }
 0x1c7   : > { %v3560_v33 = vadd.f32 %v3528_v32, %v3364_v48  ;;  %v3738_v15 = vmul.f32 %v11399_v14, %v11398_v20  ;;  %v8180_v36 = vadd.f32 %v3230_v21, %v3198_v6  ;;  %vm4344_vm15 = vcmp.ge.f32.partialorder %v3295_v38, 0.0  ;;  %v8188_v48 = vld [vmem:[#allocation2 + $0xf7] sm:$0xff]  ;;  %11406 = vst [vmem:[#allocation103_spill] sm:$0xff] %v8193_v56  ;;  %v8204_v32 = vld [vmem:[%s10813_s14] ss:$0 sm:$0xff]  ;;  %v8209_v6 = vld [vmem:[#allocation2 + $0xe7] sm:$0xff] }
 0x1c8   : > { %v8178_v51 = vadd.f32 %v2634_v42, %v2436_v2  ;;  %v4376_v35 = vmul.f32 0.25, %v3295_v38  ;;  %v4151_v19 = vsel %vm4087_vm14, %v2699_v16, %v4119_v29  ;;  %v3774_v11 = vmul.f32 %v11403_v13, %v11402_v39  ;;  %11405 = vst [vmem:[#allocation57_spill] sm:$0xff] %v8188_v48  ;;  %v8199_v21 = vld [vmem:[#allocation2 + $0xf9] sm:$0xff] }
 0x1c9   : > { %11401 = vst [vmem:[#allocation90_spill] sm:$0xff] %v8180_v36  ;;  %v3624_v30 = vadd.f32 %v3592_v54, %v3560_v33  ;;  %v3842_v9 = vmul.f32 %v11404_v7, %v8174_v62  ;;  %4234 = vrot.lane.b32.xlu1 %v4151_v19, %s5719_s27  ;;  %v1020_v44 = vmul.f32 %v8107_v46, %v7853_v53  ;;  %v5425_v2 = vld [vmem:[#allocation2 + $0xd7] sm:$0xff]  ;;  %v8234_v36 = vpop.permute.xlu1 %1922 }
 0x1ca   : > { %11400 = vst [vmem:[#allocation36_spill] sm:$0xff] %v8178_v51  ;;  %v4408_v23 = vsel %vm4344_vm15, %v3295_v38, %v4376_v35  ;;  %v1056_v22 = vmul.f32 %v8193_v56, %v7859_v40  ;;  %v1124_v25 = vmul.f32 %v7867_v4, %v8186_v60  ;;  %v3806_v16 = vadd.f32 %v3774_v11, %v3738_v15  ;;  %v8213_v38 = vld [vmem:[#allocation3 + $0xdf] sm:$0xff]  ;;  %v5427_v20 = vld [vmem:[#allocation2 + $0xd9] sm:$0xff] }
 0x1cb   : > { %11407 = vst [vmem:[#allocation96_spill] sm:$0xff] %v8199_v21  ;;  %v3660_v54 = vadd.f32 %v8204_v32, %v3624_v30  ;;  %4491 = vrot.lane.b32.xlu0 %v4408_v23, %s5720_s21  ;;  %v1222_v42 = vmul.f32 %v5425_v2, %v7876_v55  ;;  %v1258_v58 = vmul.f32 %v8209_v6, %v7885_v52  ;;  %v8218_v35 = vld [vmem:[#allocation2 + $0xe9] sm:$0xff]  ;;  %v11410_v30 = vld [vmem:[#allocation101_spill] sm:$0xff] }
 0x1cc   : > { %11408 = vst [vmem:[#allocation94_spill] sm:$0xff] %v8209_v6  ;;  %v1088_v33 = vadd.f32 %v1056_v22, %v1020_v44  ;;  %v1326_v29 = vmul.f32 %v7892_v0, %v8188_v48  ;;  %v1648_v14 = vmul.f32 %v5427_v20, %v7761_v10  ;;  %v1684_v15 = vmul.f32 %v8218_v35, %v7768_v8 }
 0x1cd   : > { %11409 = vst [vmem:[#allocation98_spill] sm:$0xff] %v8218_v35  ;;  %v3874_v19 = vadd.f32 %v3842_v9, %v3806_v16  ;;  %v1290_v39 = vadd.f32 %v1258_v58, %v1222_v42  ;;  %v1752_v13 = vmul.f32 %v8128_v18, %v8199_v21  ;;  %v2078_v11 = vmul.f32 %v8107_v46, %v7907_v26 }
 0x1ce   : > { %3694 = vst.msk [vmem:[#allocation3 + $0xd8] sm:$0xff] %vm851_vm1, %v11410_v30  ;;  %v1156_v7 = vadd.f32 %v1124_v25, %v1088_v33  ;;  %v1716_v23 = vadd.f32 %v1684_v15, %v1648_v14  ;;  %v2112_v44 = vmul.f32 %v8193_v56, %v7914_v17  ;;  %v2178_v22 = vmul.f32 %v7921_v63, %v8186_v60  ;;  %v11412_v15 = vld [vmem:[#allocation37_spill] sm:$0xff] }
 0x1cf   : > { %3692 = vst.msk [vmem:[#allocation3 + $0xc8] sm:$0xff] %vm851_vm1, %v3660_v54  ;;  %v3910_v30 = vadd.f32 %v11411_v5, %v3874_v19  ;;  %v1358_v9 = vadd.f32 %v1326_v29, %v1290_v39  ;;  %v2244_v54 = vmul.f32 %v5425_v2, %v7928_v41  ;;  %v2278_v16 = vmul.f32 %v8209_v6, %v7935_v49 }
 0x1d0   : > { %v1784_v42 = vadd.f32 %v1752_v13, %v1716_v23  ;;  %v2144_v58 = vadd.f32 %v2112_v44, %v2078_v11  ;;  %v2344_v25 = vmul.f32 %v7942_v1, %v8188_v48  ;;  %v2474_v33 = vmul.f32 %v5427_v20, %v7819_v27  ;;  %v8248_v13 = vld [vmem:[#allocation2 + $0x100] sm:$0xff] }
 0x1d1   : > { %vm4584_vm2 = vcmp.ge.f32.partialorder %v3910_v30, 0.0  ;;  %v4616_v14 = vmul.f32 0.25, %v3910_v30  ;;  %v1550_v62 = vmul.f32 %v11412_v15, %v1358_v9  ;;  %v2310_v5 = vadd.f32 %v2278_v16, %v2244_v54  ;;  %v8253_v20 = vld [vmem:[%s10808_s9] ss:$0 sm:$0xff] }
 0x1d2   : > { %v1976_v19 = vmul.f32 %v8234_v36, %v1784_v42  ;;  %v2210_v29 = vadd.f32 %v2178_v22, %v2144_v58  ;;  %v2508_v2 = vmul.f32 %v8218_v35, %v7825_v28  ;;  %v2574_v39 = vmul.f32 %v8068_v57, %v8199_v21  ;;  %v5430_v54 = vld [vmem:[#allocation2 + $0xe0] sm:$0xff] }
 0x1d3   : > { %v4648_v11 = vsel %vm4584_vm2, %v3910_v30, %v4616_v14  ;;  %v1582_v23 = vadd.f32 %v1550_v62, %v1156_v7  ;;  %v2376_v44 = vadd.f32 %v2344_v25, %v2310_v5  ;;  %v2740_v9 = vmul.f32 %v8253_v20, %v8107_v46  ;;  %v8261_v30 = vld [vmem:[#allocation2 + $0xf0] sm:$0xff]  ;;  %v3334_v7 = vld [vmem:[#allocation2 + $0xe8] sm:$0xff] }
 0x1d4   : > { %4714 = vrot.lane.b32.xlu2 %v4648_v11, %s5721_s23  ;;  %v2540_v22 = vadd.f32 %v2508_v2, %v2474_v33  ;;  %v2741_v16 = vmul.f32 %v5430_v54, %v8253_v20  ;;  %v2774_v42 = vmul.f32 %v8193_v56, %v7791_v47  ;;  %v2775_v62 = vmul.f32 %v8261_v30, %v7791_v47  ;;  %v3400_v58 = vld [vmem:[#allocation2 + $0xe7] sm:$0xff] }
 0x1d5   : > { %v3466_v25 = vld [vmem:[#allocation2 + $0xe9] sm:$0xff]  ;;  %v8265_v14 = vadd.f32 %v1976_v19, %v1582_v23  ;;  %v2408_v46 = vmul.f32 %v2376_v44, %v11412_v15  ;;  %v8270_v33 = vmul.f32 %v7791_v47, %v8186_v60  ;;  %v2840_v5 = vmul.f32 %v7799_v12, %v8186_v60 }
 0x1d6   : > { %v2606_v2 = vadd.f32 %v2574_v39, %v2540_v22  ;;  %v2806_v11 = vadd.f32 %v2774_v42, %v2740_v9  ;;  %v2807_v51 = vadd.f32 %v2775_v62, %v2741_v16  ;;  %v2841_v21 = vmul.f32 %v7799_v12, %v8248_v13  ;;  %v8324_v12 = vld [vmem:[#allocation2 + $0xf1] sm:$0xff] }
 0x1d7   : > { %11413 = vst [vmem:[#allocation95_spill] sm:$0xff] %v8265_v14  ;;  %v2440_v35 = vadd.f32 %v2408_v46, %v2210_v29  ;;  %v3368_v48 = vmul.f32 %v7807_v34, %v3334_v7  ;;  %v3434_v19 = vmul.f32 %v7738_v61, %v3400_v58  ;;  %v3500_v23 = vmul.f32 %v7846_v37, %v3466_v25  ;;  %v11416_v58 = vld [vmem:[#allocation13_spill] sm:$0xff]  ;;  %v11417_v46 = vld [vmem:[#allocation87_spill] sm:$0xff] }
 0x1d8   : > { %11414 = vst [vmem:[#allocation52_spill] sm:$0xff] %v8270_v33  ;;  %v2638_v44 = vmul.f32 %v2606_v2, %v8234_v36  ;;  %v2872_v14 = vadd.f32 %v2840_v5, %v2806_v11  ;;  %v2873_v6 = vadd.f32 %v2841_v21, %v2807_v51  ;;  %v1019_v56 = vmul.f32 %v7975_v45, %v7853_v53  ;;  %v11419_v11 = vld [vmem:[#allocation81_spill] sm:$0xff] }
 0x1d9   : > { %v3532_v39 = vmul.f32 %v3434_v19, %v11412_v15  ;;  %v3596_v9 = vmul.f32 %v3500_v23, %v8234_v36  ;;  %v1055_v22 = vmul.f32 %v5430_v54, %v7859_v40  ;;  %v1123_v29 = vmul.f32 %v8261_v30, %v7867_v4 }
 0x1da   : > { %v8287_v16 = vadd.f32 %v2638_v44, %v2440_v35  ;;  %v2908_v42 = vadd.f32 %v8043_v24, %v2872_v14  ;;  %v2909_v62 = vadd.f32 %v8043_v24, %v2873_v6  ;;  %v1221_v51 = vmul.f32 %v7989_v59, %v7876_v55  ;;  %v11418_v35 = vld [vmem:[#allocation82_spill] sm:$0xff]  ;;  %v11420_v6 = vld [vmem:[#allocation16_spill] sm:$0xff]  ;;  %v1918_v24 = vpop.permute.xlu0 %1917 }
 0x1db   : > { %v3564_v21 = vadd.f32 %v3532_v39, %v3368_v48  ;;  %v1087_v7 = vadd.f32 %v1055_v22, %v1019_v56  ;;  %v1257_v25 = vmul.f32 %v7885_v52, %v11416_v58  ;;  %v1325_v5 = vmul.f32 %v7892_v0, %v11417_v46 }
 0x1dc   : > { %11415 = vst [vmem:[#allocation101_spill] sm:$0xff] %v8287_v16  ;;  %v1647_v2 = vmul.f32 %v11418_v35, %v7761_v10  ;;  %v1683_v14 = vmul.f32 %v7768_v8, %v11419_v11  ;;  %v1751_v19 = vmul.f32 %v8128_v18, %v11420_v6  ;;  %v2077_v48 = vmul.f32 %v7975_v45, %v7907_v26  ;;  %v2971_v16 = vld [vmem:[#allocation3 + $0xe0] sm:$0xff] }
 0x1dd   : > { %2940 = vst.msk [vmem:[#allocation3 + $0xe8] sm:$0xff] %vm851_vm1, %v2908_v42  ;;  %v3628_v56 = vadd.f32 %v3596_v9, %v3564_v21  ;;  %v1155_v23 = vadd.f32 %v1123_v29, %v1087_v7  ;;  %v1289_v44 = vadd.f32 %v1257_v25, %v1221_v51  ;;  %v2111_v39 = vmul.f32 %v5430_v54, %v7914_v17  ;;  %v8315_v29 = vld [vmem:[#allocation2 + $0xef] sm:$0xff]  ;;  %v3333_v25 = vld [vmem:[#allocation2 + $0xe0] sm:$0xff] }
 0x1de   : > { %2941 = vst.msk [vmem:[#allocation3 + $0xf0] sm:$0xff] %vm851_vm1, %v2909_v62  ;;  %v1715_v22 = vadd.f32 %v1683_v14, %v1647_v2  ;;  %v2177_v42 = vmul.f32 %v8261_v30, %v7921_v63  ;;  %v2243_v46 = vmul.f32 %v7989_v59, %v7928_v41  ;;  %v2277_v6 = vmul.f32 %v7935_v49, %v11416_v58  ;;  %v11421_v2 = vld [vmem:[#allocation67_spill] sm:$0xff] }
 0x1df   : > { %v3664_v45 = vadd.f32 %v8204_v32, %v3628_v56  ;;  %v1357_v62 = vadd.f32 %v1325_v5, %v1289_v44  ;;  %v2143_v9 = vadd.f32 %v2111_v39, %v2077_v48  ;;  %v2343_v54 = vmul.f32 %v8315_v29, %v7942_v1 }
 0x1e0   : > { %v1783_v51 = vadd.f32 %v1751_v19, %v1715_v22  ;;  %v2309_v21 = vadd.f32 %v2277_v6, %v2243_v46  ;;  %v2473_v7 = vmul.f32 %v11418_v35, %v7819_v27  ;;  %v2507_v59 = vmul.f32 %v7825_v28, %v11419_v11 }
 0x1e1   : > { %v1549_v14 = vmul.f32 %v11421_v2, %v1357_v62  ;;  %v2209_v56 = vadd.f32 %v2177_v42, %v2143_v9  ;;  %v2573_v5 = vmul.f32 %v8324_v12, %v8068_v57  ;;  %v3005_v48 = vmul.f32 %v8082_v3, %v2971_v16 }
 0x1e2   : > { %v1975_v44 = vmul.f32 %v1918_v24, %v1783_v51  ;;  %v2375_v19 = vadd.f32 %v2343_v54, %v2309_v21  ;;  %v2539_v39 = vadd.f32 %v2507_v59, %v2473_v7  ;;  %v3071_v35 = vmul.f32 %v8088_v43, %v8213_v38 }
 0x1e3   : > { %v1581_v6 = vadd.f32 %v1549_v14, %v1155_v23  ;;  %v3367_v62 = vmul.f32 %v7807_v34, %v3333_v25  ;;  %v3433_v42 = vmul.f32 %v7738_v61, %v11416_v58  ;;  %v3499_v9 = vmul.f32 %v7846_v37, %v11419_v11 }
 0x1e4   : > { %v2972_v22 = vld [vmem:[#allocation3 + $0xe8] sm:$0xff]  ;;  %v2407_v21 = vmul.f32 %v2375_v19, %v11421_v2  ;;  %v2605_v38 = vadd.f32 %v2573_v5, %v2539_v39  ;;  %v3169_v61 = vmul.f32 %v3071_v35, %v11421_v2  ;;  %vm4549_vm2 = vcmask 97344  }
 0x1e5   : > { %v3038_v46 = vld [vmem:[#allocation3 + $0xe7] sm:$0xff]  ;;  %v3006_v16 = vmul.f32 %v8082_v3, %v2972_v22  ;;  %v8339_v7 = vld [vmem:[#allocation3 + $0xef] sm:$0xff]  ;;  %v8342_v59 = vadd.f32 %v1975_v44, %v1581_v6  ;;  %v3531_v22 = vmul.f32 %v3433_v42, %v11421_v2 }
 0x1e6   : > { %v3103_v33 = vld [vmem:[#allocation3 + $0xe1] sm:$0xff]  ;;  %v3072_v54 = vmul.f32 %v8088_v43, %v3038_v46  ;;  %v3104_v51 = vld [vmem:[#allocation3 + $0xe9] sm:$0xff]  ;;  %11422 = vst [vmem:[#allocation25_spill] sm:$0xff] %v8339_v7  ;;  %v2439_v11 = vadd.f32 %v2407_v21, %v2209_v56  ;;  %v2637_v14 = vmul.f32 %v2605_v38, %v1918_v24  ;;  %v3201_v19 = vadd.f32 %v3169_v61, %v3005_v48  ;;  %v8380_v42 = vld [vmem:[%s10814_s15 + $0x1] ss:$0 sm:$0xff] }
 0x1e7   : > { %v3138_v23 = vmul.f32 %v8094_v31, %v3104_v51  ;;  %11423 = vst [vmem:[#allocation37_spill] sm:$0xff] %v8342_v59  ;;  %v3137_v25 = vmul.f32 %v8094_v31, %v3103_v33  ;;  %v3595_v46 = vmul.f32 %v3499_v9, %v1918_v24  ;;  %v3563_v6 = vadd.f32 %v3531_v22, %v3367_v62  ;;  %v11425_v33 = vld [vmem:[#allocation83_spill] sm:$0xff]  ;;  %v8373_v56 = vld [vmem:[%s10814_s15] ss:$0 sm:$0xff]  ;;  %v11429_v48 = vld [vmem:[#allocation104_spill] sm:$0xff] }
 0x1e8   : > { %3696 = vst.msk [vmem:[#allocation3 + $0xe8] sm:$0xff] %vm851_vm1, %v3664_v45  ;;  %v3170_v58 = vmul.f32 %v3072_v54, %v11412_v15  ;;  %v8350_v44 = vadd.f32 %v2637_v14, %v2439_v11  ;;  %v2700_v35 = vadd.f32 %v8168_v50, %v11425_v33  ;;  %v8354_v59 = vld [vmem:[#allocation3 + $0x40] sm:$0xff]  ;;  %v8359_v15 = vld [vmem:[%s10805_s6] ss:$0 sm:$0xff]  ;;  %v3739_v62 = vmul.f32 %v8373_v56, %v11429_v48  ;;  %v8389_v61 = vld [vmem:[%s10814_s15 + $0x2] ss:$0 sm:$0xff] }
 0x1e9   : > { %v3234_v5 = vmul.f32 %v3138_v23, %v8234_v36  ;;  %v3233_v39 = vmul.f32 %v3137_v25, %v1918_v24  ;;  %11426 = vst [vmem:[#allocation87_spill] sm:$0xff] %v8354_v59  ;;  %v8366_v24 = vld [vmem:[%s10811_s12] ss:$0 sm:$0xff]  ;;  %v11428_v36 = vld [vmem:[#allocation19_spill] sm:$0xff]  ;;  %v3627_v21 = vadd.f32 %v3595_v46, %v3563_v6  ;;  %v1059_v33 = vmul.f32 %v7859_v40, %v8248_v13 }
 0x1ea   : > { %v3202_v51 = vadd.f32 %v3170_v58, %v3006_v16  ;;  %11424 = vst [vmem:[#allocation13_spill] sm:$0xff] %v8350_v44  ;;  %v3296_v2 = vadd.f32 %v8366_v24, %v11428_v36  ;;  %v11430_v9 = vld [vmem:[#allocation105_spill] sm:$0xff]  ;;  %vm4088_vm3 = vcmp.ge.f32.partialorder %v2700_v35, 0.0  ;;  %v4120_v38 = vmul.f32 0.25, %v2700_v35  ;;  %v8401_v6 = vld [vmem:[#allocation2 + $0x110] sm:$0xff] }
 0x1eb   : > { %v8361_v45 = vadd.f32 %v3233_v39, %v3201_v19  ;;  %v3775_v16 = vmul.f32 %v8380_v42, %v11430_v9  ;;  %v3843_v58 = vmul.f32 %v8389_v61, %v8354_v59  ;;  %v3663_v11 = vadd.f32 %v8204_v32, %v3627_v21  ;;  %v11432_v22 = vld [vmem:[#allocation61_spill] sm:$0xff]  ;;  %v8396_v19 = vld [vmem:[#allocation2 + $0x10f] sm:$0xff]  ;;  %v4197_v21 = vpop.permute.xlu2 %4196 }
 0x1ec   : > { %v8384_v54 = vadd.f32 %v3234_v5, %v3202_v51  ;;  %vm4345_vm4 = vcmp.ge.f32.partialorder %v3296_v2, 0.0  ;;  %v4377_v23 = vmul.f32 0.25, %v3296_v2  ;;  %v4152_v14 = vsel %vm4088_vm3, %v2700_v35, %v4120_v38  ;;  %v8405_v36 = vld [vmem:[#allocation2 + $0x111] sm:$0xff]  ;;  %v8411_v48 = vld [vmem:[#allocation2 + $0xff] sm:$0xff] }
 0x1ed   : > { %11427 = vst [vmem:[#allocation82_spill] sm:$0xff] %v8361_v45  ;;  %v3807_v25 = vadd.f32 %v3775_v16, %v3739_v62  ;;  %v2018_v5 = vadd.f32 %v8359_v15, %v11432_v22  ;;  %4236 = vrot.lane.b32.xlu1 %v4152_v14, %s5719_s27  ;;  %v1023_v51 = vmul.f32 %v8261_v30, %v7853_v53  ;;  %v8418_v9 = vld [vmem:[%s10815_s16] ss:$0 sm:$0xff] }
 0x1ee   : > { %11431 = vst [vmem:[#allocation81_spill] sm:$0xff] %v8384_v54  ;;  %v4409_v39 = vsel %vm4345_vm4, %v3296_v2, %v4377_v23  ;;  %v1127_v2 = vmul.f32 %v7867_v4, %v8401_v6  ;;  %v1225_v62 = vmul.f32 %v8315_v29, %v7876_v55  ;;  %v1261_v23 = vmul.f32 %v7885_v52, %v8411_v48  ;;  %v8441_v54 = vpop.permute.xlu1 %1937  ;;  %v11436_v45 = vld [vmem:[#allocation89_spill] sm:$0xff] }
 0x1ef   : > { %v3875_v46 = vadd.f32 %v3843_v58, %v3807_v25  ;;  %3695 = vst.msk [vmem:[#allocation3 + $0xe0] sm:$0xff] %vm851_vm1, %v3663_v11  ;;  %4493 = vrot.lane.b32.xlu0 %v4409_v39, %s5720_s21  ;;  %vm3940_vm6 = vcmp.ge.f32.partialorder %v2018_v5, 0.0  ;;  %v3972_v35 = vmul.f32 0.25, %v2018_v5  ;;  %v1091_v38 = vadd.f32 %v1059_v33, %v1023_v51  ;;  %v8425_v58 = vld [vmem:[#allocation2 + $0x101] sm:$0xff] }
 0x1f0   : > { %v1329_v25 = vmul.f32 %v7892_v0, %v8396_v19  ;;  %v1651_v14 = vmul.f32 %v8324_v12, %v7761_v10  ;;  %v1687_v22 = vmul.f32 %v7768_v8, %v8425_v58  ;;  %v1755_v39 = vmul.f32 %v8128_v18, %v8405_v36 }
 0x1f1   : > { %v3911_v16 = vadd.f32 %v8418_v9, %v3875_v46  ;;  %v4004_v11 = vsel %vm3940_vm6, %v2018_v5, %v3972_v35  ;;  %v1159_v51 = vadd.f32 %v1127_v2, %v1091_v38  ;;  %v1293_v33 = vadd.f32 %v1261_v23, %v1225_v62 }
 0x1f2   : > { %4036 = vst.msk [vmem:[#allocation4] sm:$0xff] %vm851_vm1, %v4004_v11  ;;  %v1719_v7 = vadd.f32 %v1687_v22, %v1651_v14  ;;  %v2081_v5 = vmul.f32 %v8261_v30, %v7907_v26  ;;  %v2115_v10 = vmul.f32 %v7914_v17, %v8248_v13  ;;  %v2181_v8 = vmul.f32 %v7921_v63, %v8401_v6  ;;  %v11433_v14 = vld [vmem:[#allocation48_spill] sm:$0xff] }
 0x1f3   : > { %vm4585_vm7 = vcmp.ge.f32.partialorder %v3911_v16, 0.0  ;;  %v4617_v46 = vmul.f32 0.25, %v3911_v16  ;;  %4293 = vst.msk [vmem:[#allocation4] sm:$0xff] %vm4292_vm5, %v4197_v21  ;;  %v1361_v44 = vadd.f32 %v1329_v25, %v1293_v33  ;;  %v2247_v2 = vmul.f32 %v8315_v29, %v7928_v41 }
 0x1f4   : > { %v2281_v62 = vmul.f32 %v7935_v49, %v8411_v48  ;;  %v1787_v21 = vadd.f32 %v1755_v39, %v1719_v7  ;;  %v2147_v38 = vadd.f32 %v2115_v10, %v2081_v5  ;;  %v2347_v23 = vmul.f32 %v7942_v1, %v8396_v19 }
 0x1f5   : > { %v4649_v35 = vsel %vm4585_vm7, %v3911_v16, %v4617_v46  ;;  %v2477_v11 = vmul.f32 %v8324_v12, %v7819_v27  ;;  %v1094_v16 = vld [vmem:[#allocation2 + $0x118] sm:$0xff]  ;;  %v1553_v22 = vmul.f32 %v11433_v14, %v1361_v44  ;;  %v2511_v29 = vmul.f32 %v7825_v28, %v8425_v58  ;;  %v11434_v28 = vld [vmem:[#allocation93_spill] sm:$0xff] }
 0x1f6   : > { %4716 = vrot.lane.b32.xlu2 %v4649_v35, %s5721_s23  ;;  %v2313_v25 = vadd.f32 %v2281_v62, %v2247_v2  ;;  %v2577_v46 = vmul.f32 %v8068_v57, %v8405_v36  ;;  %v1979_v33 = vmul.f32 %v8441_v54, %v1787_v21  ;;  %v2213_v7 = vadd.f32 %v2181_v8, %v2147_v38  ;;  %v3337_v35 = vld [vmem:[#allocation2 + $0x100] sm:$0xff]  ;;  %v11435_v2 = vld [vmem:[#allocation52_spill] sm:$0xff]  ;;  %v11437_v8 = vld [vmem:[#allocation55_spill] sm:$0xff] }
 0x1f7   : > { %v2743_v39 = vmul.f32 %v8261_v30, %v8253_v20  ;;  %v2744_v5 = vmul.f32 %v8253_v20, %v8186_v60  ;;  %v1585_v12 = vadd.f32 %v1553_v22, %v1159_v51  ;;  %v2543_v10 = vadd.f32 %v2511_v29, %v2477_v11  ;;  %v11439_v22 = vld [vmem:[#allocation63_spill] sm:$0xff] }
 0x1f8   : > { %v2379_v27 = vadd.f32 %v2347_v23, %v2313_v25  ;;  %v2777_v44 = vmul.f32 %v7791_v47, %v8248_v13  ;;  %v2808_v62 = vadd.f32 %v11435_v2, %v11434_v28  ;;  %v2843_v21 = vmul.f32 %v11437_v8, %v8401_v6 }
 0x1f9   : > { %v2810_v59 = vadd.f32 %v11436_v45, %v2744_v5  ;;  %v2844_v30 = vmul.f32 %v11437_v8, %v1094_v16  ;;  %v8470_v38 = vadd.f32 %v1979_v33, %v1585_v12  ;;  %v2609_v23 = vadd.f32 %v2577_v46, %v2543_v10  ;;  %v8478_v45 = vld [vmem:[%s10812_s13] ss:$0 sm:$0xff]  ;;  %v11441_v10 = vld [vmem:[#allocation103_spill] sm:$0xff]  ;;  %v5440_v8 = vld [vmem:[#allocation2 + $0x108] sm:$0xff] }
 0x1fa   : > { %v2411_v51 = vmul.f32 %v2379_v27, %v11433_v14  ;;  %v2809_v11 = vadd.f32 %v2777_v44, %v2743_v39  ;;  %v2874_v25 = vadd.f32 %v11439_v22, %v2808_v62  ;;  %v3371_v29 = vmul.f32 %v7807_v34, %v3337_v35  ;;  %v11440_v39 = vld [vmem:[#allocation24_spill] sm:$0xff]  ;;  %v1228_v35 = vld [vmem:[#allocation2 + $0x107] sm:$0xff] }
 0x1fb   : > { %11438 = vst [vmem:[#allocation16_spill] sm:$0xff] %v8470_v38  ;;  %v2876_v47 = vadd.f32 %v2844_v30, %v2810_v59  ;;  %v3437_v5 = vmul.f32 %v8478_v45, %v8411_v48  ;;  %v2641_v33 = vmul.f32 %v2609_v23, %v8441_v54  ;;  %v3503_v46 = vmul.f32 %v7846_v37, %v8425_v58  ;;  %v11443_v30 = vld [vmem:[#allocation94_spill] sm:$0xff] }
 0x1fc   : > { %v2443_v16 = vadd.f32 %v2411_v51, %v2213_v7  ;;  %v2875_v12 = vadd.f32 %v2843_v21, %v2809_v11  ;;  %v2910_v27 = vadd.f32 %v11440_v39, %v2874_v25  ;;  %v1022_v44 = vmul.f32 %v11441_v10, %v7853_v53  ;;  %v11444_v53 = vld [vmem:[#allocation57_spill] sm:$0xff]  ;;  %v11445_v25 = vld [vmem:[#allocation98_spill] sm:$0xff] }
 0x1fd   : > { %v2912_v59 = vadd.f32 %v11440_v39, %v2876_v47  ;;  %v3535_v34 = vmul.f32 %v3437_v5, %v11433_v14  ;;  %v3599_v2 = vmul.f32 %v3503_v46, %v8441_v54  ;;  %v1058_v62 = vmul.f32 %v7859_v40, %v8186_v60  ;;  %v8507_v40 = vld [vmem:[%s10804_s5 + $0x2] ss:$0 sm:$0xff] }
 0x1fe   : > { %v8490_v28 = vadd.f32 %v2641_v33, %v2443_v16  ;;  %v2911_v7 = vadd.f32 %v11440_v39, %v2875_v12  ;;  %2942 = vst.msk [vmem:[#allocation3 + $0xf8] sm:$0xff] %vm851_vm1, %v2910_v27  ;;  %v1126_v21 = vmul.f32 %v5440_v8, %v7867_v4  ;;  %v1224_v51 = vmul.f32 %v11443_v30, %v7876_v55  ;;  %v8514_v55 = vld [vmem:[%s10804_s5 + $0x5] ss:$0 sm:$0xff]  ;;  %v11446_v4 = vld [vmem:[#allocation96_spill] sm:$0xff] }
 0x1ff   : > { %v3567_v37 = vadd.f32 %v3535_v34, %v3371_v29  ;;  %v1260_v23 = vmul.f32 %v7885_v52, %v11444_v53  ;;  %v1090_v11 = vadd.f32 %v1058_v62, %v1022_v44  ;;  %v1328_v22 = vmul.f32 %v7892_v0, %v1228_v35  ;;  %2944 = vst.msk [vmem:[#allocation3 + $0x108] sm:$0xff] %vm851_vm1, %v2912_v59  ;;  %v11447_v5 = vld [vmem:[#allocation49_spill] sm:$0xff]  ;;  %v1933_v59 = vpop.permute.xlu0 %1932 }
 0x200   : > { %11442 = vst [vmem:[#allocation67_spill] sm:$0xff] %v8490_v28  ;;  %v1650_v47 = vmul.f32 %v8507_v40, %v11445_v25  ;;  %v1686_v52 = vmul.f32 %v8514_v55, %v11446_v4  ;;  %v8521_v16 = vmul.f32 %v8514_v55, %v11447_v5  ;;  %v1754_v33 = vmul.f32 %v8128_v18, %v11447_v5  ;;  %v8805_v28 = vld [vmem:[#allocation3 + $0xc8] sm:$0xff] }
 0x201   : > { %2943 = vst.msk [vmem:[#allocation3 + $0x100] sm:$0xff] %vm851_vm1, %v2911_v7  ;;  %v3631_v29 = vadd.f32 %v3599_v2, %v3567_v37  ;;  %v1292_v0 = vadd.f32 %v1260_v23, %v1224_v51  ;;  %v1158_v12 = vadd.f32 %v1126_v21, %v1090_v11  ;;  %v2080_v39 = vmul.f32 %v11441_v10, %v7907_v26  ;;  %v11449_v26 = vld [vmem:[#allocation74_spill] sm:$0xff] }
 0x202   : > { %11448 = vst [vmem:[#allocation83_spill] sm:$0xff] %v8521_v16  ;;  %v1718_v46 = vadd.f32 %v1686_v52, %v1650_v47  ;;  %v2114_v27 = vmul.f32 %v7914_v17, %v8186_v60  ;;  %v2180_v7 = vmul.f32 %v5440_v8, %v7921_v63  ;;  %v2246_v2 = vmul.f32 %v11443_v30, %v7928_v41  ;;  %v8540_v17 = vld [vmem:[%s10806_s7 + $0x2] ss:$0 sm:$0xff]  ;;  %v8547_v41 = vld [vmem:[%s10806_s7 + $0x5] ss:$0 sm:$0xff] }
 0x203   : > { %v3667_v34 = vadd.f32 %v8204_v32, %v3631_v29  ;;  %v1360_v44 = vadd.f32 %v1328_v22, %v1292_v0  ;;  %v2280_v21 = vmul.f32 %v7935_v49, %v11444_v53  ;;  %v2346_v51 = vmul.f32 %v7942_v1, %v1228_v35  ;;  %v8555_v35 = vld [vmem:[#allocation3 + $0xf0] sm:$0xff] }
 0x204   : > { %v1786_v62 = vadd.f32 %v1754_v33, %v1718_v46  ;;  %v2146_v37 = vadd.f32 %v2114_v27, %v2080_v39  ;;  %v2476_v63 = vmul.f32 %v8540_v17, %v11445_v25  ;;  %v2510_v49 = vmul.f32 %v8547_v41, %v11446_v4  ;;  %11451 = vst [vmem:[#allocation104_spill] sm:$0xff] %v8555_v35 }
 0x205   : > { %v1552_v10 = vmul.f32 %v11449_v26, %v1360_v44  ;;  %v8553_v1 = vmul.f32 %v8547_v41, %v11447_v5  ;;  %v2312_v23 = vadd.f32 %v2280_v21, %v2246_v2  ;;  %v2576_v11 = vmul.f32 %v8068_v57, %v11447_v5  ;;  %v2974_v22 = vld [vmem:[#allocation3 + $0xf8] sm:$0xff] }
 0x206   : > { %v1978_v8 = vmul.f32 %v1933_v59, %v1786_v62  ;;  %v2212_v30 = vadd.f32 %v2180_v7, %v2146_v37  ;;  %v3040_v25 = vld [vmem:[#allocation3 + $0xf7] sm:$0xff]  ;;  %v2542_v33 = vadd.f32 %v2510_v49, %v2476_v63  ;;  %v3008_v46 = vmul.f32 %v8082_v3, %v2974_v22 }
 0x207   : > { %11450 = vst [vmem:[#allocation19_spill] sm:$0xff] %v8553_v1  ;;  %v8559_v47 = vld [vmem:[#allocation3 + $0xf1] sm:$0xff]  ;;  %v1584_v0 = vadd.f32 %v1552_v10, %v1158_v12  ;;  %v3074_v39 = vmul.f32 %v8088_v43, %v3040_v25  ;;  %v2378_v62 = vadd.f32 %v2346_v51, %v2312_v23  ;;  %v2745_v1 = vmul.f32 %v8253_v20, %v8248_v13 }
 0x208   : > { %11452 = vst [vmem:[#allocation105_spill] sm:$0xff] %v8559_v47  ;;  %v2975_v52 = vld [vmem:[#allocation3 + $0x100] sm:$0xff]  ;;  %v11453_v44 = vld [vmem:[#allocation106_spill] sm:$0xff]  ;;  %v2608_v63 = vadd.f32 %v2576_v11, %v2542_v33  ;;  %v8580_v51 = vld [vmem:[%s10812_s13 + $0x1] ss:$0 sm:$0xff] }
 0x209   : > { %v3041_v29 = vld [vmem:[#allocation3 + $0xff] sm:$0xff]  ;;  %3697 = vst.msk [vmem:[#allocation3 + $0xf0] sm:$0xff] %vm851_vm1, %v11453_v44  ;;  %v3009_v7 = vmul.f32 %v8082_v3, %v2975_v52  ;;  %v8567_v37 = vld [vmem:[#allocation3 + $0x107] sm:$0xff]  ;;  %v8571_v10 = vadd.f32 %v1978_v8, %v1584_v0  ;;  %v3172_v49 = vmul.f32 %v3074_v39, %v11449_v26  ;;  %v2410_v3 = vmul.f32 %v2378_v62, %v11449_v26  ;;  %v8590_v52 = vld [vmem:[%s10812_s13 + $0x2] ss:$0 sm:$0xff] }
 0x20a   : > { %v3106_v27 = vld [vmem:[#allocation3 + $0xf9] sm:$0xff]  ;;  %v3075_v5 = vmul.f32 %v8088_v43, %v3041_v29  ;;  %v3107_v2 = vld [vmem:[#allocation3 + $0x101] sm:$0xff]  ;;  %11454 = vst [vmem:[#allocation61_spill] sm:$0xff] %v8567_v37  ;;  %v2640_v23 = vmul.f32 %v2608_v63, %v1933_v59  ;;  %v3502_v29 = vmul.f32 %v8590_v52, %v11446_v4  ;;  %v1095_v63 = vld [vmem:[#allocation2 + $0x120] sm:$0xff] }
 0x20b   : > { %v3140_v21 = vmul.f32 %v8094_v31, %v3106_v27  ;;  %v3141_v12 = vmul.f32 %v8094_v31, %v3107_v2  ;;  %11455 = vst [vmem:[#allocation48_spill] sm:$0xff] %v8571_v10  ;;  %v3370_v31 = vmul.f32 %v8580_v51, %v8186_v60  ;;  %v3204_v11 = vadd.f32 %v3172_v49, %v3008_v46  ;;  %v11456_v0 = vld [vmem:[#allocation80_spill] sm:$0xff]  ;;  %v8820_v47 = vld [vmem:[#allocation3 + $0xd8] sm:$0xff] }
 0x20c   : > { %3699 = vst.msk [vmem:[#allocation3 + $0x100] sm:$0xff] %vm851_vm1, %v3667_v34  ;;  %v3173_v22 = vmul.f32 %v3075_v5, %v11433_v14  ;;  %v3436_v34 = vmul.f32 %v8478_v45, %v11444_v53  ;;  %v2442_v14 = vadd.f32 %v2410_v3, %v2212_v30  ;;  %v2685_v60 = vadd.f32 %v8168_v50, %v11456_v0  ;;  %v11458_v46 = vld [vmem:[#allocation36_spill] sm:$0xff]  ;;  %v8642_v0 = vld [vmem:[%s10804_s5 + $0x3] ss:$0 sm:$0xff] }
 0x20d   : > { %v3236_v43 = vmul.f32 %v3140_v21, %v1933_v59  ;;  %v3237_v8 = vmul.f32 %v3141_v12, %v8441_v54  ;;  %v2702_v53 = vadd.f32 %v8168_v50, %v11458_v46  ;;  %v11459_v39 = vld [vmem:[#allocation60_spill] sm:$0xff]  ;;  %v8617_v12 = vld [vmem:[%s10804_s5 + $0x4] ss:$0 sm:$0xff]  ;;  %11477 = vst [vmem:[#allocation49_spill] sm:$0xff] %v8820_v47 }
 0x20e   : > { %v3205_v25 = vadd.f32 %v3173_v22, %v3009_v7  ;;  %v3534_v54 = vmul.f32 %v3436_v34, %v11449_v26  ;;  %v3281_v30 = vadd.f32 %v8366_v24, %v11459_v39  ;;  %v8605_v44 = vadd.f32 %v2640_v23, %v2442_v14  ;;  %v8610_v26 = vld [vmem:[%s10804_s5 + $0x1] ss:$0 sm:$0xff] }
 0x20f   : > { %v8596_v33 = vadd.f32 %v3236_v43, %v3204_v11  ;;  %v3598_v7 = vmul.f32 %v3502_v29, %v1933_v59  ;;  %vm4073_vm8 = vcmp.ge.f32.partialorder %v2685_v60, 0.0  ;;  %v4105_v5 = vmul.f32 0.25, %v2685_v60  ;;  %v1297_v49 = vld [vmem:[#allocation2 + $0x11f] sm:$0xff] }
 0x210   : > { %v8603_v27 = vadd.f32 %v3237_v8, %v3205_v25  ;;  %11461 = vst [vmem:[#allocation89_spill] sm:$0xff] %v8605_v44  ;;  %v3566_v4 = vadd.f32 %v3534_v54, %v3370_v31  ;;  %vm4090_vm9 = vcmp.ge.f32.partialorder %v2702_v53, 0.0  ;;  %v4122_v2 = vmul.f32 0.25, %v2702_v53  ;;  %v8624_v31 = vld [vmem:[%s10804_s5 + $0x7] ss:$0 sm:$0xff] }
 0x211   : > { %11457 = vst [vmem:[#allocation93_spill] sm:$0xff] %v8596_v33  ;;  %vm4330_vm10 = vcmp.ge.f32.partialorder %v3281_v30, 0.0  ;;  %v4362_v62 = vmul.f32 0.25, %v3281_v30  ;;  %v1025_v21 = vmul.f32 %v8610_v26, %v8248_v13  ;;  %v1061_v59 = vmul.f32 %v8617_v12, %v8401_v6  ;;  %v1723_v23 = vld [vmem:[#allocation2 + $0x121] sm:$0xff]  ;;  %v8633_v25 = vld [vmem:[%s10804_s5] ss:$0 sm:$0xff] }
 0x212   : > { %11460 = vst [vmem:[#allocation52_spill] sm:$0xff] %v8603_v27  ;;  %v3630_v22 = vadd.f32 %v3598_v7, %v3566_v4  ;;  %v4137_v3 = vsel %vm4073_vm8, %v2685_v60, %v4105_v5  ;;  %v4154_v43 = vsel %vm4090_vm9, %v2702_v53, %v4122_v2  ;;  %v1129_v8 = vmul.f32 %v8624_v31, %v1095_v63  ;;  %v8649_v54 = vld [vmem:[%s10804_s5 + $0x6] ss:$0 sm:$0xff]  ;;  %v8660_v4 = vld [vmem:[%s10806_s7 + $0x1] ss:$0 sm:$0xff] }
 0x213   : > { %4206 = vrot.lane.b32.xlu1 %v4137_v3, %s5719_s27  ;;  %4240 = vrot.lane.b32.xlu0 %v4154_v43, %s5719_s27  ;;  %v4394_v11 = vsel %vm4330_vm10, %v3281_v30, %v4362_v62  ;;  %v1093_v34 = vadd.f32 %v1061_v59, %v1025_v21  ;;  %v1227_v14 = vmul.f32 %v8633_v25, %v8411_v48  ;;  %v8668_v62 = vld [vmem:[%s10806_s7 + $0x4] ss:$0 sm:$0xff] }
 0x214   : > { %v3666_v29 = vadd.f32 %v8204_v32, %v3630_v22  ;;  %4463 = vrot.lane.b32.xlu2 %v4394_v11, %s5720_s21  ;;  %v1263_v60 = vmul.f32 %v8642_v0, %v8396_v19  ;;  %v1331_v46 = vmul.f32 %v8649_v54, %v1297_v49  ;;  %v1653_v53 = vmul.f32 %v8507_v40, %v8425_v58  ;;  %v8681_v22 = vld [vmem:[%s10806_s7] ss:$0 sm:$0xff] }
 0x215   : > { %v1161_v39 = vadd.f32 %v1129_v8, %v1093_v34  ;;  %v1689_v30 = vmul.f32 %v8514_v55, %v8405_v36  ;;  %v1757_v7 = vmul.f32 %v8128_v18, %v1723_v23  ;;  %v2083_v5 = vmul.f32 %v8660_v4, %v8248_v13  ;;  %v8675_v18 = vld [vmem:[%s10806_s7 + $0x7] ss:$0 sm:$0xff]  ;;  %v8688_v8 = vld [vmem:[%s10806_s7 + $0x3] ss:$0 sm:$0xff]  ;;  %v8695_v34 = vld [vmem:[%s10806_s7 + $0x6] ss:$0 sm:$0xff] }
 0x216   : > { %3698 = vst.msk [vmem:[#allocation3 + $0xf8] sm:$0xff] %vm851_vm1, %v3666_v29  ;;  %v1295_v2 = vadd.f32 %v1263_v60, %v1227_v14  ;;  %v2117_v21 = vmul.f32 %v8668_v62, %v8401_v6  ;;  %v2183_v59 = vmul.f32 %v8675_v18, %v1095_v63  ;;  %v2249_v3 = vmul.f32 %v8681_v22, %v8411_v48  ;;  %v8700_v48 = vpop.permute.xlu0 %1947 }
 0x217   : > { %v1721_v43 = vadd.f32 %v1689_v30, %v1653_v53  ;;  %v2283_v11 = vmul.f32 %v8688_v8, %v8396_v19  ;;  %v2349_v14 = vmul.f32 %v8695_v34, %v1297_v49  ;;  %v2479_v29 = vmul.f32 %v8540_v17, %v8425_v58  ;;  %v8710_v49 = vld [vmem:[%s10808_s9 + $0x1] ss:$0 sm:$0xff] }
 0x218   : > { %v1363_v60 = vadd.f32 %v1331_v46, %v1295_v2  ;;  %v2149_v53 = vadd.f32 %v2117_v21, %v2083_v5  ;;  %v2513_v30 = vmul.f32 %v8547_v41, %v8405_v36  ;;  %v2579_v16 = vmul.f32 %v8068_v57, %v1723_v23  ;;  %v11462_v46 = vld [vmem:[#allocation11_spill] sm:$0xff]  ;;  %v8718_v57 = vld [vmem:[%s10808_s9 + $0x2] ss:$0 sm:$0xff] }
 0x219   : > { %v1789_v38 = vadd.f32 %v1757_v7, %v1721_v43  ;;  %v2315_v10 = vadd.f32 %v2283_v11, %v2249_v3  ;;  %v2779_v58 = vmul.f32 %v8710_v49, %v8401_v6  ;;  %v2845_v23 = vmul.f32 %v8718_v57, %v1095_v63 }
 0x21a   : > { %v1555_v5 = vmul.f32 %v11462_v46, %v1363_v60  ;;  %v2215_v2 = vadd.f32 %v2183_v59, %v2149_v53  ;;  %v2545_v21 = vadd.f32 %v2513_v30, %v2479_v29  ;;  %v3373_v43 = vmul.f32 %v8580_v51, %v8401_v6  ;;  %v11463_v30 = vld [vmem:[#allocation18_spill] sm:$0xff]  ;;  %v8742_v51 = vld [vmem:[%s10809_s10] ss:$0 sm:$0xff] }
 0x21b   : > { %v1981_v13 = vmul.f32 %v8700_v48, %v1789_v38  ;;  %v2381_v7 = vadd.f32 %v2349_v14, %v2315_v10  ;;  %v2811_v3 = vadd.f32 %v2779_v58, %v2745_v1  ;;  %v3439_v59 = vmul.f32 %v8478_v45, %v8396_v19  ;;  %v8731_v38 = vld [vmem:[#allocation3 + $0x48] sm:$0xff]  ;;  %v11465_v58 = vld [vmem:[#allocation47_spill] sm:$0xff] }
 0x21c   : > { %v1587_v11 = vadd.f32 %v1555_v5, %v1161_v39  ;;  %v2611_v37 = vadd.f32 %v2579_v16, %v2545_v21  ;;  %v3505_v29 = vmul.f32 %v8590_v52, %v8405_v36  ;;  %v3280_v63 = vadd.f32 %v8366_v24, %v11463_v30  ;;  %v5461_v1 = vld [vmem:[#allocation3 + $0x28] sm:$0xff]  ;;  %v11466_v21 = vld [vmem:[#allocation90_spill] sm:$0xff]  ;;  %v8761_v30 = vld [vmem:[#allocation3 + $0xc0] sm:$0xff] }
 0x21d   : > { %v2413_v60 = vmul.f32 %v2381_v7, %v11462_v46  ;;  %v2877_v53 = vadd.f32 %v2845_v23, %v2811_v3  ;;  %v3740_v10 = vmul.f32 %v5461_v1, %v8373_v56  ;;  %v3537_v19 = vmul.f32 %v3439_v59, %v11462_v46  ;;  %v11468_v7 = vld [vmem:[#allocation44_spill] sm:$0xff]  ;;  %v8758_v59 = vld [vmem:[#allocation3 + $0xb0] sm:$0xff]  ;;  %11471 = vst [vmem:[#allocation103_spill] sm:$0xff] %v8761_v30 }
 0x21e   : > { %v8734_v6 = vadd.f32 %v1981_v13, %v1587_v11  ;;  %v2643_v16 = vmul.f32 %v2611_v37, %v8700_v48  ;;  %v3601_v45 = vmul.f32 %v3505_v29, %v8700_v48  ;;  %vm4329_vm11 = vcmp.ge.f32.partialorder %v3280_v63, 0.0  ;;  %v11469_v11 = vld [vmem:[#allocation5_spill] sm:$0xff]  ;;  %11470 = vst [vmem:[#allocation24_spill] sm:$0xff] %v8758_v59  ;;  %v4454_v27 = vpop.permute.xlu0 %4453 }
 0x21f   : > { %v2445_v36 = vadd.f32 %v2413_v60, %v2215_v2  ;;  %v2913_v52 = vadd.f32 %v8742_v51, %v2877_v53  ;;  %v4361_v39 = vmul.f32 0.25, %v3280_v63  ;;  %v3569_v14 = vadd.f32 %v3537_v19, %v3373_v43  ;;  %v8763_v1 = vld [vmem:[#allocation3 + $0xd0] sm:$0xff]  ;;  %4550 = vst.msk [vmem:[#allocation4] sm:$0xff] %vm4549_vm2, %v4454_v27 }
 0x220   : > { %11464 = vst [vmem:[#allocation55_spill] sm:$0xff] %v8734_v6  ;;  %v3776_v5 = vmul.f32 %v8380_v42, %v11465_v58  ;;  %v3844_v37 = vmul.f32 %v8389_v61, %v8731_v38  ;;  %v3298_v23 = vadd.f32 %v8366_v24, %v11466_v21  ;;  %v3297_v3 = vadd.f32 %v8366_v24, %v11468_v7  ;;  %v5465_v7 = vld [vmem:[#allocation2 + $0x58] sm:$0xff]  ;;  %v11481_v27 = vld [vmem:[#allocation41_spill] sm:$0xff] }
 0x221   : > { %v8751_v2 = vadd.f32 %v2643_v16, %v2445_v36  ;;  %2945 = vst.msk [vmem:[#allocation3 + $0x110] sm:$0xff] %vm851_vm1, %v2913_v52  ;;  %v4393_v13 = vsel %vm4329_vm11, %v3280_v63, %v4361_v39  ;;  %v2703_v43 = vadd.f32 %v8168_v50, %v11469_v11  ;;  %v3633_v29 = vadd.f32 %v3601_v45, %v3569_v14  ;;  %v1172_v52 = vld [vmem:[#allocation2 + $0x57] sm:$0xff] }
 0x222   : > { %4461 = vrot.lane.b32.xlu1 %v4393_v13, %s5720_s21  ;;  %v3808_v60 = vadd.f32 %v3776_v5, %v3740_v10  ;;  %vm4347_vm12 = vcmp.ge.f32.partialorder %v3298_v23, 0.0  ;;  %v4379_v53 = vmul.f32 0.25, %v3298_v23  ;;  %11472 = vst [vmem:[#allocation94_spill] sm:$0xff] %v8763_v1  ;;  %vm4346_vm13 = vcmp.ge.f32.partialorder %v3297_v3, 0.0  ;;  %v8775_v5 = vld [vmem:[#allocation3 + $0x108] sm:$0xff] }
 0x223   : > { %11467 = vst [vmem:[#allocation63_spill] sm:$0xff] %v8751_v2  ;;  %v4378_v63 = vmul.f32 0.25, %v3297_v3  ;;  %vm4091_vm14 = vcmp.ge.f32.partialorder %v2703_v43, 0.0  ;;  %v4123_v16 = vmul.f32 0.25, %v2703_v43  ;;  %v3669_v19 = vadd.f32 %v8204_v32, %v3633_v29  ;;  %v5466_v29 = vld [vmem:[#allocation2 + $0x37] sm:$0xff] }
 0x224   : > { %v3876_v36 = vadd.f32 %v3844_v37, %v3808_v60  ;;  %v4411_v50 = vsel %vm4347_vm12, %v3298_v23, %v4379_v53  ;;  %v3757_v45 = vmul.f32 %v8373_v56, %v8758_v59  ;;  %v3793_v14 = vmul.f32 %v8380_v42, %v8761_v30  ;;  %11473 = vst [vmem:[#allocation57_spill] sm:$0xff] %v8775_v5  ;;  %v5463_v37 = vld [vmem:[#allocation2 + $0x38] sm:$0xff]  ;;  %v5464_v23 = vld [vmem:[#allocation2 + $0x48] sm:$0xff] }
 0x225   : > { %4497 = vrot.lane.b32.xlu2 %v4411_v50, %s5720_s21  ;;  %v4410_v10 = vsel %vm4346_vm13, %v3297_v3, %v4378_v63  ;;  %v8769_v39 = vsel %vm4091_vm14, %v2703_v43, %v4123_v16  ;;  %v3861_v58 = vmul.f32 %v8389_v61, %v8763_v1  ;;  %v2058_v21 = vmul.f32 %v5463_v37, %v8660_v4  ;;  %v1598_v43 = vld [vmem:[#allocation2 + $0x59] sm:$0xff]  ;;  %v5467_v53 = vld [vmem:[#allocation2 + $0x47] sm:$0xff] }
 0x226   : > { %v3912_v32 = vadd.f32 %v8418_v9, %v3876_v36  ;;  %v2092_v13 = vmul.f32 %v5464_v23, %v8668_v62  ;;  %v2158_v3 = vmul.f32 %v5465_v7, %v8675_v18  ;;  %v3825_v11 = vadd.f32 %v3793_v14, %v3757_v45  ;;  %v8784_v36 = vpop.permute.xlu2 %4198  ;;  %v5468_v7 = vld [vmem:[#allocation2 + $0x39] sm:$0xff]  ;;  %v8792_v14 = vld [vmem:[%s10810_s11 + $0x1] ss:$0 sm:$0xff]  ;;  %v11475_v5 = vld [vmem:[#allocation110_spill] sm:$0xff] }
 0x227   : > { %v2224_v60 = vmul.f32 %v5466_v29, %v8681_v22  ;;  %v2258_v63 = vmul.f32 %v5467_v53, %v8688_v8  ;;  %v2324_v16 = vmul.f32 %v8695_v34, %v1172_v52  ;;  %v2454_v45 = vmul.f32 %v5468_v7, %v8540_v17  ;;  %v8798_v52 = vld [vmem:[%s10810_s11] ss:$0 sm:$0xff]  ;;  %v8803_v7 = vld [vmem:[#allocation3 + $0xb8] sm:$0xff] }
 0x228   : > { %v2977_v50 = vld [vmem:[#allocation3 + $0x110] sm:$0xff]  ;;  %vm4586_vm15 = vcmp.ge.f32.partialorder %v3912_v32, 0.0  ;;  %v4618_v23 = vmul.f32 0.25, %v3912_v32  ;;  %v2124_v2 = vadd.f32 %v2092_v13, %v2058_v21  ;;  %v3893_v21 = vadd.f32 %v3861_v58, %v3825_v11  ;;  %11476 = vst [vmem:[#allocation96_spill] sm:$0xff] %v8803_v7 }
 0x229   : > { %v3043_v37 = vld [vmem:[#allocation3 + $0x10f] sm:$0xff]  ;;  %v3011_v29 = vmul.f32 %v8792_v14, %v2977_v50  ;;  %v2290_v13 = vadd.f32 %v2258_v63, %v2224_v60  ;;  %v5472_v63 = vld [vmem:[#allocation2 + $0x49] sm:$0xff]  ;;  %vm4806_vm14 = vcmask 130144  }
 0x22a   : > { %v8786_v6 = vld [vmem:[#allocation3 + $0x109] sm:$0xff]  ;;  %v3077_v53 = vmul.f32 %v8798_v52, %v3043_v37  ;;  %v8810_v50 = vld [vmem:[%s10810_s11 + $0x2] ss:$0 sm:$0xff]  ;;  %v4650_v37 = vsel %vm4586_vm15, %v3912_v32, %v4618_v23  ;;  %4495 = vrot.lane.b32.xlu1 %v4410_v10, %s5720_s21  ;;  %v2190_v58 = vadd.f32 %v2158_v3, %v2124_v2  ;;  %v3929_v11 = vadd.f32 %v8418_v9, %v3893_v21 }
 0x22b   : > { %11474 = vst [vmem:[#allocation98_spill] sm:$0xff] %v8786_v6  ;;  %v3109_v6 = vld [vmem:[#allocation3 + $0x111] sm:$0xff]  ;;  %4718 = vrot.lane.b32.xlu0 %v4650_v37, %s5721_s23  ;;  %v2356_v60 = vadd.f32 %v2324_v16, %v2290_v13  ;;  %v2488_v33 = vmul.f32 %v5472_v63, %v8547_v41  ;;  %v3794_v10 = vmul.f32 %v8380_v42, %v8805_v28  ;;  %v11479_v21 = vld [vmem:[#allocation84_spill] sm:$0xff] }
 0x22c   : > { %3700 = vst.msk [vmem:[#allocation3 + $0x108] sm:$0xff] %vm851_vm1, %v11475_v5  ;;  %v3143_v44 = vmul.f32 %v8810_v50, %v3109_v6  ;;  %v3175_v5 = vmul.f32 %v3077_v53, %v11462_v46  ;;  %v3758_v46 = vmul.f32 %v8373_v56, %v8803_v7  ;;  %vm4603_vm3 = vcmp.ge.f32.partialorder %v3929_v11, 0.0  ;;  %v11478_v16 = vld [vmem:[#allocation14_spill] sm:$0xff]  ;;  %v8839_v13 = vld [vmem:[#allocation3 + $0x50] sm:$0xff] }
 0x22d   : > { %3701 = vst.msk [vmem:[#allocation3 + $0x110] sm:$0xff] %vm851_vm1, %v3669_v19  ;;  %v8826_v19 = vld [vmem:[%s10806_s7 + $0x8] ss:$0 sm:$0xff]  ;;  %v4635_v3 = vmul.f32 0.25, %v3929_v11  ;;  %v3862_v53 = vmul.f32 %v8389_v61, %v8820_v47  ;;  %v5474_v7 = vld [vmem:[#allocation3 + $0x30] sm:$0xff] }
 0x22e   : > { %v3239_v6 = vmul.f32 %v3143_v44, %v8700_v48  ;;  %v2554_v2 = vmul.f32 %v8826_v19, %v1598_v43  ;;  %v3207_v32 = vadd.f32 %v3175_v5, %v3011_v29  ;;  %v2388_v44 = vmul.f32 %v2356_v60, %v11478_v16  ;;  %v5487_v47 = vld [vmem:[#allocation2 + $0x40] sm:$0xff] }
 0x22f   : > { %v2520_v48 = vadd.f32 %v2488_v33, %v2454_v45  ;;  %v3826_v23 = vadd.f32 %v3794_v10, %v3758_v46  ;;  %v2986_v43 = vmul.f32 %v8792_v14, %v11479_v21  ;;  %v4667_v63 = vsel %vm4603_vm3, %v3929_v11, %v4635_v3  ;;  %v11482_v45 = vld [vmem:[#allocation86_spill] sm:$0xff]  ;;  %v11483_v46 = vld [vmem:[#allocation20_spill] sm:$0xff]  ;;  %v11484_v11 = vld [vmem:[#allocation87_spill] sm:$0xff]  ;;  %v8856_v3 = vpop.permute.xlu2 %4200 }
 0x230   : > { %v8841_v37 = vadd.f32 %v3239_v6, %v3207_v32  ;;  %v2420_v35 = vadd.f32 %v2388_v44, %v2190_v58  ;;  %v3052_v29 = vmul.f32 %v8798_v52, %v11481_v27  ;;  %4752 = vrot.lane.b32.xlu2 %v4667_v63, %s5721_s23  ;;  %v3118_v60 = vmul.f32 %v8810_v50, %v11482_v45 }
 0x231   : > { %v2586_v5 = vadd.f32 %v2554_v2, %v2520_v48  ;;  %v3894_v33 = vadd.f32 %v3862_v53, %v3826_v23  ;;  %v2019_v10 = vadd.f32 %v8359_v15, %v11483_v46  ;;  %v3741_v6 = vmul.f32 %v5474_v7, %v8373_v56  ;;  %v11485_v2 = vld [vmem:[#allocation78_spill] sm:$0xff]  ;;  %v8861_v53 = vld [vmem:[#allocation3 + $0xe0] sm:$0xff] }
 0x232   : > { %11480 = vst [vmem:[#allocation74_spill] sm:$0xff] %v8841_v37  ;;  %v3150_v21 = vmul.f32 %v3052_v29, %v11478_v16  ;;  %v3777_v58 = vmul.f32 %v8380_v42, %v11484_v11  ;;  %v3845_v32 = vmul.f32 %v8389_v61, %v8839_v13  ;;  %v3214_v23 = vmul.f32 %v3118_v60, %v11485_v2  ;;  %v8926_v16 = vld [vmem:[#allocation2 + $0x97] sm:$0xff] }
 0x233   : > { %v2618_v44 = vmul.f32 %v2586_v5, %v11485_v2  ;;  %v3930_v48 = vadd.f32 %v8418_v9, %v3894_v33  ;;  %vm3941_vm4 = vcmp.ge.f32.partialorder %v2019_v10, 0.0  ;;  %11486 = vst [vmem:[#allocation106_spill] sm:$0xff] %v8861_v53  ;;  %4242 = vrot.lane.b32.xlu0 %v8769_v39, %s5719_s27  ;;  %v3973_v63 = vmul.f32 0.25, %v2019_v10  ;;  %v8874_v39 = vld [vmem:[%s10807_s8] ss:$0 sm:$0xff] }
 0x234   : > { %v3182_v7 = vadd.f32 %v3150_v21, %v2986_v43  ;;  %v3809_v27 = vadd.f32 %v3777_v58, %v3741_v6  ;;  %v3759_v29 = vmul.f32 %v8373_v56, %v8761_v30  ;;  %v3795_v5 = vmul.f32 %v8380_v42, %v8763_v1  ;;  %v11487_v6 = vld [vmem:[#allocation79_spill] sm:$0xff] }
 0x235   : > { %v2650_v45 = vadd.f32 %v2618_v44, %v2420_v35  ;;  %vm4604_vm6 = vcmp.ge.f32.partialorder %v3930_v48, 0.0  ;;  %v4636_v46 = vmul.f32 0.25, %v3930_v48  ;;  %v4005_v60 = vsel %vm3941_vm4, %v2019_v10, %v3973_v63  ;;  %v11488_v44 = vld [vmem:[#allocation6_spill] sm:$0xff] }
 0x236   : > { %v3246_v33 = vadd.f32 %v3214_v23, %v3182_v7  ;;  %v3877_v11 = vadd.f32 %v3845_v32, %v3809_v27  ;;  %v3863_v37 = vmul.f32 %v8389_v61, %v8861_v53  ;;  %4037 = vst.msk [vmem:[#allocation4 + $0x8] sm:$0xff] %vm851_vm1, %v4005_v60  ;;  %v3827_v35 = vadd.f32 %v3795_v5, %v3759_v29  ;;  %v11489_v7 = vld [vmem:[#allocation53_spill] sm:$0xff] }
 0x237   : > { %v2686_v43 = vadd.f32 %v8874_v39, %v2650_v45  ;;  %v4668_v21 = vsel %vm4604_vm6, %v3930_v48, %v4636_v46  ;;  %v3299_v58 = vadd.f32 %v8366_v24, %v11487_v6  ;;  %4294 = vst.msk [vmem:[#allocation4 + $0x8] sm:$0xff] %vm4292_vm5, %v8784_v36  ;;  %v2020_v23 = vadd.f32 %v8359_v15, %v11488_v44  ;;  %v8895_v6 = vld [vmem:[#allocation3 + $0x58] sm:$0xff] }
 0x238   : > { %v3282_v10 = vadd.f32 %v8366_v24, %v3246_v33  ;;  %v3913_v32 = vadd.f32 %v8418_v9, %v3877_v11  ;;  %v2687_v63 = vadd.f32 %v8874_v39, %v11489_v7  ;;  %v3895_v27 = vadd.f32 %v3863_v37, %v3827_v35  ;;  %v8891_v11 = vpop.permute.xlu2 %4202  ;;  %v8897_v44 = vld [vmem:[#allocation3 + $0x5f] sm:$0xff] }
 0x239   : > { %vm4074_vm7 = vcmp.ge.f32.partialorder %v2686_v43, 0.0  ;;  %v4106_v48 = vmul.f32 0.25, %v2686_v43  ;;  %vm4348_vm8 = vcmp.ge.f32.partialorder %v3299_v58, 0.0  ;;  %v4380_v36 = vmul.f32 0.25, %v3299_v58  ;;  %11490 = vst [vmem:[#allocation80_spill] sm:$0xff] %v8897_v44  ;;  %v8899_v7 = vld [vmem:[#allocation3 + $0x59] sm:$0xff] }
 0x23a   : > { %vm4331_vm9 = vcmp.ge.f32.partialorder %v3282_v10, 0.0  ;;  %v4363_v29 = vmul.f32 0.25, %v3282_v10  ;;  %vm4587_vm10 = vcmp.ge.f32.partialorder %v3913_v32, 0.0  ;;  %v4619_v45 = vmul.f32 0.25, %v3913_v32 }
 0x23b   : > { %v4138_v46 = vsel %vm4074_vm7, %v2686_v43, %v4106_v48  ;;  %v3931_v5 = vadd.f32 %v8418_v9, %v3895_v27  ;;  %vm3942_vm11 = vcmp.ge.f32.partialorder %v2020_v23, 0.0  ;;  %4754 = vrot.lane.b32.xlu0 %v4668_v21, %s5721_s23  ;;  %v3974_v60 = vmul.f32 0.25, %v2020_v23  ;;  %v8906_v48 = vld [vmem:[#allocation2 + $0x90] sm:$0xff] }
 0x23c   : > { %4208 = vrot.lane.b32.xlu1 %v4138_v46, %s5719_s27  ;;  %v4395_v15 = vsel %vm4331_vm9, %v3282_v10, %v4363_v29  ;;  %v4651_v33 = vsel %vm4587_vm10, %v3913_v32, %v4619_v45  ;;  %vm4075_vm12 = vcmp.ge.f32.partialorder %v2687_v63, 0.0  ;;  %v4412_v43 = vsel %vm4348_vm8, %v3299_v58, %v4380_v36  ;;  %v8902_v10 = vld [vmem:[#allocation2 + $0x88] sm:$0xff]  ;;  %v8910_v58 = vld [vmem:[#allocation2 + $0x98] sm:$0xff]  ;;  %v11492_v45 = vld [vmem:[#allocation33_spill] sm:$0xff] }
 0x23d   : > { %4465 = vrot.lane.b32.xlu2 %v4395_v15, %s5720_s21  ;;  %vm4605_vm13 = vcmp.ge.f32.partialorder %v3931_v5, 0.0  ;;  %v4637_v37 = vmul.f32 0.25, %v3931_v5  ;;  %v4107_v35 = vmul.f32 0.25, %v2687_v63  ;;  %v4006_v21 = vsel %vm3942_vm11, %v2020_v23, %v3974_v60  ;;  %11491 = vst [vmem:[#allocation36_spill] sm:$0xff] %v8902_v10  ;;  %v8920_v36 = vld [vmem:[#allocation2 + $0xa0] sm:$0xff]  ;;  %v11494_v60 = vld [vmem:[#allocation50_spill] sm:$0xff] }
 0x23e   : > { %v2730_v32 = vmul.f32 %v8902_v10, %v8253_v20  ;;  %v2731_v27 = vmul.f32 %v8906_v48, %v8253_v20  ;;  %v2764_v29 = vmul.f32 %v8910_v58, %v8710_v49  ;;  %3678 = vst.msk [vmem:[#allocation3 + $0x58] sm:$0xff] %vm851_vm1, %v11492_v45  ;;  %v2765_v15 = vmul.f32 %v8920_v36, %v8710_v49  ;;  %v11493_v20 = vld [vmem:[#allocation42_spill] sm:$0xff] }
 0x23f   : > { %v4669_v46 = vsel %vm4605_vm13, %v3931_v5, %v4637_v37  ;;  %4038 = vst.msk [vmem:[#allocation4 + $0x10] sm:$0xff] %vm851_vm1, %v4006_v21  ;;  %v8918_v23 = vsel %vm4075_vm12, %v2687_v63, %v4107_v35  ;;  %v2795_v2 = vadd.f32 %v11494_v60, %v11493_v20  ;;  %v2829_v5 = vmul.f32 %v8920_v36, %v8718_v57  ;;  %v8932_v37 = vld [vmem:[#allocation2 + $0xa8] sm:$0xff]  ;;  %v8936_v35 = vld [vmem:[#allocation2 + $0xb0] sm:$0xff] }
 0x240   : > { %4295 = vst.msk [vmem:[#allocation4 + $0x10] sm:$0xff] %vm4292_vm5, %v8856_v3  ;;  %v2796_v45 = vadd.f32 %v2764_v29, %v2730_v32  ;;  %v2830_v63 = vmul.f32 %v8932_v37, %v8718_v57  ;;  %v2831_v49 = vmul.f32 %v8936_v35, %v8718_v57  ;;  %v1604_v21 = vld [vmem:[#allocation2 + $0x89] sm:$0xff]  ;;  %v2797_v20 = vadd.f32 %v2765_v15, %v2731_v27 }
 0x241   : > { %v1178_v60 = vld [vmem:[#allocation2 + $0x87] sm:$0xff]  ;;  %v2068_v3 = vmul.f32 %v8902_v10, %v8660_v4  ;;  %v2102_v32 = vmul.f32 %v8910_v58, %v8668_v62  ;;  %v2168_v29 = vmul.f32 %v8932_v37, %v8675_v18  ;;  %v2861_v30 = vadd.f32 %v2829_v5, %v2795_v2 }
 0x242   : > { %v2862_v53 = vadd.f32 %v2830_v63, %v2796_v45  ;;  %v2234_v1 = vmul.f32 %v8681_v22, %v1178_v60  ;;  %v2268_v59 = vmul.f32 %v8688_v8, %v8926_v16  ;;  %v2863_v57 = vadd.f32 %v2831_v49, %v2797_v20  ;;  %v8949_v27 = vld [vmem:[#allocation2 + $0xa7] sm:$0xff]  ;;  %v4456_v63 = vpop.permute.xlu0 %4455  ;;  %v4711_v49 = vpop.permute.xlu2 %4710 }
 0x243   : > { %v2134_v44 = vadd.f32 %v2102_v32, %v2068_v3  ;;  %v2334_v15 = vmul.f32 %v8949_v27, %v8695_v34  ;;  %v2464_v10 = vmul.f32 %v8540_v17, %v1604_v21  ;;  %4756 = vrot.lane.b32.xlu0 %v4669_v46, %s5721_s23  ;;  %v2897_v2 = vadd.f32 %v8742_v51, %v2861_v30  ;;  %v5483_v3 = vld [vmem:[#allocation2 + $0x99] sm:$0xff]  ;;  %v5484_v32 = vld [vmem:[#allocation2 + $0xa9] sm:$0xff] }
 0x244   : > { %4720 = vrot.lane.b32.xlu1 %v4651_v33, %s5721_s23  ;;  %v2898_v45 = vadd.f32 %v8742_v51, %v2862_v53  ;;  %v2300_v5 = vadd.f32 %v2268_v59, %v2234_v1  ;;  %v2899_v20 = vadd.f32 %v8742_v51, %v2863_v57  ;;  %v2498_v21 = vmul.f32 %v5483_v3, %v8547_v41  ;;  %v5485_v46 = vld [vmem:[#allocation2 + $0x20] sm:$0xff]  ;;  %v5486_v1 = vld [vmem:[#allocation2 + $0x30] sm:$0xff] }
 0x245   : > { %4499 = vrot.lane.b32.xlu2 %v4412_v43, %s5720_s21  ;;  %v2200_v60 = vadd.f32 %v2168_v29, %v2134_v44  ;;  %v2564_v33 = vmul.f32 %v5484_v32, %v8826_v19  ;;  %2929 = vst.msk [vmem:[#allocation3 + $0x90] sm:$0xff] %vm851_vm1, %v2897_v2  ;;  %v997_v59 = vmul.f32 %v5485_v46, %v8610_v26  ;;  %v5488_v44 = vld [vmem:[#allocation2 + $0x1f] sm:$0xff]  ;;  %v5489_v57 = vld [vmem:[#allocation2 + $0x2f] sm:$0xff] }
 0x246   : > { %v2366_v30 = vadd.f32 %v2334_v15, %v2300_v5  ;;  %v1033_v53 = vmul.f32 %v5486_v1, %v8617_v12  ;;  %v1101_v43 = vmul.f32 %v5487_v47, %v8624_v31  ;;  %2930 = vst.msk [vmem:[#allocation3 + $0x98] sm:$0xff] %vm851_vm1, %v2898_v45  ;;  %v2530_v51 = vadd.f32 %v2498_v21, %v2464_v10  ;;  %v5490_v2 = vld [vmem:[#allocation2 + $0x3f] sm:$0xff]  ;;  %v11495_v26 = vld [vmem:[#allocation38_spill] sm:$0xff]  ;;  %v5492_v31 = vld [vmem:[#allocation2 + $0x31] sm:$0xff] }
 0x247   : > { %v1199_v29 = vmul.f32 %v5488_v44, %v8633_v25  ;;  %v1235_v3 = vmul.f32 %v5489_v57, %v8642_v0  ;;  %v1303_v15 = vmul.f32 %v5490_v2, %v8649_v54  ;;  %2931 = vst.msk [vmem:[#allocation3 + $0xa0] sm:$0xff] %vm851_vm1, %v2899_v20  ;;  %v5491_v32 = vld [vmem:[#allocation2 + $0x21] sm:$0xff]  ;;  %v1661_v10 = vmul.f32 %v5492_v31, %v8514_v55  ;;  %v11497_v57 = vld [vmem:[#allocation76_spill] sm:$0xff] }
 0x248   : > { %v2398_v5 = vmul.f32 %v2366_v30, %v11495_v26  ;;  %v1065_v12 = vadd.f32 %v1033_v53, %v997_v59  ;;  %v1625_v47 = vmul.f32 %v5491_v32, %v8507_v40  ;;  %v8974_v45 = vld [vmem:[#allocation3 + $0x58] sm:$0xff]  ;;  %v2596_v0 = vadd.f32 %v2564_v33, %v2530_v51  ;;  %4551 = vst.msk [vmem:[#allocation4 + $0x8] sm:$0xff] %vm4549_vm2, %v4456_v63  ;;  %v11496_v33 = vld [vmem:[#allocation85_spill] sm:$0xff] }
 0x249   : > { %v4872_v25 = vld [vmem:[%s10816_s17 + $0x8] sm:$0xff]  ;;  %v1267_v21 = vadd.f32 %v1235_v3, %v1199_v29  ;;  %v3778_v53 = vmul.f32 %v8380_v42, %v8731_v38  ;;  %4807 = vst.msk [vmem:[#allocation4] sm:$0xff] %vm4806_vm14, %v4711_v49  ;;  %v3846_v29 = vmul.f32 %v8389_v61, %v8974_v45  ;;  %v8992_v3 = vadd.f32 %v8366_v24, %v11497_v57  ;;  %v4871_v61 = vld [vmem:[%s10816_s17] sm:$0xff] }
 0x24a   : > { %v5493_v54 = vld [vmem:[%s10804_s5 + $0x8] ss:$0 sm:$0xff]  ;;  %v2430_v55 = vadd.f32 %v2398_v5, %v2200_v60  ;;  %v1133_v59 = vadd.f32 %v1101_v43, %v1065_v12  ;;  %v1693_v1 = vadd.f32 %v1661_v10, %v1625_v47  ;;  %v2628_v51 = vmul.f32 %v2596_v0, %v11496_v33  ;;  %4987 = vmatpush.msra.mxu1 %v4872_v25  ;;  %v4458_v49 = vpop.permute.xlu0 %4457  ;;  %v4713_v60 = vpop.permute.xlu2 %4712  ;;  %v11503_v47 = vld [vmem:[#allocation65_spill] sm:$0xff] }
 0x24b   : > { %v5494_v20 = vld [vmem:[#allocation2 + $0x41] sm:$0xff]  ;;  %v1335_v44 = vadd.f32 %v1303_v15, %v1267_v21  ;;  %v2069_v42 = vmul.f32 %v8906_v48, %v8660_v4  ;;  %v2103_v38 = vmul.f32 %v8920_v36, %v8668_v62  ;;  %vm4332_vm15 = vcmp.ge.f32.partialorder %v8992_v3, 0.0  ;;  %4552 = vst.msk [vmem:[#allocation4 + $0x10] sm:$0xff] %vm4549_vm2, %v4458_v49  ;;  %5284 = vmatpush.msra.mxu3 %v4872_v25  ;;  %v11506_v49 = vld [vmem:[#allocation23_spill] sm:$0xff] }
 0x24c   : > { %v1729_v30 = vmul.f32 %v5494_v20, %v5493_v54  ;;  %v5495_v46 = vld [vmem:[#allocation3 + $0x38] sm:$0xff]  ;;  %4210 = vrot.lane.b32.xlu1 %v8918_v23, %s5719_s27  ;;  %v9003_v24 = vld [vmem:[#allocation3 + $0x90] sm:$0xff]  ;;  %v2660_v23 = vadd.f32 %v2628_v51, %v2430_v55  ;;  %v4364_v48 = vmul.f32 0.25, %v8992_v3  ;;  %4988 = vmatpush.msra.mxu1 %v4871_v61  ;;  %v2169_v21 = vmul.f32 %v8936_v35, %v8675_v18 }
 0x24d   : > { %v3742_v40 = vmul.f32 %v5495_v46, %v8373_v56  ;;  %11498 = vst [vmem:[#allocation60_spill] sm:$0xff] %v9003_v24  ;;  %v9005_v43 = vld [vmem:[#allocation3 + $0x8f] sm:$0xff]  ;;  %v11501_v15 = vld [vmem:[#allocation10_spill] sm:$0xff]  ;;  %v2135_v0 = vadd.f32 %v2103_v38, %v2069_v42  ;;  %v11504_v46 = vld [vmem:[#allocation35_spill] sm:$0xff]  ;;  %5285 = vmatpush.msra.mxu3 %v4871_v61 }
 0x24e   : > { %v1761_v56 = vadd.f32 %v1729_v30, %v1693_v1  ;;  %11499 = vst [vmem:[#allocation11_spill] sm:$0xff] %v9005_v43  ;;  %v9007_v2 = vld [vmem:[#allocation3 + $0x89] sm:$0xff]  ;;  %v1527_v5 = vmul.f32 %v11501_v15, %v1335_v44  ;;  %v2962_v36 = vld [vmem:[#allocation3 + $0x98] sm:$0xff]  ;;  %v2696_v25 = vadd.f32 %v8874_v39, %v2660_v23  ;;  %v2963_v55 = vld [vmem:[#allocation3 + $0xa0] sm:$0xff] }
 0x24f   : > { %v3810_v63 = vadd.f32 %v3778_v53, %v3742_v40  ;;  %11500 = vst [vmem:[#allocation18_spill] sm:$0xff] %v9007_v2  ;;  %v3028_v12 = vld [vmem:[#allocation3 + $0x97] sm:$0xff]  ;;  %v2996_v54 = vmul.f32 %v8792_v14, %v2962_v36  ;;  %v3029_v1 = vld [vmem:[#allocation3 + $0x9f] sm:$0xff]  ;;  %v2997_v35 = vmul.f32 %v8792_v14, %v2963_v55  ;;  %v2964_v38 = vld [vmem:[#allocation3 + $0xa8] sm:$0xff] }
 0x250   : > { %v9013_v32 = vld [vmem:[#allocation3 + $0x91] sm:$0xff]  ;;  %v1953_v31 = vmul.f32 %v11503_v47, %v1761_v56  ;;  %4808 = vst.msk [vmem:[#allocation4 + $0x8] sm:$0xff] %vm4806_vm14, %v4713_v60  ;;  %v3062_v20 = vmul.f32 %v8798_v52, %v3028_v12  ;;  %v3094_v30 = vld [vmem:[#allocation3 + $0x99] sm:$0xff]  ;;  %v1559_v40 = vadd.f32 %v1527_v5, %v1133_v59  ;;  %v3063_v44 = vmul.f32 %v8798_v52, %v3029_v1  ;;  %v3030_v56 = vld [vmem:[#allocation3 + $0xa7] sm:$0xff] }
 0x251   : > { %11502 = vst [vmem:[#allocation47_spill] sm:$0xff] %v9013_v32  ;;  %v3878_v10 = vadd.f32 %v3846_v29, %v3810_v63  ;;  %v3128_v53 = vmul.f32 %v8810_v50, %v3094_v30  ;;  %v3095_v29 = vld [vmem:[#allocation3 + $0xa1] sm:$0xff]  ;;  %v11505_v57 = vld [vmem:[#allocation70_spill] sm:$0xff]  ;;  %vm4084_vm3 = vcmp.ge.f32.partialorder %v2696_v25, 0.0  ;;  %v4116_v42 = vmul.f32 0.25, %v2696_v25  ;;  %v4839_v60 = vld [vmem:[#allocation4] sm:$0xff] }
 0x252   : > { %3685 = vst.msk [vmem:[#allocation3 + $0x90] sm:$0xff] %vm851_vm1, %v11504_v46  ;;  %v3160_v63 = vmul.f32 %v3062_v20, %v11495_v26  ;;  %v1985_v59 = vadd.f32 %v1953_v31, %v1559_v40  ;;  %v3129_v15 = vmul.f32 %v8810_v50, %v3095_v29  ;;  %v11507_v5 = vld [vmem:[#allocation27_spill] sm:$0xff]  ;;  %5246 = vmatmul.msk.f32.vlgmr.msra.gmra.mxu1 %vm641_vm0, %v4839_v60  ;;  %v9041_v47 = vld [vmem:[%s10805_s6] ss:$0 sm:$0xff]  ;;  %v11508_v31 = vld [vmem:[#allocation12_spill] sm:$0xff]  ;;  %v9050_v1 = vpop.permute.xlu0 %4204 }
 0x253   : > { %v3914_v51 = vadd.f32 %v8418_v9, %v3878_v10  ;;  %3686 = vst.msk [vmem:[#allocation3 + $0x98] sm:$0xff] %vm851_vm1, %v11505_v57  ;;  %v3224_v9 = vmul.f32 %v3128_v53, %v11496_v33  ;;  %v4148_v12 = vsel %vm4084_vm3, %v2696_v25, %v4116_v42  ;;  %v3161_v10 = vmul.f32 %v3063_v44, %v11508_v31  ;;  %v1179_v20 = vld [vmem:[#allocation2 + $0x8f] sm:$0xff]  ;;  %v11509_v40 = vld [vmem:[#allocation100_spill] sm:$0xff]  ;;  %v9052_v53 = vpop.permute.xlu2 %4238  ;;  %v5529_v32 = vld [vmem:[#allocation2 + $0xe1] sm:$0xff] }
 0x254   : > { %3687 = vst.msk [vmem:[#allocation3 + $0xa0] sm:$0xff] %vm851_vm1, %v11506_v49  ;;  %v3192_v36 = vadd.f32 %v3160_v63, %v2996_v54  ;;  %v2021_v61 = vadd.f32 %v9041_v47, %v1985_v59  ;;  %v1605_v30 = vld [vmem:[#allocation2 + $0x91] sm:$0xff]  ;;  %4228 = vrot.lane.b32.xlu2 %v4148_v12, %s5719_s27  ;;  %v3225_v55 = vmul.f32 %v3129_v15, %v11509_v40  ;;  %v9400_v43 = vld [vmem:[%s10806_s7 + $0x5] ss:$0 sm:$0xff] }
 0x255   : > { %vm4588_vm4 = vcmp.ge.f32.partialorder %v3914_v51, 0.0  ;;  %v4620_v23 = vmul.f32 0.25, %v3914_v51  ;;  %3688 = vst.msk [vmem:[#allocation3 + $0xa8] sm:$0xff] %vm851_vm1, %v11507_v5  ;;  %v4396_v54 = vsel %vm4332_vm15, %v8992_v3, %v4364_v48  ;;  %v2201_v25 = vadd.f32 %v2169_v21, %v2135_v0  ;;  %v9054_v29 = vld [vmem:[#allocation3 + $0x60] sm:$0xff]  ;;  %v5497_v48 = vld [vmem:[#allocation2 + $0x9f] sm:$0xff] }
 0x256   : > { %v9056_v57 = vld [vmem:[#allocation3 + $0x67] sm:$0xff]  ;;  %v3256_v63 = vadd.f32 %v3224_v9, %v3192_v36  ;;  %vm3943_vm6 = vcmp.ge.f32.partialorder %v2021_v61, 0.0  ;;  %v3193_v42 = vadd.f32 %v3161_v10, %v2997_v35  ;;  %v2235_v3 = vmul.f32 %v8681_v22, %v1179_v20  ;;  %v5498_v21 = vld [vmem:[#allocation2 + $0xaf] sm:$0xff]  ;;  %v9070_v9 = vld [vmem:[%s10811_s12] ss:$0 sm:$0xff] }
 0x257   : > { %v4652_v46 = vsel %vm4588_vm4, %v3914_v51, %v4620_v23  ;;  %v9058_v44 = vld [vmem:[#allocation3 + $0x61] sm:$0xff]  ;;  %v3975_v51 = vmul.f32 0.25, %v2021_v61  ;;  %v2269_v0 = vmul.f32 %v5497_v48, %v8688_v8  ;;  %v2335_v49 = vmul.f32 %v5498_v21, %v8695_v34  ;;  %v5500_v5 = vld [vmem:[#allocation2 + $0xa1] sm:$0xff] }
 0x258   : > { %4722 = vrot.lane.b32.xlu1 %v4652_v46, %s5721_s23  ;;  %v11510_v59 = vld [vmem:[#allocation59_spill] sm:$0xff]  ;;  %v2465_v60 = vmul.f32 %v8540_v17, %v1605_v30  ;;  %v3292_v35 = vadd.f32 %v9070_v9, %v3256_v63  ;;  %v3257_v15 = vadd.f32 %v3225_v55, %v3193_v42  ;;  %v2499_v36 = vmul.f32 %v5500_v5, %v8547_v41  ;;  %v4840_v12 = vld [vmem:[#allocation4 + $0x8] sm:$0xff]  ;;  %v11512_v42 = vld [vmem:[#allocation109_spill] sm:$0xff] }
 0x259   : > { %3679 = vst.msk [vmem:[#allocation3 + $0x60] sm:$0xff] %vm851_vm1, %v11510_v59  ;;  %v4007_v23 = vsel %vm3943_vm6, %v2021_v61, %v3975_v51  ;;  %v2301_v10 = vadd.f32 %v2269_v0, %v2235_v3  ;;  %v5501_v20 = vld [vmem:[#allocation2 + $0xb1] sm:$0xff]  ;;  %v2998_v17 = vmul.f32 %v8792_v14, %v2964_v38  ;;  %v3064_v30 = vmul.f32 %v8798_v52, %v3030_v56 }
 0x25a   : > { %4039 = vst.msk [vmem:[#allocation4 + $0x18] sm:$0xff] %vm851_vm1, %v4007_v23  ;;  %v2565_v46 = vmul.f32 %v5501_v20, %v8826_v19  ;;  %vm4341_vm7 = vcmp.ge.f32.partialorder %v3292_v35, 0.0  ;;  %v4373_v59 = vmul.f32 0.25, %v3292_v35  ;;  %v3293_v61 = vadd.f32 %v9070_v9, %v3257_v15  ;;  %v11511_v63 = vld [vmem:[#allocation51_spill] sm:$0xff]  ;;  %5247 = vmatmul.msk.f32.gmra.mxu1 %vm641_vm0, %v4840_v12  ;;  %v9099_v20 = vld [vmem:[#allocation3 + $0x88] sm:$0xff] }
 0x25b   : > { %4296 = vst.msk [vmem:[#allocation4 + $0x18] sm:$0xff] %vm4292_vm5, %v8891_v11  ;;  %v2531_v55 = vadd.f32 %v2499_v36, %v2465_v60  ;;  %v2367_v41 = vadd.f32 %v2335_v49, %v2301_v10  ;;  %v3162_v51 = vmul.f32 %v3064_v30, %v11511_v63  ;;  %v3300_v3 = vadd.f32 %v9070_v9, %v11512_v42  ;;  %v4460_v49 = vpop.permute.xlu0 %4459  ;;  %v4715_v60 = vpop.permute.xlu2 %4714  ;;  %v11517_v30 = vld [vmem:[#allocation97_spill] sm:$0xff]  ;;  %v11557_v2 = vld [vmem:[#allocation36_spill] sm:$0xff] }
 0x25c   : > { %v2070_v19 = vmul.f32 %v8910_v58, %v8660_v4  ;;  %v4405_v56 = vsel %vm4341_vm7, %v3292_v35, %v4373_v59  ;;  %vm4342_vm8 = vcmp.ge.f32.partialorder %v3293_v61, 0.0  ;;  %v4374_v38 = vmul.f32 0.25, %v3293_v61  ;;  %4467 = vrot.lane.b32.xlu2 %v4396_v54, %s5720_s21  ;;  %v5502_v35 = vld [vmem:[#allocation2 + $0xb8] sm:$0xff]  ;;  %4553 = vst.msk [vmem:[#allocation4 + $0x18] sm:$0xff] %vm4549_vm2, %v4460_v49 }
 0x25d   : > { %v2597_v48 = vadd.f32 %v2565_v46, %v2531_v55  ;;  %4485 = vrot.lane.b32.xlu0 %v4405_v56, %s5720_s21  ;;  %v2399_v11 = vmul.f32 %v2367_v41, %v11508_v31  ;;  %v3194_v0 = vadd.f32 %v3162_v51, %v2998_v17  ;;  %vm4349_vm9 = vcmp.ge.f32.partialorder %v3300_v3, 0.0  ;;  %v11513_v54 = vld [vmem:[#allocation72_spill] sm:$0xff]  ;;  %4809 = vst.msk [vmem:[#allocation4 + $0x10] sm:$0xff] %vm4806_vm14, %v4715_v60  ;;  %v11519_v41 = vld [vmem:[#allocation58_spill] sm:$0xff]  ;;  %v11522_v60 = vld [vmem:[#allocation69_spill] sm:$0xff] }
 0x25e   : > { %v4381_v21 = vmul.f32 0.25, %v3300_v3  ;;  %v4406_v23 = vsel %vm4342_vm8, %v3293_v61, %v4374_v38  ;;  %v2104_v58 = vmul.f32 %v8932_v37, %v8668_v62  ;;  %v2170_v15 = vmul.f32 %v5502_v35, %v8675_v18  ;;  %11514 = vst [vmem:[#allocation90_spill] sm:$0xff] %v9099_v20  ;;  %v9101_v46 = vld [vmem:[#allocation3 + $0x87] sm:$0xff]  ;;  %v11518_v61 = vld [vmem:[#allocation29_spill] sm:$0xff] }
 0x25f   : > { %v2629_v4 = vmul.f32 %v2597_v48, %v11509_v40  ;;  %v2431_v5 = vadd.f32 %v2399_v11, %v2201_v25  ;;  %v3258_v36 = vadd.f32 %v11513_v54, %v3194_v0  ;;  %v2236_v10 = vmul.f32 %v8681_v22, %v8926_v16  ;;  %11515 = vst [vmem:[#allocation44_spill] sm:$0xff] %v9101_v46  ;;  %v9103_v17 = vld [vmem:[#allocation3 + $0x81] sm:$0xff]  ;;  %v11546_v40 = vld [vmem:[#allocation25_spill] sm:$0xff] }
 0x260   : > { %v4413_v12 = vsel %vm4349_vm9, %v3300_v3, %v4381_v21  ;;  %11516 = vst [vmem:[#allocation5_spill] sm:$0xff] %v9103_v17  ;;  %v2136_v62 = vadd.f32 %v2104_v58, %v2070_v19  ;;  %v2270_v18 = vmul.f32 %v8949_v27, %v8688_v8  ;;  %v5503_v37 = vld [vmem:[#allocation2 + $0xb7] sm:$0xff]  ;;  %v2704_v59 = vadd.f32 %v8874_v39, %v11517_v30  ;;  %v9430_v20 = vld [vmem:[%s10810_s11 + $0x1] ss:$0 sm:$0xff] }
 0x261   : > { %v2336_v25 = vmul.f32 %v5503_v37, %v8695_v34  ;;  %3684 = vst.msk [vmem:[#allocation3 + $0x88] sm:$0xff] %vm851_vm1, %v11518_v61  ;;  %v2661_v22 = vadd.f32 %v2629_v4, %v2431_v5  ;;  %v3294_v16 = vadd.f32 %v9070_v9, %v3258_v36  ;;  %v2988_v55 = vmul.f32 %v8792_v14, %v8895_v6  ;;  %v11520_v48 = vld [vmem:[#allocation7_spill] sm:$0xff]  ;;  %v11521_v6 = vld [vmem:[#allocation17_spill] sm:$0xff]  ;;  %v9147_v30 = vld [vmem:[#allocation3 + $0xe8] sm:$0xff] }
 0x262   : > { %v3054_v51 = vmul.f32 %v8798_v52, %v11519_v41  ;;  %v2202_v42 = vadd.f32 %v2170_v15, %v2136_v62  ;;  %v2302_v8 = vadd.f32 %v2270_v18, %v2236_v10  ;;  %vm4092_vm10 = vcmp.ge.f32.partialorder %v2704_v59, 0.0  ;;  %v9128_v58 = vld [vmem:[#allocation3 + $0x60] sm:$0xff]  ;;  %v9143_v37 = vld [vmem:[%s10814_s15 + $0x1] ss:$0 sm:$0xff] }
 0x263   : > { %v4124_v27 = vmul.f32 0.25, %v2704_v59  ;;  %v2697_v34 = vadd.f32 %v8874_v39, %v2661_v22  ;;  %vm4343_vm11 = vcmp.ge.f32.partialorder %v3294_v16, 0.0  ;;  %v4375_v3 = vmul.f32 0.25, %v3294_v16  ;;  %11523 = vst [vmem:[#allocation110_spill] sm:$0xff] %v9128_v58  ;;  %v5505_v62 = vld [vmem:[#allocation3 + $0x40] sm:$0xff] }
 0x264   : > { %v3120_v19 = vmul.f32 %v8810_v50, %v8899_v7  ;;  %v2368_v56 = vadd.f32 %v2336_v25, %v2302_v8  ;;  %v3152_v11 = vmul.f32 %v3054_v51, %v11520_v48  ;;  %v2022_v0 = vadd.f32 %v9041_v47, %v11521_v6  ;;  %4501 = vrot.lane.b32.xlu2 %v4413_v12, %s5720_s21  ;;  %v4717_v7 = vpop.permute.xlu2 %4716  ;;  %v4841_v54 = vld [vmem:[#allocation4 + $0x10] sm:$0xff]  ;;  %v9137_v12 = vld [vmem:[%s10814_s15] ss:$0 sm:$0xff]  ;;  %v11525_v8 = vld [vmem:[#allocation28_spill] sm:$0xff] }
 0x265   : > { %v9120_v38 = vsel %vm4092_vm10, %v2704_v59, %v4124_v27  ;;  %4487 = vrot.lane.b32.xlu0 %v4406_v23, %s5720_s21  ;;  %vm4085_vm12 = vcmp.ge.f32.partialorder %v2697_v34, 0.0  ;;  %v4117_v21 = vmul.f32 0.25, %v2697_v34  ;;  %v4407_v49 = vsel %vm4343_vm11, %v3294_v16, %v4375_v3  ;;  %4810 = vst.msk [vmem:[#allocation4 + $0x18] sm:$0xff] %vm4806_vm14, %v4717_v7  ;;  %v11524_v23 = vld [vmem:[#allocation88_spill] sm:$0xff]  ;;  %5248 = vmatmul.msk.f32.gmra.mxu1 %vm641_vm0, %v4841_v54  ;;  %v9155_v16 = vld [vmem:[%s10814_s15 + $0x2] ss:$0 sm:$0xff] }
 0x266   : > { %v3216_v4 = vmul.f32 %v3120_v19, %v11522_v60  ;;  %v2400_v35 = vmul.f32 %v2368_v56, %v11511_v63  ;;  %v3184_v15 = vadd.f32 %v3152_v11, %v2988_v55  ;;  %vm3944_vm13 = vcmp.ge.f32.partialorder %v2022_v0, 0.0  ;;  %v11526_v3 = vld [vmem:[#allocation49_spill] sm:$0xff]  ;;  %v9170_v11 = vld [vmem:[#allocation3 + $0x98] sm:$0xff]  ;;  %v11545_v63 = vld [vmem:[#allocation104_spill] sm:$0xff] }
 0x267   : > { %v3976_v5 = vmul.f32 0.25, %v2022_v0  ;;  %v4149_v36 = vsel %vm4085_vm12, %v2697_v34, %v4117_v21  ;;  %v2039_v10 = vadd.f32 %v9041_v47, %v11524_v23  ;;  %v3743_v18 = vmul.f32 %v5505_v62, %v9137_v12  ;;  %v11527_v21 = vld [vmem:[#allocation82_spill] sm:$0xff]  ;;  %v9186_v23 = vld [vmem:[#allocation3 + $0xa8] sm:$0xff] }
 0x268   : > { %v3779_v25 = vmul.f32 %v9143_v37, %v8839_v13  ;;  %4230 = vrot.lane.b32.xlu1 %v4149_v36, %s5719_s27  ;;  %v2432_v59 = vadd.f32 %v2400_v35, %v2202_v42  ;;  %v3248_v61 = vadd.f32 %v3216_v4, %v3184_v15  ;;  %v3847_v55 = vmul.f32 %v9155_v16, %v9128_v58  ;;  %v3718_v41 = vld [vmem:[#allocation3 + $0x88] sm:$0xff] }
 0x269   : > { %v4008_v22 = vsel %vm3944_vm13, %v2022_v0, %v3976_v5  ;;  %vm3961_vm15 = vcmp.ge.f32.partialorder %v2039_v10, 0.0  ;;  %v3993_v13 = vmul.f32 0.25, %v2039_v10  ;;  %v3760_v42 = vmul.f32 %v9137_v12, %v8805_v28  ;;  %v9183_v5 = vld [vmem:[%s10815_s16] ss:$0 sm:$0xff]  ;;  %v5531_v31 = vld [vmem:[#allocation2 + $0xf1] sm:$0xff] }
 0x26a   : > { %4040 = vst.msk [vmem:[#allocation4 + $0x20] sm:$0xff] %vm851_vm1, %v4008_v22  ;;  %v3811_v51 = vadd.f32 %v3779_v25, %v3743_v18  ;;  %v2662_v27 = vadd.f32 %v11525_v8, %v2432_v59  ;;  %v3284_v34 = vadd.f32 %v9070_v9, %v3248_v61  ;;  %v3796_v19 = vmul.f32 %v9143_v37, %v11526_v3 }
 0x26b   : > { %4297 = vst.msk [vmem:[#allocation4 + $0x20] sm:$0xff] %vm4292_vm5, %v9050_v1  ;;  %v3864_v56 = vmul.f32 %v9155_v16, %v9147_v30  ;;  %v4025_v6 = vsel %vm3961_vm15, %v2039_v10, %v3993_v13  ;;  %v3301_v4 = vadd.f32 %v9070_v9, %v11527_v21  ;;  %v3752_v7 = vmul.f32 %v9137_v12, %v3718_v41  ;;  %v11528_v13 = vld [vmem:[#allocation13_spill] sm:$0xff] }
 0x26c   : > { %v3879_v0 = vadd.f32 %v3847_v55, %v3811_v51  ;;  %v2698_v35 = vadd.f32 %v8874_v39, %v2662_v27  ;;  %vm4333_vm3 = vcmp.ge.f32.partialorder %v3284_v34, 0.0  ;;  %v4365_v15 = vmul.f32 0.25, %v3284_v34  ;;  %4057 = vst.msk [vmem:[#allocation4 + $0xa8] sm:$0xff] %vm851_vm1, %v4025_v6  ;;  %v4842_v62 = vld [vmem:[#allocation4 + $0x18] sm:$0xff]  ;;  %v9204_v6 = vld [vmem:[#allocation3 + $0xa0] sm:$0xff] }
 0x26d   : > { %v3828_v1 = vadd.f32 %v3796_v19, %v3760_v42  ;;  %4489 = vrot.lane.b32.xlu0 %v4407_v49, %s5720_s21  ;;  %4314 = vst.msk [vmem:[#allocation4 + $0xa8] sm:$0xff] %vm4292_vm5, %v9052_v53  ;;  %vm4350_vm4 = vcmp.ge.f32.partialorder %v3301_v4, 0.0  ;;  %v4382_v36 = vmul.f32 0.25, %v3301_v4  ;;  %v3788_v10 = vmul.f32 %v9143_v37, %v9170_v11  ;;  %5249 = vmatmul.msk.f32.gmra.mxu1 %vm641_vm0, %v4842_v62  ;;  %v3719_v42 = vld [vmem:[#allocation3 + $0x90] sm:$0xff]  ;;  %v11533_v62 = vld [vmem:[#allocation24_spill] sm:$0xff] }
 0x26e   : > { %v3915_v54 = vadd.f32 %v9183_v5, %v3879_v0  ;;  %vm4086_vm6 = vcmp.ge.f32.partialorder %v2698_v35, 0.0  ;;  %v4118_v49 = vmul.f32 0.25, %v2698_v35  ;;  %v4397_v18 = vsel %vm4333_vm3, %v3284_v34, %v4365_v15  ;;  %v11529_v34 = vld [vmem:[#allocation80_spill] sm:$0xff] }
 0x26f   : > { %v3896_v25 = vadd.f32 %v3864_v56, %v3828_v1  ;;  %4469 = vrot.lane.b32.xlu2 %v4397_v18, %s5720_s21  ;;  %v4414_v59 = vsel %vm4350_vm4, %v3301_v4, %v4382_v36  ;;  %v3820_v61 = vadd.f32 %v3788_v10, %v3752_v7  ;;  %v3856_v41 = vmul.f32 %v9155_v16, %v9186_v23  ;;  %v11530_v7 = vld [vmem:[#allocation22_spill] sm:$0xff]  ;;  %v11531_v15 = vld [vmem:[#allocation40_spill] sm:$0xff] }
 0x270   : > { %vm4589_vm7 = vcmp.ge.f32.partialorder %v3915_v54, 0.0  ;;  %v4621_v53 = vmul.f32 0.25, %v3915_v54  ;;  %v4150_v22 = vsel %vm4086_vm6, %v2698_v35, %v4118_v49  ;;  %v2705_v51 = vadd.f32 %v8874_v39, %v11528_v13 }
 0x271   : > { %v3932_v55 = vadd.f32 %v9183_v5, %v3896_v25  ;;  %4232 = vrot.lane.b32.xlu1 %v4150_v22, %s5719_s27  ;;  %v2989_v27 = vmul.f32 %v8792_v14, %v9054_v29  ;;  %v3055_v19 = vmul.f32 %v8798_v52, %v11529_v34  ;;  %v3121_v56 = vmul.f32 %v8810_v50, %v9058_v44  ;;  %v9209_v29 = vld [vmem:[#allocation3 + $0xf0] sm:$0xff]  ;;  %v11535_v22 = vld [vmem:[#allocation106_spill] sm:$0xff] }
 0x272   : > { %v4653_v8 = vsel %vm4589_vm7, %v3915_v54, %v4621_v53  ;;  %v3888_v21 = vadd.f32 %v3856_v41, %v3820_v61  ;;  %vm4093_vm9 = vcmp.ge.f32.partialorder %v2705_v51, 0.0  ;;  %v4125_v4 = vmul.f32 0.25, %v2705_v51  ;;  %11532 = vst [vmem:[#allocation84_spill] sm:$0xff] %v9209_v29  ;;  %v11534_v53 = vld [vmem:[#allocation94_spill] sm:$0xff] }
 0x273   : > { %vm4606_vm8 = vcmp.ge.f32.partialorder %v3932_v55, 0.0  ;;  %v4638_v0 = vmul.f32 0.25, %v3932_v55  ;;  %v3153_v35 = vmul.f32 %v3055_v19, %v11530_v7  ;;  %v3217_v1 = vmul.f32 %v3121_v56, %v11531_v15  ;;  %v11560_v15 = vld [vmem:[#allocation71_spill] sm:$0xff] }
 0x274   : > { %v3753_v54 = vmul.f32 %v9137_v12, %v3719_v42  ;;  %v3924_v10 = vadd.f32 %v9183_v5, %v3888_v21  ;;  %v3789_v44 = vmul.f32 %v9143_v37, %v9204_v6  ;;  %v3857_v49 = vmul.f32 %v9155_v16, %v11533_v62 }
 0x275   : > { %v4670_v36 = vsel %vm4606_vm8, %v3932_v55, %v4638_v0  ;;  %4244 = vrot.lane.b32.xlu0 %v9120_v38, %s5719_s27  ;;  %v9218_v18 = vsel %vm4093_vm9, %v2705_v51, %v4125_v4  ;;  %v3185_v25 = vadd.f32 %v3153_v35, %v2989_v27  ;;  %v3761_v61 = vmul.f32 %v9137_v12, %v11534_v53  ;;  %v11536_v38 = vld [vmem:[#allocation81_spill] sm:$0xff]  ;;  %v11537_v4 = vld [vmem:[#allocation96_spill] sm:$0xff]  ;;  %v9247_v53 = vld [vmem:[#allocation2 + $0x70] sm:$0xff] }
 0x276   : > { %v3797_v55 = vmul.f32 %v9143_v37, %v11535_v22  ;;  %vm4598_vm10 = vcmp.ge.f32.partialorder %v3924_v10, 0.0  ;;  %v4630_v41 = vmul.f32 0.25, %v3924_v10  ;;  %v3821_v13 = vadd.f32 %v3789_v44, %v3753_v54  ;;  %v9237_v44 = vpop.permute.xlu1 %4234  ;;  %11539 = vst [vmem:[#allocation41_spill] sm:$0xff] %v9247_v53 }
 0x277   : > { %v3865_v42 = vmul.f32 %v9155_v16, %v9209_v29  ;;  %4503 = vrot.lane.b32.xlu2 %v4414_v59, %s5720_s21  ;;  %v3249_v34 = vadd.f32 %v3217_v1, %v3185_v25  ;;  %v3302_v51 = vadd.f32 %v9070_v9, %v11536_v38  ;;  %v3754_v27 = vmul.f32 %v9137_v12, %v9170_v11  ;;  %v9245_v25 = vld [vmem:[%s10808_s9 + $0x1] ss:$0 sm:$0xff] }
 0x278   : > { %v3829_v19 = vadd.f32 %v3797_v55, %v3761_v61  ;;  %v4662_v56 = vsel %vm4598_vm10, %v3924_v10, %v4630_v41  ;;  %v3889_v0 = vadd.f32 %v3857_v49, %v3821_v13  ;;  %v3790_v21 = vmul.f32 %v9143_v37, %v9186_v23  ;;  %v11538_v10 = vld [vmem:[#allocation101_spill] sm:$0xff] }
 0x279   : > { %v3858_v35 = vmul.f32 %v9155_v16, %v11537_v4  ;;  %4724 = vrot.lane.b32.xlu1 %v4653_v8, %s5721_s23  ;;  %v3285_v59 = vadd.f32 %v9070_v9, %v3249_v34  ;;  %vm4351_vm11 = vcmp.ge.f32.partialorder %v3302_v51, 0.0  ;;  %v4383_v54 = vmul.f32 0.25, %v3302_v51 }
 0x27a   : > { %v3897_v1 = vadd.f32 %v3865_v42, %v3829_v19  ;;  %v3925_v62 = vadd.f32 %v9183_v5, %v3889_v0  ;;  %v3822_v11 = vadd.f32 %v3790_v21, %v3754_v27  ;;  %v2706_v49 = vadd.f32 %v8874_v39, %v11538_v10  ;;  %v2956_v39 = vld [vmem:[#allocation3 + $0x68] sm:$0xff] }
 0x27b   : > { %v2759_v8 = vmul.f32 %v9247_v53, %v9245_v25  ;;  %vm4334_vm12 = vcmp.ge.f32.partialorder %v3285_v59, 0.0  ;;  %v4366_v61 = vmul.f32 0.25, %v3285_v59  ;;  %v4415_v55 = vsel %vm4351_vm11, %v3302_v51, %v4383_v54  ;;  %v11540_v0 = vld [vmem:[#allocation56_spill] sm:$0xff]  ;;  %v9258_v51 = vld [vmem:[%s10808_s9 + $0x2] ss:$0 sm:$0xff] }
 0x27c   : > { %v3933_v22 = vadd.f32 %v9183_v5, %v3897_v1  ;;  %vm4599_vm13 = vcmp.ge.f32.partialorder %v3925_v62, 0.0  ;;  %v4631_v41 = vmul.f32 0.25, %v3925_v62  ;;  %v3890_v13 = vadd.f32 %v3858_v35, %v3822_v11  ;;  %v9260_v1 = vld [vmem:[#allocation2 + $0x80] sm:$0xff] }
 0x27d   : > { %vm4094_vm15 = vcmp.ge.f32.partialorder %v2706_v49, 0.0  ;;  %4758 = vrot.lane.b32.xlu0 %v4670_v36, %s5721_s23  ;;  %v4398_v42 = vsel %vm4334_vm12, %v3285_v59, %v4366_v61  ;;  %v4126_v19 = vmul.f32 0.25, %v2706_v49  ;;  %v2791_v21 = vadd.f32 %v2759_v8, %v11540_v0  ;;  %11541 = vst [vmem:[#allocation86_spill] sm:$0xff] %v9260_v1  ;;  %v11542_v8 = vld [vmem:[#allocation77_spill] sm:$0xff] }
 0x27e   : > { %vm4607_vm3 = vcmp.ge.f32.partialorder %v3933_v22, 0.0  ;;  %v4639_v34 = vmul.f32 0.25, %v3933_v22  ;;  %v4663_v38 = vsel %vm4599_vm13, %v3925_v62, %v4631_v41  ;;  %v3926_v27 = vadd.f32 %v9183_v5, %v3890_v13  ;;  %v4492_v41 = vpop.permute.xlu0 %4491  ;;  %v11543_v13 = vld [vmem:[#allocation21_spill] sm:$0xff] }
 0x27f   : > { %v2825_v35 = vmul.f32 %v9260_v1, %v9258_v51  ;;  %4471 = vrot.lane.b32.xlu2 %v4398_v42, %s5720_s21  ;;  %v9267_v59 = vsel %vm4094_vm15, %v2706_v49, %v4126_v19  ;;  %v2990_v54 = vmul.f32 %v8792_v14, %v2956_v39  ;;  %v3056_v62 = vmul.f32 %v8798_v52, %v9056_v57  ;;  %v9281_v19 = vld [vmem:[#allocation3 + $0xf8] sm:$0xff] }
 0x280   : > { %v9265_v36 = vsel %vm4607_vm3, %v3933_v22, %v4639_v34  ;;  %vm4600_vm4 = vcmp.ge.f32.partialorder %v3926_v27, 0.0  ;;  %v4632_v11 = vmul.f32 0.25, %v3926_v27  ;;  %v2037_v61 = vadd.f32 %v9041_v47, %v11542_v8  ;;  %v5513_v22 = vld [vmem:[#allocation3 + $0xb0] sm:$0xff]  ;;  %v11544_v34 = vld [vmem:[#allocation103_spill] sm:$0xff]  ;;  %v9417_v1 = vld [vmem:[#allocation2 + $0x68] sm:$0xff] }
 0x281   : > { %v2857_v10 = vadd.f32 %v2825_v35, %v2791_v21  ;;  %4742 = vrot.lane.b32.xlu1 %v4662_v56, %s5721_s23  ;;  %v3154_v42 = vmul.f32 %v3056_v62, %v11543_v13  ;;  %v3755_v49 = vmul.f32 %v9137_v12, %v9204_v6  ;;  %v3791_v39 = vmul.f32 %v5513_v22, %v9143_v37  ;;  %v9288_v21 = vld [vmem:[%s10809_s10] ss:$0 sm:$0xff] }
 0x282   : > { %v3859_v57 = vmul.f32 %v9155_v16, %v11544_v34  ;;  %v9283_v0 = vsel %vm4600_vm4, %v3926_v27, %v4632_v11  ;;  %vm3959_vm6 = vcmp.ge.f32.partialorder %v2037_v61, 0.0  ;;  %v3991_v35 = vmul.f32 0.25, %v2037_v61  ;;  %v4237_v27 = vpop.permute.xlu1 %4236  ;;  %11555 = vst [vmem:[#allocation79_spill] sm:$0xff] %v9417_v1 }
 0x283   : > { %v2893_v56 = vadd.f32 %v9288_v21, %v2857_v10  ;;  %v9291_v6 = vadd.f32 %v3154_v42, %v2990_v54  ;;  %v3823_v62 = vadd.f32 %v3791_v39, %v3755_v49  ;;  %v3762_v8 = vmul.f32 %v9137_v12, %v11526_v3  ;;  %v9306_v3 = vpop.permute.xlu2 %4463  ;;  %v11547_v39 = vld [vmem:[#allocation105_spill] sm:$0xff] }
 0x284   : > { %v3798_v22 = vmul.f32 %v9143_v37, %v9147_v30  ;;  %v4023_v11 = vsel %vm3959_vm6, %v2037_v61, %v3991_v35  ;;  %v3866_v34 = vmul.f32 %v9155_v16, %v9281_v19  ;;  %v3007_v10 = vmul.f32 %v8792_v14, %v11545_v63  ;;  %v11549_v63 = vld [vmem:[#allocation34_spill] sm:$0xff] }
 0x285   : > { %2925 = vst.msk [vmem:[#allocation3 + $0x70] sm:$0xff] %vm851_vm1, %v2893_v56  ;;  %v3073_v54 = vmul.f32 %v8798_v52, %v11546_v40  ;;  %4246 = vrot.lane.b32.xlu0 %v9218_v18, %s5719_s27  ;;  %v3891_v42 = vadd.f32 %v3859_v57, %v3823_v62  ;;  %v3139_v61 = vmul.f32 %v8810_v50, %v11547_v39  ;;  %v11548_v56 = vld [vmem:[#allocation75_spill] sm:$0xff]  ;;  %v11550_v35 = vld [vmem:[#allocation102_spill] sm:$0xff] }
 0x286   : > { %4055 = vst.msk [vmem:[#allocation4 + $0x98] sm:$0xff] %vm851_vm1, %v4023_v11  ;;  %v3830_v49 = vadd.f32 %v3798_v22, %v3762_v8  ;;  %v2038_v52 = vadd.f32 %v9041_v47, %v11549_v63  ;;  %v3756_v40 = vmul.f32 %v9137_v12, %v9186_v23  ;;  %v3792_v18 = vmul.f32 %v9143_v37, %v11537_v4 }
 0x287   : > { %4312 = vst.msk [vmem:[#allocation4 + $0x98] sm:$0xff] %vm4292_vm5, %v9237_v44  ;;  %v3171_v14 = vmul.f32 %v3073_v54, %v11548_v56  ;;  %4505 = vrot.lane.b32.xlu2 %v4415_v55, %s5720_s21  ;;  %v3927_v50 = vadd.f32 %v9183_v5, %v3891_v42  ;;  %v3235_v44 = vmul.f32 %v3139_v61, %v11550_v35  ;;  %v4494_v54 = vpop.permute.xlu0 %4493 }
 0x288   : > { %4569 = vst.msk [vmem:[#allocation4 + $0x98] sm:$0xff] %vm4549_vm2, %v4492_v41  ;;  %v3898_v57 = vadd.f32 %v3866_v34, %v3830_v49  ;;  %vm3960_vm7 = vcmp.ge.f32.partialorder %v2038_v52, 0.0  ;;  %v3992_v8 = vmul.f32 0.25, %v2038_v52  ;;  %v3824_v22 = vadd.f32 %v3792_v18, %v3756_v40  ;;  %v9331_v34 = vld [vmem:[%s10806_s7 + $0x1] ss:$0 sm:$0xff]  ;;  %v5518_v49 = vld [vmem:[#allocation2 + $0xf0] sm:$0xff] }
 0x289   : > { %v3203_v62 = vadd.f32 %v3171_v14, %v3007_v10  ;;  %4744 = vrot.lane.b32.xlu1 %v4663_v38, %s5721_s23  ;;  %vm4601_vm8 = vcmp.ge.f32.partialorder %v3927_v50, 0.0  ;;  %v4633_v23 = vmul.f32 0.25, %v3927_v50  ;;  %v3860_v4 = vmul.f32 %v9155_v16, %v8805_v28  ;;  %v5516_v10 = vld [vmem:[#allocation2 + $0xe0] sm:$0xff] }
 0x28a   : > { %v3934_v11 = vadd.f32 %v9183_v5, %v3898_v57  ;;  %v4024_v41 = vsel %vm3960_vm7, %v2038_v52, %v3992_v8  ;;  %v2079_v42 = vmul.f32 %v5516_v10, %v9331_v34  ;;  %v9337_v38 = vld [vmem:[%s10806_s7 + $0x4] ss:$0 sm:$0xff]  ;;  %v9346_v40 = vld [vmem:[%s10810_s11 + $0x2] ss:$0 sm:$0xff]  ;;  %v11552_v10 = vld [vmem:[#allocation66_spill] sm:$0xff]  ;;  %v2826_v46 = vmul.f32 %v9258_v51, %v11557_v2 }
 0x28b   : > { %v3267_v55 = vadd.f32 %v3235_v44, %v3203_v62  ;;  %v2113_v39 = vmul.f32 %v5518_v49, %v9337_v38  ;;  %v9340_v61 = vsel %vm4601_vm8, %v3927_v50, %v4633_v23  ;;  %4056 = vst.msk [vmem:[#allocation4 + $0xa0] sm:$0xff] %vm851_vm1, %v4024_v41  ;;  %v3892_v63 = vadd.f32 %v3860_v4, %v3824_v22  ;;  %v9354_v50 = vld [vmem:[%s10806_s7 + $0x7] ss:$0 sm:$0xff]  ;;  %v5523_v4 = vld [vmem:[#allocation2 + $0xdf] sm:$0xff]  ;;  %v9369_v41 = vpop.permute.xlu1 %4206  ;;  %v11553_v49 = vld [vmem:[#allocation43_spill] sm:$0xff] }
 0x28c   : > { %v3088_v28 = vld [vmem:[#allocation3 + $0x69] sm:$0xff]  ;;  %vm4608_vm9 = vcmp.ge.f32.partialorder %v3934_v11, 0.0  ;;  %v4640_v14 = vmul.f32 0.25, %v3934_v11  ;;  %4313 = vst.msk [vmem:[#allocation4 + $0xa0] sm:$0xff] %vm4292_vm5, %v4237_v27 }
 0x28d   : > { %v3023_v52 = vld [vmem:[#allocation3 + $0x6f] sm:$0xff]  ;;  %v3122_v18 = vmul.f32 %v9346_v40, %v3088_v28  ;;  %v3303_v57 = vadd.f32 %v9070_v9, %v3267_v55  ;;  %v2145_v44 = vadd.f32 %v2113_v39, %v2079_v42  ;;  %4760 = vrot.lane.b32.xlu0 %v9265_v36, %s5721_s23  ;;  %4570 = vst.msk [vmem:[#allocation4 + $0xa0] sm:$0xff] %vm4549_vm2, %v4494_v54  ;;  %v9374_v54 = vpop.permute.xlu2 %4497 }
 0x28e   : > { %v5521_v62 = vld [vmem:[#allocation2 + $0x100] sm:$0xff]  ;;  %v9359_v22 = vsel %vm4608_vm9, %v3934_v11, %v4640_v14  ;;  %v3928_v23 = vadd.f32 %v9183_v5, %v3892_v63  ;;  %3680 = vst.msk [vmem:[#allocation3 + $0x68] sm:$0xff] %vm851_vm1, %v11553_v49  ;;  %v5525_v14 = vld [vmem:[#allocation2 + $0xef] sm:$0xff] }
 0x28f   : > { %v2179_v8 = vmul.f32 %v5521_v62, %v9354_v50  ;;  %v9366_v27 = vld [vmem:[%s10806_s7] ss:$0 sm:$0xff]  ;;  %v3218_v42 = vmul.f32 %v3122_v18, %v11552_v10  ;;  %vm4352_vm10 = vcmp.ge.f32.partialorder %v3303_v57, 0.0  ;;  %v4384_v36 = vmul.f32 0.25, %v3303_v57  ;;  %v9379_v28 = vld [vmem:[%s10806_s7 + $0x3] ss:$0 sm:$0xff] }
 0x290   : > { %11551 = vst [vmem:[#allocation20_spill] sm:$0xff] %v9366_v27  ;;  %v2245_v55 = vmul.f32 %v5523_v4, %v9366_v27  ;;  %vm4602_vm11 = vcmp.ge.f32.partialorder %v3928_v23, 0.0  ;;  %v4634_v39 = vmul.f32 0.25, %v3928_v23  ;;  %v2279_v63 = vmul.f32 %v5525_v14, %v9379_v28  ;;  %v9385_v18 = vld [vmem:[%s10806_s7 + $0x6] ss:$0 sm:$0xff] }
 0x291   : > { %v2211_v11 = vadd.f32 %v2179_v8, %v2145_v44  ;;  %11554 = vst [vmem:[#allocation87_spill] sm:$0xff] %v9379_v28  ;;  %v5527_v44 = vld [vmem:[#allocation2 + $0xff] sm:$0xff]  ;;  %v3250_v8 = vadd.f32 %v3218_v42, %v9291_v6  ;;  %v9389_v4 = vsel %vm4352_vm10, %v3303_v57, %v4384_v36  ;;  %4746 = vrot.lane.b32.xlu1 %v9283_v0, %s5721_s23 }
 0x292   : > { %v2345_v62 = vmul.f32 %v5527_v44, %v9385_v18  ;;  %v9394_v49 = vld [vmem:[%s10806_s7 + $0x2] ss:$0 sm:$0xff]  ;;  %v2509_v44 = vmul.f32 %v5531_v31, %v9400_v43  ;;  %v9406_v6 = vsel %vm4602_vm11, %v3928_v23, %v4634_v39  ;;  %v2311_v57 = vadd.f32 %v2279_v63, %v2245_v55  ;;  %v5534_v31 = vld [vmem:[%s10808_s9] ss:$0 sm:$0xff]  ;;  %v9421_v55 = vld [vmem:[#allocation2 + $0x78] sm:$0xff] }
 0x293   : > { %v2475_v14 = vmul.f32 %v5529_v32, %v9394_v49  ;;  %v2957_v24 = vld [vmem:[#allocation3 + $0x70] sm:$0xff]  ;;  %v9411_v32 = vld [vmem:[%s10806_s7 + $0x8] ss:$0 sm:$0xff]  ;;  %v2726_v0 = vmul.f32 %v9417_v1, %v5534_v31  ;;  %v3286_v23 = vadd.f32 %v9070_v9, %v3250_v8  ;;  %11556 = vst [vmem:[#allocation6_spill] sm:$0xff] %v9421_v55  ;;  %v2760_v63 = vmul.f32 %v9421_v55, %v9245_v25  ;;  %v4241_v55 = vpop.permute.xlu0 %4240 }
 0x294   : > { %v5533_v42 = vld [vmem:[#allocation2 + $0x101] sm:$0xff]  ;;  %v2991_v10 = vmul.f32 %v9430_v20, %v2957_v24  ;;  %v9436_v8 = vld [vmem:[%s10810_s11] ss:$0 sm:$0xff]  ;;  %v11559_v24 = vld [vmem:[#allocation8_spill] sm:$0xff]  ;;  %v4462_v7 = vpop.permute.xlu1 %4461 }
 0x295   : > { %v2575_v36 = vmul.f32 %v5533_v42, %v9411_v32  ;;  %v2541_v39 = vadd.f32 %v2509_v44, %v2475_v14  ;;  %v2377_v42 = vadd.f32 %v2345_v62, %v2311_v57  ;;  %v3057_v14 = vmul.f32 %v9436_v8, %v3023_v52  ;;  %v11558_v44 = vld [vmem:[#allocation46_spill] sm:$0xff]  ;;  %4248 = vrot.lane.b32.xlu0 %v9267_v59, %s5719_s27 }
 0x296   : > { %v2023_v25 = vadd.f32 %v9041_v47, %v11558_v44  ;;  %vm4335_vm12 = vcmp.ge.f32.partialorder %v3286_v23, 0.0  ;;  %v4367_v2 = vmul.f32 0.25, %v3286_v23  ;;  %v2792_v62 = vadd.f32 %v2760_v63, %v2726_v0  ;;  %v9453_v63 = vld [vmem:[#allocation2 + $0x48] sm:$0xff]  ;;  %4554 = vst.msk [vmem:[#allocation4 + $0x20] sm:$0xff] %vm4549_vm2, %v4462_v7 }
 0x297   : > { %v2607_v51 = vadd.f32 %v2575_v36, %v2541_v39  ;;  %v2409_v57 = vmul.f32 %v2377_v42, %v11548_v56  ;;  %v3155_v31 = vmul.f32 %v3057_v14, %v11559_v24  ;;  %v2040_v44 = vadd.f32 %v9041_v47, %v11560_v15  ;;  %v9451_v39 = vld [vmem:[#allocation2 + $0x67] sm:$0xff] }
 0x298   : > { %vm3945_vm13 = vcmp.ge.f32.partialorder %v2023_v25, 0.0  ;;  %v3977_v13 = vmul.f32 0.25, %v2023_v25  ;;  %v4399_v17 = vsel %vm4335_vm12, %v3286_v23, %v4367_v2  ;;  %v2858_v58 = vadd.f32 %v2826_v46, %v2792_v62  ;;  %11561 = vst [vmem:[#allocation53_spill] sm:$0xff] %v9451_v39  ;;  %v9459_v15 = vld [vmem:[#allocation2 + $0x69] sm:$0xff] }
 0x299   : > { %v2639_v52 = vmul.f32 %v2607_v51, %v11550_v35  ;;  %4473 = vrot.lane.b32.xlu2 %v4399_v17, %s5720_s21  ;;  %v2441_v36 = vadd.f32 %v2409_v57, %v2211_v11  ;;  %v9449_v0 = vadd.f32 %v3155_v31, %v2991_v10  ;;  %v2060_v23 = vmul.f32 %v9453_v63, %v9331_v34  ;;  %v9461_v17 = vld [vmem:[#allocation2 + $0x58] sm:$0xff]  ;;  %v9467_v10 = vpop.permute.xlu2 %4752  ;;  %v9484_v62 = vld [vmem:[#allocation3 + $0x100] sm:$0xff]  ;;  %v9489_v57 = vld [vmem:[%s10807_s8] ss:$0 sm:$0xff] }
 0x29a   : > { %v4009_v59 = vsel %vm3945_vm13, %v2023_v25, %v3977_v13  ;;  %v2894_v42 = vadd.f32 %v9288_v21, %v2858_v58  ;;  %vm3962_vm15 = vcmp.ge.f32.partialorder %v2040_v44, 0.0  ;;  %v3994_v46 = vmul.f32 0.25, %v2040_v44  ;;  %11562 = vst [vmem:[#allocation33_spill] sm:$0xff] %v9459_v15  ;;  %4748 = vrot.lane.b32.xlu1 %v9340_v61, %s5721_s23  ;;  %v9473_v21 = vld [vmem:[#allocation2 + $0x47] sm:$0xff]  ;;  %v9478_v51 = vld [vmem:[#allocation2 + $0x57] sm:$0xff] }
 0x29b   : > { %4041 = vst.msk [vmem:[#allocation4 + $0x28] sm:$0xff] %vm851_vm1, %v4009_v59  ;;  %v2094_v13 = vmul.f32 %v9461_v17, %v9337_v38  ;;  %v2671_v11 = vadd.f32 %v2639_v52, %v2441_v36  ;;  %v2160_v58 = vmul.f32 %v9417_v1, %v9354_v50  ;;  %v2226_v14 = vmul.f32 %v9473_v21, %v9366_v27  ;;  %v9494_v52 = vld [vmem:[#allocation2 + $0x49] sm:$0xff]  ;;  %v9498_v36 = vld [vmem:[#allocation2 + $0x59] sm:$0xff] }
 0x29c   : > { %4298 = vst.msk [vmem:[#allocation4 + $0x28] sm:$0xff] %vm4292_vm5, %v9369_v41  ;;  %v4026_v25 = vsel %vm3962_vm15, %v2040_v44, %v3994_v46  ;;  %v2260_v61 = vmul.f32 %v9478_v51, %v9379_v28  ;;  %v2326_v41 = vmul.f32 %v9385_v18, %v9451_v39  ;;  %v2456_v44 = vmul.f32 %v9494_v52, %v9394_v49  ;;  %v11584_v1 = vld [vmem:[#allocation54_spill] sm:$0xff] }
 0x29d   : > { %2926 = vst.msk [vmem:[#allocation3 + $0x78] sm:$0xff] %vm851_vm1, %v2894_v42  ;;  %v2126_v2 = vadd.f32 %v2094_v13, %v2060_v23  ;;  %v2707_v31 = vadd.f32 %v9489_v57, %v2671_v11  ;;  %v2490_v59 = vmul.f32 %v9498_v36, %v9400_v43  ;;  %v2556_v23 = vmul.f32 %v9411_v32, %v9459_v15  ;;  %v5546_v13 = vld [vmem:[#allocation3 + $0xe0] sm:$0xff] }
 0x29e   : > { %11563 = vst [vmem:[#allocation42_spill] sm:$0xff] %v9484_v62  ;;  %v2292_v46 = vadd.f32 %v2260_v61, %v2226_v14  ;;  %v3799_v11 = vmul.f32 %v9143_v37, %v9209_v29  ;;  %4762 = vrot.lane.b32.xlu0 %v9359_v22, %s5721_s23  ;;  %v3867_v24 = vmul.f32 %v9155_v16, %v9484_v62  ;;  %v9517_v61 = vld [vmem:[#allocation3 + $0x68] sm:$0xff]  ;;  %v5568_v15 = vld [vmem:[#allocation2 + $0x4f] sm:$0xff] }
 0x29f   : > { %4555 = vst.msk [vmem:[#allocation4 + $0x28] sm:$0xff] %vm4549_vm2, %v9306_v3  ;;  %v2192_v42 = vadd.f32 %v2160_v58, %v2126_v2  ;;  %v3763_v3 = vmul.f32 %v5546_v13, %v9137_v12  ;;  %vm4095_vm3 = vcmp.ge.f32.partialorder %v2707_v31, 0.0  ;;  %v4127_v35 = vmul.f32 0.25, %v2707_v31  ;;  %v5547_v13 = vld [vmem:[#allocation3 + $0x48] sm:$0xff] }
 0x2a0   : > { %4058 = vst.msk [vmem:[#allocation4 + $0xb0] sm:$0xff] %vm851_vm1, %v4026_v25  ;;  %v2522_v56 = vadd.f32 %v2490_v59, %v2456_v44  ;;  %v2358_v58 = vadd.f32 %v2326_v41, %v2292_v46  ;;  %v11564_v25 = vld [vmem:[#allocation93_spill] sm:$0xff]  ;;  %v3744_v22 = vmul.f32 %v5547_v13, %v9137_v12  ;;  %v4719_v59 = vpop.permute.xlu0 %4718  ;;  %v3848_v7 = vmul.f32 %v9155_v16, %v9517_v61  ;;  %v9661_v29 = vld [vmem:[#allocation2 + $0x71] sm:$0xff] }
 0x2a1   : > { %4315 = vst.msk [vmem:[#allocation4 + $0xb0] sm:$0xff] %vm4292_vm5, %v4241_v55  ;;  %v3831_v14 = vadd.f32 %v3799_v11, %v3763_v3  ;;  %v3304_v2 = vadd.f32 %v9070_v9, %v11564_v25  ;;  %4507 = vrot.lane.b32.xlu2 %v9389_v4, %s5720_s21  ;;  %v4159_v55 = vsel %vm4095_vm3, %v2707_v31, %v4127_v35  ;;  %v4496_v11 = vpop.permute.xlu1 %4495  ;;  %v11566_v31 = vld [vmem:[#allocation89_spill] sm:$0xff] }
 0x2a2   : > { %4572 = vst.msk [vmem:[#allocation4 + $0xb0] sm:$0xff] %vm4549_vm2, %v9374_v54  ;;  %v2588_v44 = vadd.f32 %v2556_v23, %v2522_v56  ;;  %v3780_v54 = vmul.f32 %v9143_v37, %v8974_v45  ;;  %v2390_v41 = vmul.f32 %v2358_v58, %v11520_v48  ;;  %4750 = vrot.lane.b32.xlu1 %v9406_v6, %s5721_s23  ;;  %v9597_v48 = vld [vmem:[#allocation2 + $0x87] sm:$0xff] }
 0x2a3   : > { %11565 = vst [vmem:[#allocation50_spill] sm:$0xff] %v9517_v61  ;;  %v3899_v46 = vadd.f32 %v3867_v24, %v3831_v14  ;;  %vm4353_vm4 = vcmp.ge.f32.partialorder %v3304_v2, 0.0  ;;  %v4385_v3 = vmul.f32 0.25, %v3304_v2  ;;  %v2708_v45 = vadd.f32 %v9489_v57, %v11566_v31 }
 0x2a4   : > { %4811 = vst.msk [vmem:[#allocation4 + $0x20] sm:$0xff] %vm4806_vm14, %v4719_v59  ;;  %v3089_v4 = vld [vmem:[#allocation3 + $0x71] sm:$0xff]  ;;  %v2620_v56 = vmul.f32 %v2588_v44, %v11522_v60  ;;  %v3812_v35 = vadd.f32 %v3780_v54, %v3744_v22  ;;  %v2422_v14 = vadd.f32 %v2390_v41, %v2192_v42  ;;  %v3090_v6 = vld [vmem:[#allocation3 + $0x79] sm:$0xff]  ;;  %v11567_v59 = vld [vmem:[#allocation68_spill] sm:$0xff]  ;;  %v9540_v22 = vpop.permute.xlu2 %4465  ;;  %v2227_v39 = vmul.f32 %v5568_v15, %v9366_v27 }
 0x2a5   : > { %v2958_v23 = vld [vmem:[#allocation3 + $0x78] sm:$0xff]  ;;  %v3123_v58 = vmul.f32 %v9346_v40, %v3089_v4  ;;  %v3935_v25 = vadd.f32 %v9183_v5, %v3899_v46  ;;  %v9536_v13 = vsel %vm4353_vm4, %v3304_v2, %v4385_v3  ;;  %11568 = vst [vmem:[#allocation38_spill] sm:$0xff] %v9540_v22  ;;  %vm4096_vm6 = vcmp.ge.f32.partialorder %v2708_v45, 0.0  ;;  %v11569_v60 = vld [vmem:[#allocation91_spill] sm:$0xff] }
 0x2a6   : > { %v3024_v24 = vld [vmem:[#allocation3 + $0x77] sm:$0xff]  ;;  %v3880_v44 = vadd.f32 %v3848_v7, %v3812_v35  ;;  %v4128_v54 = vmul.f32 0.25, %v2708_v45  ;;  %v2992_v31 = vmul.f32 %v9430_v20, %v2958_v23  ;;  %4571 = vst.msk [vmem:[#allocation4 + $0xa8] sm:$0xff] %vm4549_vm2, %v4496_v11  ;;  %v2652_v42 = vadd.f32 %v2620_v56, %v2422_v14  ;;  %4250 = vrot.lane.b32.xlu0 %v4159_v55, %s5719_s27  ;;  %v11570_v23 = vld [vmem:[#allocation107_spill] sm:$0xff]  ;;  %v11571_v14 = vld [vmem:[#allocation32_spill] sm:$0xff] }
 0x2a7   : > { %3681 = vst.msk [vmem:[#allocation3 + $0x70] sm:$0xff] %vm851_vm1, %v11567_v59  ;;  %v3219_v4 = vmul.f32 %v3123_v58, %v11569_v60  ;;  %vm4609_vm7 = vcmp.ge.f32.partialorder %v3935_v25, 0.0  ;;  %v4641_v41 = vmul.f32 0.25, %v3935_v25  ;;  %v3058_v3 = vmul.f32 %v9436_v8, %v3024_v24  ;;  %v11572_v59 = vld [vmem:[#allocation45_spill] sm:$0xff]  ;;  %v5566_v60 = vld [vmem:[#allocation2 + $0x50] sm:$0xff] }
 0x2a8   : > { %4828 = vst.msk [vmem:[#allocation4 + $0xa8] sm:$0xff] %vm4806_vm14, %v9467_v10  ;;  %v3916_v2 = vadd.f32 %v9183_v5, %v3880_v44  ;;  %v9549_v46 = vsel %vm4096_vm6, %v2708_v45, %v4128_v54  ;;  %v3124_v35 = vmul.f32 %v9346_v40, %v3090_v6  ;;  %v2688_v7 = vadd.f32 %v9489_v57, %v2652_v42  ;;  %v4243_v45 = vpop.permute.xlu0 %4242  ;;  %v9568_v42 = vld [vmem:[#allocation2 + $0x88] sm:$0xff]  ;;  %v9649_v22 = vld [vmem:[#allocation3 + $0x80] sm:$0xff] }
 0x2a9   : > { %v3251_v11 = vadd.f32 %v3219_v4, %v9449_v0  ;;  %v4673_v56 = vsel %vm4609_vm7, %v3935_v25, %v4641_v41  ;;  %v2041_v58 = vadd.f32 %v9041_v47, %v11570_v23  ;;  %v3156_v55 = vmul.f32 %v3058_v3, %v11571_v14  ;;  %v9566_v47 = vld [vmem:[%s10804_s5 + $0x1] ss:$0 sm:$0xff]  ;;  %11573 = vst [vmem:[#allocation85_spill] sm:$0xff] %v9568_v42  ;;  %v9614_v14 = vld [vmem:[%s10804_s5 + $0x6] ss:$0 sm:$0xff]  ;;  %v5570_v27 = vld [vmem:[#allocation2 + $0x51] sm:$0xff] }
 0x2aa   : > { %vm4590_vm8 = vcmp.ge.f32.partialorder %v3916_v2, 0.0  ;;  %v4622_v10 = vmul.f32 0.25, %v3916_v2  ;;  %v3220_v44 = vmul.f32 %v3124_v35, %v11572_v59  ;;  %vm4076_vm9 = vcmp.ge.f32.partialorder %v2688_v7, 0.0  ;;  %11576 = vst [vmem:[#allocation65_spill] sm:$0xff] %v9597_v48 }
 0x2ab   : > { %v4843_v54 = vld [vmem:[#allocation4 + $0x20] sm:$0xff]  ;;  %v3287_v24 = vadd.f32 %v9070_v9, %v3251_v11  ;;  %v4108_v6 = vmul.f32 0.25, %v2688_v7  ;;  %vm3963_vm10 = vcmp.ge.f32.partialorder %v2041_v58, 0.0  ;;  %v3188_v25 = vadd.f32 %v3156_v55, %v2992_v31  ;;  %v9577_v31 = vld [vmem:[#allocation2 + $0x98] sm:$0xff] }
 0x2ac   : > { %5250 = vmatmul.msk.f32.gmra.mxu1 %vm641_vm0, %v4843_v54  ;;  %v9561_v0 = vsel %vm4590_vm8, %v3916_v2, %v4622_v10  ;;  %v3995_v4 = vmul.f32 0.25, %v2041_v58  ;;  %v1010_v41 = vmul.f32 %v9568_v42, %v9566_v47  ;;  %v9575_v2 = vld [vmem:[%s10804_s5 + $0x4] ss:$0 sm:$0xff]  ;;  %11574 = vst [vmem:[#allocation76_spill] sm:$0xff] %v9577_v31  ;;  %v9586_v55 = vld [vmem:[%s10804_s5 + $0x7] ss:$0 sm:$0xff]  ;;  %v2061_v61 = vmul.f32 %v5566_v60, %v9331_v34 }
 0x2ad   : > { %vm4336_vm11 = vcmp.ge.f32.partialorder %v3287_v24, 0.0  ;;  %v4368_v3 = vmul.f32 0.25, %v3287_v24  ;;  %v4140_v35 = vsel %vm4076_vm9, %v2688_v7, %v4108_v6  ;;  %v1046_v11 = vmul.f32 %v9577_v31, %v9575_v2  ;;  %v9588_v7 = vld [vmem:[#allocation2 + $0xa8] sm:$0xff]  ;;  %v9595_v6 = vld [vmem:[%s10804_s5] ss:$0 sm:$0xff] }
 0x2ae   : > { %4212 = vrot.lane.b32.xlu1 %v4140_v35, %s5719_s27  ;;  %v3252_v23 = vadd.f32 %v3220_v44, %v3188_v25  ;;  %v4027_v10 = vsel %vm3963_vm10, %v2041_v58, %v3995_v4  ;;  %11575 = vst [vmem:[#allocation10_spill] sm:$0xff] %v9588_v7  ;;  %v1114_v54 = vmul.f32 %v9588_v7, %v9586_v55  ;;  %v9605_v4 = vld [vmem:[%s10804_s5 + $0x3] ss:$0 sm:$0xff]  ;;  %v9607_v35 = vld [vmem:[#allocation2 + $0x97] sm:$0xff]  ;;  %v5565_v7 = vld [vmem:[#allocation2 + $0xa9] sm:$0xff] }
 0x2af   : > { %v1212_v58 = vmul.f32 %v9597_v48, %v9595_v6  ;;  %v4400_v44 = vsel %vm4336_vm11, %v3287_v24, %v4368_v3  ;;  %4059 = vst.msk [vmem:[#allocation4 + $0xb8] sm:$0xff] %vm851_vm1, %v4027_v10  ;;  %v1078_v25 = vadd.f32 %v1046_v11, %v1010_v41  ;;  %v1248_v59 = vmul.f32 %v9607_v35, %v9605_v4  ;;  %v9616_v48 = vld [vmem:[#allocation2 + $0xa7] sm:$0xff]  ;;  %v4500_v41 = vpop.permute.xlu2 %4499  ;;  %v9627_v11 = vld [vmem:[%s10804_s5 + $0x2] ss:$0 sm:$0xff]  ;;  %v9646_v31 = vld [vmem:[#allocation2 + $0x6f] sm:$0xff] }
 0x2b0   : > { %11577 = vst [vmem:[#allocation35_spill] sm:$0xff] %v9607_v35  ;;  %v1316_v24 = vmul.f32 %v9616_v48, %v9614_v14  ;;  %4475 = vrot.lane.b32.xlu2 %v4400_v44, %s5720_s21  ;;  %4764 = vrot.lane.b32.xlu0 %v4673_v56, %s5721_s23  ;;  %v3288_v3 = vadd.f32 %v9070_v9, %v3252_v23  ;;  %v9629_v10 = vld [vmem:[#allocation2 + $0x89] sm:$0xff]  ;;  %v9636_v44 = vld [vmem:[%s10804_s5 + $0x5] ss:$0 sm:$0xff]  ;;  %v5563_v56 = vld [vmem:[#allocation2 + $0x99] sm:$0xff] }
 0x2b1   : > { %11578 = vst [vmem:[#allocation70_spill] sm:$0xff] %v9616_v48  ;;  %v1638_v42 = vmul.f32 %v9629_v10, %v9627_v11  ;;  %v1674_v23 = vmul.f32 %v5563_v56, %v9636_v44  ;;  %v1280_v48 = vadd.f32 %v1248_v59, %v1212_v58  ;;  %v9643_v35 = vld [vmem:[%s10804_s5 + $0x8] ss:$0 sm:$0xff]  ;;  %v9651_v56 = vld [vmem:[#allocation3 + $0x7f] sm:$0xff]  ;;  %v9653_v58 = vld [vmem:[#allocation2 + $0x60] sm:$0xff]  ;;  %v2161_v60 = vmul.f32 %v9354_v50, %v9247_v53 }
 0x2b2   : > { %4316 = vst.msk [vmem:[#allocation4 + $0xb8] sm:$0xff] %vm4292_vm5, %v4243_v45  ;;  %v1146_v45 = vadd.f32 %v1114_v54, %v1078_v25  ;;  %vm4337_vm12 = vcmp.ge.f32.partialorder %v3288_v3, 0.0  ;;  %v4369_v54 = vmul.f32 0.25, %v3288_v3  ;;  %v2095_v25 = vmul.f32 %v9653_v58, %v9337_v38 }
 0x2b3   : > { %11579 = vst [vmem:[#allocation23_spill] sm:$0xff] %v9629_v10  ;;  %v1742_v10 = vmul.f32 %v5565_v7, %v9643_v35  ;;  %v1706_v59 = vadd.f32 %v1674_v23, %v1638_v42  ;;  %v11582_v7 = vld [vmem:[#allocation108_spill] sm:$0xff]  ;;  %v1348_v62 = vadd.f32 %v1316_v24, %v1280_v48  ;;  %v2327_v53 = vmul.f32 %v9385_v18, %v9646_v31 }
 0x2b4   : > { %4573 = vst.msk [vmem:[#allocation4 + $0xb8] sm:$0xff] %vm4549_vm2, %v4500_v41  ;;  %v9657_v41 = vpop.permute.xlu1 %4208  ;;  %v9666_v42 = vld [vmem:[#allocation2 + $0x5f] sm:$0xff]  ;;  %v2127_v24 = vadd.f32 %v2095_v25, %v2061_v61 }
 0x2b5   : > { %11580 = vst [vmem:[#allocation27_spill] sm:$0xff] %v9653_v58  ;;  %v2261_v23 = vmul.f32 %v9666_v42, %v9379_v28  ;;  %v4755_v58 = vpop.permute.xlu0 %4754  ;;  %v1774_v48 = vadd.f32 %v1742_v10, %v1706_v59  ;;  %v1540_v15 = vmul.f32 %v11495_v26, %v1348_v62  ;;  %v9680_v28 = vld [vmem:[#allocation2 + $0x61] sm:$0xff]  ;;  %v3764_v26 = vmul.f32 %v9137_v12, %v9147_v30 }
 0x2b6   : > { %11581 = vst [vmem:[#allocation59_spill] sm:$0xff] %v9657_v41  ;;  %4726 = vrot.lane.b32.xlu1 %v9561_v0, %s5721_s23  ;;  %v2193_v10 = vadd.f32 %v2161_v60, %v2127_v24  ;;  %v3800_v59 = vmul.f32 %v9143_v37, %v9281_v19  ;;  %v9710_v24 = vld [vmem:[%s10805_s6] ss:$0 sm:$0xff] }
 0x2b7   : > { %3682 = vst.msk [vmem:[#allocation3 + $0x78] sm:$0xff] %vm851_vm1, %v11582_v7  ;;  %v9673_v7 = vsel %vm4337_vm12, %v3288_v3, %v4369_v54  ;;  %v2293_v41 = vadd.f32 %v2261_v23, %v2227_v39  ;;  %v3768_v3 = vld [vmem:[#allocation3 + $0x108] sm:$0xff]  ;;  %v1966_v61 = vmul.f32 %v11496_v33, %v1774_v48  ;;  %v2557_v54 = vmul.f32 %v9411_v32, %v9661_v29 }
 0x2b8   : > { %11583 = vst [vmem:[#allocation109_spill] sm:$0xff] %v9666_v42  ;;  %v2457_v42 = vmul.f32 %v5570_v27, %v9394_v49  ;;  %v1572_v39 = vadd.f32 %v1540_v15, %v1146_v45  ;;  %4509 = vrot.lane.b32.xlu2 %v9536_v13, %s5720_s21  ;;  %4252 = vrot.lane.b32.xlu0 %v9549_v46, %s5719_s27  ;;  %v5572_v23 = vld [vmem:[#allocation2 + $0x38] sm:$0xff] }
 0x2b9   : > { %3683 = vst.msk [vmem:[#allocation3 + $0x80] sm:$0xff] %vm851_vm1, %v11584_v1  ;;  %v2491_v1 = vmul.f32 %v9680_v28, %v9400_v43  ;;  %v2359_v27 = vadd.f32 %v2327_v53, %v2293_v41  ;;  %v9698_v33 = vmul.f32 %v9143_v37, %v3768_v3  ;;  %v3868_v0 = vmul.f32 %v9155_v16, %v3768_v3  ;;  %v11586_v53 = vld [vmem:[#allocation22_spill] sm:$0xff] }
 0x2ba   : > { %4829 = vst.msk [vmem:[#allocation4 + $0xb0] sm:$0xff] %vm4806_vm14, %v4755_v58  ;;  %v11585_v58 = vld [vmem:[#allocation52_spill] sm:$0xff]  ;;  %v1998_v45 = vadd.f32 %v1966_v61, %v1572_v39  ;;  %v3832_v60 = vadd.f32 %v3800_v59, %v3764_v26  ;;  %v1000_v13 = vmul.f32 %v5572_v23, %v9566_v47  ;;  %v1036_v46 = vmul.f32 %v9575_v2, %v9453_v63 }
 0x2bb   : > { %v2523_v62 = vadd.f32 %v2491_v1, %v2457_v42  ;;  %v3305_v30 = vadd.f32 %v9070_v9, %v11585_v58  ;;  %v2391_v25 = vmul.f32 %v2359_v27, %v11586_v53  ;;  %v11587_v1 = vld [vmem:[#allocation40_spill] sm:$0xff]  ;;  %v1104_v63 = vmul.f32 %v9586_v55, %v9461_v17  ;;  %v11612_v53 = vld [vmem:[#allocation98_spill] sm:$0xff] }
 0x2bc   : > { %v4721_v48 = vpop.permute.xlu1 %4720  ;;  %v2034_v9 = vadd.f32 %v9710_v24, %v1998_v45  ;;  %v3900_v61 = vadd.f32 %v3868_v0, %v3832_v60  ;;  %v1068_v39 = vadd.f32 %v1036_v46, %v1000_v13  ;;  %v5574_v27 = vld [vmem:[#allocation2 + $0x37] sm:$0xff]  ;;  %v4229_v45 = vpop.permute.xlu2 %4228  ;;  %v9726_v46 = vld [vmem:[#allocation3 + $0x70] sm:$0xff] }
 0x2bd   : > { %v2589_v41 = vadd.f32 %v2557_v54, %v2523_v62  ;;  %vm4354_vm13 = vcmp.ge.f32.partialorder %v3305_v30, 0.0  ;;  %v4386_v42 = vmul.f32 0.25, %v3305_v30  ;;  %v2423_v15 = vadd.f32 %v2391_v25, %v2193_v10  ;;  %4812 = vst.msk [vmem:[#allocation4 + $0x28] sm:$0xff] %vm4806_vm14, %v4721_v48  ;;  %v4757_v54 = vpop.permute.xlu0 %4756 }
 0x2be   : > { %v1202_v62 = vmul.f32 %v5574_v27, %v9595_v6  ;;  %4830 = vst.msk [vmem:[#allocation4 + $0xb8] sm:$0xff] %vm4806_vm14, %v4757_v54  ;;  %vm3956_vm15 = vcmp.ge.f32.partialorder %v2034_v9, 0.0  ;;  %v3988_v59 = vmul.f32 0.25, %v2034_v9  ;;  %v3936_v10 = vadd.f32 %v9183_v5, %v3900_v61  ;;  %v5576_v61 = vld [vmem:[#allocation3 + $0x50] sm:$0xff] }
 0x2bf   : > { %v2621_v3 = vmul.f32 %v2589_v41, %v11587_v1  ;;  %v4418_v26 = vsel %vm4354_vm13, %v3305_v30, %v4386_v42  ;;  %v1136_v0 = vadd.f32 %v1104_v63, %v1068_v39  ;;  %v1238_v25 = vmul.f32 %v9605_v4, %v9473_v21  ;;  %v5575_v41 = vld [vmem:[#allocation2 + $0x39] sm:$0xff]  ;;  %v11588_v63 = vld [vmem:[#allocation110_spill] sm:$0xff] }
 0x2c0   : > { %v1306_v30 = vmul.f32 %v9614_v14, %v9478_v51  ;;  %v1628_v60 = vmul.f32 %v5575_v41, %v9627_v11  ;;  %v4020_v42 = vsel %vm3956_vm15, %v2034_v9, %v3988_v59  ;;  %vm4610_vm3 = vcmp.ge.f32.partialorder %v3936_v10, 0.0  ;;  %4477 = vrot.lane.b32.xlu2 %v9673_v7, %s5720_s21 }
 0x2c1   : > { %v2653_v58 = vadd.f32 %v2621_v3, %v2423_v15  ;;  %v4642_v13 = vmul.f32 0.25, %v3936_v10  ;;  %4052 = vst.msk [vmem:[#allocation4 + $0x80] sm:$0xff] %vm851_vm1, %v4020_v42  ;;  %v1270_v48 = vadd.f32 %v1238_v25, %v1202_v62  ;;  %v1664_v21 = vmul.f32 %v9636_v44, %v9494_v52  ;;  %v11590_v25 = vld [vmem:[#allocation14_spill] sm:$0xff] }
 0x2c2   : > { %v1732_v15 = vmul.f32 %v9643_v35, %v9498_v36  ;;  %4309 = vst.msk [vmem:[#allocation4 + $0x80] sm:$0xff] %vm4292_vm5, %v4229_v45  ;;  %v3745_v54 = vmul.f32 %v5576_v61, %v9137_v12  ;;  %v3781_v27 = vmul.f32 %v9143_v37, %v11588_v63  ;;  %v3849_v52 = vmul.f32 %v9155_v16, %v9726_v46  ;;  %v11591_v16 = vld [vmem:[#allocation5_spill] sm:$0xff]  ;;  %v11594_v61 = vld [vmem:[#allocation99_spill] sm:$0xff] }
 0x2c3   : > { %v2689_v23 = vadd.f32 %v9489_v57, %v2653_v58  ;;  %v4674_v3 = vsel %vm4610_vm3, %v3936_v10, %v4642_v13  ;;  %v1338_v7 = vadd.f32 %v1306_v30, %v1270_v48  ;;  %v1696_v39 = vadd.f32 %v1664_v21, %v1628_v60  ;;  %v11589_v58 = vld [vmem:[#allocation67_spill] sm:$0xff]  ;;  %v11593_v21 = vld [vmem:[#allocation78_spill] sm:$0xff] }
 0x2c4   : > { %4766 = vrot.lane.b32.xlu0 %v4674_v3, %s5721_s23  ;;  %v4844_v62 = vld [vmem:[#allocation4 + $0x28] sm:$0xff]  ;;  %v2709_v45 = vadd.f32 %v9489_v57, %v11589_v58  ;;  %v2993_v10 = vmul.f32 %v9430_v20, %v9649_v22  ;;  %v3059_v12 = vmul.f32 %v9436_v8, %v9651_v56  ;;  %v3813_v41 = vadd.f32 %v3781_v27, %v3745_v54  ;;  %v9756_v48 = vpop.permute.xlu1 %4210  ;;  %v11595_v63 = vld [vmem:[#allocation79_spill] sm:$0xff]  ;;  %v9768_v58 = vld [vmem:[#allocation2 + $0x79] sm:$0xff] }
 0x2c5   : > { %vm4077_vm4 = vcmp.ge.f32.partialorder %v2689_v23, 0.0  ;;  %v4109_v9 = vmul.f32 0.25, %v2689_v23  ;;  %5251 = vmatmul.msk.f32.gmra.mxu1 %vm641_vm0, %v4844_v62  ;;  %v1530_v37 = vmul.f32 %v11590_v25, %v1338_v7  ;;  %v1764_v30 = vadd.f32 %v1732_v15, %v1696_v39  ;;  %v9760_v15 = vld [vmem:[#allocation2 + $0x77] sm:$0xff]  ;;  %v11596_v62 = vld [vmem:[#allocation6_spill] sm:$0xff]  ;;  %11597 = vst [vmem:[#allocation72_spill] sm:$0xff] %v9768_v58  ;;  %v11599_v25 = vld [vmem:[#allocation53_spill] sm:$0xff] }
 0x2c6   : > { %v3125_v60 = vmul.f32 %v9346_v40, %v11591_v16  ;;  %vm4097_vm6 = vcmp.ge.f32.partialorder %v2709_v45, 0.0  ;;  %v4129_v42 = vmul.f32 0.25, %v2709_v45  ;;  %v2062_v22 = vmul.f32 %v9461_v17, %v9331_v34 }
 0x2c7   : > { %v4141_v59 = vsel %vm4077_vm4, %v2689_v23, %v4109_v9  ;;  %v11592_v23 = vld [vmem:[#allocation31_spill] sm:$0xff]  ;;  %v1562_v56 = vadd.f32 %v1530_v37, %v1136_v0  ;;  %v1956_v9 = vmul.f32 %v11593_v21, %v1764_v30  ;;  %v3881_v3 = vadd.f32 %v3849_v52, %v3813_v41  ;;  %v11598_v52 = vld [vmem:[#allocation20_spill] sm:$0xff]  ;;  %v3769_v21 = vld [vmem:[#allocation3 + $0x110] sm:$0xff] }
 0x2c8   : > { %4214 = vrot.lane.b32.xlu1 %v4141_v59, %s5719_s27  ;;  %v3157_v13 = vmul.f32 %v3059_v12, %v11592_v23  ;;  %v3221_v7 = vmul.f32 %v3125_v60, %v11594_v61  ;;  %v4161_v54 = vsel %vm4097_vm6, %v2709_v45, %v4129_v42  ;;  %v2096_v27 = vmul.f32 %v11595_v63, %v9337_v38  ;;  %v11600_v37 = vld [vmem:[#allocation87_spill] sm:$0xff]  ;;  %v11613_v61 = vld [vmem:[#allocation64_spill] sm:$0xff] }
 0x2c9   : > { %v2162_v59 = vmul.f32 %v11596_v62, %v9354_v50  ;;  %4511 = vrot.lane.b32.xlu2 %v4418_v26, %s5720_s21  ;;  %v1988_v17 = vadd.f32 %v1956_v9, %v1562_v56  ;;  %v3917_v0 = vadd.f32 %v9183_v5, %v3881_v3  ;;  %v2228_v12 = vmul.f32 %v9478_v51, %v11598_v52  ;;  %v9783_v51 = vld [vmem:[%s10811_s12] ss:$0 sm:$0xff]  ;;  %v11602_v62 = vld [vmem:[#allocation84_spill] sm:$0xff] }
 0x2ca   : > { %v3189_v39 = vadd.f32 %v3157_v13, %v2993_v10  ;;  %v2262_v45 = vmul.f32 %v11600_v37, %v11599_v25  ;;  %v2128_v30 = vadd.f32 %v2096_v27, %v2062_v22  ;;  %v2328_v41 = vmul.f32 %v9385_v18, %v9760_v15  ;;  %v11601_v22 = vld [vmem:[#allocation33_spill] sm:$0xff] }
 0x2cb   : > { %v2458_v16 = vmul.f32 %v9498_v36, %v9394_v49  ;;  %v2024_v26 = vadd.f32 %v9710_v24, %v1988_v17  ;;  %vm4591_vm7 = vcmp.ge.f32.partialorder %v3917_v0, 0.0  ;;  %v4623_v5 = vmul.f32 0.25, %v3917_v0  ;;  %v9794_v27 = vld [vmem:[%s10814_s15] ss:$0 sm:$0xff] }
 0x2cc   : > { %v3253_v10 = vadd.f32 %v3221_v7, %v3189_v39  ;;  %4254 = vrot.lane.b32.xlu0 %v4161_v54, %s5719_s27  ;;  %v2294_v60 = vadd.f32 %v2262_v45, %v2228_v12  ;;  %v2194_v13 = vadd.f32 %v2162_v59, %v2128_v30  ;;  %v2492_v56 = vmul.f32 %v9400_v43, %v11601_v22  ;;  %v11603_v12 = vld [vmem:[#allocation21_spill] sm:$0xff] }
 0x2cd   : > { %v2558_v36 = vmul.f32 %v9411_v32, %v9768_v58  ;;  %vm3946_vm8 = vcmp.ge.f32.partialorder %v2024_v26, 0.0  ;;  %v3978_v9 = vmul.f32 0.25, %v2024_v26  ;;  %v4655_v3 = vsel %vm4591_vm7, %v3917_v0, %v4623_v5  ;;  %v9802_v0 = vld [vmem:[%s10814_s15 + $0x1] ss:$0 sm:$0xff] }
 0x2ce   : > { %v3289_v42 = vadd.f32 %v9783_v51, %v3253_v10  ;;  %v2360_v7 = vadd.f32 %v2328_v41, %v2294_v60  ;;  %v2524_v39 = vadd.f32 %v2492_v56, %v2458_v16  ;;  %v3765_v59 = vmul.f32 %v9794_v27, %v11602_v62  ;;  %v11604_v10 = vld [vmem:[#allocation42_spill] sm:$0xff]  ;;  %v4468_v16 = vpop.permute.xlu2 %4467  ;;  %v4723_v62 = vpop.permute.xlu1 %4722 }
 0x2cf   : > { %v4010_v17 = vsel %vm3946_vm8, %v2024_v26, %v3978_v9  ;;  %v3801_v30 = vmul.f32 %v9802_v0, %v11604_v10  ;;  %v9807_v41 = vmul.f32 %v9802_v0, %v3769_v21  ;;  %v9813_v26 = vld [vmem:[%s10814_s15 + $0x2] ss:$0 sm:$0xff]  ;;  %v2025_v23 = vadd.f32 %v9710_v24, %v11613_v61  ;;  %v5585_v10 = vld [vmem:[#allocation2 + $0x118] sm:$0xff] }
 0x2d0   : > { %4728 = vrot.lane.b32.xlu1 %v4655_v3, %s5721_s23  ;;  %vm4338_vm9 = vcmp.ge.f32.partialorder %v3289_v42, 0.0  ;;  %v4370_v54 = vmul.f32 0.25, %v3289_v42  ;;  %v2392_v45 = vmul.f32 %v2360_v7, %v11603_v12  ;;  %4042 = vst.msk [vmem:[#allocation4 + $0x30] sm:$0xff] %vm851_vm1, %v4010_v17  ;;  %v2590_v60 = vadd.f32 %v2558_v36, %v2524_v39  ;;  %v11606_v9 = vld [vmem:[#allocation57_spill] sm:$0xff]  ;;  %v9818_v7 = vld [vmem:[#allocation3 + $0x78] sm:$0xff]  ;;  %v11608_v12 = vld [vmem:[#allocation59_spill] sm:$0xff] }
 0x2d1   : > { %11605 = vst [vmem:[#allocation97_spill] sm:$0xff] %v9807_v41  ;;  %v3869_v56 = vmul.f32 %v9813_v26, %v3769_v21  ;;  %v3010_v3 = vmul.f32 %v9430_v20, %v11606_v9  ;;  %v3833_v36 = vadd.f32 %v3801_v30, %v3765_v59  ;;  %v11610_v17 = vld [vmem:[#allocation38_spill] sm:$0xff]  ;;  %v3142_v9 = vmul.f32 %v9346_v40, %v11612_v53 }
 0x2d2   : > { %v4402_v5 = vsel %vm4338_vm9, %v3289_v42, %v4370_v54  ;;  %11607 = vst [vmem:[#allocation29_spill] sm:$0xff] %v9818_v7  ;;  %v2424_v42 = vadd.f32 %v2392_v45, %v2194_v13  ;;  %v11609_v54 = vld [vmem:[#allocation61_spill] sm:$0xff]  ;;  %v11611_v21 = vld [vmem:[#allocation66_spill] sm:$0xff]  ;;  %v4486_v45 = vpop.permute.xlu0 %4485  ;;  %vm3947_vm10 = vcmp.ge.f32.partialorder %v2025_v23, 0.0  ;;  %v3979_v61 = vmul.f32 0.25, %v2025_v23 }
 0x2d3   : > { %4299 = vst.msk [vmem:[#allocation4 + $0x30] sm:$0xff] %vm4292_vm5, %v11608_v12  ;;  %4479 = vrot.lane.b32.xlu2 %v4402_v5, %s5720_s21  ;;  %v3076_v39 = vmul.f32 %v9436_v8, %v11609_v54  ;;  %v2622_v1 = vmul.f32 %v2590_v60, %v11611_v21  ;;  %v5581_v41 = vld [vmem:[#allocation3 + $0x58] sm:$0xff]  ;;  %v3901_v5 = vadd.f32 %v3869_v56, %v3833_v36 }
 0x2d4   : > { %4556 = vst.msk [vmem:[#allocation4 + $0x30] sm:$0xff] %vm4549_vm2, %v11610_v17  ;;  %v3746_v12 = vmul.f32 %v5581_v41, %v9794_v27  ;;  %v11614_v13 = vld [vmem:[#allocation30_spill] sm:$0xff]  ;;  %v3850_v17 = vmul.f32 %v9813_v26, %v9818_v7  ;;  %v9844_v41 = vld [vmem:[%s10815_s16] ss:$0 sm:$0xff] }
 0x2d5   : > { %v3174_v59 = vmul.f32 %v3076_v39, %v11614_v13  ;;  %v11615_v30 = vld [vmem:[#allocation50_spill] sm:$0xff]  ;;  %4813 = vst.msk [vmem:[#allocation4 + $0x30] sm:$0xff] %vm4806_vm14, %v4723_v62  ;;  %v2654_v60 = vadd.f32 %v2622_v1, %v2424_v42  ;;  %v3937_v56 = vadd.f32 %v9844_v41, %v3901_v5  ;;  %v4011_v62 = vsel %vm3947_vm10, %v2025_v23, %v3979_v61  ;;  %v9854_v23 = vld [vmem:[#allocation2 + $0xf7] sm:$0xff] }
 0x2d6   : > { %v3782_v54 = vmul.f32 %v9802_v0, %v11615_v30  ;;  %v11616_v53 = vld [vmem:[#allocation62_spill] sm:$0xff]  ;;  %4566 = vst.msk [vmem:[#allocation4 + $0x80] sm:$0xff] %vm4549_vm2, %v4486_v45  ;;  %v5583_v30 = vld [vmem:[#allocation2 + $0xf8] sm:$0xff]  ;;  %v2182_v45 = vmul.f32 %v5585_v10, %v9354_v50 }
 0x2d7   : > { %v3238_v21 = vmul.f32 %v3142_v9, %v11616_v53  ;;  %v3206_v36 = vadd.f32 %v3174_v59, %v3010_v3  ;;  %v2082_v7 = vmul.f32 %v5583_v30, %v9331_v34  ;;  %v2690_v1 = vadd.f32 %v9489_v57, %v2654_v60  ;;  %v5584_v42 = vld [vmem:[#allocation2 + $0x108] sm:$0xff]  ;;  %4043 = vst.msk [vmem:[#allocation4 + $0x38] sm:$0xff] %vm851_vm1, %v4011_v62  ;;  %v1296_v3 = vld [vmem:[#allocation2 + $0x117] sm:$0xff] }
 0x2d8   : > { %v3814_v39 = vadd.f32 %v3782_v54, %v3746_v12  ;;  %v2116_v9 = vmul.f32 %v5584_v42, %v9337_v38  ;;  %vm4611_vm11 = vcmp.ge.f32.partialorder %v3937_v56, 0.0  ;;  %v4643_v58 = vmul.f32 0.25, %v3937_v56  ;;  %4300 = vst.msk [vmem:[#allocation4 + $0x38] sm:$0xff] %vm4292_vm5, %v9756_v48  ;;  %v9861_v60 = vld [vmem:[#allocation2 + $0x107] sm:$0xff]  ;;  %v9865_v48 = vpop.permute.xlu2 %4501 }
 0x2d9   : > { %v3270_v22 = vadd.f32 %v3238_v21, %v3206_v36  ;;  %vm4078_vm12 = vcmp.ge.f32.partialorder %v2690_v1, 0.0  ;;  %v4110_v12 = vmul.f32 0.25, %v2690_v1  ;;  %11617 = vst [vmem:[#allocation58_spill] sm:$0xff] %v9854_v23  ;;  %v2248_v30 = vmul.f32 %v9854_v23, %v11598_v52 }
 0x2da   : > { %v3882_v5 = vadd.f32 %v3850_v17, %v3814_v39  ;;  %v2148_v59 = vadd.f32 %v2116_v9, %v2082_v7  ;;  %v4675_v54 = vsel %vm4611_vm11, %v3937_v56, %v4643_v58  ;;  %4557 = vst.msk [vmem:[#allocation4 + $0x38] sm:$0xff] %vm4549_vm2, %v4468_v16  ;;  %v1722_v17 = vld [vmem:[#allocation2 + $0x119] sm:$0xff]  ;;  %v2282_v61 = vmul.f32 %v9861_v60, %v11600_v37  ;;  %v9874_v62 = vpop.permute.xlu0 %4487 }
 0x2db   : > { %v3306_v10 = vadd.f32 %v9783_v51, %v3270_v22  ;;  %11618 = vst [vmem:[#allocation17_spill] sm:$0xff] %v9861_v60  ;;  %v4142_v7 = vsel %vm4078_vm12, %v2690_v1, %v4110_v12  ;;  %4768 = vrot.lane.b32.xlu0 %v4675_v54, %s5721_s23  ;;  %v2348_v58 = vmul.f32 %v9385_v18, %v1296_v3  ;;  %v9869_v56 = vld [vmem:[#allocation2 + $0xf9] sm:$0xff]  ;;  %v11622_v1 = vld [vmem:[#allocation19_spill] sm:$0xff] }
 0x2dc   : > { %v3918_v21 = vadd.f32 %v9844_v41, %v3882_v5  ;;  %11619 = vst [vmem:[#allocation88_spill] sm:$0xff] %v9865_v48  ;;  %v2214_v36 = vadd.f32 %v2182_v45, %v2148_v59  ;;  %v2478_v22 = vmul.f32 %v9869_v56, %v9394_v49  ;;  %4216 = vrot.lane.b32.xlu1 %v4142_v7, %s5719_s27  ;;  %v11623_v5 = vld [vmem:[#allocation90_spill] sm:$0xff]  ;;  %v11624_v54 = vld [vmem:[#allocation44_spill] sm:$0xff]  ;;  %v4845_v23 = vld [vmem:[#allocation4 + $0x30] sm:$0xff] }
 0x2dd   : > { %11620 = vst [vmem:[#allocation28_spill] sm:$0xff] %v9869_v56  ;;  %vm4355_vm13 = vcmp.ge.f32.partialorder %v3306_v10, 0.0  ;;  %v4387_v16 = vmul.f32 0.25, %v3306_v10  ;;  %v2314_v42 = vadd.f32 %v2282_v61, %v2248_v30  ;;  %v2578_v45 = vmul.f32 %v9411_v32, %v1722_v17  ;;  %v11625_v7 = vld [vmem:[#allocation18_spill] sm:$0xff]  ;;  %v9885_v61 = vld [vmem:[#allocation2 + $0x7f] sm:$0xff]  ;;  %v11626_v17 = vld [vmem:[#allocation27_spill] sm:$0xff]  ;;  %5252 = vmatmul.msk.f32.gmra.mxu1 %vm641_vm0, %v4845_v23 }
 0x2de   : > { %vm4592_vm15 = vcmp.ge.f32.partialorder %v3918_v21, 0.0  ;;  %v4624_v39 = vmul.f32 0.25, %v3918_v21  ;;  %11621 = vst [vmem:[#allocation49_spill] sm:$0xff] %v9874_v62  ;;  %v2544_v9 = vadd.f32 %v11622_v1, %v2478_v22  ;;  %v2994_v3 = vmul.f32 %v9430_v20, %v11623_v5  ;;  %v11627_v1 = vld [vmem:[#allocation41_spill] sm:$0xff]  ;;  %v11630_v62 = vld [vmem:[#allocation86_spill] sm:$0xff] }
 0x2df   : > { %v4419_v12 = vsel %vm4355_vm13, %v3306_v10, %v4387_v16  ;;  %v3060_v56 = vmul.f32 %v9436_v8, %v11624_v54  ;;  %v3126_v60 = vmul.f32 %v9346_v40, %v11625_v7  ;;  %v2380_v48 = vadd.f32 %v2348_v58, %v2314_v42  ;;  %v11628_v16 = vld [vmem:[#allocation9_spill] sm:$0xff] }
 0x2e0   : > { %v4656_v59 = vsel %vm4592_vm15, %v3918_v21, %v4624_v39  ;;  %4513 = vrot.lane.b32.xlu2 %v4419_v12, %s5720_s21  ;;  %v2610_v30 = vadd.f32 %v2578_v45, %v2544_v9  ;;  %v2063_v22 = vmul.f32 %v11626_v17, %v9331_v34  ;;  %v2097_v10 = vmul.f32 %v9337_v38, %v11627_v1  ;;  %v9891_v21 = vpop.permute.xlu1 %4230  ;;  %v11629_v5 = vld [vmem:[#allocation73_spill] sm:$0xff]  ;;  %v3836_v12 = vld [vmem:[#allocation3 + $0x118] sm:$0xff] }
 0x2e1   : > { %v3158_v39 = vmul.f32 %v3060_v56, %v11628_v16  ;;  %v3222_v54 = vmul.f32 %v3126_v60, %v11629_v5  ;;  %v9895_v7 = vld [vmem:[#allocation2 + $0x81] sm:$0xff]  ;;  %v2163_v58 = vmul.f32 %v9354_v50, %v11630_v62  ;;  %v2412_v34 = vmul.f32 %v2380_v48, %v11614_v13 }
 0x2e2   : > { %v11631_v42 = vld [vmem:[#allocation109_spill] sm:$0xff]  ;;  %v2642_v38 = vmul.f32 %v2610_v30, %v11616_v53  ;;  %v2129_v45 = vadd.f32 %v2097_v10, %v2063_v22  ;;  %v2263_v56 = vmul.f32 %v11600_v37, %v9646_v31  ;;  %v2329_v17 = vmul.f32 %v9385_v18, %v9885_v61  ;;  %v9918_v1 = vpop.permute.xlu0 %4489 }
 0x2e3   : > { %v2229_v9 = vmul.f32 %v11631_v42, %v11598_v52  ;;  %v3190_v60 = vadd.f32 %v3158_v39, %v2994_v3  ;;  %v2459_v50 = vmul.f32 %v9680_v28, %v9394_v49  ;;  %v2493_v52 = vmul.f32 %v9400_v43, %v9661_v29  ;;  %v9920_v28 = vpop.permute.xlu2 %4469  ;;  %v9924_v39 = vld [vmem:[#allocation2 + $0x90] sm:$0xff] }
 0x2e4   : > { %v2444_v23 = vadd.f32 %v2412_v34, %v2214_v36  ;;  %v2195_v62 = vadd.f32 %v2163_v58, %v2129_v45  ;;  %v2559_v30 = vmul.f32 %v9411_v32, %v9895_v7  ;;  %4730 = vrot.lane.b32.xlu1 %v4656_v59, %s5721_s23  ;;  %v3766_v3 = vmul.f32 %v9794_v27, %v9281_v19  ;;  %v11633_v36 = vld [vmem:[#allocation74_spill] sm:$0xff]  ;;  %v9930_v58 = vld [vmem:[#allocation2 + $0xa0] sm:$0xff]  ;;  %v11634_v34 = vld [vmem:[#allocation8_spill] sm:$0xff] }
 0x2e5   : > { %v2295_v48 = vadd.f32 %v2263_v56, %v2229_v9  ;;  %v3254_v37 = vadd.f32 %v3222_v54, %v3190_v60  ;;  %v2525_v22 = vadd.f32 %v2493_v52, %v2459_v50  ;;  %v3870_v18 = vmul.f32 %v9813_v26, %v3836_v12  ;;  %11632 = vst [vmem:[#allocation82_spill] sm:$0xff] %v9920_v28  ;;  %v11635_v12 = vld [vmem:[#allocation91_spill] sm:$0xff] }
 0x2e6   : > { %v2674_v43 = vadd.f32 %v2642_v38, %v2444_v23  ;;  %v3307_v10 = vadd.f32 %v9783_v51, %v11633_v36  ;;  %v1011_v32 = vmul.f32 %v9924_v39, %v9566_v47  ;;  %v3834_v19 = vadd.f32 %v9698_v33, %v3766_v3  ;;  %v9942_v36 = vld [vmem:[#allocation2 + $0x8f] sm:$0xff] }
 0x2e7   : > { %v2361_v49 = vadd.f32 %v2329_v17, %v2295_v48  ;;  %v3290_v59 = vadd.f32 %v9783_v51, %v3254_v37  ;;  %v2591_v54 = vadd.f32 %v2559_v30, %v2525_v22  ;;  %v1047_v42 = vmul.f32 %v9930_v58, %v9575_v2  ;;  %v5591_v22 = vld [vmem:[#allocation2 + $0xb0] sm:$0xff] }
 0x2e8   : > { %v2710_v9 = vadd.f32 %v9489_v57, %v2674_v43  ;;  %vm4356_vm3 = vcmp.ge.f32.partialorder %v3307_v10, 0.0  ;;  %v4388_v45 = vmul.f32 0.25, %v3307_v10  ;;  %v3902_v17 = vadd.f32 %v3870_v18, %v3834_v19  ;;  %v9937_v50 = vpop.permute.xlu1 %4232  ;;  %v11640_v28 = vld [vmem:[#allocation11_spill] sm:$0xff] }
 0x2e9   : > { %v2393_v38 = vmul.f32 %v2361_v49, %v11634_v34  ;;  %vm4339_vm4 = vcmp.ge.f32.partialorder %v3290_v59, 0.0  ;;  %v4371_v56 = vmul.f32 0.25, %v3290_v59  ;;  %v2623_v60 = vmul.f32 %v2591_v54, %v11635_v12  ;;  %v9946_v54 = vld [vmem:[#allocation2 + $0x9f] sm:$0xff] }
 0x2ea   : > { %vm4098_vm6 = vcmp.ge.f32.partialorder %v2710_v9, 0.0  ;;  %v4130_v33 = vmul.f32 0.25, %v2710_v9  ;;  %v4420_v23 = vsel %vm4356_vm3, %v3307_v10, %v4388_v45  ;;  %v3938_v30 = vadd.f32 %v9844_v41, %v3902_v17  ;;  %v9955_v45 = vld [vmem:[#allocation2 + $0x91] sm:$0xff] }
 0x2eb   : > { %v2425_v52 = vadd.f32 %v2393_v38, %v2195_v62  ;;  %v4403_v48 = vsel %vm4339_vm4, %v3290_v59, %v4371_v56  ;;  %v1079_v37 = vadd.f32 %v1047_v42, %v1011_v32  ;;  %v1115_v3 = vmul.f32 %v5591_v22, %v9586_v55  ;;  %v5594_v59 = vld [vmem:[#allocation2 + $0xaf] sm:$0xff]  ;;  %v9952_v42 = vpop.permute.xlu0 %4244  ;;  %v11639_v34 = vld [vmem:[#allocation12_spill] sm:$0xff] }
 0x2ec   : > { %v4162_v43 = vsel %vm4098_vm6, %v2710_v9, %v4130_v33  ;;  %4481 = vrot.lane.b32.xlu2 %v4403_v48, %s5720_s21  ;;  %v1213_v18 = vmul.f32 %v9942_v36, %v9595_v6  ;;  %v1249_v62 = vmul.f32 %v9946_v54, %v9605_v4  ;;  %vm4612_vm7 = vcmp.ge.f32.partialorder %v3938_v30, 0.0  ;;  %v9963_v33 = vld [vmem:[#allocation3 + $0x80] sm:$0xff] }
 0x2ed   : > { %v2655_v49 = vadd.f32 %v2623_v60, %v2425_v52  ;;  %4256 = vrot.lane.b32.xlu0 %v4162_v43, %s5719_s27  ;;  %v4644_v10 = vmul.f32 0.25, %v3938_v30  ;;  %v1147_v32 = vadd.f32 %v1115_v3, %v1079_v37  ;;  %v1317_v19 = vmul.f32 %v5594_v59, %v9614_v14  ;;  %v9959_v60 = vld [vmem:[#allocation2 + $0xa1] sm:$0xff]  ;;  %v5597_v48 = vld [vmem:[#allocation2 + $0xb1] sm:$0xff] }
 0x2ee   : > { %v1281_v38 = vadd.f32 %v1249_v62, %v1213_v18  ;;  %v1639_v56 = vmul.f32 %v9955_v45, %v9627_v11  ;;  %11636 = vst [vmem:[#allocation13_spill] sm:$0xff] %v9959_v60  ;;  %v1675_v17 = vmul.f32 %v9959_v60, %v9636_v44  ;;  %v1743_v37 = vmul.f32 %v5597_v48, %v9643_v35  ;;  %v5598_v22 = vld [vmem:[#allocation3 + $0x60] sm:$0xff]  ;;  %v11638_v35 = vld [vmem:[#allocation60_spill] sm:$0xff] }
 0x2ef   : > { %v2691_v9 = vadd.f32 %v9489_v57, %v2655_v49  ;;  %v4676_v52 = vsel %vm4612_vm7, %v3938_v30, %v4644_v10  ;;  %v3747_v3 = vmul.f32 %v5598_v22, %v9794_v27  ;;  %v3783_v43 = vmul.f32 %v9802_v0, %v9726_v46  ;;  %v9969_v49 = vpop.permute.xlu2 %4503  ;;  %v11637_v30 = vld [vmem:[#allocation63_spill] sm:$0xff] }
 0x2f0   : > { %v1349_v18 = vadd.f32 %v1317_v19, %v1281_v38  ;;  %v1707_v62 = vadd.f32 %v1675_v17, %v1639_v56  ;;  %v3851_v44 = vmul.f32 %v9813_v26, %v9963_v33  ;;  %v2711_v10 = vadd.f32 %v9489_v57, %v11637_v30  ;;  %v4725_v22 = vpop.permute.xlu1 %4724  ;;  %v11641_v56 = vld [vmem:[#allocation47_spill] sm:$0xff] }
 0x2f1   : > { %vm4079_vm8 = vcmp.ge.f32.partialorder %v2691_v9, 0.0  ;;  %v4111_v11 = vmul.f32 0.25, %v2691_v9  ;;  %v3815_v59 = vadd.f32 %v3783_v43, %v3747_v3  ;;  %v2995_v48 = vmul.f32 %v9430_v20, %v11638_v35  ;;  %4814 = vst.msk [vmem:[#allocation4 + $0x38] sm:$0xff] %vm4806_vm14, %v4725_v22  ;;  %v11644_v3 = vld [vmem:[#allocation76_spill] sm:$0xff]  ;;  %v11645_v43 = vld [vmem:[#allocation15_spill] sm:$0xff] }
 0x2f2   : > { %v1541_v53 = vmul.f32 %v11639_v34, %v1349_v18  ;;  %v1775_v13 = vadd.f32 %v1743_v37, %v1707_v62  ;;  %v3061_v60 = vmul.f32 %v9436_v8, %v11640_v28  ;;  %vm4099_vm9 = vcmp.ge.f32.partialorder %v2711_v10, 0.0  ;;  %v11643_v34 = vld [vmem:[#allocation39_spill] sm:$0xff]  ;;  %v11646_v18 = vld [vmem:[#allocation10_spill] sm:$0xff] }
 0x2f3   : > { %v4143_v12 = vsel %vm4079_vm8, %v2691_v9, %v4111_v11  ;;  %v3883_v19 = vadd.f32 %v3851_v44, %v3815_v59  ;;  %v4131_v38 = vmul.f32 0.25, %v2711_v10  ;;  %v3127_v57 = vmul.f32 %v9346_v40, %v11641_v56  ;;  %v11642_v9 = vld [vmem:[#allocation100_spill] sm:$0xff]  ;;  %v9994_v62 = vpop.permute.xlu0 %4758  ;;  %v11648_v44 = vld [vmem:[#allocation70_spill] sm:$0xff] }
 0x2f4   : > { %4218 = vrot.lane.b32.xlu1 %v4143_v12, %s5719_s27  ;;  %4515 = vrot.lane.b32.xlu2 %v4420_v23, %s5720_s21  ;;  %v1573_v20 = vadd.f32 %v1541_v53, %v1147_v32  ;;  %v1967_v17 = vmul.f32 %v11642_v9, %v1775_v13  ;;  %v3159_v37 = vmul.f32 %v3061_v60, %v11643_v34  ;;  %v5599_v13 = vld [vmem:[#allocation2 + $0xb8] sm:$0xff]  ;;  %v11647_v60 = vld [vmem:[#allocation35_spill] sm:$0xff] }
 0x2f5   : > { %v1012_v8 = vmul.f32 %v11644_v3, %v9566_v47  ;;  %4770 = vrot.lane.b32.xlu0 %v4676_v52, %s5721_s23  ;;  %v3919_v28 = vadd.f32 %v9844_v41, %v3883_v19  ;;  %v4163_v12 = vsel %vm4099_vm9, %v2711_v10, %v4131_v38  ;;  %v3223_v11 = vmul.f32 %v3127_v57, %v11645_v43  ;;  %v11649_v19 = vld [vmem:[#allocation92_spill] sm:$0xff]  ;;  %v4990_v57 = vpop.f32.mrf.mxu1  ;;  %v10127_v43 = vld [vmem:[#allocation3 + $0x90] sm:$0xff] }
 0x2f6   : > { %v1048_v40 = vmul.f32 %v11646_v18, %v9575_v2  ;;  %v1999_v53 = vadd.f32 %v1967_v17, %v1573_v20  ;;  %v3191_v23 = vadd.f32 %v3159_v37, %v2995_v48  ;;  %v1116_v32 = vmul.f32 %v5599_v13, %v9586_v55  ;;  %v5600_v2 = vld [vmem:[#allocation2 + $0xb7] sm:$0xff]  ;;  %v11651_v18 = vld [vmem:[#allocation85_spill] sm:$0xff] }
 0x2f7   : > { %v1214_v47 = vmul.f32 %v11647_v60, %v9595_v6  ;;  %vm4593_vm10 = vcmp.ge.f32.partialorder %v3919_v28, 0.0  ;;  %v4625_v52 = vmul.f32 0.25, %v3919_v28  ;;  %v1250_v30 = vmul.f32 %v11648_v44, %v9605_v4  ;;  %v10008_v6 = vld [vmem:[%s10806_s7 + $0x1] ss:$0 sm:$0xff]  ;;  %v10037_v13 = vld [vmem:[%s10806_s7] ss:$0 sm:$0xff] }
 0x2f8   : > { %v1080_v59 = vadd.f32 %v1048_v40, %v1012_v8  ;;  %v2035_v10 = vadd.f32 %v9710_v24, %v1999_v53  ;;  %v3255_v35 = vadd.f32 %v3223_v11, %v3191_v23  ;;  %v1318_v22 = vmul.f32 %v5600_v2, %v9614_v14  ;;  %v4743_v20 = vpop.permute.xlu1 %4742  ;;  %v4846_v9 = vld [vmem:[#allocation4 + $0x38] sm:$0xff]  ;;  %v10012_v14 = vpop.permute.xlu2 %4471  ;;  %v11652_v60 = vld [vmem:[#allocation51_spill] sm:$0xff]  ;;  %v10064_v2 = vld [vmem:[%s10806_s7 + $0x6] ss:$0 sm:$0xff] }
 0x2f9   : > { %v2042_v48 = vadd.f32 %v9710_v24, %v11649_v19  ;;  %v4657_v38 = vsel %vm4593_vm10, %v3919_v28, %v4625_v52  ;;  %v1282_v56 = vadd.f32 %v1250_v30, %v1214_v47  ;;  %v2064_v4 = vmul.f32 %v10008_v6, %v11595_v63  ;;  %11650 = vst [vmem:[#allocation80_spill] sm:$0xff] %v10012_v14  ;;  %v10021_v63 = vld [vmem:[%s10806_s7 + $0x4] ss:$0 sm:$0xff]  ;;  %v10023_v28 = vld [vmem:[#allocation2 + $0x78] sm:$0xff]  ;;  %v3837_v44 = vld [vmem:[#allocation3 + $0x120] sm:$0xff] }
 0x2fa   : > { %v1148_v55 = vadd.f32 %v1116_v32, %v1080_v59  ;;  %vm3957_vm11 = vcmp.ge.f32.partialorder %v2035_v10, 0.0  ;;  %v3989_v17 = vmul.f32 0.25, %v2035_v10  ;;  %v3291_v37 = vadd.f32 %v9783_v51, %v3255_v35  ;;  %4823 = vst.msk [vmem:[#allocation4 + $0x80] sm:$0xff] %vm4806_vm14, %v4743_v20  ;;  %5253 = vmatmul.msk.f32.gmra.mxu1 %vm641_vm0, %v4846_v9  ;;  %v10030_v51 = vld [vmem:[%s10806_s7 + $0x7] ss:$0 sm:$0xff] }
 0x2fb   : > { %vm3964_vm12 = vcmp.ge.f32.partialorder %v2042_v48, 0.0  ;;  %v1350_v3 = vadd.f32 %v1318_v22, %v1282_v56  ;;  %v3996_v8 = vmul.f32 0.25, %v2042_v48  ;;  %v2098_v11 = vmul.f32 %v10023_v28, %v10021_v63  ;;  %v10048_v30 = vld [vmem:[%s10817_s18] ss:$0 sm:$0xff]  ;;  %v10081_v9 = vld [vmem:[%s10806_s7 + $0x5] ss:$0 sm:$0xff] }
 0x2fc   : > { %4732 = vrot.lane.b32.xlu1 %v4657_v38, %s5721_s23  ;;  %v2164_v40 = vmul.f32 %v10030_v51, %v11651_v18  ;;  %v4021_v53 = vsel %vm3957_vm11, %v2035_v10, %v3989_v17  ;;  %vm4340_vm13 = vcmp.ge.f32.partialorder %v3291_v37, 0.0  ;;  %v4372_v23 = vmul.f32 0.25, %v3291_v37  ;;  %v10050_v10 = vpop.permute.xlu0 %4246  ;;  %v11653_v22 = vld [vmem:[#allocation65_spill] sm:$0xff]  ;;  %v11656_v17 = vld [vmem:[#allocation72_spill] sm:$0xff]  ;;  %v11658_v18 = vld [vmem:[#allocation42_spill] sm:$0xff] }
 0x2fd   : > { %v2230_v32 = vmul.f32 %v10037_v13, %v11599_v25  ;;  %4053 = vst.msk [vmem:[#allocation4 + $0x88] sm:$0xff] %vm851_vm1, %v4021_v53  ;;  %4258 = vrot.lane.b32.xlu0 %v4163_v12, %s5719_s27  ;;  %v1542_v47 = vmul.f32 %v11652_v60, %v1350_v3  ;;  %v4028_v52 = vsel %vm3964_vm12, %v2042_v48, %v3996_v8  ;;  %v10057_v12 = vld [vmem:[%s10806_s7 + $0x3] ss:$0 sm:$0xff]  ;;  %v10089_v8 = vld [vmem:[%s10806_s7 + $0x8] ss:$0 sm:$0xff] }
 0x2fe   : > { %v2130_v59 = vadd.f32 %v2098_v11, %v2064_v4  ;;  %4310 = vst.msk [vmem:[#allocation4 + $0x88] sm:$0xff] %vm4292_vm5, %v9891_v21  ;;  %v4404_v25 = vsel %vm4340_vm13, %v3291_v37, %v4372_v23  ;;  %v2264_v35 = vmul.f32 %v10057_v12, %v9760_v15  ;;  %v2330_v19 = vmul.f32 %v10064_v2, %v11653_v22  ;;  %v10071_v21 = vld [vmem:[%s10806_s7 + $0x2] ss:$0 sm:$0xff]  ;;  %v11657_v11 = vld [vmem:[#allocation23_spill] sm:$0xff]  ;;  %v11659_v23 = vld [vmem:[#allocation26_spill] sm:$0xff] }
 0x2ff   : > { %v11654_v48 = vld [vmem:[#allocation33_spill] sm:$0xff]  ;;  %4483 = vrot.lane.b32.xlu2 %v4404_v25, %s5720_s21  ;;  %v1574_v4 = vadd.f32 %v1542_v47, %v1148_v55  ;;  %v2494_v37 = vmul.f32 %v10081_v9, %v11656_v17  ;;  %4060 = vst.msk [vmem:[#allocation4 + $0xc0] sm:$0xff] %vm851_vm1, %v4028_v52  ;;  %v2560_v55 = vmul.f32 %v10089_v8, %v11657_v11  ;;  %v11660_v52 = vld [vmem:[#allocation50_spill] sm:$0xff]  ;;  %s11661_s21 = sshll.u32 %s11702_s30, 8 }
 0x300   : > { %v2460_v38 = vmul.f32 %v10071_v21, %v11654_v48  ;;  %v11655_v56 = vld [vmem:[#allocation49_spill] sm:$0xff]  ;;  %v2196_v20 = vadd.f32 %v2164_v40, %v2130_v59  ;;  %v2296_v3 = vadd.f32 %v2264_v35, %v2230_v32  ;;  %v3767_v40 = vmul.f32 %v9794_v27, %v11658_v18  ;;  %4317 = vst.msk [vmem:[#allocation4 + $0xc0] sm:$0xff] %vm4292_vm5, %v9952_v42  ;;  %v4745_v25 = vpop.permute.xlu1 %4744  ;;  %s10107_s25 = scalar_lea.vmem %s10818_s19, %s11661_s21 }
 0x301   : > { %4567 = vst.msk [vmem:[#allocation4 + $0x88] sm:$0xff] %vm4549_vm2, %v11655_v56  ;;  %v3871_v53 = vmul.f32 %v9813_v26, %v3837_v44  ;;  %v2000_v60 = vadd.f32 %v11659_v23, %v1574_v4  ;;  %v4991_v47 = vadd.f32 %v10048_v30, %v4990_v57  ;;  %v3748_v59 = vmul.f32 %v9794_v27, %v11660_v52  ;;  %v11662_v44 = vld [vmem:[#allocation88_spill] sm:$0xff]  ;;  %v11663_v22 = vld [vmem:[#allocation97_spill] sm:$0xff] }
 0x302   : > { %v2526_v32 = vadd.f32 %v2494_v37, %v2460_v38  ;;  %4574 = vst.msk [vmem:[#allocation4 + $0xc0] sm:$0xff] %vm4549_vm2, %v11662_v44  ;;  %v2362_v35 = vadd.f32 %v2330_v19, %v2296_v3  ;;  %v3835_v48 = vadd.f32 %v11663_v22, %v3767_v40  ;;  %v11664_v42 = vld [vmem:[#allocation29_spill] sm:$0xff]  ;;  %v10114_v57 = vld [vmem:[#allocation3 + $0x88] sm:$0xff]  ;;  %v3751_v19 = vmul.f32 %v9794_v27, %v9963_v33  ;;  %v4993_v3 = vpop.f32.mrf.mxu1  ;;  %v10124_v40 = vpop.permute.xlu2 %4505 }
 0x303   : > { %v3784_v38 = vmul.f32 %v9802_v0, %v11664_v42  ;;  %v3852_v56 = vmul.f32 %v10114_v57, %v9813_v26  ;;  %v4855_v4 = vld [vmem:[#allocation4 + $0x80] sm:$0xff]  ;;  %v2036_v37 = vadd.f32 %v9710_v24, %v2000_v60  ;;  %4831 = vst.msk [vmem:[#allocation4 + $0xc0] sm:$0xff] %vm4806_vm14, %v9994_v62  ;;  %v11665_v52 = vld [vmem:[#allocation32_spill] sm:$0xff] }
 0x304   : > { %v2592_v11 = vadd.f32 %v2560_v55, %v2526_v32  ;;  %v5612_v18 = vld [vmem:[%s5853_s2] sm:$0xff]  ;;  %v2394_v44 = vmul.f32 %v2362_v35, %v11665_v52  ;;  %v3903_v22 = vadd.f32 %v3871_v53, %v3835_v48  ;;  %v3787_v55 = vmul.f32 %v10127_v43, %v9802_v0  ;;  %4824 = vst.msk [vmem:[#allocation4 + $0x88] sm:$0xff] %vm4806_vm14, %v4745_v25  ;;  %v4761_v34 = vpop.permute.xlu0 %4760 }
 0x305   : > { %v5086_v23 = vadd.f32 %v5612_v18, %v4991_v47  ;;  %v3816_v14 = vadd.f32 %v3784_v38, %v3748_v59  ;;  %vm3958_vm15 = vcmp.ge.f32.partialorder %v2036_v37, 0.0  ;;  %v3990_v60 = vmul.f32 0.25, %v2036_v37  ;;  %v11666_v62 = vld [vmem:[#allocation45_spill] sm:$0xff]  ;;  %v5614_v47 = vld [vmem:[#allocation3 + $0xa0] sm:$0xff]  ;;  %5262 = vmatmul.msk.f32.vlgmr.msra.gmra.mxu3 %vm641_vm0, %v4855_v4 }
 0x306   : > { %v2624_v32 = vmul.f32 %v2592_v11, %v11666_v62  ;;  %v3855_v18 = vmul.f32 %v5614_v47, %v9813_v26  ;;  %v2426_v53 = vadd.f32 %v2394_v44, %v2196_v20  ;;  %v3939_v59 = vadd.f32 %v9844_v41, %v3903_v22  ;;  %v11667_v52 = vld [vmem:[#allocation37_spill] sm:$0xff]  ;;  %v10141_v62 = vld [vmem:[#allocation2 + $0x70] sm:$0xff] }
 0x307   : > { %5118 = vst.msk [vmem:[%s10107_s25] sm:$0xff] %vm641_vm0, %v5086_v23  ;;  %v3884_v35 = vadd.f32 %v3852_v56, %v3816_v14  ;;  %v3819_v48 = vadd.f32 %v3787_v55, %v3751_v19  ;;  %v4022_v38 = vsel %vm3958_vm15, %v2036_v37, %v3990_v60  ;;  %v4994_v25 = vadd.f32 %v10048_v30, %v4993_v3  ;;  %v5616_v56 = vld [vmem:[%s5853_s2 + $0x8] sm:$0xff]  ;;  %v10162_v47 = vld [vmem:[#allocation2 + $0x80] sm:$0xff] }
 0x308   : > { %v2043_v11 = vadd.f32 %v9710_v24, %v11667_v52  ;;  %v2065_v23 = vmul.f32 %v10141_v62, %v10008_v6  ;;  %4054 = vst.msk [vmem:[#allocation4 + $0x90] sm:$0xff] %vm851_vm1, %v4022_v38  ;;  %v2656_v4 = vadd.f32 %v2624_v32, %v2426_v53  ;;  %vm4613_vm3 = vcmp.ge.f32.partialorder %v3939_v59, 0.0  ;;  %v4747_v3 = vpop.permute.xlu1 %4746  ;;  %v10155_v52 = vld [vmem:[%s10807_s8] ss:$0 sm:$0xff] }
 0x309   : > { %v4645_v20 = vmul.f32 0.25, %v3939_v59  ;;  %v3920_v44 = vadd.f32 %v9844_v41, %v3884_v35  ;;  %4311 = vst.msk [vmem:[#allocation4 + $0x90] sm:$0xff] %vm4292_vm5, %v9937_v50  ;;  %v3887_v14 = vadd.f32 %v3855_v18, %v3819_v48  ;;  %v5087_v37 = vadd.f32 %v5616_v56, %v4994_v25 }
 0x30a   : > { %vm3965_vm4 = vcmp.ge.f32.partialorder %v2043_v11, 0.0  ;;  %v3997_v19 = vmul.f32 0.25, %v2043_v11  ;;  %4568 = vst.msk [vmem:[#allocation4 + $0x90] sm:$0xff] %vm4549_vm2, %v9918_v1  ;;  %v2692_v22 = vadd.f32 %v10155_v52, %v2656_v4  ;;  %v2099_v1 = vmul.f32 %v10162_v47, %v10021_v63  ;;  %v4996_v18 = vpop.f32.mrf.mxu1 }
 0x30b   : > { %v4677_v55 = vsel %vm4613_vm3, %v3939_v59, %v4645_v20  ;;  %vm4594_vm6 = vcmp.ge.f32.partialorder %v3920_v44, 0.0  ;;  %v4626_v60 = vmul.f32 0.25, %v3920_v44  ;;  %v3923_v50 = vadd.f32 %v9844_v41, %v3887_v14  ;;  %5119 = vst.msk [vmem:[%s10107_s25 + $0x8] sm:$0xff] %vm641_vm0, %v5087_v37  ;;  %v4856_v53 = vld [vmem:[#allocation4 + $0x88] sm:$0xff] }
 0x30c   : > { %4772 = vrot.lane.b32.xlu0 %v4677_v55, %s5721_s23  ;;  %v4029_v32 = vsel %vm3965_vm4, %v2043_v11, %v3997_v19  ;;  %vm4080_vm7 = vcmp.ge.f32.partialorder %v2692_v22, 0.0  ;;  %v4112_v35 = vmul.f32 0.25, %v2692_v22  ;;  %v2165_v59 = vmul.f32 %v10030_v51, %v9924_v39  ;;  %v4249_v4 = vpop.permute.xlu0 %4248  ;;  %4825 = vst.msk [vmem:[#allocation4 + $0x90] sm:$0xff] %vm4806_vm14, %v4747_v3 }
 0x30d   : > { %v10166_v48 = vsel %vm4594_vm6, %v3920_v44, %v4626_v60  ;;  %4061 = vst.msk [vmem:[#allocation4 + $0xc8] sm:$0xff] %vm851_vm1, %v4029_v32  ;;  %vm4597_vm8 = vcmp.ge.f32.partialorder %v3923_v50, 0.0  ;;  %v4629_v38 = vmul.f32 0.25, %v3923_v50  ;;  %v2131_v25 = vadd.f32 %v2099_v1, %v2065_v23  ;;  %5263 = vmatmul.msk.f32.gmra.mxu3 %vm641_vm0, %v4856_v53  ;;  %v10176_v44 = vpop.permute.xlu2 %4473  ;;  %v11668_v32 = vld [vmem:[#allocation95_spill] sm:$0xff] }
 0x30e   : > { %4318 = vst.msk [vmem:[#allocation4 + $0xc8] sm:$0xff] %vm4292_vm5, %v10050_v10  ;;  %v2231_v11 = vmul.f32 %v10037_v13, %v9646_v31  ;;  %v4144_v20 = vsel %vm4080_vm7, %v2692_v22, %v4112_v35  ;;  %v2265_v14 = vmul.f32 %v10057_v12, %v9885_v61  ;;  %v2331_v56 = vmul.f32 %v10064_v2, %v9942_v36 }
 0x30f   : > { %4575 = vst.msk [vmem:[#allocation4 + $0xc8] sm:$0xff] %vm4549_vm2, %v9969_v49  ;;  %v2461_v10 = vmul.f32 %v10071_v21, %v9661_v29  ;;  %4220 = vrot.lane.b32.xlu1 %v4144_v20, %s5719_s27  ;;  %v4661_v31 = vsel %vm4597_vm8, %v3923_v50, %v4629_v38  ;;  %v2197_v23 = vadd.f32 %v2165_v59, %v2131_v25  ;;  %v10204_v59 = vld [vmem:[#allocation2 + $0x88] sm:$0xff] }
 0x310   : > { %v2495_v37 = vmul.f32 %v10081_v9, %v9895_v7  ;;  %v2561_v19 = vmul.f32 %v10089_v8, %v9955_v45  ;;  %v2297_v49 = vadd.f32 %v2265_v14, %v2231_v11  ;;  %4832 = vst.msk [vmem:[#allocation4 + $0xc8] sm:$0xff] %vm4806_vm14, %v4761_v34  ;;  %v3749_v22 = vmul.f32 %v9794_v27, %v9726_v46  ;;  %v4749_v53 = vpop.permute.xlu1 %4748  ;;  %v11669_v11 = vld [vmem:[#allocation31_spill] sm:$0xff] }
 0x311   : > { %v3785_v55 = vmul.f32 %v9802_v0, %v9963_v33  ;;  %v3853_v29 = vmul.f32 %v10127_v43, %v9813_v26  ;;  %v4997_v50 = vadd.f32 %v10048_v30, %v4996_v18  ;;  %v2044_v1 = vadd.f32 %v9710_v24, %v11668_v32  ;;  %v10208_v43 = vld [vmem:[#allocation2 + $0x98] sm:$0xff]  ;;  %4826 = vst.msk [vmem:[#allocation4 + $0x98] sm:$0xff] %vm4806_vm14, %v4749_v53  ;;  %v5621_v18 = vld [vmem:[%s5853_s2 + $0x10] sm:$0xff] }
 0x312   : > { %v2527_v60 = vadd.f32 %v2495_v37, %v2461_v10  ;;  %v2066_v34 = vmul.f32 %v10023_v28, %v10008_v6  ;;  %v2363_v46 = vadd.f32 %v2331_v56, %v2297_v49  ;;  %v2100_v33 = vmul.f32 %v10204_v59, %v10021_v63  ;;  %v11670_v37 = vld [vmem:[#allocation99_spill] sm:$0xff] }
 0x313   : > { %v3817_v35 = vadd.f32 %v3785_v55, %v3749_v22  ;;  %v2166_v3 = vmul.f32 %v10208_v43, %v10030_v51  ;;  %v5088_v38 = vadd.f32 %v5621_v18, %v4997_v50  ;;  %vm3966_vm9 = vcmp.ge.f32.partialorder %v2044_v1, 0.0  ;;  %v10221_v55 = vld [vmem:[#allocation2 + $0x87] sm:$0xff] }
 0x314   : > { %4740 = vrot.lane.b32.xlu0 %v4661_v31, %s5721_s23  ;;  %v2593_v24 = vadd.f32 %v2561_v19, %v2527_v60  ;;  %v3998_v25 = vmul.f32 0.25, %v2044_v1  ;;  %v2395_v20 = vmul.f32 %v2363_v46, %v11669_v11  ;;  %v2132_v56 = vadd.f32 %v2100_v33, %v2066_v34  ;;  %v10225_v19 = vld [vmem:[#allocation2 + $0x97] sm:$0xff]  ;;  %v4763_v50 = vpop.permute.xlu0 %4762  ;;  %v10236_v46 = vld [vmem:[#allocation2 + $0x89] sm:$0xff] }
 0x315   : > { %v3885_v14 = vadd.f32 %v3853_v29, %v3817_v35  ;;  %v2232_v10 = vmul.f32 %v10037_v13, %v9760_v15  ;;  %5120 = vst.msk [vmem:[%s10107_s25 + $0x10] sm:$0xff] %vm641_vm0, %v5088_v38  ;;  %v2266_v31 = vmul.f32 %v10221_v55, %v10057_v12  ;;  %v2332_v60 = vmul.f32 %v10225_v19, %v10064_v2  ;;  %v4999_v29 = vpop.f32.mrf.mxu1 }
 0x316   : > { %v2625_v49 = vmul.f32 %v2593_v24, %v11670_v37  ;;  %v4030_v22 = vsel %vm3966_vm9, %v2044_v1, %v3998_v25  ;;  %v2427_v32 = vadd.f32 %v2395_v20, %v2197_v23  ;;  %v2198_v34 = vadd.f32 %v2166_v3, %v2132_v56  ;;  %v10240_v23 = vld [vmem:[#allocation2 + $0x99] sm:$0xff]  ;;  %v10244_v3 = vpop.permute.xlu2 %4507 }
 0x317   : > { %v3921_v15 = vadd.f32 %v9844_v41, %v3885_v14  ;;  %4062 = vst.msk [vmem:[#allocation4 + $0xd0] sm:$0xff] %vm851_vm1, %v4030_v22  ;;  %v2462_v1 = vmul.f32 %v10071_v21, %v11656_v17  ;;  %4734 = vrot.lane.b32.xlu1 %v10166_v48, %s5721_s23  ;;  %v2298_v53 = vadd.f32 %v2266_v31, %v2232_v10  ;;  %v5626_v10 = vld [vmem:[%s5853_s2 + $0x18] sm:$0xff] }
 0x318   : > { %4319 = vst.msk [vmem:[#allocation4 + $0xd0] sm:$0xff] %vm4292_vm5, %v4249_v4  ;;  %v2496_v35 = vmul.f32 %v10236_v46, %v10081_v9  ;;  %v2562_v33 = vmul.f32 %v10240_v23, %v10089_v8  ;;  %v2657_v17 = vadd.f32 %v2625_v49, %v2427_v32  ;;  %v5000_v48 = vadd.f32 %v10048_v30, %v4999_v29  ;;  %v4857_v4 = vld [vmem:[#allocation4 + $0x90] sm:$0xff]  ;;  %v4751_v20 = vpop.permute.xlu1 %4750 }
 0x319   : > { %vm4595_vm10 = vcmp.ge.f32.partialorder %v3921_v15, 0.0  ;;  %v4627_v24 = vmul.f32 0.25, %v3921_v15  ;;  %4576 = vst.msk [vmem:[#allocation4 + $0xd0] sm:$0xff] %vm4549_vm2, %v10124_v40  ;;  %v2364_v18 = vadd.f32 %v2332_v60, %v2298_v53  ;;  %5264 = vmatmul.msk.f32.gmra.mxu3 %vm641_vm0, %v4857_v4  ;;  %v3750_v25 = vmul.f32 %v9794_v27, %v11664_v42  ;;  %v5627_v60 = vld [vmem:[#allocation3 + $0x98] sm:$0xff]  ;;  %v10265_v27 = vld [vmem:[%s10804_s5 + $0x1] ss:$0 sm:$0xff] }
 0x31a   : > { %v2528_v38 = vadd.f32 %v2496_v35, %v2462_v1  ;;  %4833 = vst.msk [vmem:[#allocation4 + $0xd0] sm:$0xff] %vm4806_vm14, %v4763_v50  ;;  %v2693_v14 = vadd.f32 %v10155_v52, %v2657_v17  ;;  %v5089_v40 = vadd.f32 %v5626_v10, %v5000_v48  ;;  %v3786_v49 = vmul.f32 %v10114_v57, %v9802_v0  ;;  %v5629_v42 = vld [vmem:[#allocation2 + $0xe0] sm:$0xff]  ;;  %v5637_v10 = vld [vmem:[#allocation2 + $0xef] sm:$0xff] }
 0x31b   : > { %v10254_v56 = vsel %vm4595_vm10, %v3921_v15, %v4627_v24  ;;  %4827 = vst.msk [vmem:[#allocation4 + $0xa0] sm:$0xff] %vm4806_vm14, %v4751_v20  ;;  %v2396_v22 = vmul.f32 %v2364_v18, %v11628_v16  ;;  %v3854_v29 = vmul.f32 %v5627_v60, %v9813_v26  ;;  %v1021_v50 = vmul.f32 %v5629_v42, %v10265_v27  ;;  %v10273_v57 = vld [vmem:[%s10804_s5 + $0x4] ss:$0 sm:$0xff]  ;;  %v5631_v15 = vld [vmem:[#allocation2 + $0xf0] sm:$0xff]  ;;  %v10280_v35 = vld [vmem:[%s10804_s5 + $0x7] ss:$0 sm:$0xff] }
 0x31c   : > { %v2594_v31 = vadd.f32 %v2562_v33, %v2528_v38  ;;  %vm4081_vm11 = vcmp.ge.f32.partialorder %v2693_v14, 0.0  ;;  %v4113_v32 = vmul.f32 0.25, %v2693_v14  ;;  %5121 = vst.msk [vmem:[%s10107_s25 + $0x18] sm:$0xff] %vm641_vm0, %v5089_v40  ;;  %v3818_v0 = vadd.f32 %v3786_v49, %v3750_v25  ;;  %v5633_v33 = vld [vmem:[#allocation2 + $0x100] sm:$0xff]  ;;  %v10289_v18 = vpop.permute.xlu0 %4250  ;;  %v4858_v49 = vld [vmem:[#allocation4 + $0x98] sm:$0xff] }
 0x31d   : > { %v1057_v26 = vmul.f32 %v5631_v15, %v10273_v57  ;;  %v2428_v1 = vadd.f32 %v2396_v22, %v2198_v34  ;;  %v1125_v17 = vmul.f32 %v5633_v33, %v10280_v35  ;;  %v10286_v24 = vld [vmem:[%s10804_s5] ss:$0 sm:$0xff]  ;;  %v10295_v20 = vld [vmem:[%s10804_s5 + $0x3] ss:$0 sm:$0xff]  ;;  %v10321_v33 = vld [vmem:[%s10804_s5 + $0x8] ss:$0 sm:$0xff] }
 0x31e   : > { %v2626_v53 = vmul.f32 %v2594_v31, %v11629_v5  ;;  %v5635_v48 = vld [vmem:[#allocation2 + $0xdf] sm:$0xff]  ;;  %v4145_v34 = vsel %vm4081_vm11, %v2693_v14, %v4113_v32  ;;  %v3886_v38 = vadd.f32 %v3854_v29, %v3818_v0  ;;  %v1259_v40 = vmul.f32 %v5637_v10, %v10295_v20  ;;  %v5643_v0 = vld [vmem:[#allocation2 + $0xf1] sm:$0xff] }
 0x31f   : > { %v1223_v4 = vmul.f32 %v5635_v48, %v10286_v24  ;;  %v1089_v25 = vadd.f32 %v1057_v26, %v1021_v50  ;;  %4222 = vrot.lane.b32.xlu1 %v4145_v34, %s5719_s27  ;;  %v10302_v31 = vld [vmem:[%s10804_s5 + $0x6] ss:$0 sm:$0xff]  ;;  %v10308_v29 = vld [vmem:[%s10804_s5 + $0x2] ss:$0 sm:$0xff]  ;;  %v10314_v32 = vld [vmem:[%s10804_s5 + $0x5] ss:$0 sm:$0xff] }
 0x320   : > { %v2658_v22 = vadd.f32 %v2626_v53, %v2428_v1  ;;  %v5639_v14 = vld [vmem:[#allocation2 + $0xff] sm:$0xff]  ;;  %v1685_v15 = vmul.f32 %v5643_v0, %v10314_v32  ;;  %v3922_v26 = vadd.f32 %v9844_v41, %v3886_v38  ;;  %v2101_v41 = vmul.f32 %v10021_v63, %v9924_v39 }
 0x321   : > { %v1327_v60 = vmul.f32 %v5639_v14, %v10302_v31  ;;  %v5641_v42 = vld [vmem:[#allocation2 + $0xe1] sm:$0xff]  ;;  %v1157_v1 = vadd.f32 %v1125_v17, %v1089_v25  ;;  %v1291_v53 = vadd.f32 %v1259_v40, %v1223_v4  ;;  %5265 = vmatmul.msk.f32.gmra.mxu3 %vm641_vm0, %v4858_v49  ;;  %v10330_v17 = vpop.permute.xlu2 %4475  ;;  %v2167_v25 = vmul.f32 %v10030_v51, %v9930_v58  ;;  %v11671_v49 = vld [vmem:[#allocation75_spill] sm:$0xff]  ;;  %v10344_v51 = vpop.permute.xlu1 %4212 }
 0x322   : > { %v1649_v50 = vmul.f32 %v5641_v42, %v10308_v29  ;;  %v5645_v48 = vld [vmem:[#allocation2 + $0x101] sm:$0xff]  ;;  %v2694_v10 = vadd.f32 %v10155_v52, %v2658_v22  ;;  %v2067_v42 = vmul.f32 %v10162_v47, %v10008_v6  ;;  %vm4596_vm12 = vcmp.ge.f32.partialorder %v3922_v26, 0.0 }
 0x323   : > { %v1753_v34 = vmul.f32 %v5645_v48, %v10321_v33  ;;  %v4628_v4 = vmul.f32 0.25, %v3922_v26  ;;  %v1359_v38 = vadd.f32 %v1327_v60, %v1291_v53  ;;  %v2233_v6 = vmul.f32 %v10037_v13, %v9885_v61  ;;  %v11672_v48 = vld [vmem:[#allocation102_spill] sm:$0xff]  ;;  %v11673_v13 = vld [vmem:[#allocation13_spill] sm:$0xff] }
 0x324   : > { %v1717_v14 = vadd.f32 %v1685_v15, %v1649_v50  ;;  %vm4082_vm13 = vcmp.ge.f32.partialorder %v2694_v10, 0.0  ;;  %v4114_v40 = vmul.f32 0.25, %v2694_v10  ;;  %v2133_v50 = vadd.f32 %v2101_v41, %v2067_v42  ;;  %v10361_v41 = vld [vmem:[#allocation2 + $0x68] sm:$0xff]  ;;  %v10395_v5 = vld [vmem:[#allocation2 + $0x60] sm:$0xff] }
 0x325   : > { %v10334_v0 = vsel %vm4596_vm12, %v3922_v26, %v4628_v4  ;;  %v1551_v15 = vmul.f32 %v11671_v49, %v1359_v38  ;;  %v2267_v39 = vmul.f32 %v10057_v12, %v9942_v36  ;;  %v2333_v58 = vmul.f32 %v10064_v2, %v9946_v54  ;;  %v4859_v36 = vld [vmem:[#allocation4 + $0xa0] sm:$0xff]  ;;  %v5646_v54 = vld [vmem:[#allocation2 + $0x48] sm:$0xff]  ;;  %v10366_v38 = vld [vmem:[#allocation2 + $0x57] sm:$0xff] }
 0x326   : > { %v1785_v22 = vadd.f32 %v1753_v34, %v1717_v14  ;;  %v4146_v63 = vsel %vm4082_vm13, %v2694_v10, %v4114_v40  ;;  %v2199_v53 = vadd.f32 %v2167_v25, %v2133_v50  ;;  %v10346_v34 = vpop.permute.xlu0 %4764  ;;  %v2463_v42 = vmul.f32 %v10071_v21, %v9895_v7  ;;  %v10357_v10 = vld [vmem:[#allocation2 + $0x58] sm:$0xff]  ;;  %v10370_v40 = vld [vmem:[#allocation2 + $0x67] sm:$0xff] }
 0x327   : > { %v1583_v26 = vadd.f32 %v1551_v15, %v1157_v1  ;;  %v2299_v14 = vadd.f32 %v2267_v39, %v2233_v6  ;;  %v2497_v61 = vmul.f32 %v10081_v9, %v9955_v45  ;;  %4736 = vrot.lane.b32.xlu1 %v10254_v56, %s5721_s23  ;;  %v2563_v12 = vmul.f32 %v10089_v8, %v11673_v13  ;;  %v5649_v56 = vld [vmem:[#allocation2 + $0x47] sm:$0xff]  ;;  %v10379_v15 = vld [vmem:[%s10805_s6] ss:$0 sm:$0xff]  ;;  %v11674_v39 = vld [vmem:[#allocation39_spill] sm:$0xff] }
 0x328   : > { %v1977_v60 = vmul.f32 %v11672_v48, %v1785_v22  ;;  %v1002_v2 = vmul.f32 %v5646_v54, %v10265_v27  ;;  %v1038_v1 = vmul.f32 %v10357_v10, %v10273_v57  ;;  %v1106_v7 = vmul.f32 %v10361_v41, %v10280_v35  ;;  %v5652_v50 = vld [vmem:[#allocation2 + $0x49] sm:$0xff]  ;;  %v11675_v13 = vld [vmem:[#allocation48_spill] sm:$0xff] }
 0x329   : > { %v2365_v21 = vadd.f32 %v2333_v58, %v2299_v14  ;;  %v2529_v9 = vadd.f32 %v2497_v61, %v2463_v42  ;;  %v1204_v4 = vmul.f32 %v5649_v56, %v10286_v24  ;;  %v1240_v25 = vmul.f32 %v10366_v38, %v10295_v20  ;;  %5266 = vmatmul.msk.f32.gmra.mxu3 %vm641_vm0, %v4859_v36  ;;  %v10383_v58 = vld [vmem:[#allocation2 + $0x59] sm:$0xff]  ;;  %v10387_v61 = vld [vmem:[#allocation2 + $0x69] sm:$0xff] }
 0x32a   : > { %v2009_v45 = vadd.f32 %v1977_v60, %v1583_v26  ;;  %v1070_v8 = vadd.f32 %v1038_v1, %v1002_v2  ;;  %v1308_v22 = vmul.f32 %v10370_v40, %v10302_v31  ;;  %v1630_v49 = vmul.f32 %v5652_v50, %v10308_v29  ;;  %v4510_v2 = vpop.permute.xlu2 %4509 }
 0x32b   : > { %v2397_v48 = vmul.f32 %v2365_v21, %v11674_v39  ;;  %v2595_v60 = vadd.f32 %v2563_v12, %v2529_v9  ;;  %v1666_v26 = vmul.f32 %v10383_v58, %v10314_v32  ;;  %v1272_v42 = vadd.f32 %v1240_v25, %v1204_v4  ;;  %v11676_v12 = vld [vmem:[#allocation15_spill] sm:$0xff] }
 0x32c   : > { %v2045_v6 = vadd.f32 %v10379_v15, %v2009_v45  ;;  %v1138_v14 = vadd.f32 %v1106_v7, %v1070_v8  ;;  %v1734_v36 = vmul.f32 %v10387_v61, %v10321_v33  ;;  %v2046_v54 = vadd.f32 %v10379_v15, %v11675_v13  ;;  %v5656_v25 = vld [vmem:[#allocation2 + $0x50] sm:$0xff] }
 0x32d   : > { %v2429_v45 = vadd.f32 %v2397_v48, %v2199_v53  ;;  %v2627_v21 = vmul.f32 %v2595_v60, %v11676_v12  ;;  %v1340_v9 = vadd.f32 %v1308_v22, %v1272_v42  ;;  %v1698_v56 = vadd.f32 %v1666_v26, %v1630_v49  ;;  %v11677_v53 = vld [vmem:[#allocation7_spill] sm:$0xff]  ;;  %v10402_v48 = vpop.permute.xlu1 %4726  ;;  %v4860_v26 = vld [vmem:[#allocation4 + $0xa8] sm:$0xff] }
 0x32e   : > { %vm3967_vm15 = vcmp.ge.f32.partialorder %v2045_v6, 0.0  ;;  %v3999_v1 = vmul.f32 0.25, %v2045_v6  ;;  %vm3968_vm3 = vcmp.ge.f32.partialorder %v2046_v54, 0.0  ;;  %v4000_v50 = vmul.f32 0.25, %v2046_v54  ;;  %v4253_v7 = vpop.permute.xlu0 %4252 }
 0x32f   : > { %v2659_v8 = vadd.f32 %v2627_v21, %v2429_v45  ;;  %v1003_v39 = vmul.f32 %v5656_v25, %v10265_v27  ;;  %v1039_v13 = vmul.f32 %v10395_v5, %v10273_v57  ;;  %4224 = vrot.lane.b32.xlu1 %v4146_v63, %s5719_s27  ;;  %v1532_v22 = vmul.f32 %v11677_v53, %v1340_v9  ;;  %v5658_v45 = vld [vmem:[#allocation2 + $0x4f] sm:$0xff]  ;;  %v11678_v21 = vld [vmem:[#allocation69_spill] sm:$0xff] }
 0x330   : > { %v4031_v4 = vsel %vm3967_vm15, %v2045_v6, %v3999_v1  ;;  %v1766_v49 = vadd.f32 %v1734_v36, %v1698_v56  ;;  %v4032_v60 = vsel %vm3968_vm3, %v2046_v54, %v4000_v50  ;;  %v1107_v1 = vmul.f32 %v10280_v35, %v10141_v62  ;;  %v10414_v54 = vld [vmem:[#allocation2 + $0x5f] sm:$0xff]  ;;  %v10420_v50 = vld [vmem:[#allocation2 + $0x6f] sm:$0xff] }
 0x331   : > { %4063 = vst.msk [vmem:[#allocation4 + $0xd8] sm:$0xff] %vm851_vm1, %v4031_v4  ;;  %v2695_v6 = vadd.f32 %v10155_v52, %v2659_v8  ;;  %v1071_v42 = vadd.f32 %v1039_v13, %v1003_v39  ;;  %v1205_v63 = vmul.f32 %v5658_v45, %v10286_v24  ;;  %v1564_v36 = vadd.f32 %v1532_v22, %v1138_v14  ;;  %v5661_v8 = vld [vmem:[#allocation2 + $0x51] sm:$0xff]  ;;  %v10426_v13 = vld [vmem:[#allocation2 + $0x61] sm:$0xff] }
 0x332   : > { %4320 = vst.msk [vmem:[#allocation4 + $0xd8] sm:$0xff] %vm4292_vm5, %v10289_v18  ;;  %v1958_v9 = vmul.f32 %v11678_v21, %v1766_v49  ;;  %5267 = vmatmul.msk.f32.gmra.mxu3 %vm641_vm0, %v4860_v26  ;;  %v1241_v52 = vmul.f32 %v10414_v54, %v10295_v20  ;;  %v5002_v18 = vpop.f32.mrf.mxu1  ;;  %v1631_v25 = vmul.f32 %v5661_v8, %v10308_v29  ;;  %v10433_v22 = vld [vmem:[#allocation2 + $0x71] sm:$0xff] }
 0x333   : > { %4577 = vst.msk [vmem:[#allocation4 + $0xd8] sm:$0xff] %vm4549_vm2, %v10244_v3  ;;  %vm4083_vm4 = vcmp.ge.f32.partialorder %v2695_v6, 0.0  ;;  %v4115_v39 = vmul.f32 0.25, %v2695_v6  ;;  %v1139_v56 = vadd.f32 %v1107_v1, %v1071_v42  ;;  %v1309_v3 = vmul.f32 %v10420_v50, %v10302_v31  ;;  %v11679_v26 = vld [vmem:[#allocation16_spill] sm:$0xff] }
 0x334   : > { %4834 = vst.msk [vmem:[#allocation4 + $0xd8] sm:$0xff] %vm4806_vm14, %v10346_v34  ;;  %v1990_v14 = vadd.f32 %v1958_v9, %v1564_v36  ;;  %v1273_v4 = vadd.f32 %v1241_v52, %v1205_v63  ;;  %v1667_v53 = vmul.f32 %v10426_v13, %v10314_v32  ;;  %v1735_v49 = vmul.f32 %v10433_v22, %v10321_v33  ;;  %v5664_v36 = vld [vmem:[%s5853_s2 + $0x20] sm:$0xff] }
 0x335   : > { %4064 = vst.msk [vmem:[#allocation4 + $0xe0] sm:$0xff] %vm851_vm1, %v4032_v60  ;;  %v10430_v34 = vsel %vm4083_vm4, %v2695_v6, %v4115_v39  ;;  %v5003_v60 = vadd.f32 %v10048_v30, %v5002_v18  ;;  %v2047_v42 = vadd.f32 %v10379_v15, %v11679_v26  ;;  %v1004_v6 = vmul.f32 %v10357_v10, %v10265_v27  ;;  %v11681_v18 = vld [vmem:[#allocation22_spill] sm:$0xff]  ;;  %v4861_v10 = vld [vmem:[#allocation4 + $0xb0] sm:$0xff]  ;;  %v11682_v26 = vld [vmem:[#allocation40_spill] sm:$0xff] }
 0x336   : > { %4321 = vst.msk [vmem:[#allocation4 + $0xe0] sm:$0xff] %vm4292_vm5, %v4253_v7  ;;  %v2026_v1 = vadd.f32 %v10379_v15, %v1990_v14  ;;  %v1341_v45 = vadd.f32 %v1309_v3, %v1273_v4  ;;  %v1699_v63 = vadd.f32 %v1667_v53, %v1631_v25  ;;  %v10444_v7 = vpop.permute.xlu2 %4477  ;;  %v1040_v52 = vmul.f32 %v10361_v41, %v10273_v57  ;;  %v4767_v14 = vpop.permute.xlu0 %4766 }
 0x337   : > { %4578 = vst.msk [vmem:[#allocation4 + $0xe0] sm:$0xff] %vm4549_vm2, %v4510_v2  ;;  %v5090_v21 = vadd.f32 %v5664_v36, %v5003_v60  ;;  %vm3969_vm6 = vcmp.ge.f32.partialorder %v2047_v42, 0.0  ;;  %v4001_v9 = vmul.f32 0.25, %v2047_v42  ;;  %4738 = vrot.lane.b32.xlu1 %v10334_v0, %s5721_s23  ;;  %v1108_v25 = vmul.f32 %v10280_v35, %v10023_v28 }
 0x338   : > { %11680 = vst [vmem:[#allocation24_spill] sm:$0xff] %v10444_v7  ;;  %vm3948_vm7 = vcmp.ge.f32.partialorder %v2026_v1, 0.0  ;;  %v3980_v2 = vmul.f32 0.25, %v2026_v1  ;;  %v1533_v39 = vmul.f32 %v11681_v18, %v1341_v45  ;;  %v1767_v3 = vadd.f32 %v1735_v49, %v1699_v63  ;;  %v10464_v45 = vld [vmem:[#allocation2 + $0x77] sm:$0xff] }
 0x339   : > { %4835 = vst.msk [vmem:[#allocation4 + $0xe0] sm:$0xff] %vm4806_vm14, %v4767_v14  ;;  %v4033_v4 = vsel %vm3969_vm6, %v2047_v42, %v4001_v9  ;;  %v1072_v8 = vadd.f32 %v1040_v52, %v1004_v6  ;;  %v1206_v53 = vmul.f32 %v10366_v38, %v10286_v24  ;;  %v1242_v42 = vmul.f32 %v10370_v40, %v10295_v20  ;;  %v10474_v6 = vld [vmem:[#allocation2 + $0x79] sm:$0xff]  ;;  %v11684_v14 = vld [vmem:[#allocation58_spill] sm:$0xff] }
 0x33a   : > { %v4012_v60 = vsel %vm3948_vm7, %v2026_v1, %v3980_v2  ;;  %v1565_v0 = vadd.f32 %v1533_v39, %v1139_v56  ;;  %v1959_v36 = vmul.f32 %v11682_v26, %v1767_v3  ;;  %v4215_v7 = vpop.permute.xlu1 %4214  ;;  %5268 = vmatmul.msk.f32.gmra.mxu3 %vm641_vm0, %v4861_v10  ;;  %5122 = vst.msk [vmem:[%s10107_s25 + $0x20] sm:$0xff] %vm641_vm0, %v5090_v21  ;;  %v5667_v9 = vld [vmem:[#allocation2 + $0xf8] sm:$0xff]  ;;  %v11683_v2 = vld [vmem:[#allocation82_spill] sm:$0xff] }
 0x33b   : > { %4044 = vst.msk [vmem:[#allocation4 + $0x40] sm:$0xff] %vm851_vm1, %v4012_v60  ;;  %v1140_v49 = vadd.f32 %v1108_v25, %v1072_v8  ;;  %v1310_v38 = vmul.f32 %v10464_v45, %v10302_v31  ;;  %v1632_v56 = vmul.f32 %v10383_v58, %v10308_v29  ;;  %v1668_v63 = vmul.f32 %v10387_v61, %v10314_v32  ;;  %v5668_v58 = vld [vmem:[#allocation2 + $0x108] sm:$0xff]  ;;  %v11685_v60 = vld [vmem:[#allocation17_spill] sm:$0xff]  ;;  %v5670_v26 = vld [vmem:[#allocation2 + $0x117] sm:$0xff] }
 0x33c   : > { %4301 = vst.msk [vmem:[#allocation4 + $0x40] sm:$0xff] %vm4292_vm5, %v10344_v51  ;;  %v1991_v1 = vadd.f32 %v1959_v36, %v1565_v0  ;;  %v1736_v21 = vmul.f32 %v10474_v6, %v10321_v33  ;;  %v1024_v52 = vmul.f32 %v5667_v9, %v10265_v27  ;;  %v1274_v18 = vadd.f32 %v1242_v42, %v1206_v53  ;;  %v5669_v51 = vld [vmem:[#allocation2 + $0x118] sm:$0xff] }
 0x33d   : > { %4558 = vst.msk [vmem:[#allocation4 + $0x40] sm:$0xff] %vm4549_vm2, %v11683_v2  ;;  %v1060_v39 = vmul.f32 %v5668_v58, %v10273_v57  ;;  %v1128_v3 = vmul.f32 %v5669_v51, %v10280_v35  ;;  %v1226_v10 = vmul.f32 %v10286_v24, %v11684_v14  ;;  %v1700_v25 = vadd.f32 %v1668_v63, %v1632_v56  ;;  %v11686_v9 = vld [vmem:[#allocation28_spill] sm:$0xff] }
 0x33e   : > { %4815 = vst.msk [vmem:[#allocation4 + $0x40] sm:$0xff] %vm4806_vm14, %v10402_v48  ;;  %v2027_v8 = vadd.f32 %v10379_v15, %v1991_v1  ;;  %v1262_v0 = vmul.f32 %v10295_v20, %v11685_v60  ;;  %v1330_v53 = vmul.f32 %v5670_v26, %v10302_v31  ;;  %v1342_v36 = vadd.f32 %v1310_v38, %v1274_v18  ;;  %v5671_v58 = vld [vmem:[#allocation2 + $0x119] sm:$0xff]  ;;  %v4255_v56 = vpop.permute.xlu0 %4254  ;;  %v4512_v14 = vpop.permute.xlu2 %4511 }
 0x33f   : > { %4065 = vst.msk [vmem:[#allocation4 + $0xe8] sm:$0xff] %vm851_vm1, %v4033_v4  ;;  %v1092_v42 = vadd.f32 %v1060_v39, %v1024_v52  ;;  %v1652_v2 = vmul.f32 %v10308_v29, %v11686_v9  ;;  %v1756_v51 = vmul.f32 %v5671_v58, %v10321_v33  ;;  %4226 = vrot.lane.b32.xlu1 %v10430_v34, %s5719_s27  ;;  %v4862_v4 = vld [vmem:[#allocation4 + $0xb8] sm:$0xff]  ;;  %v11687_v38 = vld [vmem:[#allocation21_spill] sm:$0xff]  ;;  %v11688_v39 = vld [vmem:[#allocation83_spill] sm:$0xff] }
 0x340   : > { %vm3949_vm8 = vcmp.ge.f32.partialorder %v2027_v8, 0.0  ;;  %v3981_v48 = vmul.f32 0.25, %v2027_v8  ;;  %v1768_v1 = vadd.f32 %v1736_v21, %v1700_v25  ;;  %v1294_v63 = vadd.f32 %v1262_v0, %v1226_v10  ;;  %4322 = vst.msk [vmem:[#allocation4 + $0xe8] sm:$0xff] %vm4292_vm5, %v4255_v56  ;;  %v11689_v34 = vld [vmem:[#allocation66_spill] sm:$0xff] }
 0x341   : > { %v1534_v52 = vmul.f32 %v11687_v38, %v1342_v36  ;;  %v1160_v18 = vadd.f32 %v1128_v3, %v1092_v42  ;;  %v1720_v60 = vadd.f32 %v11688_v39, %v1652_v2  ;;  %v1005_v26 = vmul.f32 %v10395_v5, %v10265_v27  ;;  %4579 = vst.msk [vmem:[#allocation4 + $0xe8] sm:$0xff] %vm4549_vm2, %v4512_v14  ;;  %v11690_v5 = vld [vmem:[#allocation30_spill] sm:$0xff] }
 0x342   : > { %v4013_v9 = vsel %vm3949_vm8, %v2027_v8, %v3981_v48  ;;  %5269 = vmatmul.msk.f32.gmra.mxu3 %vm641_vm0, %v4862_v4  ;;  %v1960_v21 = vmul.f32 %v11689_v34, %v1768_v1  ;;  %v1362_v10 = vadd.f32 %v1330_v53, %v1294_v63  ;;  %v4729_v25 = vpop.permute.xlu1 %4728  ;;  %v1041_v3 = vmul.f32 %v10273_v57, %v10141_v62  ;;  %v5005_v42 = vpop.f32.mrf.mxu1  ;;  %v11691_v48 = vld [vmem:[#allocation80_spill] sm:$0xff]  ;;  %v11692_v1 = vld [vmem:[#allocation62_spill] sm:$0xff] }
 0x343   : > { %4045 = vst.msk [vmem:[#allocation4 + $0x48] sm:$0xff] %vm851_vm1, %v4013_v9  ;;  %v1566_v0 = vadd.f32 %v1534_v52, %v1140_v49  ;;  %v1788_v58 = vadd.f32 %v1756_v51, %v1720_v60  ;;  %v1109_v36 = vmul.f32 %v10280_v35, %v10162_v47  ;;  %v1207_v2 = vmul.f32 %v10414_v54, %v10286_v24  ;;  %v10516_v49 = vld [vmem:[#allocation2 + $0x7f] sm:$0xff]  ;;  %v5673_v60 = vld [vmem:[%s5853_s2 + $0x28] sm:$0xff] }
 0x344   : > { %4302 = vst.msk [vmem:[#allocation4 + $0x48] sm:$0xff] %vm4292_vm5, %v4215_v7  ;;  %v1554_v8 = vmul.f32 %v11690_v5, %v1362_v10  ;;  %v1243_v53 = vmul.f32 %v10420_v50, %v10295_v20  ;;  %v1311_v51 = vmul.f32 %v10516_v49, %v10302_v31  ;;  %v5006_v14 = vadd.f32 %v10048_v30, %v5005_v42 }
 0x345   : > { %4559 = vst.msk [vmem:[#allocation4 + $0x48] sm:$0xff] %vm4549_vm2, %v11691_v48  ;;  %v4847_v56 = vld [vmem:[#allocation4 + $0x40] sm:$0xff]  ;;  %v1992_v7 = vadd.f32 %v1960_v21, %v1566_v0  ;;  %v1980_v63 = vmul.f32 %v11692_v1, %v1788_v58  ;;  %v1073_v4 = vadd.f32 %v1041_v3, %v1005_v26  ;;  %v1633_v52 = vmul.f32 %v10426_v13, %v10308_v29 }
 0x346   : > { %5254 = vmatmul.msk.f32.gmra.mxu1 %vm641_vm0, %v4847_v56  ;;  %4816 = vst.msk [vmem:[#allocation4 + $0x48] sm:$0xff] %vm4806_vm14, %v4729_v25  ;;  %v1586_v54 = vadd.f32 %v1554_v8, %v1160_v18  ;;  %v1275_v38 = vadd.f32 %v1243_v53, %v1207_v2  ;;  %v5091_v9 = vadd.f32 %v5673_v60, %v5006_v14  ;;  %v10532_v0 = vld [vmem:[#allocation2 + $0x81] sm:$0xff]  ;;  %v11693_v8 = vld [vmem:[#allocation8_spill] sm:$0xff]  ;;  %v11694_v14 = vld [vmem:[#allocation91_spill] sm:$0xff] }
 0x347   : > { %v2028_v39 = vadd.f32 %v10379_v15, %v1992_v7  ;;  %v1141_v34 = vadd.f32 %v1109_v36, %v1073_v4  ;;  %v1669_v21 = vmul.f32 %v10433_v22, %v10314_v32  ;;  %v1737_v18 = vmul.f32 %v10532_v0, %v10321_v33  ;;  %v4863_v58 = vld [vmem:[#allocation4 + $0xc0] sm:$0xff] }
 0x348   : > { %v2012_v10 = vadd.f32 %v1980_v63, %v1586_v54  ;;  %v1343_v26 = vadd.f32 %v1311_v51, %v1275_v38  ;;  %v1006_v25 = vmul.f32 %v10361_v41, %v10265_v27  ;;  %5123 = vst.msk [vmem:[%s10107_s25 + $0x28] sm:$0xff] %vm641_vm0, %v5091_v9  ;;  %v1042_v36 = vmul.f32 %v10273_v57, %v10023_v28 }
 0x349   : > { %vm3950_vm9 = vcmp.ge.f32.partialorder %v2028_v39, 0.0  ;;  %v3982_v13 = vmul.f32 0.25, %v2028_v39  ;;  %v1701_v3 = vadd.f32 %v1669_v21, %v1633_v52  ;;  %v1110_v2 = vmul.f32 %v10280_v35, %v10204_v59 }
 0x34a   : > { %5270 = vmatmul.msk.f32.gmra.mxu3 %vm641_vm0, %v4863_v58  ;;  %v2048_v5 = vadd.f32 %v10379_v15, %v2012_v10  ;;  %v1535_v42 = vmul.f32 %v11693_v8, %v1343_v26  ;;  %v1208_v41 = vmul.f32 %v10370_v40, %v10286_v24  ;;  %v1074_v48 = vadd.f32 %v1042_v36, %v1006_v25  ;;  %v11695_v10 = vld [vmem:[#allocation55_spill] sm:$0xff] }
 0x34b   : > { %v4014_v53 = vsel %vm3950_vm9, %v2028_v39, %v3982_v13  ;;  %v1769_v51 = vadd.f32 %v1737_v18, %v1701_v3  ;;  %v1244_v56 = vmul.f32 %v10464_v45, %v10295_v20  ;;  %v1312_v1 = vmul.f32 %v10302_v31, %v10221_v55  ;;  %v10570_v58 = vld [vmem:[#allocation2 + $0x90] sm:$0xff] }
 0x34c   : > { %4046 = vst.msk [vmem:[#allocation4 + $0x50] sm:$0xff] %vm851_vm1, %v4014_v53  ;;  %vm3970_vm10 = vcmp.ge.f32.partialorder %v2048_v5, 0.0  ;;  %v4002_v28 = vmul.f32 0.25, %v2048_v5  ;;  %v1567_v7 = vadd.f32 %v1535_v42, %v1141_v34  ;;  %v1142_v54 = vadd.f32 %v1110_v2, %v1074_v48  ;;  %v11696_v2 = vld [vmem:[#allocation32_spill] sm:$0xff]  ;;  %v10584_v48 = vpop.permute.xlu2 %4479 }
 0x34d   : > { %v4848_v63 = vld [vmem:[#allocation4 + $0x48] sm:$0xff]  ;;  %v1961_v4 = vmul.f32 %v11694_v14, %v1769_v51  ;;  %v1276_v38 = vadd.f32 %v1244_v56, %v1208_v41  ;;  %v1634_v40 = vmul.f32 %v10387_v61, %v10308_v29  ;;  %v1670_v39 = vmul.f32 %v10474_v6, %v10314_v32  ;;  %v4769_v34 = vpop.permute.xlu0 %4768 }
 0x34e   : > { %5255 = vmatmul.msk.f32.gmra.mxu1 %vm641_vm0, %v4848_v63  ;;  %v4034_v52 = vsel %vm3970_vm10, %v2048_v5, %v4002_v28  ;;  %v1738_v60 = vmul.f32 %v10321_v33, %v10236_v46  ;;  %v1007_v9 = vmul.f32 %v10265_v27, %v10141_v62  ;;  %v2049_v26 = vadd.f32 %v10379_v15, %v11695_v10  ;;  %v4217_v25 = vpop.permute.xlu1 %4216  ;;  %v4864_v5 = vld [vmem:[#allocation4 + $0xc8] sm:$0xff] }
 0x34f   : > { %4066 = vst.msk [vmem:[#allocation4 + $0xf0] sm:$0xff] %vm851_vm1, %v4034_v52  ;;  %v1993_v21 = vadd.f32 %v1961_v4, %v1567_v7  ;;  %v1344_v61 = vadd.f32 %v1312_v1, %v1276_v38  ;;  %v1043_v18 = vmul.f32 %v10273_v57, %v10162_v47  ;;  %v1702_v13 = vadd.f32 %v1670_v39, %v1634_v40  ;;  %v11697_v1 = vld [vmem:[#allocation45_spill] sm:$0xff]  ;;  %v10588_v14 = vld [vmem:[#allocation2 + $0x8f] sm:$0xff] }
 0x350   : > { %4836 = vst.msk [vmem:[#allocation4 + $0xe8] sm:$0xff] %vm4806_vm14, %v4769_v34  ;;  %v1111_v62 = vmul.f32 %v10570_v58, %v10280_v35  ;;  %v1209_v3 = vmul.f32 %v10420_v50, %v10286_v24  ;;  %v1245_v36 = vmul.f32 %v10516_v49, %v10295_v20  ;;  %vm3971_vm11 = vcmp.ge.f32.partialorder %v2049_v26, 0.0  ;;  %v10596_v52 = vld [vmem:[#allocation2 + $0x91] sm:$0xff] }
 0x351   : > { %4303 = vst.msk [vmem:[#allocation4 + $0x50] sm:$0xff] %vm4292_vm5, %v4217_v25  ;;  %v2029_v8 = vadd.f32 %v10379_v15, %v1993_v21  ;;  %v4003_v42 = vmul.f32 0.25, %v2049_v26  ;;  %v1536_v41 = vmul.f32 %v11696_v2, %v1344_v61  ;;  %v1770_v53 = vadd.f32 %v1738_v60, %v1702_v13 }
 0x352   : > { %4560 = vst.msk [vmem:[#allocation4 + $0x50] sm:$0xff] %vm4549_vm2, %v10176_v44  ;;  %5271 = vmatmul.msk.f32.gmra.mxu3 %vm641_vm0, %v4864_v5  ;;  %v1075_v51 = vadd.f32 %v1043_v18, %v1007_v9  ;;  %v1277_v50 = vadd.f32 %v1245_v36, %v1209_v3  ;;  %v1313_v44 = vmul.f32 %v10588_v14, %v10302_v31 }
 0x353   : > { %vm3951_vm12 = vcmp.ge.f32.partialorder %v2029_v8, 0.0  ;;  %v3983_v56 = vmul.f32 0.25, %v2029_v8  ;;  %v4035_v28 = vsel %vm3971_vm11, %v2049_v26, %v4003_v42  ;;  %v1568_v7 = vadd.f32 %v1536_v41, %v1142_v54  ;;  %v4865_v26 = vld [vmem:[#allocation4 + $0xd0] sm:$0xff]  ;;  %v4866_v41 = vld [vmem:[#allocation4 + $0xd8] sm:$0xff] }
 0x354   : > { %4067 = vst.msk [vmem:[#allocation4 + $0xf8] sm:$0xff] %vm851_vm1, %v4035_v28  ;;  %v1962_v63 = vmul.f32 %v11697_v1, %v1770_v53  ;;  %v1635_v4 = vmul.f32 %v10433_v22, %v10308_v29  ;;  %v1671_v40 = vmul.f32 %v10532_v0, %v10314_v32  ;;  %v1739_v39 = vmul.f32 %v10596_v52, %v10321_v33  ;;  %v5678_v53 = vld [vmem:[%s5853_s2 + $0x30] sm:$0xff] }
 0x355   : > { %v4015_v38 = vsel %vm3951_vm12, %v2029_v8, %v3983_v56  ;;  %v1143_v60 = vadd.f32 %v1111_v62, %v1075_v51  ;;  %v1345_v9 = vadd.f32 %v1313_v44, %v1277_v50  ;;  %v4514_v62 = vpop.permute.xlu2 %4513 }
 0x356   : > { %4047 = vst.msk [vmem:[#allocation4 + $0x58] sm:$0xff] %vm851_vm1, %v4015_v38  ;;  %v1994_v54 = vadd.f32 %v1962_v63, %v1568_v7  ;;  %v1703_v34 = vadd.f32 %v1671_v40, %v1635_v4  ;;  %v4731_v21 = vpop.permute.xlu1 %4730  ;;  %v4867_v7 = vld [vmem:[#allocation4 + $0xe0] sm:$0xff]  ;;  %v5679_v63 = vld [vmem:[#allocation2 + $0x78] sm:$0xff]  ;;  %v1044_v4 = vmul.f32 %v10273_v57, %v10204_v59 }
 0x357   : > { %v1537_v22 = vmul.f32 %v11669_v11, %v1345_v9  ;;  %4817 = vst.msk [vmem:[#allocation4 + $0x50] sm:$0xff] %vm4806_vm14, %v4731_v21  ;;  %v1008_v44 = vmul.f32 %v5679_v63, %v10265_v27  ;;  %v1112_v9 = vmul.f32 %v10280_v35, %v10208_v43  ;;  %v1636_v21 = vmul.f32 %v10474_v6, %v10308_v29 }
 0x358   : > { %v2030_v10 = vadd.f32 %v10379_v15, %v1994_v54  ;;  %v1771_v61 = vadd.f32 %v1739_v39, %v1703_v34  ;;  %v1210_v39 = vmul.f32 %v10464_v45, %v10286_v24  ;;  %v1246_v54 = vmul.f32 %v10295_v20, %v10221_v55 }
 0x359   : > { %v1569_v25 = vadd.f32 %v1537_v22, %v1143_v60  ;;  %v1076_v60 = vadd.f32 %v1044_v4, %v1008_v44  ;;  %v1314_v34 = vmul.f32 %v10302_v31, %v10225_v19  ;;  %v1009_v45 = vmul.f32 %v10265_v27, %v10162_v47  ;;  %v11700_v44 = vld [vmem:[#allocation24_spill] sm:$0xff] }
 0x35a   : > { %5272 = vmatmul.msk.f32.gmra.mxu3 %vm641_vm0, %v4865_v26  ;;  %vm3952_vm13 = vcmp.ge.f32.partialorder %v2030_v10, 0.0  ;;  %v3984_v18 = vmul.f32 0.25, %v2030_v10  ;;  %v1963_v13 = vmul.f32 %v11670_v37, %v1771_v61  ;;  %v5008_v5 = vpop.f32.mrf.mxu1  ;;  %v1278_v59 = vadd.f32 %v1246_v54, %v1210_v39 }
 0x35b   : > { %v5009_v2 = vadd.f32 %v10048_v30, %v5008_v5  ;;  %v1045_v55 = vmul.f32 %v10570_v58, %v10273_v57  ;;  %v1211_v22 = vmul.f32 %v10516_v49, %v10286_v24  ;;  %v1247_v43 = vmul.f32 %v10588_v14, %v10295_v20  ;;  %v5680_v24 = vld [vmem:[#allocation2 + $0x9f] sm:$0xff] }
 0x35c   : > { %v4016_v3 = vsel %vm3952_vm13, %v2030_v10, %v3984_v18  ;;  %v1995_v36 = vadd.f32 %v1963_v13, %v1569_v25  ;;  %v1672_v10 = vmul.f32 %v10314_v32, %v10236_v46  ;;  %v1346_v19 = vadd.f32 %v1314_v34, %v1278_v59  ;;  %v11698_v5 = vld [vmem:[#allocation73_spill] sm:$0xff]  ;;  %v5686_v34 = vld [vmem:[%s5853_s2 + $0x88] sm:$0xff] }
 0x35d   : > { %4048 = vst.msk [vmem:[#allocation4 + $0x60] sm:$0xff] %vm851_vm1, %v4016_v3  ;;  %v5092_v51 = vadd.f32 %v5678_v53, %v5009_v2  ;;  %v10617_v30 = vpop.permute.xlu2 %4481  ;;  %v1637_v6 = vmul.f32 %v10532_v0, %v10308_v29  ;;  %v1673_v46 = vmul.f32 %v10596_v52, %v10314_v32  ;;  %v1740_v47 = vmul.f32 %v10321_v33, %v10240_v23  ;;  %v5681_v29 = vld [vmem:[#allocation2 + $0xa1] sm:$0xff]  ;;  %v10664_v23 = vld [vmem:[%s10817_s18] ss:$0 sm:$0xff] }
 0x35e   : > { %v2031_v11 = vadd.f32 %v10379_v15, %v1995_v36  ;;  %v4849_v42 = vld [vmem:[#allocation4 + $0x50] sm:$0xff]  ;;  %v1704_v61 = vadd.f32 %v1672_v10, %v1636_v21  ;;  %v1077_v27 = vadd.f32 %v1045_v55, %v1009_v45  ;;  %v1279_v57 = vadd.f32 %v1247_v43, %v1211_v22  ;;  %v5684_v36 = vld [vmem:[%s5853_s2 + $0x38] sm:$0xff] }
 0x35f   : > { %v4257_v8 = vpop.permute.xlu0 %4256  ;;  %5256 = vmatmul.msk.f32.gmra.mxu1 %vm641_vm0, %v4849_v42  ;;  %5124 = vst.msk [vmem:[%s10107_s25 + $0x30] sm:$0xff] %vm641_vm0, %v5092_v51  ;;  %v1315_v49 = vmul.f32 %v5680_v24, %v10302_v31  ;;  %v1144_v58 = vadd.f32 %v1112_v9, %v1076_v60  ;;  %v1538_v14 = vmul.f32 %v11628_v16, %v1346_v19  ;;  %v5683_v31 = vld [vmem:[#allocation2 + $0xa0] sm:$0xff]  ;;  %v11699_v42 = vld [vmem:[#allocation39_spill] sm:$0xff] }
 0x360   : > { %4323 = vst.msk [vmem:[#allocation4 + $0xf0] sm:$0xff] %vm4292_vm5, %v4257_v8  ;;  %vm3953_vm15 = vcmp.ge.f32.partialorder %v2031_v11, 0.0  ;;  %v3985_v37 = vmul.f32 0.25, %v2031_v11  ;;  %v1705_v18 = vadd.f32 %v1673_v46, %v1637_v6  ;;  %v1741_v0 = vmul.f32 %v5681_v29, %v10321_v33  ;;  %v5687_v22 = vld [vmem:[%s5853_s2 + $0x90] sm:$0xff]  ;;  %v5688_v6 = vld [vmem:[%s5853_s2 + $0x98] sm:$0xff]  ;;  %v5689_v24 = vld [vmem:[%s5853_s2 + $0xa0] sm:$0xff] }
 0x361   : > { %4580 = vst.msk [vmem:[#allocation4 + $0xf0] sm:$0xff] %vm4549_vm2, %v4514_v62  ;;  %v1772_v25 = vadd.f32 %v1740_v47, %v1704_v61  ;;  %v1113_v13 = vmul.f32 %v5683_v31, %v10280_v35  ;;  %v1347_v3 = vadd.f32 %v1315_v49, %v1279_v57  ;;  %v1570_v16 = vadd.f32 %v1538_v14, %v1144_v58 }
 0x362   : > { %5273 = vmatmul.msk.f32.gmra.mxu3 %vm641_vm0, %v4866_v41  ;;  %v4017_v50 = vsel %vm3953_vm15, %v2031_v11, %v3985_v37  ;;  %v1773_v62 = vadd.f32 %v1741_v0, %v1705_v18  ;;  %v5690_v0 = vld [vmem:[%s5853_s2 + $0xa8] sm:$0xff] }
 0x363   : > { %4049 = vst.msk [vmem:[#allocation4 + $0x68] sm:$0xff] %vm851_vm1, %v4017_v50  ;;  %v1964_v11 = vmul.f32 %v11698_v5, %v1772_v25  ;;  %v1145_v8 = vadd.f32 %v1113_v13, %v1077_v27  ;;  %v1539_v2 = vmul.f32 %v11699_v42, %v1347_v3  ;;  %v5691_v13 = vld [vmem:[%s5853_s2 + $0xb0] sm:$0xff] }
 0x364   : > { %v1965_v53 = vmul.f32 %v11676_v12, %v1773_v62 }
 0x365   : > { %v4516_v40 = vpop.permute.xlu2 %4515  ;;  %v1996_v41 = vadd.f32 %v1964_v11, %v1570_v16  ;;  %v1571_v37 = vadd.f32 %v1539_v2, %v1145_v8  ;;  %v5693_v8 = vld [vmem:[%s5853_s2 + $0xb8] sm:$0xff] }
 0x366   : > { %v4219_v56 = vpop.permute.xlu1 %4218 }
 0x367   : > { %4304 = vst.msk [vmem:[#allocation4 + $0x58] sm:$0xff] %vm4292_vm5, %v4219_v56  ;;  %v4771_v28 = vpop.permute.xlu0 %4770  ;;  %v2032_v35 = vadd.f32 %v10379_v15, %v1996_v41  ;;  %v1997_v50 = vadd.f32 %v1965_v53, %v1571_v37  ;;  %v5694_v53 = vld [vmem:[%s5853_s2 + $0x48] sm:$0xff] }
 0x368   : > { %4561 = vst.msk [vmem:[#allocation4 + $0x58] sm:$0xff] %vm4549_vm2, %v10330_v17  ;;  %v4868_v17 = vld [vmem:[#allocation4 + $0xe8] sm:$0xff] }
 0x369   : > { %4837 = vst.msk [vmem:[#allocation4 + $0xf0] sm:$0xff] %vm4806_vm14, %v4771_v28  ;;  %vm3954_vm3 = vcmp.ge.f32.partialorder %v2032_v35, 0.0  ;;  %v3986_v56 = vmul.f32 0.25, %v2032_v35  ;;  %v2033_v28 = vadd.f32 %v10379_v15, %v1997_v50  ;;  %v5695_v50 = vld [vmem:[%s5853_s2 + $0xc0] sm:$0xff] }
 0x36a   : > { %5274 = vmatmul.msk.f32.gmra.mxu3 %vm641_vm0, %v4867_v7 }
 0x36b   : > { %vm3955_vm4 = vcmp.ge.f32.partialorder %v2033_v28, 0.0  ;;  %v3987_v63 = vmul.f32 0.25, %v2033_v28 }
 0x36d   : > { %v4019_v12 = vsel %vm3955_vm4, %v2033_v28, %v3987_v63 }
 0x36e   : > { %v4733_v1 = vpop.permute.xlu1 %4732  ;;  %4051 = vst.msk [vmem:[#allocation4 + $0x78] sm:$0xff] %vm851_vm1, %v4019_v12 }
 0x36f   : > { %4818 = vst.msk [vmem:[#allocation4 + $0x58] sm:$0xff] %vm4806_vm14, %v4733_v1  ;;  %v4259_v38 = vpop.permute.xlu0 %4258  ;;  %v4018_v1 = vsel %vm3954_vm3, %v2032_v35, %v3986_v56 }
 0x370   : > { %4324 = vst.msk [vmem:[#allocation4 + $0xf8] sm:$0xff] %vm4292_vm5, %v4259_v38  ;;  %v4869_v32 = vld [vmem:[#allocation4 + $0xf0] sm:$0xff] }
 0x371   : > { %4581 = vst.msk [vmem:[#allocation4 + $0xf8] sm:$0xff] %vm4549_vm2, %v4516_v40 }
 0x372   : > { %5275 = vmatmul.msk.f32.gmra.mxu3 %vm641_vm0, %v4868_v17  ;;  %4050 = vst.msk [vmem:[#allocation4 + $0x70] sm:$0xff] %vm851_vm1, %v4018_v1  ;;  %v5685_v17 = vld [vmem:[%s5853_s2 + $0x80] sm:$0xff]  ;;  %v5696_v1 = vld [vmem:[%s5853_s2 + $0xc8] sm:$0xff] }
 0x376   : > { %v4850_v26 = vld [vmem:[#allocation4 + $0x58] sm:$0xff] }
 0x377   : > { %5257 = vmatmul.msk.f32.gmra.mxu1 %vm641_vm0, %v4850_v26  ;;  %v5011_v20 = vpop.f32.mrf.mxu1 }
 0x378   : > { %v5012_v52 = vadd.f32 %v10664_v23, %v5011_v20 }
 0x37a   : > { %5276 = vmatmul.msk.f32.gmra.mxu3 %vm641_vm0, %v4869_v32  ;;  %v5093_v33 = vadd.f32 %v5684_v36, %v5012_v52 }
 0x37c   : > { %5125 = vst.msk [vmem:[%s10107_s25 + $0x38] sm:$0xff] %vm641_vm0, %v5093_v33  ;;  %v5692_v33 = vld [vmem:[%s5853_s2 + $0x40] sm:$0xff] }
 0x37e   : > { %v4773_v51 = vpop.permute.xlu0 %4772 }
 0x37f   : > { %4838 = vst.msk [vmem:[#allocation4 + $0xf8] sm:$0xff] %vm4806_vm14, %v4773_v51 }
 0x381   : > { %v4221_v7 = vpop.permute.xlu1 %4220 }
 0x382   : > { %4305 = vst.msk [vmem:[#allocation4 + $0x60] sm:$0xff] %vm4292_vm5, %v4221_v7 }
 0x383   : > { %4562 = vst.msk [vmem:[#allocation4 + $0x60] sm:$0xff] %vm4549_vm2, %v11700_v44 }
 0x386   : > { %v4870_v4 = vld [vmem:[#allocation4 + $0xf8] sm:$0xff]  ;;  %v4741_v14 = vpop.permute.xlu0 %4740 }
 0x387   : > { %5277 = vmatmul.msk.f32.gmra.mxu3 %vm641_vm0, %v4870_v4 }
 0x388   : > { %v5038_v15 = vpop.f32.mrf.mxu3 }
 0x389   : > { %v4735_v38 = vpop.permute.xlu1 %4734  ;;  %v5039_v40 = vadd.f32 %v10664_v23, %v5038_v15 }
 0x38a   : > { %4819 = vst.msk [vmem:[#allocation4 + $0x60] sm:$0xff] %vm4806_vm14, %v4735_v38  ;;  %v5697_v38 = vld [vmem:[%s5853_s2 + $0xd0] sm:$0xff] }
 0x38b   : > { %v5102_v39 = vadd.f32 %v5685_v17, %v5039_v40  ;;  %v5698_v17 = vld [vmem:[%s5853_s2 + $0x50] sm:$0xff] }
 0x38d   : > { %5134 = vst.msk [vmem:[%s10107_s25 + $0x80] sm:$0xff] %vm641_vm0, %v5102_v39 }
 0x390   : > { %v5041_v54 = vpop.f32.mrf.mxu3 }
 0x391   : > { %v4223_v60 = vpop.permute.xlu1 %4222  ;;  %v4851_v9 = vld [vmem:[#allocation4 + $0x60] sm:$0xff]  ;;  %v5042_v59 = vadd.f32 %v10664_v23, %v5041_v54 }
 0x392   : > { %4306 = vst.msk [vmem:[#allocation4 + $0x68] sm:$0xff] %vm4292_vm5, %v4223_v60  ;;  %5258 = vmatmul.msk.f32.gmra.mxu1 %vm641_vm0, %v4851_v9  ;;  %v5699_v9 = vld [vmem:[%s5853_s2 + $0xd8] sm:$0xff] }
 0x393   : > { %4563 = vst.msk [vmem:[#allocation4 + $0x68] sm:$0xff] %vm4549_vm2, %v10584_v48  ;;  %v5103_v21 = vadd.f32 %v5686_v34, %v5042_v59 }
 0x395   : > { %5135 = vst.msk [vmem:[%s10107_s25 + $0x88] sm:$0xff] %vm641_vm0, %v5103_v21 }
 0x399   : > { %v4737_v10 = vpop.permute.xlu1 %4736 }
 0x39a   : > { %4820 = vst.msk [vmem:[#allocation4 + $0x68] sm:$0xff] %vm4806_vm14, %v4737_v10  ;;  %v5700_v10 = vld [vmem:[%s5853_s2 + $0xe0] sm:$0xff] }
 0x39c   : > { %v5044_v45 = vpop.f32.mrf.mxu3 }
 0x39d   : > { %v5045_v55 = vadd.f32 %v10664_v23, %v5044_v45 }
 0x39f   : > { %v5104_v43 = vadd.f32 %v5687_v22, %v5045_v55 }
 0x3a1   : > { %v4225_v26 = vpop.permute.xlu1 %4224  ;;  %v4852_v19 = vld [vmem:[#allocation4 + $0x68] sm:$0xff]  ;;  %5136 = vst.msk [vmem:[%s10107_s25 + $0x90] sm:$0xff] %vm641_vm0, %v5104_v43 }
 0x3a2   : > { %4307 = vst.msk [vmem:[#allocation4 + $0x70] sm:$0xff] %vm4292_vm5, %v4225_v26  ;;  %5259 = vmatmul.msk.f32.gmra.mxu1 %vm641_vm0, %v4852_v19  ;;  %v5701_v19 = vld [vmem:[%s5853_s2 + $0x58] sm:$0xff] }
 0x3a3   : > { %4564 = vst.msk [vmem:[#allocation4 + $0x70] sm:$0xff] %vm4549_vm2, %v10617_v30  ;;  %v4484_v30 = vpop.permute.xlu2 %4483 }
 0x3a4   : > { %v5047_v48 = vpop.f32.mrf.mxu3 }
 0x3a5   : > { %v5048_v61 = vadd.f32 %v10664_v23, %v5047_v48 }
 0x3a7   : > { %v5105_v46 = vadd.f32 %v5688_v6, %v5048_v61  ;;  %v5702_v61 = vld [vmem:[%s5853_s2 + $0xe8] sm:$0xff] }
 0x3a9   : > { %v4739_v47 = vpop.permute.xlu1 %4738  ;;  %5137 = vst.msk [vmem:[%s10107_s25 + $0x98] sm:$0xff] %vm641_vm0, %v5105_v46 }
 0x3aa   : > { %4821 = vst.msk [vmem:[#allocation4 + $0x70] sm:$0xff] %vm4806_vm14, %v4739_v47 }
 0x3ac   : > { %v5050_v27 = vpop.f32.mrf.mxu3 }
 0x3ad   : > { %v5051_v57 = vadd.f32 %v10664_v23, %v5050_v27  ;;  %v5703_v27 = vld [vmem:[%s5853_s2 + $0xf0] sm:$0xff] }
 0x3af   : > { %v5106_v49 = vadd.f32 %v5689_v24, %v5051_v57 }
 0x3b1   : > { %v4227_v20 = vpop.permute.xlu1 %4226  ;;  %v4853_v58 = vld [vmem:[#allocation4 + $0x70] sm:$0xff]  ;;  %5138 = vst.msk [vmem:[%s10107_s25 + $0xa0] sm:$0xff] %vm641_vm0, %v5106_v49 }
 0x3b2   : > { %4308 = vst.msk [vmem:[#allocation4 + $0x78] sm:$0xff] %vm4292_vm5, %v4227_v20  ;;  %5260 = vmatmul.msk.f32.gmra.mxu1 %vm641_vm0, %v4853_v58  ;;  %v5704_v20 = vld [vmem:[%s5853_s2 + $0xf8] sm:$0xff] }
 0x3b3   : > { %4565 = vst.msk [vmem:[#allocation4 + $0x78] sm:$0xff] %vm4549_vm2, %v4484_v30 }
 0x3b4   : > { %4822 = vst.msk [vmem:[#allocation4 + $0x78] sm:$0xff] %vm4806_vm14, %v4741_v14 }
 0x3b5   : > { %v5053_v18 = vpop.f32.mrf.mxu3 }
 0x3b6   : > { %v5054_v29 = vadd.f32 %v10664_v23, %v5053_v18  ;;  %v5705_v18 = vld [vmem:[%s5853_s2 + $0x60] sm:$0xff] }
 0x3b8   : > { %v5107_v32 = vadd.f32 %v5690_v0, %v5054_v29 }
 0x3ba   : > { %5139 = vst.msk [vmem:[%s10107_s25 + $0xa8] sm:$0xff] %vm641_vm0, %v5107_v32 }
 0x3bb   : > { %v4854_v52 = vld [vmem:[#allocation4 + $0x78] sm:$0xff] }
 0x3bc   : > { %5261 = vmatmul.msk.f32.gmra.mxu1 %vm641_vm0, %v4854_v52  ;;  %v5706_v52 = vld [vmem:[%s5853_s2 + $0x68] sm:$0xff] }
 0x3bd   : > { %v5056_v25 = vpop.f32.mrf.mxu3 }
 0x3be   : > { %v5057_v31 = vadd.f32 %v10664_v23, %v5056_v25 }
 0x3c0   : > { %v5108_v3 = vadd.f32 %v5691_v13, %v5057_v31 }
 0x3c2   : > { %5140 = vst.msk [vmem:[%s10107_s25 + $0xb0] sm:$0xff] %vm641_vm0, %v5108_v3  ;;  %v5707_v3 = vld [vmem:[%s5853_s2 + $0x70] sm:$0xff] }
 0x3c3   : > { %v5014_v16 = vpop.f32.mrf.mxu1 }
 0x3c4   : > { %v5015_v62 = vadd.f32 %v10664_v23, %v5014_v16 }
 0x3c5   : > { %v5059_v36 = vpop.f32.mrf.mxu3 }
 0x3c6   : > { %v5094_v5 = vadd.f32 %v5692_v33, %v5015_v62  ;;  %v5060_v11 = vadd.f32 %v10664_v23, %v5059_v36  ;;  %v5708_v33 = vld [vmem:[%s5853_s2 + $0x78] sm:$0xff] }
 0x3c8   : > { %5126 = vst.msk [vmem:[%s10107_s25 + $0x40] sm:$0xff] %vm641_vm0, %v5094_v5  ;;  %v5109_v42 = vadd.f32 %v5693_v8, %v5060_v11 }
 0x3ca   : > { %5141 = vst.msk [vmem:[%s10107_s25 + $0xb8] sm:$0xff] %vm641_vm0, %v5109_v42 }
 0x3cb   : > { %v5017_v2 = vpop.f32.mrf.mxu1 }
 0x3cc   : > { %v5018_v41 = vadd.f32 %v10664_v23, %v5017_v2 }
 0x3cd   : > { %v5062_v37 = vpop.f32.mrf.mxu3 }
 0x3ce   : > { %v5095_v51 = vadd.f32 %v5694_v53, %v5018_v41  ;;  %v5063_v35 = vadd.f32 %v10664_v23, %v5062_v37 }
 0x3d0   : > { %5127 = vst.msk [vmem:[%s10107_s25 + $0x48] sm:$0xff] %vm641_vm0, %v5095_v51  ;;  %v5110_v56 = vadd.f32 %v5695_v50, %v5063_v35 }
 0x3d2   : > { %5142 = vst.msk [vmem:[%s10107_s25 + $0xc0] sm:$0xff] %vm641_vm0, %v5110_v56 }
 0x3d5   : > { %v5065_v28 = vpop.f32.mrf.mxu3 }
 0x3d6   : > { %v5066_v7 = vadd.f32 %v10664_v23, %v5065_v28 }
 0x3d8   : > { %v5111_v63 = vadd.f32 %v5696_v1, %v5066_v7 }
 0x3da   : > { %5143 = vst.msk [vmem:[%s10107_s25 + $0xc8] sm:$0xff] %vm641_vm0, %v5111_v63 }
 0x3dc   : > { %v5020_v12 = vpop.f32.mrf.mxu1 }
 0x3dd   : > { %v5068_v44 = vpop.f32.mrf.mxu3  ;;  %v5021_v15 = vadd.f32 %v10664_v23, %v5020_v12 }
 0x3de   : > { %v5069_v4 = vadd.f32 %v10664_v23, %v5068_v44 }
 0x3df   : > { %v5096_v39 = vadd.f32 %v5698_v17, %v5021_v15 }
 0x3e0   : > { %v5112_v40 = vadd.f32 %v5697_v38, %v5069_v4 }
 0x3e1   : > { %5128 = vst.msk [vmem:[%s10107_s25 + $0x50] sm:$0xff] %vm641_vm0, %v5096_v39 }
 0x3e2   : > { %5144 = vst.msk [vmem:[%s10107_s25 + $0xd0] sm:$0xff] %vm641_vm0, %v5112_v40 }
 0x3e5   : > { %v5071_v54 = vpop.f32.mrf.mxu3 }
 0x3e6   : > { %v5072_v60 = vadd.f32 %v10664_v23, %v5071_v54 }
 0x3e8   : > { %v5113_v59 = vadd.f32 %v5699_v9, %v5072_v60 }
 0x3ea   : > { %5145 = vst.msk [vmem:[%s10107_s25 + $0xd8] sm:$0xff] %vm641_vm0, %v5113_v59 }
 0x3ed   : > { %v5074_v34 = vpop.f32.mrf.mxu3 }
 0x3ee   : > { %v5075_v21 = vadd.f32 %v10664_v23, %v5074_v34 }
 0x3f0   : > { %v5114_v45 = vadd.f32 %v5700_v10, %v5075_v21 }
 0x3f2   : > { %5146 = vst.msk [vmem:[%s10107_s25 + $0xe0] sm:$0xff] %vm641_vm0, %v5114_v45 }
 0x3f4   : > { %v5023_v55 = vpop.f32.mrf.mxu1 }
 0x3f5   : > { %v5024_v22 = vadd.f32 %v10664_v23, %v5023_v55  ;;  %v5077_v43 = vpop.f32.mrf.mxu3 }
 0x3f6   : > { %v5078_v26 = vadd.f32 %v10664_v23, %v5077_v43 }
 0x3f7   : > { %v5097_v48 = vadd.f32 %v5701_v19, %v5024_v22 }
 0x3f8   : > { %v5115_v6 = vadd.f32 %v5702_v61, %v5078_v26 }
 0x3f9   : > { %5129 = vst.msk [vmem:[%s10107_s25 + $0x58] sm:$0xff] %vm641_vm0, %v5097_v48 }
 0x3fa   : > { %5147 = vst.msk [vmem:[%s10107_s25 + $0xe8] sm:$0xff] %vm641_vm0, %v5115_v6 }
 0x3fd   : > { %v5080_v46 = vpop.f32.mrf.mxu3 }
 0x3fe   : > { %v5081_v47 = vadd.f32 %v10664_v23, %v5080_v46 }
 0x400   : > { %v5116_v57 = vadd.f32 %v5703_v27, %v5081_v47 }
 0x402   : > { %5148 = vst.msk [vmem:[%s10107_s25 + $0xf0] sm:$0xff] %vm641_vm0, %v5116_v57 }
 0x40a   : > { %v5083_v24 = vpop.f32.mrf.mxu3 }
 0x40b   : > { %v5084_v49 = vadd.f32 %v10664_v23, %v5083_v24 }
 0x40d   : > { %v5117_v58 = vadd.f32 %v5704_v20, %v5084_v49 }
 0x40f   : > { %5149 = vst.msk [vmem:[%s10107_s25 + $0xf8] sm:$0xff] %vm641_vm0, %v5117_v58  ;;  %v5026_v30 = vpop.f32.mrf.mxu1 }
 0x410   : > { %v5027_v14 = vadd.f32 %v10664_v23, %v5026_v30 }
 0x412   : > { %v5098_v29 = vadd.f32 %v5705_v18, %v5027_v14 }
 0x414   : > { %5130 = vst.msk [vmem:[%s10107_s25 + $0x60] sm:$0xff] %vm641_vm0, %v5098_v29 }
 0x41f   : > { %v5029_v0 = vpop.f32.mrf.mxu1 }
 0x420   : > { %v5030_v32 = vadd.f32 %v10664_v23, %v5029_v0 }
 0x422   : > { %v5099_v25 = vadd.f32 %v5706_v52, %v5030_v32 }
 0x424   : > { %5131 = vst.msk [vmem:[%s10107_s25 + $0x68] sm:$0xff] %vm641_vm0, %v5099_v25 }
 0x42f   : > { %v5032_v31 = vpop.f32.mrf.mxu1 }
 0x430   : > { %v5033_v13 = vadd.f32 %v10664_v23, %v5032_v31 }
 0x432   : > { %v5100_v16 = vadd.f32 %v5707_v3, %v5033_v13 }
 0x434   : > { %5132 = vst.msk [vmem:[%s10107_s25 + $0x70] sm:$0xff] %vm641_vm0, %v5100_v16 }
 0x439   : > { %v5035_v62 = vpop.f32.mrf.mxu1 }
 0x43a   : > { %v5036_v36 = vadd.f32 %v10664_v23, %v5035_v62 }
 0x43c   : > { %v5101_v5 = vadd.f32 %v5708_v33, %v5036_v36 }
 0x43e   : > { %5133 = vst.msk [vmem:[%s10107_s25 + $0x78] sm:$0xff] %vm641_vm0, %v5101_v5 }
 0x43f PF: > { %s29_s0 = sadd.s32 1, %s5715_s0  }
 0x440   : > { %p26_p4 = scmp.ge.s32.totalorder %s29_s0, 4  }
 0x442   :  { %28 = sbr.rel (!%p26_p4) target bundleno = 5 (0x5), region = 126 }

</bundles_post_ra>
